<compile_context>
chip_gen: v6e
topology: v6e:2x2x1
jax: 0.10.0
libtpu: 0.0.40
codegen_flags: <defaults>
</compile_context>

<pallas_src>
import functools

import jax
import jax.numpy as jnp
from jax.experimental import pallas as pl
from jax.experimental.pallas import tpu as pltpu

HIDDEN = 768   # hidden_dim hardcoded in the module
INTER = 512    # intermediate_dim of BilinearAttentionFusion
LANES = 128


# ----------------------------------------------------------------------------
# helpers
# ----------------------------------------------------------------------------
def _round_up(n, m):
    return ((n + m - 1) // m) * m


def _pad_last(x, target):
    pad = target - x.shape[-1]
    if pad == 0:
        return x
    return jnp.pad(x, [(0, 0)] * (x.ndim - 1) + [(0, pad)])


# ----------------------------------------------------------------------------
# kernels
# ----------------------------------------------------------------------------
def _fused_kernel(x_ref, pooled_ref, labels_ref, lbl_ref,
                  w_in_ref, w_lbl_ref, bias_ctx_ref, wpool_ref,
                  wc_ref, misc_ref,
                  fusion_ref, logits_ref, probs_ref, loss_ref,
                  *, bt, seq_len, inv_n):
    f32, bf16 = jnp.float32, jnp.bfloat16
    sig = jax.nn.sigmoid
    I = INTER

    # unpack packed operands (static, 128-aligned lane slices / tiny sublane slices)
    b_in = bias_ctx_ref[:, 0:2 * I]            # (1, 2I) = [bti | bai]
    b_lbl = bias_ctx_ref[:, 2 * I:4 * I]       # (1, 2I) = [btl | bal]
    ctx = bias_ctx_ref[:, 4 * I:5 * I]         # (1, I)  context vector
    bc = misc_ref[0:1, :]                      # (1, LP) classifier bias
    lw = misc_ref[1:2, :]                      # (1, LP) label weights (0 on padding)
    score_mask = misc_ref[2:3, :]              # (1, LP) 0 real / -1e30 padded labels

    # ---- BilinearAttentionFusion: token side of this batch tile ----
    x = x_ref[0].astype(bf16)                  # (bt*S, H); f32 -> bf16 cast in kernel
    tok = jnp.dot(x, w_in_ref[...], preferred_element_type=f32) + b_in   # (bt*S, 2I)
    it = sig(tok[:, :I])                       # input_transform (f32 for the VPU mul)
    ia = sig(tok[:, I:]).astype(bf16)          # input_attention (bf16 MXU operand)

    # ---- label side (batch-invariant; only LP=128 rows -> cheap per tile) ----
    lab = jnp.dot(lbl_ref[...], w_lbl_ref[...], preferred_element_type=f32) + b_lbl
    lt = sig(lab[:, :I]).astype(bf16)          # label_transform  (LP, I)
    la = (sig(lab[:, I:]) * ctx).astype(bf16)  # label_attention with ctx folded in

    # scores = (ia * ctx) @ la^T == ia @ (la * ctx)^T ; bf16 MXU, f32 accumulate
    scores = jax.lax.dot_general(ia, la, (((1,), (1,)), ((), ())),
                                 preferred_element_type=f32)             # (bt*S, LP)
    attn = jax.nn.softmax(scores + score_mask, axis=-1)   # padded cols get weight 0

    prod = it * jnp.dot(attn.astype(bf16), lt, preferred_element_type=f32)  # (bt*S, I)

    # per-batch sum over S: reshape + sublane reduction (no O(B^2*S*I) segment matmul)
    fusion = jnp.sum(prod.reshape(bt, seq_len, I), axis=1)               # (bt, I)
    fusion_ref[0] = jnp.dot(fusion.astype(bf16), wpool_ref[...],
                            preferred_element_type=f32)                  # (bt, H)

    # ---- classifier_fc + sigmoid + weighted BCEWithLogits (f32, tiny matmul) ----
    logits = jnp.dot(pooled_ref[0], wc_ref[...], preferred_element_type=f32) + bc
    probs = sig(logits)
    lab_t = labels_ref[0]
    elem = lw * (jnp.maximum(logits, 0.0) - logits * lab_t
                 + jnp.log1p(jnp.exp(-jnp.abs(logits))))
    total = jnp.sum(jnp.sum(elem, axis=1, keepdims=True), axis=0, keepdims=True)
    logits_ref[0] = logits
    probs_ref[0] = probs
    loss_ref[0] = jnp.broadcast_to(total * inv_n, (1, LANES))   # per-tile partial mean


def _classifier_only_kernel(pooled_ref, labels_ref, wc_ref, misc_ref,
                            logits_ref, probs_ref, loss_ref, *, inv_n):
    f32 = jnp.float32
    bc = misc_ref[0:1, :]
    lw = misc_ref[1:2, :]
    logits = jnp.dot(pooled_ref[...], wc_ref[...], preferred_element_type=f32) + bc
    probs = jax.nn.sigmoid(logits)
    elem = lw * (jnp.maximum(logits, 0.0) - logits * labels_ref[...]
                 + jnp.log1p(jnp.exp(-jnp.abs(logits))))
    total = jnp.sum(jnp.sum(elem, axis=1, keepdims=True), axis=0, keepdims=True)
    logits_ref[...] = logits
    probs_ref[...] = probs
    loss_ref[...] = jnp.broadcast_to(total * inv_n, loss_ref.shape)


# ----------------------------------------------------------------------------
# parameter packing (done once, outside the per-call path)
# ----------------------------------------------------------------------------
def pack_params(params):
    """Pack module weights into fewer, MXU/lane-friendly kernel operands."""
    L = params["wc"].shape[1]
    LP = _round_up(L, LANES)
    bf16 = jnp.bfloat16
    w_in = jnp.concatenate([params["wti"], params["wai"]], axis=1).astype(bf16)   # (H, 2I)
    w_lbl = jnp.concatenate([params["wtl"], params["wal"]], axis=1).astype(bf16)  # (H, 2I)
    bias_ctx = jnp.concatenate([params["bti"], params["bai"], params["btl"],
                                params["bal"], params["ctx"]], axis=1)            # (1, 5I)
    score_mask = jnp.where(jnp.arange(LP) < L, 0.0, -1e30).astype(jnp.float32)[None, :]
    misc = jnp.concatenate([_pad_last(params["bc"], LP),
                            _pad_last(params["lw"], LP),
                            score_mask], axis=0)                                  # (3, LP)
    return dict(
        w_in=w_in, w_lbl=w_lbl, bias_ctx=bias_ctx,
        wpool=params["wpool"].astype(bf16),
        wc=_pad_last(params["wc"], LP),     # f32: classifier kept at high precision
        misc=misc, num_labels=L, lp=LP)


# ----------------------------------------------------------------------------
# wrappers
# ----------------------------------------------------------------------------
def fused_forward(packed, seq, pooled, label_pooled, labels):
    """BAF fusion + classifier + BCE loss in one pallas_call (grid over batch tiles)."""
    B, S, H = seq.shape
    L, LP = packed["num_labels"], packed["lp"]
    bf16 = jnp.bfloat16

    # pad label states to a full 128-lane label dim (phantom labels masked pre-softmax)
    lbl = jnp.pad(label_pooled, ((0, LP - L), (0, 0))).astype(bf16)
    labels_p = _pad_last(labels, LP)

    # batch tiling: 2 parallel tiles when possible so v7x's 2nd TensorCore is used;
    # on v5e/v6e this is just a 2-step serial loop with resident weights.
    n_bt = 2 if (B % 2 == 0 and B >= 2) else 1
    bt = B // n_bt
    x3 = seq.reshape(n_bt, bt * S, H)            # f32; cast to bf16 inside the kernel
    pooled3 = pooled.reshape(n_bt, bt, H)
    labels3 = labels_p.reshape(n_bt, bt, LP)

    kernel = functools.partial(_fused_kernel, bt=bt, seq_len=S, inv_n=1.0 / (B * L))

    def full2d(shape):
        return pl.BlockSpec(shape, lambda i: (0, 0))

    fusion3, logits3, probs3, loss3 = pl.pallas_call(
        kernel,
        grid=(n_bt,),
        in_specs=[
            pl.BlockSpec((1, bt * S, H), lambda i: (i, 0, 0)),   # token states (f32)
            pl.BlockSpec((1, bt, H), lambda i: (i, 0, 0)),       # pooled states (f32)
            pl.BlockSpec((1, bt, LP), lambda i: (i, 0, 0)),      # labels
            full2d((LP, H)),                                     # label states (bf16)
            full2d((H, 2 * INTER)),                              # wti || wai   (bf16)
            full2d((H, 2 * INTER)),                              # wtl || wal   (bf16)
            full2d((1, 5 * INTER)),                              # biases + ctx (f32)
            full2d((INTER, H)),                                  # pool weight  (bf16)
            full2d((H, LP)),                                     # classifier w (f32)
            full2d((3, LP)),                                     # bc / lw / score mask
        ],
        out_specs=(
            pl.BlockSpec((1, bt, H), lambda i: (i, 0, 0)),
            pl.BlockSpec((1, bt, LP), lambda i: (i, 0, 0)),
            pl.BlockSpec((1, bt, LP), lambda i: (i, 0, 0)),
            pl.BlockSpec((1, 1, LANES), lambda i: (i, 0, 0)),
        ),
        out_shape=(
            jax.ShapeDtypeStruct((n_bt, bt, H), jnp.float32),
            jax.ShapeDtypeStruct((n_bt, bt, LP), jnp.float32),
            jax.ShapeDtypeStruct((n_bt, bt, LP), jnp.float32),
            jax.ShapeDtypeStruct((n_bt, 1, LANES), jnp.float32),
        ),
        compiler_params=pltpu.CompilerParams(dimension_semantics=("parallel",)),
    )(x3, pooled3, labels3, lbl,
      packed["w_in"], packed["w_lbl"], packed["bias_ctx"], packed["wpool"],
      packed["wc"], packed["misc"])

    fusion = fusion3.reshape(B, H)
    logits = logits3.reshape(B, LP)[:, :L]
    probs = probs3.reshape(B, LP)[:, :L]
    loss = jnp.sum(loss3[:, 0, 0])        # per-tile partial means sum to the full mean
    return fusion, logits, probs, loss


def classifier_forward(packed, pooled, labels):
    """classifier_fc + sigmoid + BCE only (BAF compute skipped, as in the reference)."""
    B = pooled.shape[0]
    L, LP = packed["num_labels"], packed["lp"]
    labels_p = _pad_last(labels, LP)
    kernel = functools.partial(_classifier_only_kernel, inv_n=1.0 / (B * L))
    vmem = pl.BlockSpec(memory_space=pltpu.MemorySpace.VMEM)
    logits_p, probs_p, loss = pl.pallas_call(
        kernel,
        in_specs=[vmem] * 4,
        out_specs=(vmem, vmem, vmem),
        out_shape=(jax.ShapeDtypeStruct((B, LP), jnp.float32),
                   jax.ShapeDtypeStruct((B, LP), jnp.float32),
                   jax.ShapeDtypeStruct((1, LANES), jnp.float32)),
    )(pooled, labels_p, packed["wc"], packed["misc"])
    return logits_p[:, :L], probs_p[:, :L], loss[0, 0]


# ----------------------------------------------------------------------------
# Top-level forward (mirrors BAFForTextClassfication.forward)
# ----------------------------------------------------------------------------
def baf_for_text_classification_forward(packed, input_seq_states, input_pooled,
                                        label_pooled, labels=None, compute_baf=True):
    B = input_pooled.shape[0]
    L = packed["num_labels"]
    # TODO(synk): when labels is None the kernel still computes (and discards) the BCE loss.
    labels_arr = labels if labels is not None else jnp.zeros((B, L), jnp.float32)

    if compute_baf:
        baf_fusion, logits, probs, loss = fused_forward(
            packed, input_seq_states, input_pooled, label_pooled, labels_arr)
    else:
        # the reference overwrites the BAF output with None before use -> skip it entirely
        baf_fusion = None
        logits, probs, loss = classifier_forward(packed, input_pooled, labels_arr)

    output = {
        "loss": loss if labels is not None else None,
        "logits": probs,            # reference returns sigmoid(logits)
        "hidden_states": None,      # reference: input_fusion_states = None
    }
    return output, baf_fusion, logits


# ----------------------------------------------------------------------------
# deterministic parameter init (shapes from the module's __init__)
# ----------------------------------------------------------------------------
def init_params(key, num_labels):
    ks = jax.random.split(key, 12)

    def w(k, shape, scale=0.02):
        return scale * jax.random.normal(k, shape, jnp.float32)

    return dict(
        wti=w(ks[0], (HIDDEN, INTER)), bti=w(ks[1], (1, INTER)),
        wtl=w(ks[2], (HIDDEN, INTER)), btl=w(ks[3], (1, INTER)),
        wai=w(ks[4], (HIDDEN, INTER)), bai=w(ks[5], (1, INTER)),
        wal=w(ks[6], (HIDDEN, INTER)), bal=w(ks[7], (1, INTER)),
        ctx=jax.random.uniform(ks[8], (1, INTER), jnp.float32),   # torch.rand
        wpool=w(ks[9], (INTER, HIDDEN)),
        wc=w(ks[10], (HIDDEN, num_labels)), bc=w(ks[11], (1, num_labels)),
        lw=jnp.ones((1, num_labels), jnp.float32),                # label_weights
    )


# ----------------------------------------------------------------------------
# pure-JAX reference for verification
# ----------------------------------------------------------------------------
def reference_forward(params, seq, pooled, label_pooled, labels):
    hp = jax.lax.Precision.HIGHEST
    sig = jax.nn.sigmoid
    B = seq.shape[0]
    L, H = label_pooled.shape
    lbl = jnp.broadcast_to(label_pooled[None], (B, L, H))
    it = sig(jnp.einsum('bsh,hi->bsi', seq, params['wti'], precision=hp) + params['bti'])
    lt = sig(jnp.einsum('blh,hi->bli', lbl, params['wtl'], precision=hp) + params['btl'])
    ia = sig(jnp.einsum('bsh,hi->bsi', seq, params['wai'], precision=hp) + params['bai'])
    la = sig(jnp.einsum('blh,hi->bli', lbl, params['wal'], precision=hp) + params['bal'])
    scores = jnp.einsum('bsi,bli->bsl', ia * params['ctx'], la, precision=hp)
    attn = jax.nn.softmax(scores, axis=-1)
    tmp = jnp.einsum('bsl,bli->bsi', attn, lt, precision=hp)
    fusion = jnp.sum(it * tmp, axis=1)
    fusion = jnp.einsum('bi,ih->bh', fusion, params['wpool'], precision=hp)
    logits = jnp.einsum('bh,hl->bl', pooled, params['wc'], precision=hp) + params['bc']
    probs = sig(logits)
    elem = params['lw'] * (jnp.maximum(logits, 0.0) - logits * labels
                           + jnp.log1p(jnp.exp(-jnp.abs(logits))))
    return fusion, logits, probs, jnp.mean(elem)


if __name__ == "__main__":
    import numpy as np

    key = jax.random.PRNGKey(0)
    B, S, NUM_LABELS = 2, 8, 8

    kp, k1, k2, k3, k4 = jax.random.split(key, 5)
    params = init_params(kp, NUM_LABELS)
    packed = pack_params(params)   # one-time weight packing / casting

    # synthetic hier_encoder outputs
    input_seq_states = jax.random.normal(k1, (B, S, HIDDEN), jnp.float32)   # [0] token states
    input_pooled = jax.random.normal(k2, (B, HIDDEN), jnp.float32)          # [1] pooled states
    label_pooled = jax.random.normal(k3, (NUM_LABELS, HIDDEN), jnp.float32) # label [1] pooled
    labels = (jax.random.uniform(k4, (B, NUM_LABELS)) > 0.5).astype(jnp.float32)

    # full path (BAF kept for verification)
    output, baf_fusion, logits = baf_for_text_classification_forward(
        packed, input_seq_states, input_pooled, label_pooled, labels, compute_baf=True)
    jax.block_until_ready((output, baf_fusion, logits))

    # reference-semantics path (BAF discarded -> skipped entirely)
    output2, baf_none, logits2 = baf_for_text_classification_forward(
        packed, input_seq_states, input_pooled, label_pooled, labels, compute_baf=False)
    jax.block_until_ready((output2, logits2))

    # verify against pure-JAX reference
    ref_fusion, ref_logits, ref_probs, ref_loss = reference_forward(
        params, input_seq_states, input_pooled, label_pooled, labels)

    np.testing.assert_allclose(np.asarray(baf_fusion), np.asarray(ref_fusion),
                               rtol=5e-2, atol=8e-2)
    np.testing.assert_allclose(np.asarray(output["logits"]), np.asarray(ref_probs),
                               rtol=5e-2, atol=5e-2)
    np.testing.assert_allclose(float(output["loss"]), float(ref_loss),
                               rtol=5e-2, atol=5e-2)
    np.testing.assert_allclose(np.asarray(output2["logits"]), np.asarray(ref_probs),
                               rtol=5e-2, atol=5e-2)
    np.testing.assert_allclose(float(output2["loss"]), float(ref_loss),
                               rtol=5e-2, atol=5e-2)
    assert output["hidden_states"] is None   # matches reference (fusion discarded)
    assert output2["hidden_states"] is None
    assert baf_none is None

    print("KERNEL_OK")
</pallas_src>

<mosaic_0001>
module attributes {stable_mosaic.version = 11 : i64} {
  func.func @_fused_kernel(%arg0: i32, %arg1: memref<1x8x768xf32, #tpu.memory_space<vmem>>, %arg2: memref<1x1x768xf32, #tpu.memory_space<vmem>>, %arg3: memref<1x1x128xf32, #tpu.memory_space<vmem>>, %arg4: memref<128x768xbf16, #tpu.memory_space<vmem>>, %arg5: memref<768x1024xbf16, #tpu.memory_space<vmem>>, %arg6: memref<768x1024xbf16, #tpu.memory_space<vmem>>, %arg7: memref<1x2560xf32, #tpu.memory_space<vmem>>, %arg8: memref<512x768xbf16, #tpu.memory_space<vmem>>, %arg9: memref<768x128xf32, #tpu.memory_space<vmem>>, %arg10: memref<3x128xf32, #tpu.memory_space<vmem>>, %arg11: memref<1x1x768xf32, #tpu.memory_space<vmem>>, %arg12: memref<1x1x128xf32, #tpu.memory_space<vmem>>, %arg13: memref<1x1x128xf32, #tpu.memory_space<vmem>>, %arg14: memref<1x1x128xf32, #tpu.memory_space<vmem>>) attributes {dimension_semantics = [#tpu.dimension_semantics<parallel>], iteration_bounds = array<i64: 2>, scalar_prefetch = 0 : i64, scratch_operands = 0 : i64, tpu.core_type = #tpu.core_type<tc>, window_params = [{transform_indices = @transform_0, window_bounds = array<i64: 1, 8, 768>}, {transform_indices = @transform_1, window_bounds = array<i64: 1, 1, 768>}, {transform_indices = @transform_2, window_bounds = array<i64: 1, 1, 128>}, {pipeline_mode = #tpu.pipeline_mode<synchronous>, transform_indices = @transform_3, window_bounds = array<i64: 128, 768>}, {pipeline_mode = #tpu.pipeline_mode<synchronous>, transform_indices = @transform_4, window_bounds = array<i64: 768, 1024>}, {pipeline_mode = #tpu.pipeline_mode<synchronous>, transform_indices = @transform_5, window_bounds = array<i64: 768, 1024>}, {pipeline_mode = #tpu.pipeline_mode<synchronous>, transform_indices = @transform_6, window_bounds = array<i64: 1, 2560>}, {pipeline_mode = #tpu.pipeline_mode<synchronous>, transform_indices = @transform_7, window_bounds = array<i64: 512, 768>}, {pipeline_mode = #tpu.pipeline_mode<synchronous>, transform_indices = @transform_8, window_bounds = array<i64: 768, 128>}, {pipeline_mode = #tpu.pipeline_mode<synchronous>, transform_indices = @transform_9, window_bounds = array<i64: 3, 128>}, {transform_indices = @transform_10, window_bounds = array<i64: 1, 1, 768>}, {transform_indices = @transform_11, window_bounds = array<i64: 1, 1, 128>}, {transform_indices = @transform_12, window_bounds = array<i64: 1, 1, 128>}, {transform_indices = @transform_13, window_bounds = array<i64: 1, 1, 128>}]} {
    %c0 = arith.constant 0 : index
    %c0_0 = arith.constant 0 : index
    %0 = vector.load %arg7[%c0, %c0_0] : memref<1x2560xf32, #tpu.memory_space<vmem>>, vector<1x1024xf32>
    %c0_1 = arith.constant 0 : index
    %c1024 = arith.constant 1024 : index
    %1 = vector.load %arg7[%c0_1, %c1024] : memref<1x2560xf32, #tpu.memory_space<vmem>>, vector<1x1024xf32>
    %c0_2 = arith.constant 0 : index
    %c2048 = arith.constant 2048 : index
    %2 = vector.load %arg7[%c0_2, %c2048] : memref<1x2560xf32, #tpu.memory_space<vmem>>, vector<1x512xf32>
    %c0_3 = arith.constant 0 : index
    %c0_4 = arith.constant 0 : index
    %3 = vector.load %arg10[%c0_3, %c0_4] : memref<3x128xf32, #tpu.memory_space<vmem>>, vector<1x128xf32>
    %c1 = arith.constant 1 : index
    %c0_5 = arith.constant 0 : index
    %4 = vector.load %arg10[%c1, %c0_5] : memref<3x128xf32, #tpu.memory_space<vmem>>, vector<1x128xf32>
    %c2 = arith.constant 2 : index
    %c0_6 = arith.constant 0 : index
    %5 = vector.load %arg10[%c2, %c0_6] : memref<3x128xf32, #tpu.memory_space<vmem>>, vector<1x128xf32>
    %c0_7 = arith.constant 0 : index
    %c0_8 = arith.constant 0 : index
    %c0_9 = arith.constant 0 : index
    %6 = vector.load %arg1[%c0_7, %c0_8, %c0_9] : memref<1x8x768xf32, #tpu.memory_space<vmem>>, vector<1x8x768xf32>
    %7 = vector.shape_cast %6 : vector<1x8x768xf32> to vector<8x768xf32>
    %8 = arith.truncf %7 : vector<8x768xf32> to vector<8x768xbf16>
    %c0_10 = arith.constant 0 : index
    %c0_11 = arith.constant 0 : index
    %9 = vector.load %arg5[%c0_10, %c0_11] : memref<768x1024xbf16, #tpu.memory_space<vmem>>, vector<768x1024xbf16>
    %cst = arith.constant dense<0.000000e+00> : vector<8x1024xf32>
    %10 = tpu.matmul %8, %9, %cst {dimension_numbers = #tpu.dot_dimension_numbers<[1], [0], [0], [1], [0, 0, 1, 1], [], []>} : vector<8x768xbf16>, vector<768x1024xbf16>, vector<8x1024xf32> -> vector<8x1024xf32>
    %11 = vector.broadcast %0 : vector<1x1024xf32> to vector<8x1024xf32>
    %12 = arith.addf %10, %11 : vector<8x1024xf32>
    %13 = vector.extract_strided_slice %12 {offsets = [0, 0], sizes = [8, 512], strides = [1, 1]} : vector<8x1024xf32> to vector<8x512xf32>
    %14 = arith.negf %13 : vector<8x512xf32>
    %15 = math.exp %14 : vector<8x512xf32>
    %cst_12 = arith.constant 1.000000e+00 : f32
    %16 = vector.broadcast %cst_12 : f32 to vector<8x512xf32>
    %17 = arith.addf %16, %15 : vector<8x512xf32>
    %18 = arith.divf %16, %17 : vector<8x512xf32>
    %19 = vector.extract_strided_slice %12 {offsets = [0, 512], sizes = [8, 512], strides = [1, 1]} : vector<8x1024xf32> to vector<8x512xf32>
    %20 = arith.negf %19 : vector<8x512xf32>
    %21 = math.exp %20 : vector<8x512xf32>
    %cst_13 = arith.constant 1.000000e+00 : f32
    %22 = vector.broadcast %cst_13 : f32 to vector<8x512xf32>
    %23 = arith.addf %22, %21 : vector<8x512xf32>
    %24 = arith.divf %22, %23 : vector<8x512xf32>
    %25 = arith.truncf %24 : vector<8x512xf32> to vector<8x512xbf16>
    %c0_14 = arith.constant 0 : index
    %c0_15 = arith.constant 0 : index
    %26 = vector.load %arg4[%c0_14, %c0_15] : memref<128x768xbf16, #tpu.memory_space<vmem>>, vector<128x768xbf16>
    %c0_16 = arith.constant 0 : index
    %c0_17 = arith.constant 0 : index
    %27 = vector.load %arg6[%c0_16, %c0_17] : memref<768x1024xbf16, #tpu.memory_space<vmem>>, vector<768x1024xbf16>
    %cst_18 = arith.constant dense<0.000000e+00> : vector<128x1024xf32>
    %28 = tpu.matmul %26, %27, %cst_18 {dimension_numbers = #tpu.dot_dimension_numbers<[1], [0], [0], [1], [0, 0, 1, 1], [], []>} : vector<128x768xbf16>, vector<768x1024xbf16>, vector<128x1024xf32> -> vector<128x1024xf32>
    %29 = vector.broadcast %1 : vector<1x1024xf32> to vector<128x1024xf32>
    %30 = arith.addf %28, %29 : vector<128x1024xf32>
    %31 = vector.extract_strided_slice %30 {offsets = [0, 0], sizes = [128, 512], strides = [1, 1]} : vector<128x1024xf32> to vector<128x512xf32>
    %32 = arith.negf %31 : vector<128x512xf32>
    %33 = math.exp %32 : vector<128x512xf32>
    %cst_19 = arith.constant 1.000000e+00 : f32
    %34 = vector.broadcast %cst_19 : f32 to vector<128x512xf32>
    %35 = arith.addf %34, %33 : vector<128x512xf32>
    %36 = arith.divf %34, %35 : vector<128x512xf32>
    %37 = arith.truncf %36 : vector<128x512xf32> to vector<128x512xbf16>
    %38 = vector.extract_strided_slice %30 {offsets = [0, 512], sizes = [128, 512], strides = [1, 1]} : vector<128x1024xf32> to vector<128x512xf32>
    %39 = arith.negf %38 : vector<128x512xf32>
    %40 = math.exp %39 : vector<128x512xf32>
    %cst_20 = arith.constant 1.000000e+00 : f32
    %41 = vector.broadcast %cst_20 : f32 to vector<128x512xf32>
    %42 = arith.addf %41, %40 : vector<128x512xf32>
    %43 = arith.divf %41, %42 : vector<128x512xf32>
    %44 = vector.broadcast %2 : vector<1x512xf32> to vector<128x512xf32>
    %45 = arith.mulf %43, %44 : vector<128x512xf32>
    %46 = arith.truncf %45 : vector<128x512xf32> to vector<128x512xbf16>
    %cst_21 = arith.constant dense<0.000000e+00> : vector<8x128xf32>
    %47 = tpu.matmul %25, %46, %cst_21 {dimension_numbers = #tpu.dot_dimension_numbers<[1], [1], [0], [0], [0, 0, 1, 0], [], []>} : vector<8x512xbf16>, vector<128x512xbf16>, vector<8x128xf32> -> vector<8x128xf32>
    %48 = vector.broadcast %5 : vector<1x128xf32> to vector<8x128xf32>
    %49 = arith.addf %47, %48 : vector<8x128xf32>
    %cst_22 = arith.constant dense<0xFF800000> : vector<8xf32>
    %50 = vector.multi_reduction <maximumf>, %49, %cst_22 [1] : vector<8x128xf32> to vector<8xf32>
    %cst_23 = arith.constant 0xFF800000 : f32
    %51 = vector.broadcast %cst_23 : f32 to vector<8xf32>
    %52 = arith.maximumf %51, %50 : vector<8xf32>
    %53 = vector.shape_cast %52 : vector<8xf32> to vector<8x1xf32>
    %54 = vector.broadcast %53 : vector<8x1xf32> to vector<8x128xf32>
    %55 = arith.subf %49, %54 : vector<8x128xf32>
    %56 = math.exp %55 : vector<8x128xf32>
    %cst_24 = arith.constant dense<0.000000e+00> : vector<8xf32>
    %57 = vector.multi_reduction <add>, %56, %cst_24 [1] : vector<8x128xf32> to vector<8xf32>
    %58 = vector.shape_cast %57 : vector<8xf32> to vector<8x1xf32>
    %59 = vector.broadcast %58 : vector<8x1xf32> to vector<8x128xf32>
    %60 = arith.divf %56, %59 : vector<8x128xf32>
    %61 = arith.truncf %60 : vector<8x128xf32> to vector<8x128xbf16>
    %cst_25 = arith.constant dense<0.000000e+00> : vector<8x512xf32>
    %62 = tpu.matmul %61, %37, %cst_25 {dimension_numbers = #tpu.dot_dimension_numbers<[1], [0], [0], [1], [0, 0, 1, 1], [], []>} : vector<8x128xbf16>, vector<128x512xbf16>, vector<8x512xf32> -> vector<8x512xf32>
    %63 = arith.mulf %18, %62 : vector<8x512xf32>
    %64 = vector.shape_cast %63 : vector<8x512xf32> to vector<1x8x512xf32>
    %cst_26 = arith.constant dense<0.000000e+00> : vector<1x512xf32>
    %65 = vector.multi_reduction <add>, %64, %cst_26 [1] : vector<1x8x512xf32> to vector<1x512xf32>
    %66 = arith.truncf %65 : vector<1x512xf32> to vector<1x512xbf16>
    %c0_27 = arith.constant 0 : index
    %c0_28 = arith.constant 0 : index
    %67 = vector.load %arg8[%c0_27, %c0_28] : memref<512x768xbf16, #tpu.memory_space<vmem>>, vector<512x768xbf16>
    %cst_29 = arith.constant dense<0.000000e+00> : vector<1x768xf32>
    %68 = tpu.matmul %66, %67, %cst_29 {dimension_numbers = #tpu.dot_dimension_numbers<[1], [0], [0], [1], [0, 0, 1, 1], [], []>} : vector<1x512xbf16>, vector<512x768xbf16>, vector<1x768xf32> -> vector<1x768xf32>
    %c0_30 = arith.constant 0 : index
    %c0_31 = arith.constant 0 : index
    %c0_32 = arith.constant 0 : index
    %69 = vector.load %arg11[%c0_30, %c0_31, %c0_32] : memref<1x1x768xf32, #tpu.memory_space<vmem>>, vector<1x1x768xf32>
    %70 = vector.shape_cast %69 : vector<1x1x768xf32> to vector<1x768xf32>
    %71 = vector.shape_cast %68 : vector<1x768xf32> to vector<1x1x768xf32>
    tpu.vector_store %arg11[%c0_30, %c0_31, %c0_32], %71 {strides = array<i32>} : memref<1x1x768xf32, #tpu.memory_space<vmem>>, vector<1x1x768xf32>,
    %c0_33 = arith.constant 0 : index
    %c0_34 = arith.constant 0 : index
    %c0_35 = arith.constant 0 : index
    %72 = vector.load %arg2[%c0_33, %c0_34, %c0_35] : memref<1x1x768xf32, #tpu.memory_space<vmem>>, vector<1x1x768xf32>
    %73 = vector.shape_cast %72 : vector<1x1x768xf32> to vector<1x768xf32>
    %c0_36 = arith.constant 0 : index
    %c0_37 = arith.constant 0 : index
    %74 = vector.load %arg9[%c0_36, %c0_37] : memref<768x128xf32, #tpu.memory_space<vmem>>, vector<768x128xf32>
    %cst_38 = arith.constant dense<0.000000e+00> : vector<1x128xf32>
    %75 = tpu.matmul %73, %74, %cst_38 {dimension_numbers = #tpu.dot_dimension_numbers<[1], [0], [0], [1], [0, 0, 1, 1], [], []>} : vector<1x768xf32>, vector<768x128xf32>, vector<1x128xf32> -> vector<1x128xf32>
    %76 = arith.addf %75, %3 : vector<1x128xf32>
    %77 = arith.negf %76 : vector<1x128xf32>
    %78 = math.exp %77 : vector<1x128xf32>
    %cst_39 = arith.constant 1.000000e+00 : f32
    %79 = vector.broadcast %cst_39 : f32 to vector<1x128xf32>
    %80 = arith.addf %79, %78 : vector<1x128xf32>
    %81 = arith.divf %79, %80 : vector<1x128xf32>
    %c0_40 = arith.constant 0 : index
    %c0_41 = arith.constant 0 : index
    %c0_42 = arith.constant 0 : index
    %82 = vector.load %arg3[%c0_40, %c0_41, %c0_42] : memref<1x1x128xf32, #tpu.memory_space<vmem>>, vector<1x1x128xf32>
    %83 = vector.shape_cast %82 : vector<1x1x128xf32> to vector<1x128xf32>
    %cst_43 = arith.constant 0.000000e+00 : f32
    %84 = vector.broadcast %cst_43 : f32 to vector<1x128xf32>
    %85 = arith.maximumf %76, %84 : vector<1x128xf32>
    %86 = arith.mulf %76, %83 : vector<1x128xf32>
    %87 = arith.subf %85, %86 : vector<1x128xf32>
    %88 = math.absf %76 : vector<1x128xf32>
    %cst_44 = arith.constant 0.000000e+00 : f32
    %89 = vector.broadcast %cst_44 : f32 to vector<1x128xf32>
    %90 = arith.subf %89, %88 : vector<1x128xf32>
    %91 = math.exp %90 : vector<1x128xf32>
    %92 = math.log1p %91 : vector<1x128xf32>
    %93 = arith.addf %87, %92 : vector<1x128xf32>
    %94 = arith.mulf %4, %93 : vector<1x128xf32>
    %cst_45 = arith.constant dense<0.000000e+00> : vector<1xf32>
    %95 = vector.multi_reduction <add>, %94, %cst_45 [1] : vector<1x128xf32> to vector<1xf32>
    %96 = vector.shape_cast %95 : vector<1xf32> to vector<1x1xf32>
    %cst_46 = arith.constant dense<0.000000e+00> : vector<1xf32>
    %97 = vector.multi_reduction <add>, %96, %cst_46 [0] : vector<1x1xf32> to vector<1xf32>
    %98 = vector.shape_cast %97 : vector<1xf32> to vector<1x1xf32>
    %c0_47 = arith.constant 0 : index
    %c0_48 = arith.constant 0 : index
    %c0_49 = arith.constant 0 : index
    %99 = vector.load %arg12[%c0_47, %c0_48, %c0_49] : memref<1x1x128xf32, #tpu.memory_space<vmem>>, vector<1x1x128xf32>
    %100 = vector.shape_cast %99 : vector<1x1x128xf32> to vector<1x128xf32>
    %101 = vector.shape_cast %76 : vector<1x128xf32> to vector<1x1x128xf32>
    tpu.vector_store %arg12[%c0_47, %c0_48, %c0_49], %101 {strides = array<i32>} : memref<1x1x128xf32, #tpu.memory_space<vmem>>, vector<1x1x128xf32>,
    %c0_50 = arith.constant 0 : index
    %c0_51 = arith.constant 0 : index
    %c0_52 = arith.constant 0 : index
    %102 = vector.load %arg13[%c0_50, %c0_51, %c0_52] : memref<1x1x128xf32, #tpu.memory_space<vmem>>, vector<1x1x128xf32>
    %103 = vector.shape_cast %102 : vector<1x1x128xf32> to vector<1x128xf32>
    %104 = vector.shape_cast %81 : vector<1x128xf32> to vector<1x1x128xf32>
    tpu.vector_store %arg13[%c0_50, %c0_51, %c0_52], %104 {strides = array<i32>} : memref<1x1x128xf32, #tpu.memory_space<vmem>>, vector<1x1x128xf32>,
    %cst_53 = arith.constant 6.250000e-02 : f32
    %105 = vector.broadcast %cst_53 : f32 to vector<1x1xf32>
    %106 = arith.mulf %98, %105 : vector<1x1xf32>
    %107 = vector.shape_cast %106 : vector<1x1xf32> to vector<1x1xf32>
    %108 = vector.broadcast %107 : vector<1x1xf32> to vector<1x128xf32>
    %c0_54 = arith.constant 0 : index
    %c0_55 = arith.constant 0 : index
    %c0_56 = arith.constant 0 : index
    %109 = vector.load %arg14[%c0_54, %c0_55, %c0_56] : memref<1x1x128xf32, #tpu.memory_space<vmem>>, vector<1x1x128xf32>
    %110 = vector.shape_cast %109 : vector<1x1x128xf32> to vector<1x128xf32>
    %111 = vector.shape_cast %108 : vector<1x128xf32> to vector<1x1x128xf32>
    tpu.vector_store %arg14[%c0_54, %c0_55, %c0_56], %111 {strides = array<i32>} : memref<1x1x128xf32, #tpu.memory_space<vmem>>, vector<1x1x128xf32>,
    return
  }
  func.func @transform_0(%arg0: i32) -> (i32, i32, i32) {
    %c0_i32 = arith.constant 0 : i32
    %c0_i32_0 = arith.constant 0 : i32
    %c0_i32_1 = arith.constant 0 : i32
    return %arg0, %c0_i32, %c0_i32_0 : i32, i32, i32
  }
  func.func @transform_1(%arg0: i32) -> (i32, i32, i32) {
    %c0_i32 = arith.constant 0 : i32
    %c0_i32_0 = arith.constant 0 : i32
    %c0_i32_1 = arith.constant 0 : i32
    return %arg0, %c0_i32, %c0_i32_0 : i32, i32, i32
  }
  func.func @transform_2(%arg0: i32) -> (i32, i32, i32) {
    %c0_i32 = arith.constant 0 : i32
    %c0_i32_0 = arith.constant 0 : i32
    %c0_i32_1 = arith.constant 0 : i32
    return %arg0, %c0_i32, %c0_i32_0 : i32, i32, i32
  }
  func.func @transform_3(%arg0: i32) -> (i32, i32) {
    %c0_i32 = arith.constant 0 : i32
    %c0_i32_0 = arith.constant 0 : i32
    %c0_i32_1 = arith.constant 0 : i32
    return %c0_i32, %c0_i32_0 : i32, i32
  }
  func.func @transform_4(%arg0: i32) -> (i32, i32) {
    %c0_i32 = arith.constant 0 : i32
    %c0_i32_0 = arith.constant 0 : i32
    %c0_i32_1 = arith.constant 0 : i32
    return %c0_i32, %c0_i32_0 : i32, i32
  }
  func.func @transform_5(%arg0: i32) -> (i32, i32) {
    %c0_i32 = arith.constant 0 : i32
    %c0_i32_0 = arith.constant 0 : i32
    %c0_i32_1 = arith.constant 0 : i32
    return %c0_i32, %c0_i32_0 : i32, i32
  }
  func.func @transform_6(%arg0: i32) -> (i32, i32) {
    %c0_i32 = arith.constant 0 : i32
    %c0_i32_0 = arith.constant 0 : i32
    %c0_i32_1 = arith.constant 0 : i32
    return %c0_i32, %c0_i32_0 : i32, i32
  }
  func.func @transform_7(%arg0: i32) -> (i32, i32) {
    %c0_i32 = arith.constant 0 : i32
    %c0_i32_0 = arith.constant 0 : i32
    %c0_i32_1 = arith.constant 0 : i32
    return %c0_i32, %c0_i32_0 : i32, i32
  }
  func.func @transform_8(%arg0: i32) -> (i32, i32) {
    %c0_i32 = arith.constant 0 : i32
    %c0_i32_0 = arith.constant 0 : i32
    %c0_i32_1 = arith.constant 0 : i32
    return %c0_i32, %c0_i32_0 : i32, i32
  }
  func.func @transform_9(%arg0: i32) -> (i32, i32) {
    %c0_i32 = arith.constant 0 : i32
    %c0_i32_0 = arith.constant 0 : i32
    %c0_i32_1 = arith.constant 0 : i32
    return %c0_i32, %c0_i32_0 : i32, i32
  }
  func.func @transform_10(%arg0: i32) -> (i32, i32, i32) {
    %c0_i32 = arith.constant 0 : i32
    %c0_i32_0 = arith.constant 0 : i32
    %c0_i32_1 = arith.constant 0 : i32
    return %arg0, %c0_i32, %c0_i32_0 : i32, i32, i32
  }
  func.func @transform_11(%arg0: i32) -> (i32, i32, i32) {
    %c0_i32 = arith.constant 0 : i32
    %c0_i32_0 = arith.constant 0 : i32
    %c0_i32_1 = arith.constant 0 : i32
    return %arg0, %c0_i32, %c0_i32_0 : i32, i32, i32
  }
  func.func @transform_12(%arg0: i32) -> (i32, i32, i32) {
    %c0_i32 = arith.constant 0 : i32
    %c0_i32_0 = arith.constant 0 : i32
    %c0_i32_1 = arith.constant 0 : i32
    return %arg0, %c0_i32, %c0_i32_0 : i32, i32, i32
  }
  func.func @transform_13(%arg0: i32) -> (i32, i32, i32) {
    %c0_i32 = arith.constant 0 : i32
    %c0_i32_0 = arith.constant 0 : i32
    %c0_i32_1 = arith.constant 0 : i32
    return %arg0, %c0_i32, %c0_i32_0 : i32, i32, i32
  }
}

</mosaic_0001>

<bundles_post_ra>
// kernel: tpu_custom_call.1
= control target key start
LH: loop header
LB: loop body
LE: loop exit
PB: predicated region body
PF: predicated region fallthrough
CT: control target
= control target key end

     0   :  { %s16012_s0 = inlined_call_operand.hbm [shape: f32[2,8,768], index: 0, kind: input, shape index: {}]   ;;  %s16013_s1 = inlined_call_operand.hbm [shape: f32[2,1,768], index: 1, kind: input, shape index: {}]   ;;  %s16014_s2 = inlined_call_operand.hbm [shape: f32[2,1,128], index: 2, kind: input, shape index: {}]   ;;  %s16015_s3 = inlined_call_operand.hbm [shape: bf16[128,768], index: 3, kind: input, shape index: {}]   ;;  %s16016_s4 = inlined_call_operand.hbm [shape: bf16[768,1024], index: 4, kind: input, shape index: {}]   ;;  %s16017_s5 = inlined_call_operand.hbm [shape: bf16[768,1024], index: 5, kind: input, shape index: {}]   ;;  %s16018_s6 = inlined_call_operand.hbm [shape: f32[1,2560], index: 6, kind: input, shape index: {}]   ;;  %s16019_s7 = inlined_call_operand.hbm [shape: bf16[512,768], index: 7, kind: input, shape index: {}]   ;;  %s16020_s8 = inlined_call_operand.hbm [shape: f32[768,128], index: 8, kind: input, shape index: {}]   ;;  %s16021_s9 = inlined_call_operand.hbm [shape: f32[3,128], index: 9, kind: input, shape index: {}]   ;;  %s16022_s10 = inlined_call_operand.hbm [shape: f32[2,1,768], index: 10, kind: output, shape index: {0}]   ;;  %s16023_s11 = inlined_call_operand.hbm [shape: f32[2,1,128], index: 11, kind: output, shape index: {1}]   ;;  %s16024_s12 = inlined_call_operand.hbm [shape: f32[2,1,128], index: 12, kind: output, shape index: {2}]   ;;  %s16025_s13 = inlined_call_operand.hbm [shape: f32[2,1,128], index: 13, kind: output, shape index: {3}]  }
   0x1   :  { %16156 = sst [smem:[#allocation127_spill]] %s16015_s3 }
   0x2   :  { %16157 = sst [smem:[#allocation128_spill]] %s16017_s5 }
   0x3   :  { %16158 = sst [smem:[#allocation129_spill]] %s16019_s7 }
   0x4   :  { %16159 = sst [smem:[#allocation130_spill]] %s16022_s10 }
   0x5   :  { %16160 = sst [smem:[#allocation131_spill]] %s16023_s11 }
   0x6   :  { %16161 = sst [smem:[#allocation132_spill]] %s16024_s12 }
   0x7   :  { %16162 = sst [smem:[#allocation133_spill]] %s16025_s13 }
   0x8   :  { %19 = vsyncpa [#allocation3], 0 }
   0x9   :  { %21 = vsyncpa [#allocation3 + $0x1], 0 }
   0xa   :  { %22 = vsyncpa [#allocation6], 0 }
   0xb   :  { %24 = vsyncpa [#allocation6 + $0x1], 0 }
   0xc   :  { %25 = vsyncpa [#allocation9], 0 }
   0xd   :  { %26 = vsyncpa [#allocation12], 0 }
   0xe   :  { %27 = vsyncpa [#allocation15], 0 }
   0xf   :  { %28 = vsyncpa [#allocation18], 0 }
  0x10   :  { %29 = vsyncpa [#allocation4], 0 }
  0x11   :  { %31 = vsyncpa [#allocation4 + $0x1], 0 }
  0x12   :  { %32 = vsyncpa [#allocation21], 0 }
  0x13   :  { %34 = vsyncpa [#allocation21 + $0x1], 0 }
  0x14   :  { %35 = vsyncpa [#allocation24], 0 }
  0x15   :  { %37 = vsyncpa [#allocation24 + $0x1], 0  ;;  %s13766_s25 = smov 0   ;;  %s13768_s26 = smov 0  }
  0x16   :  { %s13770_s27 = smov 0   ;;  %s13772_s28 = smov 0  }
  0x17 LB: > { %16163 = sst [smem:[#allocation34_spill]] %s13660_s25  ;;  %s13674_s29 = smov [#allocation8]   ;;  %s13672_s28 = sphi %s13772_s28, %s16487_s28   ;;  %s13668_s27 = sphi %s13770_s27, %s16489_s27   ;;  %s13664_s26 = sphi %s13768_s26, %s16491_s26   ;;  %s13660_s25 = sphi %s13766_s25, %s16490_s25  }
  0x18   : > { %16164 = sst [smem:[#allocation35_spill]] %s13668_s27  ;;  %s389_s30 = sshll.u32 %s13674_s29, 4  ;;  %s390_s30 = int_to_ptr.vmem [resolvable:$true] %s389_s30 }
  0x19   : > { %s13787_s14 = sadd.s32 4294967295, %s13672_s28   ;;  %p10818_p0 = scmp.ge.s32.totalorder %s13672_s28, 1 }
  0x1a   : > { %p16037_p1 = scmp.eq.s32.totalorder %s13787_s14, 0  ;;  %p377_p2 = scmp.lt.s32.totalorder %s13672_s28, 3 }
  0x1b   : > { %s13675_s17 = smov [#allocation11]   ;;  %s13676_s19 = smov [#allocation14]  }
  0x1c   : > { %p13792_p3 = pnand %p10818_p0, %p377_p2  ;;  %s415_s18 = sshll.u32 %s13675_s17, 4  ;;  %s13805_s18 = int_to_ptr.vmem [resolvable:$true] %s415_s18 }
  0x1d   : > { %s13807_s20 = sshll.u32 %s13676_s19, 4  ;;  %s13247_s22 = scalar_lea.vmem %s390_s30, 6144  ;;  %s440_s20 = int_to_ptr.vmem [resolvable:$true] %s13807_s20 }
  0x1e   : > { %s16165_s15 = scalar_select %p13792_p3, 1, 0 }
  0x1f   : > { %p12144_p5 = pneg %p13792_p3  ;;  %p13248_p8 = scmp.ne.s32.totalorder %s390_s30, %s13247_s22 }
  0x20   : > { %p13255_p11 = scmp.lt.s32.totalorder %s390_s30, %s390_s30  ;;  %p13256_p12 = scmp.lt.s32.totalorder %s13247_s22, %s13247_s22 }
  0x21   : > { %p13801_p6 = pnand %p12144_p5, %p16037_p1 }
  0x22   : > { %p13257_p13 = por %p13256_p12, %p13255_p11 }
  0x23   : > { %s16166_s16 = scalar_select %p13801_p6, 1, 0 }
  0x24   : > { %p13811_p7 = pneg %p13801_p6 }
  0x26   : > { %s16167_s21 = scalar_select %p13811_p7, 1, 0 }
  0x27   : > { %p13250_p9 = pnand %p13248_p8, %p13811_p7 }
  0x29   : > { %p13251_p10 = pneg %p13250_p9 }
  0x2b   : > { %p13258_p0 = pnand %p13257_p13, %p13251_p10 }
  0x2d   : > { %13261 = shalt.err (!%p13258_p0)
}
  0x2e   : > { %s13677_s23 = smov 384   ;;  %s13678_s24 = smov 24  }
  0x2f   : > { %s16168_s3 = sld [smem:[#allocation127_spill]]  ;;  %s13273_s19 = scalar_lea.vmem %s13805_s18, 49152 }
  0x30   : > { %p13274_p2 = scmp.ne.s32.totalorder %s13805_s18, %s13273_s19  ;;  %p13281_p9 = scmp.lt.s32.totalorder %s13805_s18, %s13805_s18 }
  0x31   : > { %p13282_p10 = scmp.lt.s32.totalorder %s13273_s19, %s13273_s19 }
  0x32   : > { %p13276_p5 = pnand %p13274_p2, %p13811_p7 }
  0x33   : > { %p13283_p11 = por %p13282_p10, %p13281_p9 }
  0x34   : > { %p13277_p8 = pneg %p13276_p5 }
  0x35   : > { %12147 = dma.hbm_to_vmem [thread:$0]  (!%p13801_p6), %s16168_s3, 6144, %s390_s30, [#allocation9], %s13677_s23, %s13677_s23, %s13678_s24  }
  0x36   : > { %p13284_p12 = pnand %p13283_p11, %p13277_p8 }
  0x38   : > { %13287 = shalt.err (!%p13284_p12)
}
  0x39   : > { %s16028_s22 = smov 512   ;;  %s16029_s13 = smov 32  }
  0x3a   : > { %s16169_s5 = sld [smem:[#allocation128_spill]]  ;;  %s13299_s17 = scalar_lea.vmem %s440_s20, 24576 }
  0x3b   : > { %p13300_p13 = scmp.ne.s32.totalorder %s440_s20, %s13299_s17  ;;  %p13307_p5 = scmp.lt.s32.totalorder %s440_s20, %s440_s20 }
  0x3c   : > { %p13308_p8 = scmp.lt.s32.totalorder %s13299_s17, %s13299_s17 }
  0x3d   : > { %p13302_p0 = pnand %p13300_p13, %p13811_p7 }
  0x3e   : > { %p13309_p9 = por %p13308_p8, %p13307_p5 }
  0x3f   : > { %p13303_p2 = pneg %p13302_p0 }
  0x40   : > { %12153 = dma.hbm_to_vmem [thread:$0]  (!%p13801_p6), %s16169_s5, 49152, %s13805_s18, [#allocation12], %s16028_s22, %s16028_s22, %s16029_s13  }
  0x41   : > { %p13310_p10 = pnand %p13309_p9, %p13303_p2 }
  0x43   : > { %13313 = shalt.err (!%p13310_p10)
}
  0x44   : > { %s16170_s7 = sld [smem:[#allocation129_spill]]  ;;  %s16030_s18 = sadd.s32 4294967294, %s13672_s28  }
  0x45   : > { %s13847_s30 = sadd.s32 1, %s13672_s28   ;;  %s50_s3 = sadd.s32 1, %s13668_s27 }
  0x46   : > { %16171 = sst [smem:[#allocation36_spill]] %s13847_s30  ;;  %s47_s29 = ssub.s32 %s13672_s28, %s13847_s30 }
  0x47   : > { %p57_p11 = scmp.ne.s32.totalorder %s13668_s27, %s13664_s26  ;;  %p48_p12 = scmp.eq.s32.totalorder %s47_s29, 0 }
  0x48   : > { %p58_p13 = scmp.eq.s32.totalorder %s13672_s28, 0  ;;  %p63_p0 = scmp.ne.s32.totalorder %s13664_s26, %s13660_s25 }
  0x49   : > { %p286_p2 = scmp.eq.s32.totalorder %s13787_s14, 1  ;;  %p292_p10 = scmp.eq.s32.totalorder %s16030_s18, 1 }
  0x4a   : > { %12159 = dma.hbm_to_vmem [thread:$0]  (!%p13801_p6), %s16170_s7, 24576, %s440_s20, [#allocation15], %s13677_s23, %s13677_s23, %s13678_s24  }
  0x4b   : > { %s13859_s17 = scalar_select %p48_p12, %s13668_s27, %s50_s3  }
  0x4c   : > { %p59_p5 = por %p58_p13, %p57_p11  ;;  %p13863_p8 = por %p16037_p1, %p63_p0 }
  0x4d   : > { %16172 = sst [smem:[#allocation37_spill]] %s13859_s17  ;;  %p13867_p9 = por %p286_p2, %p57_p11 }
  0x4e   : > { %s16173_s20 = scalar_select %p13863_p8, 1, 0 }
  0x4f   : > { %s16174_s23 = scalar_select %p13867_p9, 1, 0 }
  0x50   : > { %p12196_p4 = scmp.lt.s32.totalorder %s13672_s28, 2  ;;  %s13875_s24 = sand.u32 1, %s13668_s27  }
  0x51   : > { %16175 = sst [smem:[#allocation38_spill]] %s16174_s23  ;;  %p13877_p3 = por %p292_p10, %p63_p0 }
  0x52   : > { %s496_s3 = sand.u32 1, %s13672_s28   ;;  %p13882_p12 = pnand %p12196_p4, %p59_p5 }
  0x53   : > { %s16176_s19 = scalar_select %p13877_p3, 1, 0 }
  0x54   : > { %s16178_s29 = scalar_select %p13882_p12, 1, 0 }
  0x55   : > { %16177 = sst [smem:[#allocation39_spill]] %s16176_s19  ;;  %s12097_s22 = smul.u32 6, %s13875_s24 }
  0x56   : > { %s12098_s13 = smul.u32 96, %s13672_s28  ;;  %s13681_s5 = smov [#allocation10]  }
  0x57   : > { %s402_s7 = sshll.u32 %s13681_s5, 4  ;;  %s500_s30 = scalar_lea.vmem [#allocation5], %s12097_s22  ;;  %s13893_s7 = int_to_ptr.vmem [resolvable:$true] %s402_s7 }
  0x58   : > { %s13891_s27 = scalar_lea.hbm %s16013_s1, %s12098_s13  ;;  %s508_s19 = sshll.u32 %s500_s30, 4  ;;  %s509_s19 = int_to_ptr.vmem [resolvable:$true] %s508_s19 }
  0x59   : > { %s13895_s25 = scalar_lea.sflag [#allocation6], %s496_s3  ;;  %s13314_s10 = scalar_lea.hbm %s13891_s27, 96 }
  0x5a   : > { %p13315_p4 = scmp.ne.s32.totalorder %s13891_s27, %s13314_s10  ;;  %p13901_p11 = pneg %p13882_p12 }
  0x5b   : > { %s13319_s22 = scalar_lea.hbm %s16013_s1, 192  ;;  %p13320_p2 = scmp.lt.s32.totalorder %s13891_s27, %s16013_s1 }
  0x5c   : > { %s16179_s5 = scalar_select %p13901_p11, 1, 0 }
  0x5d   : > { %p13317_p13 = pnand %p13901_p11, %p13315_p4  ;;  %p13321_p5 = scmp.lt.s32.totalorder %s13319_s22, %s13314_s10 }
  0x5f   : > { %p13318_p0 = pneg %p13317_p13  ;;  %p13322_p10 = por %p13321_p5, %p13320_p2 }
  0x61   : > { %p13323_p1 = pnand %p13322_p10, %p13318_p0 }
  0x63   : > { %13326 = shalt.err (!%p13323_p1)
}
  0x64   : > { %s13327_s3 = scalar_lea.vmem %s509_s19, 96  ;;  %s13682_s12 = smov [#allocation5]  }
  0x65   : > { %p13328_p3 = scmp.ne.s32.totalorder %s509_s19, %s13327_s3  ;;  %s13332_s11 = sshll.u32 %s13682_s12, 4  ;;  %s13333_s11 = int_to_ptr.vmem [resolvable:$false] %s13332_s11 }
  0x66   : > { %s13334_s23 = scalar_lea.vmem %s13333_s11, 192  ;;  %p13335_p4 = scmp.lt.s32.totalorder %s509_s19, %s13333_s11 }
  0x67   : > { %p13330_p9 = pnand %p13328_p3, %p13901_p11  ;;  %p13336_p13 = scmp.lt.s32.totalorder %s13334_s23, %s13327_s3 }
  0x69   : > { %p13331_p8 = pneg %p13330_p9  ;;  %p13337_p6 = por %p13336_p13, %p13335_p4 }
  0x6b   : > { %p13338_p7 = pnand %p13337_p6, %p13331_p8 }
  0x6d   : > { %13341 = shalt.err (!%p13338_p7)
}
  0x6e   : > { %12172 = dma.hbm_to_vmem [thread:$0]  (!%p13882_p12), %s13891_s27, 96, %s509_s19, %s13895_s25  }
  0x6f   : > { %s13353_s10 = scalar_lea.vmem %s13893_s7, 49152  ;;  %p16180_p3 = scmp.ne.s32.totalorder %s16167_s21, 0 }
  0x70   : > { %p13354_p1 = scmp.ne.s32.totalorder %s13893_s7, %s13353_s10  ;;  %p13361_p2 = scmp.lt.s32.totalorder %s13893_s7, %s13893_s7 }
  0x71   : > { %p13362_p5 = scmp.lt.s32.totalorder %s13353_s10, %s13353_s10 }
  0x72   : > { %p13356_p9 = pnand %p13354_p1, %p16180_p3 }
  0x73   : > { %p13363_p10 = por %p13362_p5, %p13361_p2 }
  0x74   : > { %p13357_p0 = pneg %p13356_p9 }
  0x76   : > { %p13364_p6 = pnand %p13363_p10, %p13357_p0 }
  0x78   : > { %13367 = shalt.err (!%p13364_p6)
}
  0x79   : > { %p16181_p7 = scmp.ne.s32.totalorder %s16166_s16, 0  ;;  %s16182_s11 = smov 32  }
  0x7a   : > { %s16183_s12 = smov 512   ;;  %s13683_s27 = smov [#allocation13]  }
  0x7b   : > { %12150 = dma.hbm_to_vmem [thread:$0]  (!%p16181_p7), %s16016_s4, 49152, %s13893_s7, [#allocation9], %s16183_s12, %s16183_s12, %s16182_s11  }
  0x7c   : > { %s429_s19 = sshll.u32 %s13683_s27, 4  ;;  %s13684_s18 = smov [#allocation16]   ;;  %s430_s19 = int_to_ptr.vmem [resolvable:$true] %s429_s19 }
  0x7d   : > { %s452_s22 = sshll.u32 %s13684_s18, 4  ;;  %s13379_s30 = scalar_lea.vmem %s430_s19, 320  ;;  %s453_s22 = int_to_ptr.vmem [resolvable:$true] %s452_s22 }
  0x7e   : > { %p13380_p8 = scmp.ne.s32.totalorder %s430_s19, %s13379_s30  ;;  %p13387_p1 = scmp.lt.s32.totalorder %s430_s19, %s430_s19 }
  0x7f   : > { %p13388_p9 = scmp.lt.s32.totalorder %s13379_s30, %s13379_s30 }
  0x80   : > { %p13382_p4 = pnand %p13380_p8, %p16180_p3 }
  0x81   : > { %p13389_p0 = por %p13388_p9, %p13387_p1 }
  0x82   : > { %p13383_p13 = pneg %p13382_p4 }
  0x84   : > { %p13390_p2 = pnand %p13389_p0, %p13383_p13 }
  0x86   : > { %13393 = shalt.err (!%p13390_p2)
}
  0x87   : > { %12156 = dma.hbm_to_vmem [thread:$0]  (!%p16181_p7), %s16018_s6, 320, %s430_s19, [#allocation12]  }
  0x88   : > { %s13405_s3 = scalar_lea.vmem %s453_s22, 12288  ;;  %p13413_p12 = scmp.lt.s32.totalorder %s453_s22, %s453_s22 }
  0x89   : > { %p13406_p5 = scmp.ne.s32.totalorder %s453_s22, %s13405_s3  ;;  %p13414_p8 = scmp.lt.s32.totalorder %s13405_s3, %s13405_s3 }
  0x8b   : > { %p13408_p10 = pnand %p13406_p5, %p16180_p3  ;;  %p13415_p4 = por %p13414_p8, %p13413_p12 }
  0x8d   : > { %p13409_p6 = pneg %p13408_p10 }
  0x8f   : > { %p13416_p11 = pnand %p13415_p4, %p13409_p6 }
  0x91   : > { %13419 = shalt.err (!%p13416_p11)
}
  0x92   : > { %s13685_s10 = smov 128   ;;  %s13686_s11 = smov 8  }
  0x93   : > { %12162 = dma.hbm_to_vmem [thread:$0]  (!%p16181_p7), %s16020_s8, 12288, %s453_s22, [#allocation15], %s13685_s10, %s13685_s10, %s13686_s11  }
  0x94   : > { %s13687_s13 = smov [#allocation17]   ;;  %s12095_s19 = smul.u32 48, %s13875_s24 }
  0x95   : > { %s466_s27 = sshll.u32 %s13687_s13, 4  ;;  %s12096_s18 = smul.u32 768, %s13672_s28  ;;  %s467_s27 = int_to_ptr.vmem [resolvable:$true] %s466_s27 }
  0x96   : > { %s13431_s30 = scalar_lea.vmem %s467_s27, 64  ;;  %p13439_p1 = scmp.lt.s32.totalorder %s467_s27, %s467_s27 }
  0x97   : > { %p13432_p12 = scmp.ne.s32.totalorder %s467_s27, %s13431_s30  ;;  %p13440_p9 = scmp.lt.s32.totalorder %s13431_s30, %s13431_s30 }
  0x99   : > { %p13434_p11 = pnand %p13432_p12, %p16180_p3  ;;  %p13441_p0 = por %p13440_p9, %p13439_p1 }
  0x9b   : > { %p13435_p13 = pneg %p13434_p11 }
  0x9d   : > { %p13442_p2 = pnand %p13441_p0, %p13435_p13 }
  0x9f   : > { %13445 = shalt.err (!%p13442_p2)
}
  0xa0   : > { %12165 = dma.hbm_to_vmem [thread:$0]  (!%p16181_p7), %s16021_s9, 64, %s467_s27, [#allocation18]  }
  0xa1   : > { %s13961_s21 = scalar_lea.hbm %s16012_s0, %s12096_s18  ;;  %s481_s10 = scalar_lea.vmem [#allocation2], %s12095_s19 }
  0xa2   : > { %s489_s11 = sshll.u32 %s481_s10, 4  ;;  %s10829_s12 = sshll.u32 %s13672_s28, 4  ;;  %s490_s11 = int_to_ptr.vmem [resolvable:$true] %s489_s11 }
  0xa3   : > { %s478_s16 = scalar_lea.sflag [#allocation3], %s13875_s24  ;;  %s13446_s23 = scalar_lea.hbm %s13961_s21, 768 }
  0xa4   : > { %p13447_p3 = scmp.ne.s32.totalorder %s13961_s21, %s13446_s23  ;;  %p16184_p5 = scmp.ne.s32.totalorder %s16179_s5, 0 }
  0xa5   : > { %s13451_s30 = scalar_lea.hbm %s16012_s0, 1536  ;;  %p13452_p7 = scmp.lt.s32.totalorder %s13961_s21, %s16012_s0 }
  0xa6   : > { %p13449_p10 = pnand %p13447_p3, %p16184_p5  ;;  %p13453_p8 = scmp.lt.s32.totalorder %s13451_s30, %s13446_s23 }
  0xa8   : > { %p13450_p6 = pneg %p13449_p10  ;;  %p13454_p4 = por %p13453_p8, %p13452_p7 }
  0xaa   : > { %p13455_p12 = pnand %p13454_p4, %p13450_p6 }
  0xac   : > { %13458 = shalt.err (!%p13455_p12)
}
  0xad   : > { %s13459_s19 = scalar_lea.vmem %s490_s11, 768  ;;  %s13688_s7 = smov [#allocation2]  }
  0xae   : > { %p13460_p11 = scmp.ne.s32.totalorder %s490_s11, %s13459_s19  ;;  %s13464_s22 = sshll.u32 %s13688_s7, 4  ;;  %s13465_s22 = int_to_ptr.vmem [resolvable:$false] %s13464_s22 }
  0xaf   : > { %s13466_s3 = scalar_lea.vmem %s13465_s22, 1536  ;;  %p13467_p9 = scmp.lt.s32.totalorder %s490_s11, %s13465_s22 }
  0xb0   : > { %p13462_p13 = pnand %p13460_p11, %p16184_p5  ;;  %p13468_p0 = scmp.lt.s32.totalorder %s13466_s3, %s13459_s19 }
  0xb2   : > { %p13463_p1 = pneg %p13462_p13  ;;  %p13469_p2 = por %p13468_p0, %p13467_p9 }
  0xb4   : > { %p13470_p3 = pnand %p13469_p2, %p13463_p1 }
  0xb6   : > { %13473 = shalt.err (!%p13470_p3)
}
  0xb7   : > { %p16185_p10 = scmp.ne.s32.totalorder %s16178_s29, 0  ;;  %s523_s13 = scalar_lea.hbm %s16014_s2, %s10829_s12 }
  0xb8   : > { %s518_s27 = scalar_lea.vmem [#allocation7], %s13875_s24  ;;  %s13474_s17 = scalar_lea.hbm %s523_s13, 16 }
  0xb9   : > { %12169 = dma.hbm_to_vmem [thread:$0]  (!%p16185_p10), %s13961_s21, 768, %s490_s11, %s478_s16  }
  0xba   : > { %s525_s30 = sshll.u32 %s518_s27, 4  ;;  %p13475_p6 = scmp.ne.s32.totalorder %s523_s13, %s13474_s17  ;;  %s526_s30 = int_to_ptr.vmem [resolvable:$true] %s525_s30 }
  0xbb   : > { %s13479_s7 = scalar_lea.hbm %s16014_s2, 32  ;;  %p13480_p4 = scmp.lt.s32.totalorder %s523_s13, %s16014_s2 }
  0xbc   : > { %p13477_p7 = pnand %p13475_p6, %p16184_p5  ;;  %p13481_p12 = scmp.lt.s32.totalorder %s13479_s7, %s13474_s17 }
  0xbe   : > { %p13478_p8 = pneg %p13477_p7  ;;  %p13482_p11 = por %p13481_p12, %p13480_p4 }
  0xc0   : > { %p13483_p13 = pnand %p13482_p11, %p13478_p8 }
  0xc2   : > { %13486 = shalt.err (!%p13483_p13)
}
  0xc3   : > { %s13487_s24 = scalar_lea.vmem %s526_s30, 16  ;;  %s13689_s21 = smov [#allocation7]  }
  0xc4   : > { %p13488_p1 = scmp.ne.s32.totalorder %s526_s30, %s13487_s24  ;;  %s13492_s11 = sshll.u32 %s13689_s21, 4  ;;  %s13493_s11 = int_to_ptr.vmem [resolvable:$false] %s13492_s11 }
  0xc5   : > { %s13494_s12 = scalar_lea.vmem %s13493_s11, 32  ;;  %p13495_p2 = scmp.lt.s32.totalorder %s526_s30, %s13493_s11 }
  0xc6   : > { %p13490_p9 = pnand %p13488_p1, %p16184_p5  ;;  %p13496_p3 = scmp.lt.s32.totalorder %s13494_s12, %s13487_s24 }
  0xc8   : > { %p13491_p0 = pneg %p13490_p9  ;;  %p13497_p6 = por %p13496_p3, %p13495_p2 }
  0xca   : > { %p13498_p7 = pnand %p13497_p6, %p13491_p0 }
  0xcc   : > { %13501 = shalt.err (!%p13498_p7)
}
  0xcd   : > { %12175 = dma.hbm_to_vmem [thread:$0]  (!%p16185_p10), %s523_s13, 16, %s526_s30, %s13895_s25  }
  0xce   : > { %p16186_p8 = scmp.ne.s32.totalorder %s16165_s15, 0 }
  0xd0   : > { %534 = sbr.rel (%p16186_p8) target bundleno = 2685 (0xa7d), region = 60 }
  0xd5   : > { %s14001_s5 = sand.u32 1, %s13664_s26   ;;  %p16187_p5 = scmp.ne.s32.totalorder %s16173_s20, 0 }
  0xd6   : > { %s12099_s16 = smul.u32 48, %s14001_s5  ;;  %s537_s10 = scalar_lea.sflag [#allocation3], %s14001_s5 }
  0xd8   : > { %s14005_s23 = scalar_lea.vmem [#allocation2], %s12099_s16 }
  0xd9   : > { %13623 = dma.done.wait (%p16187_p5), %s537_s10, 768  }
  0xda   : > { %13625 = vsyncadd (%p16187_p5), %s537_s10, 4294966528  ;;  %s545_s25 = sand.u32 1, %s13787_s14   ;;  %s12100_s15 = smul.u32 6, %s14001_s5 }
  0xdb   : > { %s546_s29 = scalar_lea.sflag [#allocation6], %s545_s25 }
  0xdc   : > { %s14017_s13 = scalar_lea.vmem [#allocation5], %s12100_s15 }
  0xdd   : > { %13627 = dma.done.wait (%p16187_p5), %s546_s29, 112  }
  0xde   : > { %13629 = vsyncadd (%p16187_p5), %s546_s29, 4294967184  ;;  %s557_s27 = scalar_lea.vmem [#allocation7], %s14001_s5  ;;  %p16188_p10 = scmp.eq.s32.totalorder %s13787_s14, 0 }
  0xe0   : > { %13631 = dma.done.wait (%p16188_p10), [#allocation9], 55296   ;;  %p16189_p4 = pmov %p16188_p10 }
  0xe2   : > { %13633 = vsyncadd (%p16189_p4), [#allocation9], 4294912000  ;;  %p16190_p12 = pmov %p16189_p4 }
  0xe3   : > { %p16191_p11 = pmov %p16189_p4 }
  0xe4   : > { %13635 = dma.done.wait (%p16190_p12), [#allocation12], 49472  }
  0xe5   : > { %13637 = vsyncadd (%p16191_p11), [#allocation12], 4294917824  ;;  %p16192_p13 = pmov %p16189_p4 }
  0xe6   : > { %p16193_p1 = pmov %p16189_p4 }
  0xe7   : > { %13639 = dma.done.wait (%p16192_p13), [#allocation15], 36864  }
  0xe8   : > { %13641 = vsyncadd (%p16193_p1), [#allocation15], 4294930432  ;;  %p16194_p9 = pmov %p16193_p1 }
  0xe9   : > { %p16195_p0 = pmov %p16193_p1 }
  0xea   : > { %13643 = dma.done.wait (%p16194_p9), [#allocation18], 64  }
  0xeb   : > { %13645 = vsyncadd (%p16195_p0), [#allocation18], 4294967232  ;;  %v724_v0 = vld [vmem:[#allocation10 + $0x1c0] sm:$0xff]  ;;  %s15888_s20 = scalar_lea.vmem [#allocation19], %s12100_s15  ;;  %s636_s30 = scalar_lea.vmem [#allocation20], %s14001_s5  ;;  %vm10484_vm2 = vcmask 1040384  }
  0xec   : > { %v728_v1 = vld [vmem:[#allocation10 + $0x1e0] sm:$0xff]  ;;  %s642_s17 = scalar_lea.vmem [#allocation22], %s14001_s5  ;;  %s16476_s18 = sld [smem:[#allocation38_spill]] }
  0xed   : > { %v852_v2 = vld [vmem:[#allocation10 + $0x5c0] sm:$0xff]  ;;  %v10895_v3 = vcombine.high %v724_v0, %v728_v1  ;;  %v10894_v5 = vcombine.low %v724_v0, %v728_v1  ;;  %s15900_s19 = sshll.u32 %s13787_s14, 4  ;;  %s10533_s7 = sshll.u32 %s636_s30, 4  ;;  %s10534_s7 = int_to_ptr.vmem [resolvable:$true] %s10533_s7 }
  0xee   : > { %v856_v4 = vld [vmem:[#allocation10 + $0x5e0] sm:$0xff]  ;;  %s16477_s24 = sld [smem:[#allocation131_spill]]  ;;  %s15910_s11 = scalar_lea.sflag [#allocation21], %s545_s25 }
  0xef   : > { %v716_v6 = vld [vmem:[#allocation10 + $0x180] sm:$0xff]  ;;  %v11023_v8 = vcombine.high %v852_v2, %v856_v4  ;;  %v11022_v9 = vcombine.low %v852_v2, %v856_v4  ;;  %3013 = vmatprep.subr.bf16.mxu0 %v10895_v3  ;;  %s13502_s12 = scalar_lea.vmem %s10534_s7, 16  ;;  %s13692_s16 = smov [#allocation20]  }
  0xf0   : > { %v720_v7 = vld [vmem:[#allocation10 + $0x1a0] sm:$0xff]  ;;  %3014 = vmatpush1.bf16.msra.mxu0 %v10894_v5  ;;  %p13503_p2 = scmp.ne.s32.totalorder %s10534_s7, %s13502_s12  ;;  %s13506_s10 = sshll.u32 %s13692_s16, 4  ;;  %s13507_s10 = int_to_ptr.vmem [resolvable:$false] %s13506_s10 }
  0xf1   : > { %v10887_v10 = vcombine.high %v716_v6, %v720_v7  ;;  %v844_v11 = vld [vmem:[#allocation10 + $0x580] sm:$0xff]  ;;  %3054 = vmatprep.subr.bf16.mxu1 %v11023_v8  ;;  %v10886_v18 = vcombine.low %v716_v6, %v720_v7  ;;  %p13509_p8 = scmp.lt.s32.totalorder %s10534_s7, %s13507_s10 }
  0xf2   : > { %v848_v12 = vld [vmem:[#allocation10 + $0x5a0] sm:$0xff]  ;;  %3055 = vmatpush1.bf16.msra.mxu1 %v11022_v9  ;;  %p16478_p3 = scmp.ne.s32.totalorder %s16476_s18, 0 }
  0xf3   : > { %v708_v13 = vld [vmem:[#allocation10 + $0x140] sm:$0xff]  ;;  %v11015_v14 = vcombine.high %v844_v11, %v848_v12  ;;  %3015 = vmatprep.subr.bf16.mxu0 %v10887_v10  ;;  %v11014_v19 = vcombine.low %v844_v11, %v848_v12 }
  0xf4   : > { %v712_v15 = vld [vmem:[#allocation10 + $0x160] sm:$0xff]  ;;  %3016 = vmatpush1.bf16.msra.mxu0 %v10886_v18  ;;  %s10531_s21 = scalar_lea.hbm %s16477_s24, %s15900_s19  ;;  %p13504_p6 = pnand %p13503_p2, %p16478_p3 }
  0xf5   : > { %v836_v16 = vld [vmem:[#allocation10 + $0x540] sm:$0xff]  ;;  %v10879_v20 = vcombine.high %v708_v13, %v712_v15  ;;  %3056 = vmatprep.subr.bf16.mxu1 %v11015_v14  ;;  %v10878_v26 = vcombine.low %v708_v13, %v712_v15 }
  0xf6   : > { %v840_v17 = vld [vmem:[#allocation10 + $0x560] sm:$0xff]  ;;  %3057 = vmatpush1.bf16.msra.mxu1 %v11014_v19  ;;  %p13505_p7 = pneg %p13504_p6 }
  0xf7   : > { %v11007_v21 = vcombine.high %v836_v16, %v840_v17  ;;  %v700_v22 = vld [vmem:[#allocation10 + $0x100] sm:$0xff]  ;;  %3017 = vmatprep.subr.bf16.mxu0 %v10879_v20  ;;  %v11006_v27 = vcombine.low %v836_v16, %v840_v17 }
  0xf8   : > { %v704_v23 = vld [vmem:[#allocation10 + $0x120] sm:$0xff]  ;;  %3018 = vmatpush1.bf16.msra.mxu0 %v10878_v26 }
  0xf9   : > { %v828_v24 = vld [vmem:[#allocation10 + $0x500] sm:$0xff]  ;;  %v10871_v28 = vcombine.high %v700_v22, %v704_v23  ;;  %3058 = vmatprep.subr.bf16.mxu1 %v11007_v21  ;;  %v10870_v34 = vcombine.low %v700_v22, %v704_v23 }
  0xfa   : > { %v832_v25 = vld [vmem:[#allocation10 + $0x520] sm:$0xff]  ;;  %3059 = vmatpush1.bf16.msra.mxu1 %v11006_v27 }
  0xfb   : > { %v10999_v29 = vcombine.high %v828_v24, %v832_v25  ;;  %v692_v30 = vld [vmem:[#allocation10 + $0xc0] sm:$0xff]  ;;  %3019 = vmatprep.subr.bf16.mxu0 %v10871_v28  ;;  %v10998_v35 = vcombine.low %v828_v24, %v832_v25 }
  0xfc   : > { %v696_v31 = vld [vmem:[#allocation10 + $0xe0] sm:$0xff]  ;;  %3020 = vmatpush1.bf16.msra.mxu0 %v10870_v34 }
  0xfd   : > { %v820_v32 = vld [vmem:[#allocation10 + $0x4c0] sm:$0xff]  ;;  %v10863_v36 = vcombine.high %v692_v30, %v696_v31  ;;  %3060 = vmatprep.subr.bf16.mxu1 %v10999_v29  ;;  %v10862_v42 = vcombine.low %v692_v30, %v696_v31 }
  0xfe   : > { %v824_v33 = vld [vmem:[#allocation10 + $0x4e0] sm:$0xff]  ;;  %3061 = vmatpush1.bf16.msra.mxu1 %v10998_v35 }
  0xff   : > { %v10991_v37 = vcombine.high %v820_v32, %v824_v33  ;;  %v684_v38 = vld [vmem:[#allocation10 + $0x80] sm:$0xff]  ;;  %3021 = vmatprep.subr.bf16.mxu0 %v10863_v36  ;;  %v10990_v43 = vcombine.low %v820_v32, %v824_v33 }
 0x100   : > { %v688_v39 = vld [vmem:[#allocation10 + $0xa0] sm:$0xff]  ;;  %3022 = vmatpush1.bf16.msra.mxu0 %v10862_v42 }
 0x101   : > { %v812_v40 = vld [vmem:[#allocation10 + $0x480] sm:$0xff]  ;;  %v10855_v44 = vcombine.high %v684_v38, %v688_v39  ;;  %3062 = vmatprep.subr.bf16.mxu1 %v10991_v37  ;;  %v10854_v50 = vcombine.low %v684_v38, %v688_v39 }
 0x102   : > { %v816_v41 = vld [vmem:[#allocation10 + $0x4a0] sm:$0xff]  ;;  %3063 = vmatpush1.bf16.msra.mxu1 %v10990_v43 }
 0x103   : > { %v10983_v45 = vcombine.high %v812_v40, %v816_v41  ;;  %v676_v46 = vld [vmem:[#allocation10 + $0x40] sm:$0xff]  ;;  %3023 = vmatprep.subr.bf16.mxu0 %v10855_v44  ;;  %v10982_v51 = vcombine.low %v812_v40, %v816_v41 }
 0x104   : > { %v680_v47 = vld [vmem:[#allocation10 + $0x60] sm:$0xff]  ;;  %3024 = vmatpush1.bf16.msra.mxu0 %v10854_v50 }
 0x105   : > { %v804_v48 = vld [vmem:[#allocation10 + $0x440] sm:$0xff]  ;;  %v10847_v52 = vcombine.high %v676_v46, %v680_v47  ;;  %3064 = vmatprep.subr.bf16.mxu1 %v10983_v45  ;;  %v10846_v62 = vcombine.low %v676_v46, %v680_v47 }
 0x106   : > { %v808_v49 = vld [vmem:[#allocation10 + $0x460] sm:$0xff]  ;;  %3065 = vmatpush1.bf16.msra.mxu1 %v10982_v51 }
 0x107   : > { %v657_v53 = vld [vmem:[%s14005_s23 + $0x8] sm:$0xff]  ;;  %v659_v54 = vld [vmem:[%s14005_s23 + $0x18] sm:$0xff]  ;;  %v10975_v55 = vcombine.high %v804_v48, %v808_v49  ;;  %3025 = vmatprep.subr.bf16.mxu0 %v10847_v52  ;;  %v10974_v63 = vcombine.low %v804_v48, %v808_v49 }
 0x108   : > { %v668_v56 = vld [vmem:[#allocation10] sm:$0xff]  ;;  %v14042_v58 = vpack.c.bf16 %v657_v53, %v657_v53  ;;  %v14044_v59 = vpack.c.bf16 %v659_v54, %v659_v54  ;;  %3026 = vmatpush1.bf16.msra.mxu0 %v10846_v62 }
 0x109   : > { %v672_v57 = vld [vmem:[#allocation10 + $0x20] sm:$0xff]  ;;  %3066 = vmatprep.subr.bf16.mxu1 %v10975_v55 }
 0x10a   : > { %v796_v60 = vld [vmem:[#allocation10 + $0x400] sm:$0xff]  ;;  %3045 = vmatprep.mubr.bf16.mxu0 %v14042_v58  ;;  %v10839_v0 = vcombine.high %v668_v56, %v672_v57  ;;  %3086 = vmatprep.mubr.bf16.mxu1 %v14044_v59  ;;  %v10838_v6 = vcombine.low %v668_v56, %v672_v57 }
 0x10b   : > { %v800_v61 = vld [vmem:[#allocation10 + $0x420] sm:$0xff]  ;;  %3067 = vmatpush1.bf16.msra.mxu1 %v10974_v63 }
 0x10c   : > { %v10967_v1 = vcombine.high %v796_v60, %v800_v61  ;;  %v788_v2 = vld [vmem:[#allocation10 + $0x3c0] sm:$0xff]  ;;  %3027 = vmatprep.subr.bf16.mxu0 %v10839_v0  ;;  %v10966_v7 = vcombine.low %v796_v60, %v800_v61 }
 0x10d   : > { %v792_v3 = vld [vmem:[#allocation10 + $0x3e0] sm:$0xff]  ;;  %3028 = vmatpush1.bf16.msra.mxu0 %v10838_v6  ;;  %v725_v6 = vld [vmem:[#allocation10 + $0x1c8] sm:$0xff] }
 0x10e   : > { %v916_v4 = vld [vmem:[#allocation10 + $0x7c0] sm:$0xff]  ;;  %v10959_v8 = vcombine.high %v788_v2, %v792_v3  ;;  %3068 = vmatprep.subr.bf16.mxu1 %v10967_v1  ;;  %v10958_v14 = vcombine.low %v788_v2, %v792_v3 }
 0x10f   : > { %v920_v5 = vld [vmem:[#allocation10 + $0x7e0] sm:$0xff]  ;;  %3069 = vmatpush1.bf16.msra.mxu1 %v10966_v7  ;;  %v729_v7 = vld [vmem:[#allocation10 + $0x1e8] sm:$0xff] }
 0x110   : > { %v11087_v9 = vcombine.high %v916_v4, %v920_v5  ;;  %v780_v10 = vld [vmem:[#allocation10 + $0x380] sm:$0xff]  ;;  %3029 = vmatprep.subr.bf16.mxu0 %v10959_v8  ;;  %v11086_v15 = vcombine.low %v916_v4, %v920_v5 }
 0x111   : > { %v784_v11 = vld [vmem:[#allocation10 + $0x3a0] sm:$0xff]  ;;  %3030 = vmatpush2.bf16.msra.mxu0 %v10958_v14 }
 0x112   : > { %v908_v12 = vld [vmem:[#allocation10 + $0x780] sm:$0xff]  ;;  %v10951_v16 = vcombine.high %v780_v10, %v784_v11  ;;  %3070 = vmatprep.subr.bf16.mxu1 %v11087_v9  ;;  %v10950_v22 = vcombine.low %v780_v10, %v784_v11 }
 0x113   : > { %v912_v13 = vld [vmem:[#allocation10 + $0x7a0] sm:$0xff]  ;;  %3071 = vmatpush2.bf16.msra.mxu1 %v11086_v15 }
 0x114   : > { %v11079_v17 = vcombine.high %v908_v12, %v912_v13  ;;  %v772_v18 = vld [vmem:[#allocation10 + $0x340] sm:$0xff]  ;;  %3031 = vmatprep.subr.bf16.mxu0 %v10951_v16  ;;  %v11078_v23 = vcombine.low %v908_v12, %v912_v13  ;;  %v10897_v13 = vcombine.high %v725_v6, %v729_v7 }
 0x115   : > { %v776_v19 = vld [vmem:[#allocation10 + $0x360] sm:$0xff]  ;;  %3032 = vmatpush2.bf16.msra.mxu0 %v10950_v22  ;;  %v10896_v22 = vcombine.low %v725_v6, %v729_v7  ;;  %v673_v7 = vld [vmem:[#allocation10 + $0x28] sm:$0xff] }
 0x116   : > { %v900_v20 = vld [vmem:[#allocation10 + $0x740] sm:$0xff]  ;;  %v10943_v24 = vcombine.high %v772_v18, %v776_v19  ;;  %3072 = vmatprep.subr.bf16.mxu1 %v11079_v17  ;;  %v10942_v30 = vcombine.low %v772_v18, %v776_v19  ;;  %v717_v17 = vld [vmem:[#allocation10 + $0x188] sm:$0xff] }
 0x117   : > { %v904_v21 = vld [vmem:[#allocation10 + $0x760] sm:$0xff]  ;;  %3073 = vmatpush2.bf16.msra.mxu1 %v11078_v23  ;;  %v721_v18 = vld [vmem:[#allocation10 + $0x1a8] sm:$0xff] }
 0x118   : > { %v11071_v25 = vcombine.high %v900_v20, %v904_v21  ;;  %v764_v26 = vld [vmem:[#allocation10 + $0x300] sm:$0xff]  ;;  %3033 = vmatprep.subr.bf16.mxu0 %v10943_v24  ;;  %v11070_v31 = vcombine.low %v900_v20, %v904_v21  ;;  %v10889_v24 = vcombine.high %v717_v17, %v721_v18 }
 0x119   : > { %v768_v27 = vld [vmem:[#allocation10 + $0x320] sm:$0xff]  ;;  %3034 = vmatpush2.bf16.msra.mxu0 %v10942_v30 }
 0x11a   : > { %v892_v28 = vld [vmem:[#allocation10 + $0x700] sm:$0xff]  ;;  %v10935_v32 = vcombine.high %v764_v26, %v768_v27  ;;  %3074 = vmatprep.subr.bf16.mxu1 %v11071_v25  ;;  %v10934_v38 = vcombine.low %v764_v26, %v768_v27  ;;  %v709_v27 = vld [vmem:[#allocation10 + $0x148] sm:$0xff] }
 0x11b   : > { %v896_v29 = vld [vmem:[#allocation10 + $0x720] sm:$0xff]  ;;  %3075 = vmatpush2.bf16.msra.mxu1 %v11070_v31  ;;  %v10888_v31 = vcombine.low %v717_v17, %v721_v18 }
 0x11c   : > { %v11063_v33 = vcombine.high %v892_v28, %v896_v29  ;;  %v756_v34 = vld [vmem:[#allocation10 + $0x2c0] sm:$0xff]  ;;  %3035 = vmatprep.subr.bf16.mxu0 %v10935_v32  ;;  %v11062_v39 = vcombine.low %v892_v28, %v896_v29  ;;  %v713_v29 = vld [vmem:[#allocation10 + $0x168] sm:$0xff] }
 0x11d   : > { %v760_v35 = vld [vmem:[#allocation10 + $0x2e0] sm:$0xff]  ;;  %3036 = vmatpush2.bf16.msra.mxu0 %v10934_v38 }
 0x11e   : > { %v884_v36 = vld [vmem:[#allocation10 + $0x6c0] sm:$0xff]  ;;  %v10927_v40 = vcombine.high %v756_v34, %v760_v35  ;;  %3076 = vmatprep.subr.bf16.mxu1 %v11063_v33  ;;  %v10926_v46 = vcombine.low %v756_v34, %v760_v35  ;;  %v701_v35 = vld [vmem:[#allocation10 + $0x108] sm:$0xff] }
 0x11f   : > { %v888_v37 = vld [vmem:[#allocation10 + $0x6e0] sm:$0xff]  ;;  %3077 = vmatpush2.bf16.msra.mxu1 %v11062_v39  ;;  %v10880_v39 = vcombine.low %v709_v27, %v713_v29 }
 0x120   : > { %v11055_v41 = vcombine.high %v884_v36, %v888_v37  ;;  %v748_v42 = vld [vmem:[#allocation10 + $0x280] sm:$0xff]  ;;  %3037 = vmatprep.subr.bf16.mxu0 %v10927_v40  ;;  %v11054_v47 = vcombine.low %v884_v36, %v888_v37  ;;  %v10881_v36 = vcombine.high %v709_v27, %v713_v29  ;;  %v705_v37 = vld [vmem:[#allocation10 + $0x128] sm:$0xff] }
 0x121   : > { %v752_v43 = vld [vmem:[#allocation10 + $0x2a0] sm:$0xff]  ;;  %3038 = vmatpush2.bf16.msra.mxu0 %v10926_v46 }
 0x122   : > { %v876_v44 = vld [vmem:[#allocation10 + $0x680] sm:$0xff]  ;;  %v10919_v48 = vcombine.high %v748_v42, %v752_v43  ;;  %3078 = vmatprep.subr.bf16.mxu1 %v11055_v41  ;;  %v10918_v54 = vcombine.low %v748_v42, %v752_v43  ;;  %v693_v43 = vld [vmem:[#allocation10 + $0xc8] sm:$0xff] }
 0x123   : > { %v880_v45 = vld [vmem:[#allocation10 + $0x6a0] sm:$0xff]  ;;  %3079 = vmatpush2.bf16.msra.mxu1 %v11054_v47  ;;  %v10872_v47 = vcombine.low %v701_v35, %v705_v37 }
 0x124   : > { %v11047_v49 = vcombine.high %v876_v44, %v880_v45  ;;  %v740_v50 = vld [vmem:[#allocation10 + $0x240] sm:$0xff]  ;;  %3039 = vmatprep.subr.bf16.mxu0 %v10919_v48  ;;  %v11046_v55 = vcombine.low %v876_v44, %v880_v45  ;;  %v10873_v44 = vcombine.high %v701_v35, %v705_v37  ;;  %v697_v45 = vld [vmem:[#allocation10 + $0xe8] sm:$0xff] }
 0x125   : > { %v744_v51 = vld [vmem:[#allocation10 + $0x260] sm:$0xff]  ;;  %3040 = vmatpush2.bf16.msra.mxu0 %v10918_v54 }
 0x126   : > { %v868_v52 = vld [vmem:[#allocation10 + $0x640] sm:$0xff]  ;;  %v10911_v56 = vcombine.high %v740_v50, %v744_v51  ;;  %3080 = vmatprep.subr.bf16.mxu1 %v11047_v49  ;;  %v10910_v0 = vcombine.low %v740_v50, %v744_v51  ;;  %v685_v51 = vld [vmem:[#allocation10 + $0x88] sm:$0xff] }
 0x127   : > { %v872_v53 = vld [vmem:[#allocation10 + $0x660] sm:$0xff]  ;;  %3081 = vmatpush2.bf16.msra.mxu1 %v11046_v55  ;;  %v10864_v55 = vcombine.low %v693_v43, %v697_v45 }
 0x128   : > { %v11039_v57 = vcombine.high %v868_v52, %v872_v53  ;;  %v732_v60 = vld [vmem:[#allocation10 + $0x200] sm:$0xff]  ;;  %3041 = vmatprep.subr.bf16.mxu0 %v10911_v56  ;;  %v11038_v1 = vcombine.low %v868_v52, %v872_v53  ;;  %v10865_v52 = vcombine.high %v693_v43, %v697_v45  ;;  %v689_v53 = vld [vmem:[#allocation10 + $0xa8] sm:$0xff] }
 0x129   : > { %v736_v61 = vld [vmem:[#allocation10 + $0x220] sm:$0xff]  ;;  %3042 = vmatpush2.bf16.msra.mxu0 %v10910_v0 }
 0x12a   : > { %v860_v62 = vld [vmem:[#allocation10 + $0x600] sm:$0xff]  ;;  %v10903_v2 = vcombine.high %v732_v60, %v736_v61  ;;  %3082 = vmatprep.subr.bf16.mxu1 %v11039_v57  ;;  %v10902_v8 = vcombine.low %v732_v60, %v736_v61  ;;  %v677_v61 = vld [vmem:[#allocation10 + $0x48] sm:$0xff] }
 0x12b   : > { %v864_v63 = vld [vmem:[#allocation10 + $0x620] sm:$0xff]  ;;  %3083 = vmatpush2.bf16.msra.mxu1 %v11038_v1  ;;  %v10856_v1 = vcombine.low %v685_v51, %v689_v53 }
 0x12c   : > { %v11031_v3 = vcombine.high %v860_v62, %v864_v63  ;;  %v980_v4 = vld [vmem:[#allocation10 + $0x9c0] sm:$0xff]  ;;  %3043 = vmatprep.subr.bf16.mxu0 %v10903_v2  ;;  %v11030_v10 = vcombine.low %v860_v62, %v864_v63  ;;  %v10857_v62 = vcombine.high %v685_v51, %v689_v53  ;;  %v681_v63 = vld [vmem:[#allocation10 + $0x68] sm:$0xff] }
 0x12d   : > { %v984_v5 = vld [vmem:[#allocation10 + $0x9e0] sm:$0xff]  ;;  %3044 = vmatpush2.bf16.msra.mxu0 %v10902_v8  ;;  %v10849_v6 = vcombine.high %v677_v61, %v681_v63 }
 0x12e   : > { %v656_v9 = vld [vmem:[%s14005_s23] sm:$0xff]  ;;  %v658_v11 = vld [vmem:[%s14005_s23 + $0x10] sm:$0xff]  ;;  %v11151_v12 = vcombine.high %v980_v4, %v984_v5  ;;  %3084 = vmatprep.subr.bf16.mxu1 %v11031_v3  ;;  %v661_v19 = vld [vmem:[%s14005_s23 + $0x28] sm:$0xff]  ;;  %v11150_v21 = vcombine.low %v980_v4, %v984_v5 }
 0x12f   : > { %v972_v14 = vld [vmem:[#allocation10 + $0x980] sm:$0xff]  ;;  %v14050_v16 = vpack.c.bf16 %v656_v9, %v656_v9  ;;  %v14053_v20 = vpack.c.bf16 %v658_v11, %v658_v11  ;;  %3085 = vmatpush2.bf16.msra.mxu1 %v11030_v10  ;;  %v14055_v28 = vpack.c.bf16 %v661_v19, %v661_v19  ;;  %v669_v5 = vld [vmem:[#allocation10 + $0x8] sm:$0xff]  ;;  %v10848_v9 = vcombine.low %v677_v61, %v681_v63 }
 0x130   : > { %v976_v15 = vld [vmem:[#allocation10 + $0x9a0] sm:$0xff]  ;;  %3095 = vmatprep.subr.bf16.mxu0 %v11151_v12  ;;  %3136 = vmatprep.subr.bf16.mxu1 %v10897_v13  ;;  %v789_v13 = vld [vmem:[#allocation10 + $0x3c8] sm:$0xff]  ;;  %v10840_v18 = vcombine.low %v669_v5, %v673_v7 }
 0x131   : > { %v11143_v23 = vcombine.high %v972_v14, %v976_v15  ;;  %v964_v25 = vld [vmem:[#allocation10 + $0x940] sm:$0xff]  ;;  %3046 = vmatmul.mubr.bf16.vlgmr.msra.gmra.mxu0 %v14050_v16  ;;  %v11142_v30 = vcombine.low %v972_v14, %v976_v15  ;;  %v10841_v14 = vcombine.high %v669_v5, %v673_v7  ;;  %v793_v15 = vld [vmem:[#allocation10 + $0x3e8] sm:$0xff] }
 0x132   : > { %v968_v26 = vld [vmem:[#allocation10 + $0x960] sm:$0xff]  ;;  %3087 = vmatmul.mubr.bf16.vlgmr.msra.gmra.mxu1 %v14053_v20  ;;  %3096 = vmatpush1.bf16.msra.mxu0 %v11150_v21  ;;  %v10960_v27 = vcombine.low %v789_v13, %v793_v15 }
 0x133   : > { %3137 = vmatpush1.bf16.msra.mxu1 %v10896_v22  ;;  %3097 = vmatprep.subr.bf16.mxu0 %v11143_v23  ;;  %v11135_v32 = vcombine.high %v964_v25, %v968_v26  ;;  %v956_v33 = vld [vmem:[#allocation10 + $0x900] sm:$0xff]  ;;  %v11134_v38 = vcombine.low %v964_v25, %v968_v26  ;;  %v781_v23 = vld [vmem:[#allocation10 + $0x388] sm:$0xff] }
 0x134   : > { %v960_v34 = vld [vmem:[#allocation10 + $0x920] sm:$0xff]  ;;  %3138 = vmatprep.subr.bf16.mxu1 %v10889_v24  ;;  %3127 = vmatprep.mubr.bf16.mxu0 %v14055_v28  ;;  %v10961_v24 = vcombine.high %v789_v13, %v793_v15  ;;  %v785_v25 = vld [vmem:[#allocation10 + $0x3a8] sm:$0xff] }
 0x135   : > { %3168 = vmatprep.mubr.bf16.mxu1 %v14042_v58  ;;  %v11127_v40 = vcombine.high %v956_v33, %v960_v34  ;;  %v948_v41 = vld [vmem:[#allocation10 + $0x8c0] sm:$0xff]  ;;  %v11126_v46 = vcombine.low %v956_v33, %v960_v34  ;;  %v10953_v33 = vcombine.high %v781_v23, %v785_v25  ;;  %v777_v34 = vld [vmem:[#allocation10 + $0x368] sm:$0xff] }
 0x136   : > { %3098 = vmatpush1.bf16.msra.mxu0 %v11142_v30  ;;  %v952_v42 = vld [vmem:[#allocation10 + $0x8e0] sm:$0xff] }
 0x137   : > { %3139 = vmatpush1.bf16.msra.mxu1 %v10888_v31  ;;  %3099 = vmatprep.subr.bf16.mxu0 %v11135_v32  ;;  %v11119_v48 = vcombine.high %v948_v41, %v952_v42  ;;  %v940_v49 = vld [vmem:[#allocation10 + $0x880] sm:$0xff]  ;;  %v11118_v54 = vcombine.low %v948_v41, %v952_v42  ;;  %v773_v32 = vld [vmem:[#allocation10 + $0x348] sm:$0xff] }
 0x138   : > { %3140 = vmatprep.subr.bf16.mxu1 %v10881_v36  ;;  %v944_v50 = vld [vmem:[#allocation10 + $0x8a0] sm:$0xff]  ;;  %v10952_v36 = vcombine.low %v781_v23, %v785_v25  ;;  %v10945_v41 = vcombine.high %v773_v32, %v777_v34  ;;  %v769_v42 = vld [vmem:[#allocation10 + $0x328] sm:$0xff] }
 0x139   : > { %v11111_v56 = vcombine.high %v940_v49, %v944_v50  ;;  %v932_v57 = vld [vmem:[#allocation10 + $0x840] sm:$0xff]  ;;  %v11110_v0 = vcombine.low %v940_v49, %v944_v50  ;;  %v761_v50 = vld [vmem:[#allocation10 + $0x2e8] sm:$0xff] }
 0x13a   : > { %3100 = vmatpush1.bf16.msra.mxu0 %v11134_v38  ;;  %v936_v60 = vld [vmem:[#allocation10 + $0x860] sm:$0xff]  ;;  %v985_v23 = vld [vmem:[#allocation10 + $0x9e8] sm:$0xff] }
 0x13b   : > { %3141 = vmatpush1.bf16.msra.mxu1 %v10880_v39  ;;  %3101 = vmatprep.subr.bf16.mxu0 %v11127_v40  ;;  %v11103_v2 = vcombine.high %v932_v57, %v936_v60  ;;  %v924_v3 = vld [vmem:[#allocation10 + $0x800] sm:$0xff]  ;;  %v11102_v8 = vcombine.low %v932_v57, %v936_v60  ;;  %v765_v40 = vld [vmem:[#allocation10 + $0x308] sm:$0xff] }
 0x13c   : > { %3142 = vmatprep.subr.bf16.mxu1 %v10873_v44  ;;  %v928_v4 = vld [vmem:[#allocation10 + $0x820] sm:$0xff]  ;;  %v10944_v44 = vcombine.low %v773_v32, %v777_v34  ;;  %v10937_v49 = vcombine.high %v765_v40, %v769_v42  ;;  %v753_v60 = vld [vmem:[#allocation10 + $0x2a8] sm:$0xff] }
 0x13d   : > { %v11095_v10 = vcombine.high %v924_v3, %v928_v4  ;;  %v1044_v11 = vld [vmem:[#allocation10 + $0xbc0] sm:$0xff]  ;;  %v11094_v17 = vcombine.low %v924_v3, %v928_v4  ;;  %v745_v4 = vld [vmem:[#allocation10 + $0x268] sm:$0xff] }
 0x13e   : > { %3102 = vmatpush1.bf16.msra.mxu0 %v11126_v46  ;;  %v1048_v12 = vld [vmem:[#allocation10 + $0xbe0] sm:$0xff]  ;;  %v977_v32 = vld [vmem:[#allocation10 + $0x9a8] sm:$0xff] }
 0x13f   : > { %3143 = vmatpush1.bf16.msra.mxu1 %v10872_v47  ;;  %3103 = vmatprep.subr.bf16.mxu0 %v11119_v48  ;;  %v11215_v19 = vcombine.high %v1044_v11, %v1048_v12  ;;  %v1036_v21 = vld [vmem:[#allocation10 + $0xb80] sm:$0xff]  ;;  %v11214_v26 = vcombine.low %v1044_v11, %v1048_v12  ;;  %v757_v48 = vld [vmem:[#allocation10 + $0x2c8] sm:$0xff] }
 0x140   : > { %3144 = vmatprep.subr.bf16.mxu1 %v10865_v52  ;;  %v1040_v22 = vld [vmem:[#allocation10 + $0xba0] sm:$0xff]  ;;  %v10936_v52 = vcombine.low %v765_v40, %v769_v42  ;;  %v10929_v57 = vcombine.high %v757_v48, %v761_v50  ;;  %v737_v12 = vld [vmem:[#allocation10 + $0x228] sm:$0xff] }
 0x141   : > { %v11207_v29 = vcombine.high %v1036_v21, %v1040_v22  ;;  %v1028_v30 = vld [vmem:[#allocation10 + $0xb40] sm:$0xff]  ;;  %v11206_v35 = vcombine.low %v1036_v21, %v1040_v22  ;;  %v965_v40 = vld [vmem:[#allocation10 + $0x948] sm:$0xff] }
 0x142   : > { %3104 = vmatpush1.bf16.msra.mxu0 %v11118_v54  ;;  %v1032_v31 = vld [vmem:[#allocation10 + $0xb60] sm:$0xff] }
 0x143   : > { %3145 = vmatpush1.bf16.msra.mxu1 %v10864_v55  ;;  %3105 = vmatprep.subr.bf16.mxu0 %v11111_v56  ;;  %v11199_v37 = vcombine.high %v1028_v30, %v1032_v31  ;;  %v1020_v38 = vld [vmem:[#allocation10 + $0xb00] sm:$0xff]  ;;  %v11198_v43 = vcombine.low %v1028_v30, %v1032_v31  ;;  %v749_v56 = vld [vmem:[#allocation10 + $0x288] sm:$0xff] }
 0x144   : > { %3146 = vmatprep.subr.bf16.mxu1 %v10857_v62  ;;  %v1024_v39 = vld [vmem:[#allocation10 + $0xb20] sm:$0xff]  ;;  %v10928_v62 = vcombine.low %v757_v48, %v761_v50  ;;  %v10921_v3 = vcombine.high %v749_v56, %v753_v60  ;;  %v973_v30 = vld [vmem:[#allocation10 + $0x988] sm:$0xff] }
 0x145   : > { %v11191_v45 = vcombine.high %v1020_v38, %v1024_v39  ;;  %v1012_v46 = vld [vmem:[#allocation10 + $0xac0] sm:$0xff]  ;;  %v11190_v51 = vcombine.low %v1020_v38, %v1024_v39  ;;  %v837_v38 = vld [vmem:[#allocation10 + $0x548] sm:$0xff] }
 0x146   : > { %3106 = vmatpush1.bf16.msra.mxu0 %v11110_v0  ;;  %v1016_v47 = vld [vmem:[#allocation10 + $0xae0] sm:$0xff]  ;;  %v841_v39 = vld [vmem:[#allocation10 + $0x568] sm:$0xff] }
 0x147   : > { %3147 = vmatpush1.bf16.msra.mxu1 %v10856_v1  ;;  %3107 = vmatprep.subr.bf16.mxu0 %v11103_v2  ;;  %v11183_v53 = vcombine.high %v1012_v46, %v1016_v47  ;;  %v1004_v54 = vld [vmem:[#allocation10 + $0xa80] sm:$0xff]  ;;  %v11182_v61 = vcombine.low %v1012_v46, %v1016_v47  ;;  %v741_v2 = vld [vmem:[#allocation10 + $0x248] sm:$0xff]  ;;  %v11008_v50 = vcombine.low %v837_v38, %v841_v39 }
 0x148   : > { %3148 = vmatprep.subr.bf16.mxu1 %v10849_v6  ;;  %v1008_v55 = vld [vmem:[#allocation10 + $0xaa0] sm:$0xff]  ;;  %v10920_v6 = vcombine.low %v749_v56, %v753_v60  ;;  %v10913_v11 = vcombine.high %v741_v2, %v745_v4  ;;  %v833_v46 = vld [vmem:[#allocation10 + $0x528] sm:$0xff] }
 0x149   : > { %v11175_v63 = vcombine.high %v1004_v54, %v1008_v55  ;;  %v996_v0 = vld [vmem:[#allocation10 + $0xa40] sm:$0xff]  ;;  %v11174_v5 = vcombine.low %v1004_v54, %v1008_v55  ;;  %v957_v47 = vld [vmem:[#allocation10 + $0x908] sm:$0xff] }
 0x14a   : > { %3108 = vmatpush1.bf16.msra.mxu0 %v11102_v8  ;;  %v1000_v1 = vld [vmem:[#allocation10 + $0xa60] sm:$0xff]  ;;  %v825_v54 = vld [vmem:[#allocation10 + $0x4e8] sm:$0xff] }
 0x14b   : > { %3149 = vmatpush1.bf16.msra.mxu1 %v10848_v9  ;;  %3109 = vmatprep.subr.bf16.mxu0 %v11095_v10  ;;  %v11167_v7 = vcombine.high %v996_v0, %v1000_v1  ;;  %v988_v8 = vld [vmem:[#allocation10 + $0xa00] sm:$0xff]  ;;  %v733_v10 = vld [vmem:[#allocation10 + $0x208] sm:$0xff]  ;;  %v11166_v13 = vcombine.low %v996_v0, %v1000_v1 }
 0x14c   : > { %3150 = vmatprep.subr.bf16.mxu1 %v10841_v14  ;;  %v992_v9 = vld [vmem:[#allocation10 + $0xa20] sm:$0xff]  ;;  %v10912_v14 = vcombine.low %v741_v2, %v745_v4  ;;  %v10905_v21 = vcombine.high %v733_v10, %v737_v12  ;;  %v10904_v25 = vcombine.low %v733_v10, %v737_v12  ;;  %v949_v55 = vld [vmem:[#allocation10 + $0x8c8] sm:$0xff] }
 0x14d   : > { %v11159_v15 = vcombine.high %v988_v8, %v992_v9  ;;  %v660_v22 = vld [vmem:[%s14005_s23 + $0x20] sm:$0xff]  ;;  %s13508_s23 = scalar_lea.vmem %s13507_s10, 32 }
 0x14e   : > { %3110 = vmatpush1.bf16.msra.mxu0 %v11094_v17  ;;  %v853_v17 = vld [vmem:[#allocation10 + $0x5c8] sm:$0xff]  ;;  %p13510_p5 = scmp.lt.s32.totalorder %s13508_s23, %s13502_s12 }
 0x14f   : > { %3151 = vmatpush1.bf16.msra.mxu1 %v10840_v18  ;;  %3111 = vmatprep.subr.bf16.mxu0 %v11215_v19  ;;  %v857_v18 = vld [vmem:[#allocation10 + $0x5e8] sm:$0xff] }
 0x150   : > { %3152 = vmatprep.subr.bf16.mxu1 %v10961_v24  ;;  %v981_v19 = vld [vmem:[#allocation10 + $0x9c8] sm:$0xff]  ;;  %v11158_v24 = vcombine.low %v988_v8, %v992_v9  ;;  %v11024_v34 = vcombine.low %v853_v17, %v857_v18  ;;  %p13511_p10 = por %p13510_p5, %p13509_p8 }
 0x151   : > { %v11153_v31 = vcombine.high %v981_v19, %v985_v23  ;;  %v817_v0 = vld [vmem:[#allocation10 + $0x4a8] sm:$0xff] }
 0x152   : > { %3112 = vmatpush2.bf16.msra.mxu0 %v11214_v26  ;;  %v11025_v26 = vcombine.high %v853_v17, %v857_v18  ;;  %v941_v1 = vld [vmem:[#allocation10 + $0x888] sm:$0xff]  ;;  %p13512_p4 = pnand %p13511_p10, %p13505_p7 }
 0x153   : > { %3153 = vmatpush2.bf16.msra.mxu1 %v10960_v27  ;;  %3113 = vmatprep.subr.bf16.mxu0 %v11207_v29  ;;  %v845_v27 = vld [vmem:[#allocation10 + $0x588] sm:$0xff] }
 0x154   : > { %3154 = vmatprep.subr.bf16.mxu1 %v10953_v33  ;;  %v849_v29 = vld [vmem:[#allocation10 + $0x5a8] sm:$0xff]  ;;  %v14062_v33 = vpack.c.bf16 %v660_v22, %v660_v22 }
 0x155   : > { %v11016_v42 = vcombine.low %v845_v27, %v849_v29  ;;  %v809_v8 = vld [vmem:[#allocation10 + $0x468] sm:$0xff] }
 0x156   : > { %3114 = vmatpush2.bf16.msra.mxu0 %v11206_v35  ;;  %v11152_v35 = vcombine.low %v981_v19, %v985_v23  ;;  %v933_v9 = vld [vmem:[#allocation10 + $0x848] sm:$0xff] }
 0x157   : > { %3155 = vmatpush2.bf16.msra.mxu1 %v10952_v36  ;;  %3115 = vmatprep.subr.bf16.mxu0 %v11199_v37  ;;  %v11017_v36 = vcombine.high %v845_v27, %v849_v29  ;;  %v11145_v37 = vcombine.high %v973_v30, %v977_v32  ;;  %v801_v17 = vld [vmem:[#allocation10 + $0x428] sm:$0xff] }
 0x158   : > { %3156 = vmatprep.subr.bf16.mxu1 %v10945_v41  ;;  %v969_v41 = vld [vmem:[#allocation10 + $0x968] sm:$0xff] }
 0x159   : > { %v11137_v48 = vcombine.high %v965_v40, %v969_v41  ;;  %v925_v18 = vld [vmem:[#allocation10 + $0x808] sm:$0xff] }
 0x15a   : > { %3116 = vmatpush2.bf16.msra.mxu0 %v11198_v43  ;;  %v11144_v43 = vcombine.low %v973_v30, %v977_v32  ;;  %v1045_v27 = vld [vmem:[#allocation10 + $0xbc8] sm:$0xff] }
 0x15b   : > { %3157 = vmatpush2.bf16.msra.mxu1 %v10944_v44  ;;  %3117 = vmatprep.subr.bf16.mxu0 %v11191_v45  ;;  %v11009_v44 = vcombine.high %v837_v38, %v841_v39  ;;  %v829_v45 = vld [vmem:[#allocation10 + $0x508] sm:$0xff] }
 0x15c   : > { %3158 = vmatprep.subr.bf16.mxu1 %v10937_v49  ;;  %v961_v49 = vld [vmem:[#allocation10 + $0x928] sm:$0xff]  ;;  %v11000_v60 = vcombine.low %v829_v45, %v833_v46 }
 0x15d   : > { %v11129_v56 = vcombine.high %v957_v47, %v961_v49  ;;  %v1049_v30 = vld [vmem:[#allocation10 + $0xbe8] sm:$0xff] }
 0x15e   : > { %3118 = vmatpush2.bf16.msra.mxu0 %v11190_v51  ;;  %v11136_v51 = vcombine.low %v965_v40, %v969_v41  ;;  %v11217_v38 = vcombine.high %v1045_v27, %v1049_v30  ;;  %v1041_v39 = vld [vmem:[#allocation10 + $0xba8] sm:$0xff]  ;;  %v11216_v41 = vcombine.low %v1045_v27, %v1049_v30 }
 0x15f   : > { %3159 = vmatpush2.bf16.msra.mxu1 %v10936_v52  ;;  %3119 = vmatprep.subr.bf16.mxu0 %v11183_v53  ;;  %v11001_v52 = vcombine.high %v829_v45, %v833_v46  ;;  %v821_v53 = vld [vmem:[#allocation10 + $0x4c8] sm:$0xff] }
 0x160   : > { %3160 = vmatprep.subr.bf16.mxu1 %v10929_v57  ;;  %v953_v57 = vld [vmem:[#allocation10 + $0x8e8] sm:$0xff]  ;;  %v10992_v4 = vcombine.low %v821_v53, %v825_v54 }
 0x161   : > { %v11121_v2 = vcombine.high %v949_v55, %v953_v57  ;;  %v1029_v45 = vld [vmem:[#allocation10 + $0xb48] sm:$0xff] }
 0x162   : > { %3120 = vmatpush2.bf16.msra.mxu0 %v11182_v61  ;;  %v11128_v61 = vcombine.low %v957_v47, %v961_v49  ;;  %v1033_v47 = vld [vmem:[#allocation10 + $0xb68] sm:$0xff] }
 0x163   : > { %3161 = vmatpush2.bf16.msra.mxu1 %v10928_v62  ;;  %3121 = vmatprep.subr.bf16.mxu0 %v11175_v63  ;;  %v10993_v62 = vcombine.high %v821_v53, %v825_v54  ;;  %v813_v63 = vld [vmem:[#allocation10 + $0x488] sm:$0xff]  ;;  %v11201_v54 = vcombine.high %v1029_v45, %v1033_v47 }
 0x164   : > { %3162 = vmatprep.subr.bf16.mxu1 %v10921_v3  ;;  %v945_v3 = vld [vmem:[#allocation10 + $0x8a8] sm:$0xff]  ;;  %v10984_v12 = vcombine.low %v813_v63, %v817_v0 }
 0x165   : > { %v11113_v10 = vcombine.high %v941_v1, %v945_v3  ;;  %v1021_v53 = vld [vmem:[#allocation10 + $0xb08] sm:$0xff] }
 0x166   : > { %3122 = vmatpush2.bf16.msra.mxu0 %v11174_v5  ;;  %v11120_v5 = vcombine.low %v949_v55, %v953_v57  ;;  %v1025_v55 = vld [vmem:[#allocation10 + $0xb28] sm:$0xff]  ;;  %v11200_v57 = vcombine.low %v1029_v45, %v1033_v47  ;;  %v850_v45 = vld [vmem:[#allocation10 + $0x5b0] sm:$0xff] }
 0x167   : > { %3163 = vmatpush2.bf16.msra.mxu1 %v10920_v6  ;;  %3123 = vmatprep.subr.bf16.mxu0 %v11167_v7  ;;  %v10985_v6 = vcombine.high %v813_v63, %v817_v0  ;;  %v805_v7 = vld [vmem:[#allocation10 + $0x448] sm:$0xff]  ;;  %v11193_v0 = vcombine.high %v1021_v53, %v1025_v55 }
 0x168   : > { %3164 = vmatprep.subr.bf16.mxu1 %v10913_v11  ;;  %v937_v11 = vld [vmem:[#allocation10 + $0x868] sm:$0xff]  ;;  %v10976_v22 = vcombine.low %v805_v7, %v809_v8 }
 0x169   : > { %v11105_v19 = vcombine.high %v933_v9, %v937_v11  ;;  %v11104_v23 = vcombine.low %v933_v9, %v937_v11  ;;  %v1013_v63 = vld [vmem:[#allocation10 + $0xac8] sm:$0xff] }
 0x16a   : > { %3124 = vmatpush2.bf16.msra.mxu0 %v11166_v13  ;;  %v11112_v13 = vcombine.low %v941_v1, %v945_v3  ;;  %v1017_v1 = vld [vmem:[#allocation10 + $0xae8] sm:$0xff]  ;;  %v11192_v3 = vcombine.low %v1021_v53, %v1025_v55  ;;  %v842_v53 = vld [vmem:[#allocation10 + $0x570] sm:$0xff] }
 0x16b   : > { %3165 = vmatpush2.bf16.msra.mxu1 %v10912_v14  ;;  %3125 = vmatprep.subr.bf16.mxu0 %v11159_v15  ;;  %v10977_v14 = vcombine.high %v805_v7, %v809_v8  ;;  %v797_v15 = vld [vmem:[#allocation10 + $0x408] sm:$0xff]  ;;  %v11185_v8 = vcombine.high %v1013_v63, %v1017_v1  ;;  %v11184_v11 = vcombine.low %v1013_v63, %v1017_v1  ;;  %v834_v63 = vld [vmem:[#allocation10 + $0x530] sm:$0xff] }
 0x16c   : > { %3166 = vmatprep.subr.bf16.mxu1 %v10905_v21  ;;  %v929_v21 = vld [vmem:[#allocation10 + $0x828] sm:$0xff] }
 0x16d   : > { %v11097_v29 = vcombine.high %v925_v18, %v929_v21  ;;  %v11096_v32 = vcombine.low %v925_v18, %v929_v21  ;;  %v1005_v7 = vld [vmem:[#allocation10 + $0xa88] sm:$0xff] }
 0x16e   : > { %3126 = vmatpush2.bf16.msra.mxu0 %v11158_v24  ;;  %v10969_v24 = vcombine.high %v797_v15, %v801_v17  ;;  %v1009_v9 = vld [vmem:[#allocation10 + $0xaa8] sm:$0xff] }
 0x16f   : > { %3167 = vmatpush2.bf16.msra.mxu1 %v10904_v25  ;;  %3177 = vmatprep.subr.bf16.mxu0 %v11025_v26  ;;  %v917_v25 = vld [vmem:[#allocation10 + $0x7c8] sm:$0xff]  ;;  %v11176_v21 = vcombine.low %v1005_v7, %v1009_v9 }
 0x170   : > { %3218 = vmatprep.subr.bf16.mxu1 %v11153_v31  ;;  %v921_v26 = vld [vmem:[#allocation10 + $0x7e8] sm:$0xff]  ;;  %v10968_v31 = vcombine.low %v797_v15, %v801_v17  ;;  %v11177_v17 = vcombine.high %v1005_v7, %v1009_v9  ;;  %v826_v7 = vld [vmem:[#allocation10 + $0x4f0] sm:$0xff] }
 0x171   : > { %3128 = vmatmul.mubr.bf16.vlgmr.msra.gmra.mxu0 %v14062_v33  ;;  %v11088_v40 = vcombine.low %v917_v25, %v921_v26  ;;  %v997_v15 = vld [vmem:[#allocation10 + $0xa48] sm:$0xff] }
 0x172   : > { %3169 = vmatmul.mubr.bf16.vlgmr.msra.gmra.mxu1 %v14050_v16  ;;  %3178 = vmatpush1.bf16.msra.mxu0 %v11024_v34  ;;  %v11089_v34 = vcombine.high %v917_v25, %v921_v26  ;;  %v1001_v18 = vld [vmem:[#allocation10 + $0xa68] sm:$0xff] }
 0x173   : > { %3219 = vmatpush1.bf16.msra.mxu1 %v11152_v35  ;;  %3179 = vmatprep.subr.bf16.mxu0 %v11017_v36  ;;  %v909_v35 = vld [vmem:[#allocation10 + $0x788] sm:$0xff]  ;;  %v11169_v26 = vcombine.high %v997_v15, %v1001_v18  ;;  %v11168_v30 = vcombine.low %v997_v15, %v1001_v18  ;;  %v818_v15 = vld [vmem:[#allocation10 + $0x4b0] sm:$0xff] }
 0x174   : > { %3220 = vmatprep.subr.bf16.mxu1 %v11145_v37  ;;  %3209 = vmatprep.mubr.bf16.mxu0 %v14044_v59  ;;  %v913_v36 = vld [vmem:[#allocation10 + $0x7a8] sm:$0xff] }
 0x175   : > { %3250 = vmatprep.mubr.bf16.mxu1 %v14055_v28  ;;  %v1037_v37 = vld [vmem:[#allocation10 + $0xb88] sm:$0xff] }
 0x176   : > { %3180 = vmatpush1.bf16.msra.mxu0 %v11016_v42  ;;  %v11081_v42 = vcombine.high %v909_v35, %v913_v36  ;;  %v11209_v46 = vcombine.high %v1037_v37, %v1041_v39  ;;  %v11208_v49 = vcombine.low %v1037_v37, %v1041_v39  ;;  %v989_v25 = vld [vmem:[#allocation10 + $0xa08] sm:$0xff]  ;;  %v858_v37 = vld [vmem:[#allocation10 + $0x5f0] sm:$0xff] }
 0x177   : > { %3221 = vmatpush1.bf16.msra.mxu1 %v11144_v43  ;;  %3181 = vmatprep.subr.bf16.mxu0 %v11009_v44  ;;  %v901_v43 = vld [vmem:[#allocation10 + $0x748] sm:$0xff] }
 0x178   : > { %3222 = vmatprep.subr.bf16.mxu1 %v11137_v48  ;;  %v905_v44 = vld [vmem:[#allocation10 + $0x768] sm:$0xff]  ;;  %v11080_v48 = vcombine.low %v909_v35, %v913_v36  ;;  %v854_v35 = vld [vmem:[#allocation10 + $0x5d0] sm:$0xff] }
 0x179   : > { %v993_v27 = vld [vmem:[#allocation10 + $0xa28] sm:$0xff]  ;;  %v11026_v47 = vcombine.low %v854_v35, %v858_v37 }
 0x17a   : > { %3182 = vmatpush1.bf16.msra.mxu0 %v11008_v50  ;;  %v11073_v50 = vcombine.high %v901_v43, %v905_v44  ;;  %v11161_v36 = vcombine.high %v989_v25, %v993_v27  ;;  %v11160_v39 = vcombine.low %v989_v25, %v993_v27  ;;  %v810_v25 = vld [vmem:[#allocation10 + $0x470] sm:$0xff] }
 0x17b   : > { %3223 = vmatpush1.bf16.msra.mxu1 %v11136_v51  ;;  %3183 = vmatprep.subr.bf16.mxu0 %v11001_v52  ;;  %v893_v51 = vld [vmem:[#allocation10 + $0x708] sm:$0xff] }
 0x17c   : > { %3224 = vmatprep.subr.bf16.mxu1 %v11129_v56  ;;  %v897_v52 = vld [vmem:[#allocation10 + $0x728] sm:$0xff]  ;;  %v11072_v56 = vcombine.low %v901_v43, %v905_v44  ;;  %v722_v43 = vld [vmem:[#allocation10 + $0x1b0] sm:$0xff] }
 0x17d   : > { %v846_v44 = vld [vmem:[#allocation10 + $0x590] sm:$0xff] }
 0x17e   : > { %3184 = vmatpush1.bf16.msra.mxu0 %v11000_v60  ;;  %v11065_v60 = vcombine.high %v893_v51, %v897_v52  ;;  %v11018_v55 = vcombine.low %v846_v44, %v850_v45 }
 0x17f   : > { %3225 = vmatpush1.bf16.msra.mxu1 %v11128_v61  ;;  %3185 = vmatprep.subr.bf16.mxu0 %v10993_v62  ;;  %v885_v61 = vld [vmem:[#allocation10 + $0x6c8] sm:$0xff] }
 0x180   : > { %3226 = vmatprep.subr.bf16.mxu1 %v11121_v2  ;;  %v889_v62 = vld [vmem:[#allocation10 + $0x6e8] sm:$0xff]  ;;  %v11064_v2 = vcombine.low %v893_v51, %v897_v52  ;;  %v714_v51 = vld [vmem:[#allocation10 + $0x170] sm:$0xff] }
 0x181   : > { %v838_v52 = vld [vmem:[#allocation10 + $0x550] sm:$0xff] }
 0x182   : > { %3186 = vmatpush1.bf16.msra.mxu0 %v10992_v4  ;;  %v11057_v4 = vcombine.high %v885_v61, %v889_v62  ;;  %v11010_v1 = vcombine.low %v838_v52, %v842_v53 }
 0x183   : > { %3227 = vmatpush1.bf16.msra.mxu1 %v11120_v5  ;;  %3187 = vmatprep.subr.bf16.mxu0 %v10985_v6  ;;  %v877_v5 = vld [vmem:[#allocation10 + $0x688] sm:$0xff] }
 0x184   : > { %3228 = vmatprep.subr.bf16.mxu1 %v11113_v10  ;;  %v881_v6 = vld [vmem:[#allocation10 + $0x6a8] sm:$0xff]  ;;  %v11056_v10 = vcombine.low %v885_v61, %v889_v62  ;;  %v706_v61 = vld [vmem:[#allocation10 + $0x130] sm:$0xff] }
 0x185   : > { %v830_v62 = vld [vmem:[#allocation10 + $0x510] sm:$0xff] }
 0x186   : > { %3188 = vmatpush1.bf16.msra.mxu0 %v10984_v12  ;;  %v11049_v12 = vcombine.high %v877_v5, %v881_v6  ;;  %v11002_v9 = vcombine.low %v830_v62, %v834_v63 }
 0x187   : > { %3229 = vmatpush1.bf16.msra.mxu1 %v11112_v13  ;;  %3189 = vmatprep.subr.bf16.mxu0 %v10977_v14  ;;  %v869_v13 = vld [vmem:[#allocation10 + $0x648] sm:$0xff] }
 0x188   : > { %3230 = vmatprep.subr.bf16.mxu1 %v11105_v19  ;;  %v873_v14 = vld [vmem:[#allocation10 + $0x668] sm:$0xff]  ;;  %v11048_v19 = vcombine.low %v877_v5, %v881_v6  ;;  %v698_v5 = vld [vmem:[#allocation10 + $0xf0] sm:$0xff] }
 0x189   : > { %v822_v6 = vld [vmem:[#allocation10 + $0x4d0] sm:$0xff] }
 0x18a   : > { %3190 = vmatpush1.bf16.msra.mxu0 %v10976_v22  ;;  %v11041_v22 = vcombine.high %v869_v13, %v873_v14  ;;  %v10994_v18 = vcombine.low %v822_v6, %v826_v7 }
 0x18b   : > { %3231 = vmatpush1.bf16.msra.mxu1 %v11104_v23  ;;  %3191 = vmatprep.subr.bf16.mxu0 %v10969_v24  ;;  %v861_v23 = vld [vmem:[#allocation10 + $0x608] sm:$0xff] }
 0x18c   : > { %3232 = vmatprep.subr.bf16.mxu1 %v11097_v29  ;;  %v865_v24 = vld [vmem:[#allocation10 + $0x628] sm:$0xff]  ;;  %v11040_v29 = vcombine.low %v869_v13, %v873_v14  ;;  %v690_v13 = vld [vmem:[#allocation10 + $0xb0] sm:$0xff] }
 0x18d   : > { %v814_v14 = vld [vmem:[#allocation10 + $0x490] sm:$0xff] }
 0x18e   : > { %3192 = vmatpush1.bf16.msra.mxu0 %v10968_v31  ;;  %v11033_v31 = vcombine.high %v861_v23, %v865_v24  ;;  %v10986_v27 = vcombine.low %v814_v14, %v818_v15 }
 0x18f   : > { %3233 = vmatpush1.bf16.msra.mxu1 %v11096_v32  ;;  %3193 = vmatprep.subr.bf16.mxu0 %v11089_v34  ;;  %v726_v32 = vld [vmem:[#allocation10 + $0x1d0] sm:$0xff] }
 0x190   : > { %3234 = vmatprep.subr.bf16.mxu1 %v11217_v38  ;;  %v730_v34 = vld [vmem:[#allocation10 + $0x1f0] sm:$0xff]  ;;  %v11032_v38 = vcombine.low %v861_v23, %v865_v24 }
 0x191   : > { %v682_v23 = vld [vmem:[#allocation10 + $0x70] sm:$0xff] }
 0x192   : > { %3194 = vmatpush2.bf16.msra.mxu0 %v11088_v40  ;;  %v10899_v40 = vcombine.high %v726_v32, %v730_v34  ;;  %v806_v24 = vld [vmem:[#allocation10 + $0x450] sm:$0xff] }
 0x193   : > { %3235 = vmatpush2.bf16.msra.mxu1 %v11216_v41  ;;  %3195 = vmatprep.subr.bf16.mxu0 %v11081_v42  ;;  %v11027_v41 = vcombine.high %v854_v35, %v858_v37  ;;  %v718_v42 = vld [vmem:[#allocation10 + $0x190] sm:$0xff]  ;;  %v10978_v37 = vcombine.low %v806_v24, %v810_v25 }
 0x194   : > { %3236 = vmatprep.subr.bf16.mxu1 %v11209_v46  ;;  %v10898_v46 = vcombine.low %v726_v32, %v730_v34  ;;  %v674_v32 = vld [vmem:[#allocation10 + $0x30] sm:$0xff] }
 0x195   : > { %v798_v34 = vld [vmem:[#allocation10 + $0x410] sm:$0xff] }
 0x196   : > { %3196 = vmatpush2.bf16.msra.mxu0 %v11080_v48  ;;  %v10891_v48 = vcombine.high %v718_v42, %v722_v43  ;;  %v802_v35 = vld [vmem:[#allocation10 + $0x430] sm:$0xff] }
 0x197   : > { %3237 = vmatpush2.bf16.msra.mxu1 %v11208_v49  ;;  %3197 = vmatprep.subr.bf16.mxu0 %v11073_v50  ;;  %v11019_v49 = vcombine.high %v846_v44, %v850_v45  ;;  %v710_v50 = vld [vmem:[#allocation10 + $0x150] sm:$0xff]  ;;  %v10970_v45 = vcombine.low %v798_v34, %v802_v35 }
 0x198   : > { %3238 = vmatprep.subr.bf16.mxu1 %v11201_v54  ;;  %v10890_v54 = vcombine.low %v718_v42, %v722_v43  ;;  %v918_v42 = vld [vmem:[#allocation10 + $0x7d0] sm:$0xff] }
 0x199   : > { %v922_v43 = vld [vmem:[#allocation10 + $0x7f0] sm:$0xff] }
 0x19a   : > { %3198 = vmatpush2.bf16.msra.mxu0 %v11072_v56  ;;  %v10883_v56 = vcombine.high %v710_v50, %v714_v51 }
 0x19b   : > { %3239 = vmatpush2.bf16.msra.mxu1 %v11200_v57  ;;  %3199 = vmatprep.subr.bf16.mxu0 %v11065_v60  ;;  %v11011_v57 = vcombine.high %v838_v52, %v842_v53  ;;  %v702_v60 = vld [vmem:[#allocation10 + $0x110] sm:$0xff]  ;;  %v11090_v53 = vcombine.low %v918_v42, %v922_v43 }
 0x19c   : > { %3240 = vmatprep.subr.bf16.mxu1 %v11193_v0  ;;  %v10882_v0 = vcombine.low %v710_v50, %v714_v51  ;;  %v910_v50 = vld [vmem:[#allocation10 + $0x790] sm:$0xff] }
 0x19d   : > { %v914_v51 = vld [vmem:[#allocation10 + $0x7b0] sm:$0xff] }
 0x19e   : > { %3200 = vmatpush2.bf16.msra.mxu0 %v11064_v2  ;;  %v10875_v2 = vcombine.high %v702_v60, %v706_v61 }
 0x19f   : > { %3241 = vmatpush2.bf16.msra.mxu1 %v11192_v3  ;;  %3201 = vmatprep.subr.bf16.mxu0 %v11057_v4  ;;  %v11003_v3 = vcombine.high %v830_v62, %v834_v63  ;;  %v694_v4 = vld [vmem:[#allocation10 + $0xd0] sm:$0xff]  ;;  %v11082_v63 = vcombine.low %v910_v50, %v914_v51 }
 0x1a0   : > { %3242 = vmatprep.subr.bf16.mxu1 %v11185_v8  ;;  %v10874_v8 = vcombine.low %v702_v60, %v706_v61  ;;  %v902_v60 = vld [vmem:[#allocation10 + $0x750] sm:$0xff] }
 0x1a1   : > { %v906_v61 = vld [vmem:[#allocation10 + $0x770] sm:$0xff] }
 0x1a2   : > { %3202 = vmatpush2.bf16.msra.mxu0 %v11056_v10  ;;  %v10867_v10 = vcombine.high %v694_v4, %v698_v5 }
 0x1a3   : > { %3243 = vmatpush2.bf16.msra.mxu1 %v11184_v11  ;;  %3203 = vmatprep.subr.bf16.mxu0 %v11049_v12  ;;  %v10995_v11 = vcombine.high %v822_v6, %v826_v7  ;;  %v686_v12 = vld [vmem:[#allocation10 + $0x90] sm:$0xff]  ;;  %v11074_v7 = vcombine.low %v902_v60, %v906_v61 }
 0x1a4   : > { %3244 = vmatprep.subr.bf16.mxu1 %v11177_v17  ;;  %v10866_v17 = vcombine.low %v694_v4, %v698_v5  ;;  %v894_v4 = vld [vmem:[#allocation10 + $0x710] sm:$0xff] }
 0x1a5   : > { %v898_v5 = vld [vmem:[#allocation10 + $0x730] sm:$0xff] }
 0x1a6   : > { %3204 = vmatpush2.bf16.msra.mxu0 %v11048_v19  ;;  %v10859_v19 = vcombine.high %v686_v12, %v690_v13 }
 0x1a7   : > { %3245 = vmatpush2.bf16.msra.mxu1 %v11176_v21  ;;  %3205 = vmatprep.subr.bf16.mxu0 %v11041_v22  ;;  %v10987_v21 = vcombine.high %v814_v14, %v818_v15  ;;  %v678_v22 = vld [vmem:[#allocation10 + $0x50] sm:$0xff]  ;;  %v11066_v15 = vcombine.low %v894_v4, %v898_v5 }
 0x1a8   : > { %3246 = vmatprep.subr.bf16.mxu1 %v11169_v26  ;;  %v10858_v26 = vcombine.low %v686_v12, %v690_v13  ;;  %v886_v12 = vld [vmem:[#allocation10 + $0x6d0] sm:$0xff] }
 0x1a9   : > { %v890_v13 = vld [vmem:[#allocation10 + $0x6f0] sm:$0xff] }
 0x1aa   : > { %3206 = vmatpush2.bf16.msra.mxu0 %v11040_v29  ;;  %v10851_v29 = vcombine.high %v678_v22, %v682_v23 }
 0x1ab   : > { %3247 = vmatpush2.bf16.msra.mxu1 %v11168_v30  ;;  %3207 = vmatprep.subr.bf16.mxu0 %v11033_v31  ;;  %v10979_v30 = vcombine.high %v806_v24, %v810_v25  ;;  %v670_v31 = vld [vmem:[#allocation10 + $0x10] sm:$0xff]  ;;  %v11058_v25 = vcombine.low %v886_v12, %v890_v13 }
 0x1ac   : > { %3248 = vmatprep.subr.bf16.mxu1 %v11161_v36  ;;  %v10850_v36 = vcombine.low %v678_v22, %v682_v23  ;;  %v10842_v44 = vcombine.low %v670_v31, %v674_v32  ;;  %v878_v22 = vld [vmem:[#allocation10 + $0x690] sm:$0xff] }
 0x1ad   : > { %v882_v23 = vld [vmem:[#allocation10 + $0x6b0] sm:$0xff] }
 0x1ae   : > { %3208 = vmatpush2.bf16.msra.mxu0 %v11032_v38  ;;  %v10843_v38 = vcombine.high %v670_v31, %v674_v32  ;;  %v870_v31 = vld [vmem:[#allocation10 + $0x650] sm:$0xff] }
 0x1af   : > { %3249 = vmatpush2.bf16.msra.mxu1 %v11160_v39  ;;  %3259 = vmatprep.subr.bf16.mxu0 %v10899_v40  ;;  %v10971_v39 = vcombine.high %v798_v34, %v802_v35  ;;  %v790_v40 = vld [vmem:[#allocation10 + $0x3d0] sm:$0xff]  ;;  %v16052_v35 = vlaneseq }
 0x1b0   : > { %3300 = vmatprep.subr.bf16.mxu1 %v11027_v41  ;;  %v794_v41 = vld [vmem:[#allocation10 + $0x3f0] sm:$0xff] }
 0x1b1   : > { %3210 = vmatmul.mubr.bf16.vlgmr.msra.gmra.mxu0 %v14053_v20  ;;  %v10962_v52 = vcombine.low %v790_v40, %v794_v41  ;;  %v874_v32 = vld [vmem:[#allocation10 + $0x670] sm:$0xff] }
 0x1b2   : > { %3251 = vmatmul.mubr.bf16.vlgmr.msra.gmra.mxu1 %v14062_v33  ;;  %3260 = vmatpush1.bf16.msra.mxu0 %v10898_v46  ;;  %v10963_v46 = vcombine.high %v790_v40, %v794_v41  ;;  %v738_v40 = vld [vmem:[#allocation10 + $0x230] sm:$0xff] }
 0x1b3   : > { %3301 = vmatpush1.bf16.msra.mxu1 %v11026_v47  ;;  %3261 = vmatprep.subr.bf16.mxu0 %v10891_v48  ;;  %v11091_v47 = vcombine.high %v918_v42, %v922_v43  ;;  %v782_v48 = vld [vmem:[#allocation10 + $0x390] sm:$0xff] }
 0x1b4   : > { %3302 = vmatprep.subr.bf16.mxu1 %v11019_v49  ;;  %3291 = vmatprep.mubr.bf16.mxu0 %v14042_v58  ;;  %v786_v49 = vld [vmem:[#allocation10 + $0x3b0] sm:$0xff] }
 0x1b5   : > { %3332 = vmatprep.mubr.bf16.mxu1 %v14044_v59  ;;  %v10954_v62 = vcombine.low %v782_v48, %v786_v49  ;;  %v862_v41 = vld [vmem:[#allocation10 + $0x610] sm:$0xff] }
 0x1b6   : > { %3262 = vmatpush1.bf16.msra.mxu0 %v10890_v54  ;;  %v10955_v54 = vcombine.high %v782_v48, %v786_v49  ;;  %v866_v42 = vld [vmem:[#allocation10 + $0x630] sm:$0xff] }
 0x1b7   : > { %3303 = vmatpush1.bf16.msra.mxu1 %v11018_v55  ;;  %3263 = vmatprep.subr.bf16.mxu0 %v10883_v56  ;;  %v11083_v55 = vcombine.high %v910_v50, %v914_v51  ;;  %v774_v56 = vld [vmem:[#allocation10 + $0x350] sm:$0xff]  ;;  %v727_v50 = vld [vmem:[#allocation10 + $0x1d8] sm:$0xff] }
 0x1b8   : > { %3304 = vmatprep.subr.bf16.mxu1 %v11011_v57  ;;  %v778_v57 = vld [vmem:[#allocation10 + $0x370] sm:$0xff]  ;;  %v731_v51 = vld [vmem:[#allocation10 + $0x1f8] sm:$0xff] }
 0x1b9   : > { %v10946_v6 = vcombine.low %v774_v56, %v778_v57  ;;  %v982_v48 = vld [vmem:[#allocation10 + $0x9d0] sm:$0xff] }
 0x1ba   : > { %3264 = vmatpush1.bf16.msra.mxu0 %v10882_v0  ;;  %v10947_v0 = vcombine.high %v774_v56, %v778_v57  ;;  %v986_v49 = vld [vmem:[#allocation10 + $0x9f0] sm:$0xff]  ;;  %v10901_v57 = vcombine.high %v727_v50, %v731_v51 }
 0x1bb   : > { %3305 = vmatpush1.bf16.msra.mxu1 %v11010_v1  ;;  %3265 = vmatprep.subr.bf16.mxu0 %v10875_v2  ;;  %v11075_v1 = vcombine.high %v902_v60, %v906_v61  ;;  %v766_v2 = vld [vmem:[#allocation10 + $0x310] sm:$0xff]  ;;  %v11155_v56 = vcombine.high %v982_v48, %v986_v49 }
 0x1bc   : > { %3306 = vmatprep.subr.bf16.mxu1 %v11003_v3  ;;  %v770_v3 = vld [vmem:[#allocation10 + $0x330] sm:$0xff] }
 0x1bd   : > { %v10938_v14 = vcombine.low %v766_v2, %v770_v3  ;;  %v974_v61 = vld [vmem:[#allocation10 + $0x990] sm:$0xff] }
 0x1be   : > { %3266 = vmatpush1.bf16.msra.mxu0 %v10874_v8  ;;  %v10939_v8 = vcombine.high %v766_v2, %v770_v3  ;;  %v11154_v2 = vcombine.low %v982_v48, %v986_v49  ;;  %v10900_v3 = vcombine.low %v727_v50, %v731_v51  ;;  %v942_v48 = vld [vmem:[#allocation10 + $0x890] sm:$0xff]  ;;  %v687_v50 = vld [vmem:[#allocation10 + $0x98] sm:$0xff] }
 0x1bf   : > { %3307 = vmatpush1.bf16.msra.mxu1 %v11002_v9  ;;  %3267 = vmatprep.subr.bf16.mxu0 %v10867_v10  ;;  %v11067_v9 = vcombine.high %v894_v4, %v898_v5  ;;  %v758_v10 = vld [vmem:[#allocation10 + $0x2d0] sm:$0xff]  ;;  %v691_v51 = vld [vmem:[#allocation10 + $0xb8] sm:$0xff] }
 0x1c0   : > { %3308 = vmatprep.subr.bf16.mxu1 %v10995_v11  ;;  %v762_v11 = vld [vmem:[#allocation10 + $0x2f0] sm:$0xff] }
 0x1c1   : > { %v10930_v24 = vcombine.low %v758_v10, %v762_v11  ;;  %v946_v49 = vld [vmem:[#allocation10 + $0x8b0] sm:$0xff] }
 0x1c2   : > { %3268 = vmatpush1.bf16.msra.mxu0 %v10866_v17  ;;  %v10931_v17 = vcombine.high %v758_v10, %v762_v11  ;;  %v711_v10 = vld [vmem:[#allocation10 + $0x158] sm:$0xff] }
 0x1c3   : > { %3309 = vmatpush1.bf16.msra.mxu1 %v10994_v18  ;;  %3269 = vmatprep.subr.bf16.mxu0 %v10859_v19  ;;  %v11059_v18 = vcombine.high %v886_v12, %v890_v13  ;;  %v750_v19 = vld [vmem:[#allocation10 + $0x290] sm:$0xff]  ;;  %v715_v11 = vld [vmem:[#allocation10 + $0x178] sm:$0xff] }
 0x1c4   : > { %3310 = vmatprep.subr.bf16.mxu1 %v10987_v21  ;;  %v754_v21 = vld [vmem:[#allocation10 + $0x2b0] sm:$0xff] }
 0x1c5   : > { %v10922_v34 = vcombine.low %v750_v19, %v754_v21 }
 0x1c6   : > { %3270 = vmatpush1.bf16.msra.mxu0 %v10858_v26  ;;  %v10923_v26 = vcombine.high %v750_v19, %v754_v21 }
 0x1c7   : > { %3311 = vmatpush1.bf16.msra.mxu1 %v10986_v27  ;;  %3271 = vmatprep.subr.bf16.mxu0 %v10851_v29  ;;  %v11051_v27 = vcombine.high %v878_v22, %v882_v23  ;;  %v742_v29 = vld [vmem:[#allocation10 + $0x250] sm:$0xff] }
 0x1c8   : > { %3312 = vmatprep.subr.bf16.mxu1 %v10979_v30  ;;  %v746_v30 = vld [vmem:[#allocation10 + $0x270] sm:$0xff] }
 0x1c9   : > { %v10914_v43 = vcombine.low %v742_v29, %v746_v30 }
 0x1ca   : > { %3272 = vmatpush1.bf16.msra.mxu0 %v10850_v36  ;;  %v11050_v36 = vcombine.low %v878_v22, %v882_v23  ;;  %v10885_v23 = vcombine.high %v711_v10, %v715_v11 }
 0x1cb   : > { %3313 = vmatpush1.bf16.msra.mxu1 %v10978_v37  ;;  %3273 = vmatprep.subr.bf16.mxu0 %v10843_v38  ;;  %v10915_v37 = vcombine.high %v742_v29, %v746_v30  ;;  %v11043_v38 = vcombine.high %v870_v31, %v874_v32  ;;  %v707_v29 = vld [vmem:[#allocation10 + $0x138] sm:$0xff] }
 0x1cc   : > { %3314 = vmatprep.subr.bf16.mxu1 %v10971_v39  ;;  %v734_v39 = vld [vmem:[#allocation10 + $0x210] sm:$0xff] }
 0x1ce   : > { %3274 = vmatpush1.bf16.msra.mxu0 %v10842_v44  ;;  %v14073_v44 = vshrl.u32 %v16052_v35, 7  ;;  %v14299_v35 = vld [vmem:[#allocation8 + $0x3c] ss:$24 sps:$4 sm:$0xff]  }
 0x1cf   : > { %3315 = vmatpush1.bf16.msra.mxu1 %v10970_v45  ;;  %3275 = vmatprep.subr.bf16.mxu0 %v10963_v46  ;;  %v11042_v45 = vcombine.low %v870_v31, %v874_v32  ;;  %v10907_v46 = vcombine.high %v734_v39, %v738_v40 }
 0x1d0   : > { %3316 = vmatprep.subr.bf16.mxu1 %v11091_v47  ;;  %16196 = vst [vmem:[#allocation40_spill] sm:$0xff] %v14073_v44  ;;  %v11035_v47 = vcombine.high %v862_v41, %v866_v42  ;;  %v14081_v60 = vsub.s32 1, %v14073_v44 }
 0x1d2   : > { %3276 = vmatpush2.bf16.msra.mxu0 %v10962_v52  ;;  %v10906_v52 = vcombine.low %v734_v39, %v738_v40  ;;  %16198 = vst [vmem:[#allocation42_spill] sm:$0xff] %v14081_v60  ;;  %v950_v40 = vld [vmem:[#allocation10 + $0x8d0] sm:$0xff] }
 0x1d3   : > { %3317 = vmatpush2.bf16.msra.mxu1 %v11090_v53  ;;  %3277 = vmatprep.subr.bf16.mxu0 %v10955_v54  ;;  %v14076_v53 = vsub.s32 0, %v14073_v44  ;;  %v11034_v54 = vcombine.low %v862_v41, %v866_v42  ;;  %v954_v41 = vld [vmem:[#allocation10 + $0x8f0] sm:$0xff]  ;;  %v695_v42 = vld [vmem:[#allocation10 + $0xd8] sm:$0xff] }
 0x1d4   : > { %3318 = vmatprep.subr.bf16.mxu1 %v11083_v55  ;;  %v14078_v55 = vld [vmem:[#allocation13] sm:$0xff] }
 0x1d5   : > { %16197 = vst [vmem:[#allocation41_spill] sm:$0xff] %v14076_v53  ;;  %v1060_v5 = vrot.slane %v14078_v55, %v14081_v60 }
 0x1d6   : > { %3278 = vmatpush2.bf16.msra.mxu0 %v10954_v62  ;;  %v978_v62 = vld [vmem:[#allocation10 + $0x9b0] sm:$0xff] }
 0x1d7   : > { %3319 = vmatpush2.bf16.msra.mxu1 %v11082_v63  ;;  %3279 = vmatprep.subr.bf16.mxu0 %v10947_v0  ;;  %v719_v63 = vld [vmem:[#allocation10 + $0x198] sm:$0xff]  ;;  %v11147_v4 = vcombine.high %v974_v61, %v978_v62 }
 0x1d8   : > { %3320 = vmatprep.subr.bf16.mxu1 %v11075_v1  ;;  %v723_v0 = vld [vmem:[#allocation10 + $0x1b8] sm:$0xff]  ;;  %v1056_v1 = vrot.slane %v14078_v55, %v14076_v53 }
 0x1da   : > { %3280 = vmatpush2.bf16.msra.mxu0 %v10946_v6  ;;  %v10893_v6 = vcombine.high %v719_v63, %v723_v0 }
 0x1db   : > { %3321 = vmatpush2.bf16.msra.mxu1 %v11074_v7  ;;  %3281 = vmatprep.subr.bf16.mxu0 %v10939_v8  ;;  %v966_v7 = vld [vmem:[#allocation10 + $0x950] sm:$0xff] }
 0x1dc   : > { %3322 = vmatprep.subr.bf16.mxu1 %v11067_v9  ;;  %v970_v8 = vld [vmem:[#allocation10 + $0x970] sm:$0xff] }
 0x1dd   : > { %v11138_v32 = vcombine.low %v966_v7, %v970_v8 }
 0x1de   : > { %3282 = vmatpush2.bf16.msra.mxu0 %v10938_v14  ;;  %v11146_v14 = vcombine.low %v974_v61, %v978_v62  ;;  %v934_v61 = vld [vmem:[#allocation10 + $0x850] sm:$0xff] }
 0x1df   : > { %3323 = vmatpush2.bf16.msra.mxu1 %v11066_v15  ;;  %3283 = vmatprep.subr.bf16.mxu0 %v10931_v17  ;;  %v10892_v17 = vcombine.low %v719_v63, %v723_v0  ;;  %v938_v62 = vld [vmem:[#allocation10 + $0x870] sm:$0xff]  ;;  %v679_v63 = vld [vmem:[#allocation10 + $0x58] sm:$0xff] }
 0x1e0   : > { %3324 = vmatprep.subr.bf16.mxu1 %v11059_v18  ;;  %v11139_v18 = vcombine.high %v966_v7, %v970_v8  ;;  %v683_v0 = vld [vmem:[#allocation10 + $0x78] sm:$0xff] }
 0x1e1   : > { %v671_v7 = vld [vmem:[#allocation10 + $0x18] sm:$0xff] }
 0x1e2   : > { %3284 = vmatpush2.bf16.msra.mxu0 %v10930_v24  ;;  %v958_v24 = vld [vmem:[#allocation10 + $0x910] sm:$0xff]  ;;  %v675_v8 = vld [vmem:[#allocation10 + $0x38] sm:$0xff] }
 0x1e3   : > { %3325 = vmatpush2.bf16.msra.mxu1 %v11058_v25  ;;  %3285 = vmatprep.subr.bf16.mxu0 %v10923_v26  ;;  %v962_v25 = vld [vmem:[#allocation10 + $0x930] sm:$0xff] }
 0x1e4   : > { %3326 = vmatprep.subr.bf16.mxu1 %v11051_v27  ;;  %v703_v27 = vld [vmem:[#allocation10 + $0x118] sm:$0xff] }
 0x1e5   : > { %v10877_v39 = vcombine.high %v703_v27, %v707_v29 }
 0x1e6   : > { %3286 = vmatpush2.bf16.msra.mxu0 %v10922_v34 }
 0x1e7   : > { %3327 = vmatpush2.bf16.msra.mxu1 %v11050_v36  ;;  %3287 = vmatprep.subr.bf16.mxu0 %v10915_v37  ;;  %v10884_v36 = vcombine.low %v711_v10, %v715_v11  ;;  %v11131_v37 = vcombine.high %v958_v24, %v962_v25  ;;  %v10852_v10 = vcombine.low %v679_v63, %v683_v0 }
 0x1e8   : > { %3328 = vmatprep.subr.bf16.mxu1 %v11043_v38 }
 0x1ea   : > { %3288 = vmatpush2.bf16.msra.mxu0 %v10914_v43  ;;  %v699_v43 = vld [vmem:[#allocation10 + $0xf8] sm:$0xff] }
 0x1eb   : > { %3329 = vmatpush2.bf16.msra.mxu1 %v11042_v45  ;;  %3289 = vmatprep.subr.bf16.mxu0 %v10907_v46  ;;  %v11130_v45 = vcombine.low %v958_v24, %v962_v25  ;;  %v11123_v46 = vcombine.high %v950_v40, %v954_v41  ;;  %v1038_v24 = vld [vmem:[#allocation10 + $0xb90] sm:$0xff] }
 0x1ec   : > { %3330 = vmatprep.subr.bf16.mxu1 %v11035_v47  ;;  %v10869_v47 = vcombine.high %v695_v42, %v699_v43  ;;  %v1042_v25 = vld [vmem:[#allocation10 + $0xbb0] sm:$0xff] }
 0x1ee   : > { %3290 = vmatpush2.bf16.msra.mxu0 %v10906_v52  ;;  %v11122_v52 = vcombine.low %v950_v40, %v954_v41  ;;  %v11210_v40 = vcombine.low %v1038_v24, %v1042_v25 }
 0x1ef   : > { %3331 = vmatpush2.bf16.msra.mxu1 %v11034_v54  ;;  %3341 = vmatprep.subr.bf16.mxu0 %v11155_v56  ;;  %v10868_v54 = vcombine.low %v695_v42, %v699_v43  ;;  %v11115_v56 = vcombine.high %v942_v48, %v946_v49 }
 0x1f0   : > { %3382 = vmatprep.subr.bf16.mxu1 %v10901_v57  ;;  %v10861_v57 = vcombine.high %v687_v50, %v691_v51 }
 0x1f1   : > { %v3047_v9 = vpop.f32.mrf.mxu0  ;;  %3292 = vmatmul.mubr.bf16.vlgmr.msra.gmra.mxu0 %v14050_v16 }
 0x1f2   : > { %v3048_v12 = vadd.f32 %v3047_v9, %v1056_v1  ;;  %v3088_v13 = vpop.f32.mrf.mxu1  ;;  %3333 = vmatmul.mubr.bf16.vlgmr.msra.gmra.mxu1 %v14053_v20  ;;  %3342 = vmatpush1.bf16.msra.mxu0 %v11154_v2  ;;  %v11114_v1 = vcombine.low %v942_v48, %v946_v49  ;;  %v10860_v2 = vcombine.low %v687_v50, %v691_v51 }
 0x1f3   : > { %3383 = vmatpush1.bf16.msra.mxu1 %v10900_v3  ;;  %v3049_v15 = vpop.f32.mrf.mxu0  ;;  %3343 = vmatprep.subr.bf16.mxu0 %v11147_v4  ;;  %v11107_v3 = vcombine.high %v934_v61, %v938_v62  ;;  %v10853_v4 = vcombine.high %v679_v63, %v683_v0  ;;  %v11106_v9 = vcombine.low %v934_v61, %v938_v62 }
 0x1f4   : > { %v14089_v19 = vadd.f32 %v3088_v13, %v3048_v12  ;;  %v3050_v21 = vadd.f32 %v3049_v15, %v1060_v5  ;;  %v3090_v22 = vpop.f32.mrf.mxu1  ;;  %3384 = vmatprep.subr.bf16.mxu1 %v10893_v6  ;;  %3373 = vmatprep.mubr.bf16.mxu0 %v14055_v28  ;;  %v926_v5 = vld [vmem:[#allocation10 + $0x810] sm:$0xff]  ;;  %v10845_v12 = vcombine.high %v671_v7, %v675_v8  ;;  %v791_v15 = vld [vmem:[#allocation10 + $0x3d8] sm:$0xff] }
 0x1f5   : > { %v3051_v26 = vpop.f32.mrf.mxu0  ;;  %3414 = vmatprep.mubr.bf16.mxu1 %v14042_v58  ;;  %v10876_v58 = vcombine.low %v703_v27, %v707_v29  ;;  %v930_v6 = vld [vmem:[#allocation10 + $0x830] sm:$0xff]  ;;  %v787_v27 = vld [vmem:[#allocation10 + $0x3b8] sm:$0xff] }
 0x1f6   : > { %v14093_v30 = vadd.f32 %v3090_v22, %v3050_v21  ;;  %v3092_v31 = vpop.f32.mrf.mxu1  ;;  %3344 = vmatpush1.bf16.msra.mxu0 %v11146_v14  ;;  %v11099_v11 = vcombine.high %v926_v5, %v930_v6  ;;  %v1046_v13 = vld [vmem:[#allocation10 + $0xbd0] sm:$0xff]  ;;  %v10844_v21 = vcombine.low %v671_v7, %v675_v8  ;;  %v783_v26 = vld [vmem:[#allocation10 + $0x398] sm:$0xff] }
 0x1f7   : > { %3385 = vmatpush1.bf16.msra.mxu1 %v10892_v17  ;;  %v3052_v34 = vpop.f32.mrf.mxu0  ;;  %3345 = vmatprep.subr.bf16.mxu0 %v11139_v18  ;;  %v1050_v14 = vld [vmem:[#allocation10 + $0xbf0] sm:$0xff]  ;;  %v795_v17 = vld [vmem:[#allocation10 + $0x3f8] sm:$0xff]  ;;  %v11098_v18 = vcombine.low %v926_v5, %v930_v6  ;;  %v10956_v41 = vcombine.low %v783_v26, %v787_v27 }
 0x1f8   : > { %v3093_v38 = vpop.f32.mrf.mxu1  ;;  %3386 = vmatprep.subr.bf16.mxu1 %v10885_v23  ;;  %v11219_v22 = vcombine.high %v1046_v13, %v1050_v14  ;;  %v10965_v23 = vcombine.high %v791_v15, %v795_v17  ;;  %v11218_v29 = vcombine.low %v1046_v13, %v1050_v14  ;;  %v10964_v31 = vcombine.low %v791_v15, %v795_v17 }
 0x1f9   : > { %v10957_v34 = vcombine.high %v783_v26, %v787_v27  ;;  %v775_v38 = vld [vmem:[#allocation10 + $0x358] sm:$0xff] }
 0x1fa   : > { %3346 = vmatpush1.bf16.msra.mxu0 %v11138_v32  ;;  %v11211_v32 = vcombine.high %v1038_v24, %v1042_v25 }
 0x1fb   : > { %3387 = vmatpush1.bf16.msra.mxu1 %v10884_v36  ;;  %3347 = vmatprep.subr.bf16.mxu0 %v11131_v37  ;;  %v1030_v36 = vld [vmem:[#allocation10 + $0xb50] sm:$0xff] }
 0x1fc   : > { %3388 = vmatprep.subr.bf16.mxu1 %v10877_v39  ;;  %v1034_v37 = vld [vmem:[#allocation10 + $0xb70] sm:$0xff]  ;;  %v779_v39 = vld [vmem:[#allocation10 + $0x378] sm:$0xff] }
 0x1fd   : > { %v11203_v42 = vcombine.high %v1030_v36, %v1034_v37  ;;  %v10949_v43 = vcombine.high %v775_v38, %v779_v39  ;;  %v11202_v48 = vcombine.low %v1030_v36, %v1034_v37  ;;  %v10948_v49 = vcombine.low %v775_v38, %v779_v39 }
 0x1fe   : > { %3348 = vmatpush1.bf16.msra.mxu0 %v11130_v45  ;;  %v1022_v45 = vld [vmem:[#allocation10 + $0xb10] sm:$0xff] }
 0x1ff   : > { %3389 = vmatpush1.bf16.msra.mxu1 %v10876_v58  ;;  %3349 = vmatprep.subr.bf16.mxu0 %v11123_v46  ;;  %v1026_v58 = vld [vmem:[#allocation10 + $0xb30] sm:$0xff]  ;;  %v767_v46 = vld [vmem:[#allocation10 + $0x318] sm:$0xff] }
 0x200   : > { %3390 = vmatprep.subr.bf16.mxu1 %v10869_v47  ;;  %v771_v47 = vld [vmem:[#allocation10 + $0x338] sm:$0xff]  ;;  %v11195_v50 = vcombine.high %v1022_v45, %v1026_v58  ;;  %v11194_v61 = vcombine.low %v1022_v45, %v1026_v58 }
 0x201   : > { %v10941_v51 = vcombine.high %v767_v46, %v771_v47  ;;  %v10940_v62 = vcombine.low %v767_v46, %v771_v47 }
 0x202   : > { %3350 = vmatpush1.bf16.msra.mxu0 %v11122_v52  ;;  %v1014_v52 = vld [vmem:[#allocation10 + $0xad0] sm:$0xff] }
 0x203   : > { %3391 = vmatpush1.bf16.msra.mxu1 %v10868_v54  ;;  %3351 = vmatprep.subr.bf16.mxu0 %v11115_v56  ;;  %v1018_v54 = vld [vmem:[#allocation10 + $0xaf0] sm:$0xff]  ;;  %v759_v56 = vld [vmem:[#allocation10 + $0x2d8] sm:$0xff] }
 0x204   : > { %3392 = vmatprep.subr.bf16.mxu1 %v10861_v57  ;;  %v763_v57 = vld [vmem:[#allocation10 + $0x2f8] sm:$0xff]  ;;  %v11187_v63 = vcombine.high %v1014_v52, %v1018_v54  ;;  %v11186_v5 = vcombine.low %v1014_v52, %v1018_v54 }
 0x205   : > { %v10933_v0 = vcombine.high %v759_v56, %v763_v57  ;;  %v10932_v6 = vcombine.low %v759_v56, %v763_v57  ;;  %v971_v52 = vld [vmem:[#allocation10 + $0x978] sm:$0xff] }
 0x206   : > { %3352 = vmatpush1.bf16.msra.mxu0 %v11114_v1  ;;  %v1006_v1 = vld [vmem:[#allocation10 + $0xa90] sm:$0xff] }
 0x207   : > { %3393 = vmatpush1.bf16.msra.mxu1 %v10860_v2  ;;  %3353 = vmatprep.subr.bf16.mxu0 %v11107_v3  ;;  %v1010_v2 = vld [vmem:[#allocation10 + $0xab0] sm:$0xff]  ;;  %v751_v3 = vld [vmem:[#allocation10 + $0x298] sm:$0xff] }
 0x208   : > { %3394 = vmatprep.subr.bf16.mxu1 %v10853_v4  ;;  %v755_v4 = vld [vmem:[#allocation10 + $0x2b8] sm:$0xff]  ;;  %v11179_v7 = vcombine.high %v1006_v1, %v1010_v2  ;;  %v11178_v13 = vcombine.low %v1006_v1, %v1010_v2 }
 0x209   : > { %v10925_v8 = vcombine.high %v751_v3, %v755_v4  ;;  %v10924_v14 = vcombine.low %v751_v3, %v755_v4  ;;  %v835_v3 = vld [vmem:[#allocation10 + $0x538] sm:$0xff] }
 0x20a   : > { %3354 = vmatpush1.bf16.msra.mxu0 %v11106_v9  ;;  %v998_v9 = vld [vmem:[#allocation10 + $0xa50] sm:$0xff] }
 0x20b   : > { %3395 = vmatpush1.bf16.msra.mxu1 %v10852_v10  ;;  %3355 = vmatprep.subr.bf16.mxu0 %v11099_v11  ;;  %v1002_v10 = vld [vmem:[#allocation10 + $0xa70] sm:$0xff]  ;;  %v743_v11 = vld [vmem:[#allocation10 + $0x258] sm:$0xff] }
 0x20c   : > { %3396 = vmatprep.subr.bf16.mxu1 %v10845_v12  ;;  %v747_v12 = vld [vmem:[#allocation10 + $0x278] sm:$0xff]  ;;  %v11171_v15 = vcombine.high %v998_v9, %v1002_v10  ;;  %v11170_v24 = vcombine.low %v998_v9, %v1002_v10 }
 0x20d   : > { %v10917_v17 = vcombine.high %v743_v11, %v747_v12  ;;  %v10916_v25 = vcombine.low %v743_v11, %v747_v12  ;;  %v823_v12 = vld [vmem:[#allocation10 + $0x4d8] sm:$0xff] }
 0x20e   : > { %3356 = vmatpush1.bf16.msra.mxu0 %v11098_v18  ;;  %v990_v18 = vld [vmem:[#allocation10 + $0xa10] sm:$0xff] }
 0x20f   : > { %3397 = vmatpush1.bf16.msra.mxu1 %v10844_v21  ;;  %3357 = vmatprep.subr.bf16.mxu0 %v11219_v22  ;;  %v994_v21 = vld [vmem:[#allocation10 + $0xa30] sm:$0xff]  ;;  %v735_v22 = vld [vmem:[#allocation10 + $0x218] sm:$0xff] }
 0x210   : > { %3398 = vmatprep.subr.bf16.mxu1 %v10965_v23  ;;  %v739_v23 = vld [vmem:[#allocation10 + $0x238] sm:$0xff]  ;;  %v11163_v26 = vcombine.high %v990_v18, %v994_v21  ;;  %v11162_v36 = vcombine.low %v990_v18, %v994_v21 }
 0x211   : > { %v10909_v27 = vcombine.high %v735_v22, %v739_v23  ;;  %v10908_v37 = vcombine.low %v735_v22, %v739_v23  ;;  %v815_v21 = vld [vmem:[#allocation10 + $0x498] sm:$0xff] }
 0x212   : > { %3358 = vmatpush2.bf16.msra.mxu0 %v11218_v29  ;;  %v855_v29 = vld [vmem:[#allocation10 + $0x5d8] sm:$0xff] }
 0x213   : > { %3399 = vmatpush2.bf16.msra.mxu1 %v10964_v31  ;;  %3359 = vmatprep.subr.bf16.mxu0 %v11211_v32  ;;  %v859_v31 = vld [vmem:[#allocation10 + $0x5f8] sm:$0xff] }
 0x214   : > { %3400 = vmatprep.subr.bf16.mxu1 %v10957_v34  ;;  %v983_v32 = vld [vmem:[#allocation10 + $0x9d8] sm:$0xff]  ;;  %v11029_v38 = vcombine.high %v855_v29, %v859_v31  ;;  %v11028_v45 = vcombine.low %v855_v29, %v859_v31 }
 0x215   : > { %v987_v34 = vld [vmem:[#allocation10 + $0x9f8] sm:$0xff] }
 0x216   : > { %3360 = vmatpush2.bf16.msra.mxu0 %v11210_v40  ;;  %v11157_v39 = vcombine.high %v983_v32, %v987_v34  ;;  %v847_v40 = vld [vmem:[#allocation10 + $0x598] sm:$0xff]  ;;  %v11156_v58 = vcombine.low %v983_v32, %v987_v34 }
 0x217   : > { %3401 = vmatpush2.bf16.msra.mxu1 %v10956_v41  ;;  %3361 = vmatprep.subr.bf16.mxu0 %v11203_v42  ;;  %v851_v41 = vld [vmem:[#allocation10 + $0x5b8] sm:$0xff] }
 0x218   : > { %3402 = vmatprep.subr.bf16.mxu1 %v10949_v43  ;;  %v975_v42 = vld [vmem:[#allocation10 + $0x998] sm:$0xff]  ;;  %v11021_v46 = vcombine.high %v847_v40, %v851_v41  ;;  %v11020_v57 = vcombine.low %v847_v40, %v851_v41 }
 0x219   : > { %v979_v43 = vld [vmem:[#allocation10 + $0x9b8] sm:$0xff] }
 0x21a   : > { %3362 = vmatpush2.bf16.msra.mxu0 %v11202_v48  ;;  %v11149_v47 = vcombine.high %v975_v42, %v979_v43  ;;  %v839_v48 = vld [vmem:[#allocation10 + $0x558] sm:$0xff] }
 0x21b   : > { %3403 = vmatpush2.bf16.msra.mxu1 %v10948_v49  ;;  %3363 = vmatprep.subr.bf16.mxu0 %v11195_v50  ;;  %v843_v49 = vld [vmem:[#allocation10 + $0x578] sm:$0xff] }
 0x21c   : > { %3404 = vmatprep.subr.bf16.mxu1 %v10941_v51  ;;  %v967_v51 = vld [vmem:[#allocation10 + $0x958] sm:$0xff] }
 0x21d   : > { %v11141_v2 = vcombine.high %v967_v51, %v971_v52  ;;  %v819_v22 = vld [vmem:[#allocation10 + $0x4b8] sm:$0xff] }
 0x21e   : > { %3364 = vmatpush2.bf16.msra.mxu0 %v11194_v61  ;;  %v943_v23 = vld [vmem:[#allocation10 + $0x898] sm:$0xff] }
 0x21f   : > { %3405 = vmatpush2.bf16.msra.mxu1 %v10940_v62  ;;  %3365 = vmatprep.subr.bf16.mxu0 %v11187_v63  ;;  %v11148_v62 = vcombine.low %v975_v42, %v979_v43  ;;  %v11013_v63 = vcombine.high %v839_v48, %v843_v49  ;;  %v807_v31 = vld [vmem:[#allocation10 + $0x458] sm:$0xff] }
 0x220   : > { %3406 = vmatprep.subr.bf16.mxu1 %v10933_v0  ;;  %v811_v32 = vld [vmem:[#allocation10 + $0x478] sm:$0xff] }
 0x221   : > { %v935_v34 = vld [vmem:[#allocation10 + $0x858] sm:$0xff] }
 0x222   : > { %3366 = vmatpush2.bf16.msra.mxu0 %v11186_v5  ;;  %v963_v5 = vld [vmem:[#allocation10 + $0x938] sm:$0xff] }
 0x223   : > { %3407 = vmatpush2.bf16.msra.mxu1 %v10932_v6  ;;  %3367 = vmatprep.subr.bf16.mxu0 %v11179_v7  ;;  %v11012_v7 = vcombine.low %v839_v48, %v843_v49  ;;  %v799_v41 = vld [vmem:[#allocation10 + $0x418] sm:$0xff] }
 0x224   : > { %3408 = vmatprep.subr.bf16.mxu1 %v10925_v8  ;;  %v803_v42 = vld [vmem:[#allocation10 + $0x438] sm:$0xff] }
 0x225   : > { %v927_v43 = vld [vmem:[#allocation10 + $0x818] sm:$0xff] }
 0x226   : > { %3368 = vmatpush2.bf16.msra.mxu0 %v11178_v13  ;;  %v827_v13 = vld [vmem:[#allocation10 + $0x4f8] sm:$0xff] }
 0x227   : > { %3409 = vmatpush2.bf16.msra.mxu1 %v10924_v14  ;;  %3369 = vmatprep.subr.bf16.mxu0 %v11171_v15  ;;  %v951_v14 = vld [vmem:[#allocation10 + $0x8d8] sm:$0xff] }
 0x228   : > { %3410 = vmatprep.subr.bf16.mxu1 %v10917_v17  ;;  %v10997_v17 = vcombine.high %v823_v12, %v827_v13  ;;  %v919_v49 = vld [vmem:[#allocation10 + $0x7d8] sm:$0xff] }
 0x22a   : > { %3370 = vmatpush2.bf16.msra.mxu0 %v11170_v24  ;;  %v947_v24 = vld [vmem:[#allocation10 + $0x8b8] sm:$0xff] }
 0x22b   : > { %3411 = vmatpush2.bf16.msra.mxu1 %v10916_v25  ;;  %3371 = vmatprep.subr.bf16.mxu0 %v11163_v26  ;;  %v10996_v25 = vcombine.low %v823_v12, %v827_v13  ;;  %v11117_v29 = vcombine.high %v943_v23, %v947_v24 }
 0x22c   : > { %3412 = vmatprep.subr.bf16.mxu1 %v10909_v27  ;;  %v10989_v27 = vcombine.high %v815_v21, %v819_v22 }
 0x22e   : > { %3372 = vmatpush2.bf16.msra.mxu0 %v11162_v36  ;;  %v939_v36 = vld [vmem:[#allocation10 + $0x878] sm:$0xff] }
 0x22f   : > { %3413 = vmatpush2.bf16.msra.mxu1 %v10908_v37  ;;  %3423 = vmatprep.subr.bf16.mxu0 %v11029_v38  ;;  %v10988_v37 = vcombine.low %v815_v21, %v819_v22  ;;  %v11116_v38 = vcombine.low %v943_v23, %v947_v24  ;;  %v11109_v40 = vcombine.high %v935_v34, %v939_v36  ;;  %v887_v24 = vld [vmem:[#allocation10 + $0x6d8] sm:$0xff] }
 0x230   : > { %3464 = vmatprep.subr.bf16.mxu1 %v11157_v39  ;;  %v10981_v39 = vcombine.high %v807_v31, %v811_v32 }
 0x231   : > { %v3129_v50 = vpop.f32.mrf.mxu0  ;;  %3374 = vmatmul.mubr.bf16.vlgmr.msra.gmra.mxu0 %v14062_v33 }
 0x232   : > { %v14097_v54 = vadd.f32 %v3129_v50, %v14089_v19  ;;  %v14099_v56 = vpop.f32.mrf.mxu1  ;;  %3415 = vmatmul.mubr.bf16.vlgmr.msra.gmra.mxu1 %v14050_v16  ;;  %3424 = vmatpush1.bf16.msra.mxu0 %v11028_v45  ;;  %v831_v19 = vld [vmem:[#allocation10 + $0x518] sm:$0xff] }
 0x233   : > { %3465 = vmatpush1.bf16.msra.mxu1 %v11156_v58  ;;  %v3131_v61 = vpop.f32.mrf.mxu0  ;;  %3425 = vmatprep.subr.bf16.mxu0 %v11021_v46  ;;  %v959_v16 = vld [vmem:[#allocation10 + $0x918] sm:$0xff]  ;;  %v11005_v9 = vcombine.high %v831_v19, %v835_v3  ;;  %v11004_v15 = vcombine.low %v831_v19, %v835_v3  ;;  %v10980_v58 = vcombine.low %v807_v31, %v811_v32 }
 0x234   : > { %16199 = vst [vmem:[#allocation43_spill] sm:$0xff] %v14097_v54  ;;  %v14103_v0 = vadd.f32 %v3131_v61, %v14093_v30  ;;  %v14105_v1 = vpop.f32.mrf.mxu1  ;;  %3466 = vmatprep.subr.bf16.mxu1 %v11149_v47  ;;  %3455 = vmatprep.mubr.bf16.mxu0 %v14044_v59  ;;  %v11140_v30 = vcombine.low %v967_v51, %v971_v52  ;;  %v955_v59 = vld [vmem:[#allocation10 + $0x8f8] sm:$0xff]  ;;  %v3967_v54 = vld [vmem:[#allocation11 + $0xb50] sm:$0xff] }
 0x235   : > { %v3133_v4 = vpop.f32.mrf.mxu0  ;;  %3496 = vmatprep.mubr.bf16.mxu1 %v14055_v28  ;;  %v11133_v11 = vcombine.high %v959_v16, %v963_v5  ;;  %v11132_v28 = vcombine.low %v959_v16, %v963_v5  ;;  %v11125_v18 = vcombine.high %v951_v14, %v955_v59  ;;  %v11124_v26 = vcombine.low %v951_v14, %v955_v59  ;;  %v931_v45 = vld [vmem:[#allocation10 + $0x838] sm:$0xff] }
 0x236   : > { %16200 = vst [vmem:[#allocation44_spill] sm:$0xff] %v14103_v0  ;;  %v3174_v6 = vpop.f32.mrf.mxu1  ;;  %3426 = vmatpush1.bf16.msra.mxu0 %v11020_v57  ;;  %v11108_v46 = vcombine.low %v935_v34, %v939_v36  ;;  %v10973_v47 = vcombine.high %v799_v41, %v803_v42  ;;  %v11101_v48 = vcombine.high %v927_v43, %v931_v45  ;;  %v923_v50 = vld [vmem:[#allocation10 + $0x7f8] sm:$0xff] }
 0x237   : > { %3467 = vmatpush1.bf16.msra.mxu1 %v11148_v62  ;;  %v3134_v8 = vpop.f32.mrf.mxu0  ;;  %3427 = vmatprep.subr.bf16.mxu0 %v11013_v63  ;;  %v1047_v51 = vld [vmem:[#allocation10 + $0xbd8] sm:$0xff]  ;;  %v10972_v57 = vcombine.low %v799_v41, %v803_v42  ;;  %v11100_v61 = vcombine.low %v927_v43, %v931_v45  ;;  %v11093_v62 = vcombine.high %v919_v49, %v923_v50 }
 0x238   : > { %v3175_v10 = vpop.f32.mrf.mxu1  ;;  %3468 = vmatprep.subr.bf16.mxu1 %v11141_v2  ;;  %v1051_v52 = vld [vmem:[#allocation10 + $0xbf8] sm:$0xff]  ;;  %v11092_v16 = vcombine.low %v919_v49, %v923_v50 }
 0x239   : > { %v11221_v63 = vcombine.high %v1047_v51, %v1051_v52  ;;  %v911_v2 = vld [vmem:[#allocation10 + $0x798] sm:$0xff]  ;;  %v11220_v5 = vcombine.low %v1047_v51, %v1051_v52 }
 0x23a   : > { %3428 = vmatpush1.bf16.msra.mxu0 %v11012_v7  ;;  %v915_v19 = vld [vmem:[#allocation10 + $0x7b8] sm:$0xff] }
 0x23b   : > { %3469 = vmatpush1.bf16.msra.mxu1 %v11140_v30  ;;  %3429 = vmatprep.subr.bf16.mxu0 %v11005_v9  ;;  %v1039_v3 = vld [vmem:[#allocation10 + $0xb98] sm:$0xff]  ;;  %v11085_v6 = vcombine.high %v911_v2, %v915_v19 }
 0x23c   : > { %3470 = vmatprep.subr.bf16.mxu1 %v11133_v11  ;;  %v1043_v4 = vld [vmem:[#allocation10 + $0xbb8] sm:$0xff]  ;;  %v11084_v11 = vcombine.low %v911_v2, %v915_v19 }
 0x23d   : > { %v11213_v7 = vcombine.high %v1039_v3, %v1043_v4  ;;  %v903_v8 = vld [vmem:[#allocation10 + $0x758] sm:$0xff]  ;;  %v11212_v12 = vcombine.low %v1039_v3, %v1043_v4  ;;  %v14110_v3 = vsub.s32 2, %v14073_v44 }
 0x23e   : > { %3430 = vmatpush1.bf16.msra.mxu0 %v11004_v15  ;;  %v907_v30 = vld [vmem:[#allocation10 + $0x778] sm:$0xff] }
 0x23f   : > { %3471 = vmatpush1.bf16.msra.mxu1 %v11132_v28  ;;  %3431 = vmatprep.subr.bf16.mxu0 %v10997_v17  ;;  %v1031_v9 = vld [vmem:[#allocation10 + $0xb58] sm:$0xff]  ;;  %v11077_v13 = vcombine.high %v903_v8, %v907_v30  ;;  %16201 = vst [vmem:[#allocation45_spill] sm:$0xff] %v14110_v3 }
 0x240   : > { %3472 = vmatprep.subr.bf16.mxu1 %v11125_v18  ;;  %v1035_v10 = vld [vmem:[#allocation10 + $0xb78] sm:$0xff]  ;;  %v11076_v18 = vcombine.low %v903_v8, %v907_v30  ;;  %v14113_v8 = vsub.s32 3, %v14073_v44 }
 0x241   : > { %v11205_v14 = vcombine.high %v1031_v9, %v1035_v10  ;;  %v895_v59 = vld [vmem:[#allocation10 + $0x718] sm:$0xff]  ;;  %v11204_v21 = vcombine.low %v1031_v9, %v1035_v10 }
 0x242   : > { %3432 = vmatpush1.bf16.msra.mxu0 %v10996_v25  ;;  %v899_v15 = vld [vmem:[#allocation10 + $0x738] sm:$0xff]  ;;  %16202 = vst [vmem:[#allocation46_spill] sm:$0xff] %v14113_v8 }
 0x243   : > { %3473 = vmatpush1.bf16.msra.mxu1 %v11124_v26  ;;  %3433 = vmatprep.subr.bf16.mxu0 %v10989_v27  ;;  %v1023_v28 = vld [vmem:[#allocation10 + $0xb18] sm:$0xff]  ;;  %v11069_v22 = vcombine.high %v895_v59, %v899_v15 }
 0x244   : > { %3474 = vmatprep.subr.bf16.mxu1 %v11117_v29  ;;  %v1027_v17 = vld [vmem:[#allocation10 + $0xb38] sm:$0xff]  ;;  %v11068_v29 = vcombine.low %v895_v59, %v899_v15  ;;  %v3781_v59 = vld [vmem:[#allocation11 + $0x580] sm:$0xff] }
 0x245   : > { %v11197_v23 = vcombine.high %v1023_v28, %v1027_v17  ;;  %v891_v25 = vld [vmem:[#allocation10 + $0x6f8] sm:$0xff]  ;;  %v11196_v31 = vcombine.low %v1023_v28, %v1027_v17  ;;  %v3785_v15 = vld [vmem:[#allocation11 + $0x5a0] sm:$0xff]  ;;  %v1068_v28 = vrot.slane %v14078_v55, %v14113_v8 }
 0x246   : > { %3434 = vmatpush1.bf16.msra.mxu0 %v10988_v37  ;;  %v1015_v26 = vld [vmem:[#allocation10 + $0xad8] sm:$0xff]  ;;  %v11061_v32 = vcombine.high %v887_v24, %v891_v25 }
 0x247   : > { %3475 = vmatpush1.bf16.msra.mxu1 %v11116_v38  ;;  %3435 = vmatprep.subr.bf16.mxu0 %v10981_v39  ;;  %v1019_v27 = vld [vmem:[#allocation10 + $0xaf8] sm:$0xff] }
 0x248   : > { %3476 = vmatprep.subr.bf16.mxu1 %v11109_v40  ;;  %v11189_v34 = vcombine.high %v1015_v26, %v1019_v27  ;;  %v879_v36 = vld [vmem:[#allocation10 + $0x698] sm:$0xff]  ;;  %v11060_v40 = vcombine.low %v887_v24, %v891_v25  ;;  %v11188_v41 = vcombine.low %v1015_v26, %v1019_v27  ;;  %v3645_v24 = vld [vmem:[#allocation11 + $0x140] sm:$0xff] }
 0x249   : > { %v883_v37 = vld [vmem:[#allocation10 + $0x6b8] sm:$0xff]  ;;  %v3649_v25 = vld [vmem:[#allocation11 + $0x160] sm:$0xff] }
 0x24a   : > { %3436 = vmatpush1.bf16.msra.mxu0 %v10980_v58  ;;  %v1007_v38 = vld [vmem:[#allocation10 + $0xa98] sm:$0xff]  ;;  %v11053_v42 = vcombine.high %v879_v36, %v883_v37 }
 0x24b   : > { %3477 = vmatpush1.bf16.msra.mxu1 %v11108_v46  ;;  %3437 = vmatprep.subr.bf16.mxu0 %v10973_v47  ;;  %v1011_v39 = vld [vmem:[#allocation10 + $0xab8] sm:$0xff] }
 0x24c   : > { %3478 = vmatprep.subr.bf16.mxu1 %v11101_v48  ;;  %v11181_v43 = vcombine.high %v1007_v38, %v1011_v39  ;;  %v871_v45 = vld [vmem:[#allocation10 + $0x658] sm:$0xff]  ;;  %v11052_v48 = vcombine.low %v879_v36, %v883_v37  ;;  %v11180_v49 = vcombine.low %v1007_v38, %v1011_v39  ;;  %v11454_v38 = vcombine.low %v3781_v59, %v3785_v15 }
 0x24d   : > { %v875_v58 = vld [vmem:[#allocation10 + $0x678] sm:$0xff]  ;;  %v11319_v39 = vcombine.high %v3645_v24, %v3649_v25 }
 0x24e   : > { %3438 = vmatpush1.bf16.msra.mxu0 %v10972_v57  ;;  %v999_v46 = vld [vmem:[#allocation10 + $0xa58] sm:$0xff]  ;;  %v11045_v50 = vcombine.high %v871_v45, %v875_v58 }
 0x24f   : > { %3479 = vmatpush1.bf16.msra.mxu1 %v11100_v61  ;;  %3439 = vmatprep.subr.bf16.mxu0 %v11093_v62  ;;  %v1003_v47 = vld [vmem:[#allocation10 + $0xa78] sm:$0xff] }
 0x250   : > { %3480 = vmatprep.subr.bf16.mxu1 %v11221_v63  ;;  %v11173_v51 = vcombine.high %v999_v46, %v1003_v47  ;;  %v863_v52 = vld [vmem:[#allocation10 + $0x618] sm:$0xff]  ;;  %v11044_v63 = vcombine.low %v871_v45, %v875_v58  ;;  %v11172_v2 = vcombine.low %v999_v46, %v1003_v47  ;;  %v3641_v45 = vld [vmem:[#allocation11 + $0x120] sm:$0xff] }
 0x251   : > { %v867_v57 = vld [vmem:[#allocation10 + $0x638] sm:$0xff]  ;;  %v3765_v58 = vld [vmem:[#allocation11 + $0x500] sm:$0xff] }
 0x252   : > { %3440 = vmatpush2.bf16.msra.mxu0 %v11092_v16  ;;  %v991_v61 = vld [vmem:[#allocation10 + $0xa18] sm:$0xff]  ;;  %v11037_v19 = vcombine.high %v863_v52, %v867_v57  ;;  %v3661_v16 = vld [vmem:[#allocation11 + $0x1c0] sm:$0xff]  ;;  %v11036_v30 = vcombine.low %v863_v52, %v867_v57 }
 0x253   : > { %3481 = vmatpush2.bf16.msra.mxu1 %v11220_v5  ;;  %3441 = vmatprep.subr.bf16.mxu0 %v11085_v6  ;;  %v995_v62 = vld [vmem:[#allocation10 + $0xa38] sm:$0xff]  ;;  %v3665_v5 = vld [vmem:[#allocation11 + $0x1e0] sm:$0xff] }
 0x254   : > { %3482 = vmatprep.subr.bf16.mxu1 %v11213_v7  ;;  %v11165_v4 = vcombine.high %v991_v61, %v995_v62  ;;  %v3789_v6 = vld [vmem:[#allocation11 + $0x5c0] sm:$0xff]  ;;  %v11164_v9 = vcombine.low %v991_v61, %v995_v62  ;;  %v11335_v10 = vcombine.high %v3661_v16, %v3665_v5  ;;  %v11334_v17 = vcombine.low %v3661_v16, %v3665_v5 }
 0x255   : > { %v3793_v7 = vld [vmem:[#allocation11 + $0x5e0] sm:$0xff] }
 0x256   : > { %3442 = vmatpush2.bf16.msra.mxu0 %v11084_v11  ;;  %v1064_v11 = vrot.slane %v14078_v55, %v14110_v3  ;;  %v14120_v26 = vld [vmem:[#allocation8 + $0x4] ss:$24 sps:$4 sm:$0xff]  }
 0x257   : > { %3483 = vmatpush2.bf16.msra.mxu1 %v11212_v12  ;;  %3443 = vmatprep.subr.bf16.mxu0 %v11077_v13  ;;  %v11463_v12 = vcombine.high %v3789_v6, %v3793_v7  ;;  %v3653_v13 = vld [vmem:[#allocation11 + $0x180] sm:$0xff] }
 0x258   : > { %3484 = vmatprep.subr.bf16.mxu1 %v11205_v14  ;;  %v3657_v14 = vld [vmem:[#allocation11 + $0x1a0] sm:$0xff] }
 0x259   : > { %v12254_v55 = vld [vmem:[#allocation8 + $0xc] ss:$24 sps:$4 sm:$0xff]  }
 0x25a   : > { %3444 = vmatpush2.bf16.msra.mxu0 %v11076_v18  ;;  %v11462_v18 = vcombine.low %v3789_v6, %v3793_v7  ;;  %v3629_v61 = vld [vmem:[#allocation11 + $0xc0] sm:$0xff] }
 0x25b   : > { %3485 = vmatpush2.bf16.msra.mxu1 %v11204_v21  ;;  %3445 = vmatprep.subr.bf16.mxu0 %v11069_v22  ;;  %v11327_v21 = vcombine.high %v3653_v13, %v3657_v14  ;;  %v3171_v22 = vadd.f32 %v14099_v56, %v1064_v11  ;;  %v11326_v56 = vcombine.low %v3653_v13, %v3657_v14  ;;  %v3633_v62 = vld [vmem:[#allocation11 + $0xe0] sm:$0xff] }
 0x25c   : > { %3486 = vmatprep.subr.bf16.mxu1 %v11197_v23  ;;  %v11455_v23 = vcombine.high %v3781_v59, %v3785_v15  ;;  %v11303_v16 = vcombine.high %v3629_v61, %v3633_v62  ;;  %v3621_v6 = vld [vmem:[#allocation11 + $0x80] sm:$0xff] }
 0x25d   : > { %v3625_v7 = vld [vmem:[#allocation11 + $0xa0] sm:$0xff] }
 0x25e   : > { %3446 = vmatpush2.bf16.msra.mxu0 %v11068_v29  ;;  %v3773_v29 = vld [vmem:[#allocation11 + $0x540] sm:$0xff] }
 0x25f   : > { %3487 = vmatpush2.bf16.msra.mxu1 %v11196_v31  ;;  %3447 = vmatprep.subr.bf16.mxu0 %v11061_v32  ;;  %v3777_v31 = vld [vmem:[#allocation11 + $0x560] sm:$0xff]  ;;  %v3173_v32 = vadd.f32 %v14105_v1, %v1068_v28 }
 0x260   : > { %3488 = vmatprep.subr.bf16.mxu1 %v11189_v34  ;;  %v3613_v14 = vld [vmem:[#allocation11 + $0x40] sm:$0xff] }
 0x261   : > { %v3617_v59 = vld [vmem:[#allocation11 + $0x60] sm:$0xff] }
 0x262   : > { %3448 = vmatpush2.bf16.msra.mxu0 %v11060_v40  ;;  %v3741_v15 = vld [vmem:[#allocation11 + $0x440] sm:$0xff] }
 0x263   : > { %3489 = vmatpush2.bf16.msra.mxu1 %v11188_v41  ;;  %3449 = vmatprep.subr.bf16.mxu0 %v11053_v42  ;;  %v11447_v42 = vcombine.high %v3773_v29, %v3777_v31  ;;  %v3745_v28 = vld [vmem:[#allocation11 + $0x460] sm:$0xff] }
 0x264   : > { %3490 = vmatprep.subr.bf16.mxu1 %v11181_v43  ;;  %v3637_v43 = vld [vmem:[#allocation11 + $0x100] sm:$0xff] }
 0x266   : > { %3450 = vmatpush2.bf16.msra.mxu0 %v11052_v48  ;;  %v11318_v48 = vcombine.low %v3645_v24, %v3649_v25  ;;  %v3609_v24 = vld [vmem:[#allocation11 + $0x20] sm:$0xff] }
 0x267   : > { %3491 = vmatpush2.bf16.msra.mxu1 %v11180_v49  ;;  %3451 = vmatprep.subr.bf16.mxu0 %v11045_v50  ;;  %v11446_v50 = vcombine.low %v3773_v29, %v3777_v31  ;;  %v3733_v25 = vld [vmem:[#allocation11 + $0x400] sm:$0xff]  ;;  %v11286_v29 = vcombine.low %v3613_v14, %v3617_v59  ;;  %v11414_v31 = vcombine.low %v3741_v15, %v3745_v28 }
 0x268   : > { %3492 = vmatprep.subr.bf16.mxu1 %v11173_v51  ;;  %v11311_v51 = vcombine.high %v3637_v43, %v3641_v45 }
 0x26a   : > { %3452 = vmatpush2.bf16.msra.mxu0 %v11044_v63  ;;  %v3757_v63 = vld [vmem:[#allocation11 + $0x4c0] sm:$0xff] }
 0x26b   : > { %3493 = vmatpush2.bf16.msra.mxu1 %v11172_v2  ;;  %3453 = vmatprep.subr.bf16.mxu0 %v11037_v19  ;;  %v3761_v2 = vld [vmem:[#allocation11 + $0x4e0] sm:$0xff]  ;;  %v11310_v19 = vcombine.low %v3637_v43, %v3641_v45 }
 0x26c   : > { %3494 = vmatprep.subr.bf16.mxu1 %v11165_v4  ;;  %v11431_v5 = vcombine.high %v3757_v63, %v3761_v2  ;;  %v11430_v11 = vcombine.low %v3757_v63, %v3761_v2  ;;  %v3721_v43 = vld [vmem:[#allocation11 + $0x3a0] sm:$0xff] }
 0x26d   : > { %v3845_v45 = vld [vmem:[#allocation11 + $0x780] sm:$0xff] }
 0x26e   : > { %3454 = vmatpush2.bf16.msra.mxu0 %v11036_v30  ;;  %v3749_v30 = vld [vmem:[#allocation11 + $0x480] sm:$0xff] }
 0x26f   : > { %3495 = vmatpush2.bf16.msra.mxu1 %v11164_v9  ;;  %6190 = vmatprep.subr.bf16.mxu0 %v11335_v10  ;;  %v3753_v9 = vld [vmem:[#allocation11 + $0x4a0] sm:$0xff]  ;;  %v11302_v10 = vcombine.low %v3629_v61, %v3633_v62 }
 0x270   : > { %6303 = vmatprep.subr.bf16.mxu1 %v11463_v12  ;;  %v11295_v12 = vcombine.high %v3621_v6, %v3625_v7  ;;  %v11423_v13 = vcombine.high %v3749_v30, %v3753_v9  ;;  %v3701_v2 = vld [vmem:[#allocation11 + $0x300] sm:$0xff] }
 0x271   : > { %v3211_v27 = vpop.f32.mrf.mxu0  ;;  %3456 = vmatmul.mubr.bf16.vlgmr.msra.gmra.mxu0 %v14053_v20 }
 0x272   : > { %v3212_v34 = vadd.f32 %v3211_v27, %v3171_v22  ;;  %v3252_v36 = vpop.f32.mrf.mxu1  ;;  %3497 = vmatmul.mubr.bf16.vlgmr.msra.gmra.mxu1 %v14062_v33  ;;  %6191 = vmatpush1.bf16.msra.mxu0 %v11334_v17  ;;  %v3769_v33 = vld [vmem:[#allocation11 + $0x520] sm:$0xff]  ;;  %v11294_v17 = vcombine.low %v3621_v6, %v3625_v7  ;;  %v11415_v22 = vcombine.high %v3741_v15, %v3745_v28 }
 0x273   : > { %6304 = vmatpush1.bf16.msra.mxu1 %v11462_v18  ;;  %v3213_v37 = vpop.f32.mrf.mxu0  ;;  %6192 = vmatprep.subr.bf16.mxu0 %v11327_v21  ;;  %v11439_v57 = vcombine.high %v3765_v58, %v3769_v33  ;;  %v11438_v4 = vcombine.low %v3765_v58, %v3769_v33  ;;  %v11422_v18 = vcombine.low %v3749_v30, %v3753_v9  ;;  %v3737_v27 = vld [vmem:[#allocation11 + $0x420] sm:$0xff] }
 0x274   : > { %v14125_v40 = vadd.f32 %v3252_v36, %v3212_v34  ;;  %v3214_v41 = vadd.f32 %v3213_v37, %v3173_v32  ;;  %v3254_v20 = vpop.f32.mrf.mxu1  ;;  %6305 = vmatprep.subr.bf16.mxu1 %v11455_v23  ;;  %6222 = vmatprep.mubr.bf16.mxu0 %v14120_v26  ;;  %v11287_v21 = vcombine.high %v3613_v14, %v3617_v59  ;;  %v3605_v23 = vld [vmem:[#allocation11] sm:$0xff] }
 0x275   : > { %v3215_v1 = vpop.f32.mrf.mxu0  ;;  %6335 = vmatprep.mubr.bf16.mxu1 %v12254_v55  ;;  %v11279_v55 = vcombine.high %v3605_v23, %v3609_v24  ;;  %v11407_v32 = vcombine.high %v3733_v25, %v3737_v27  ;;  %v3725_v34 = vld [vmem:[#allocation11 + $0x3c0] sm:$0xff] }
 0x276   : > { %16203 = vst [vmem:[#allocation47_spill] sm:$0xff] %v14125_v40  ;;  %v14128_v46 = vadd.f32 %v3254_v20, %v3214_v41  ;;  %v3256_v47 = vpop.f32.mrf.mxu1  ;;  %6193 = vmatpush1.bf16.msra.mxu0 %v11326_v56  ;;  %v3729_v36 = vld [vmem:[#allocation11 + $0x3e0] sm:$0xff] }
 0x277   : > { %6306 = vmatpush1.bf16.msra.mxu1 %v11454_v38  ;;  %v3216_v49 = vpop.f32.mrf.mxu0  ;;  %6194 = vmatprep.subr.bf16.mxu0 %v11319_v39  ;;  %v3853_v56 = vld [vmem:[#allocation11 + $0x7c0] sm:$0xff]  ;;  %v11278_v38 = vcombine.low %v3605_v23, %v3609_v24  ;;  %v11406_v39 = vcombine.low %v3733_v25, %v3737_v27  ;;  %v11399_v41 = vcombine.high %v3725_v34, %v3729_v36 }
 0x278   : > { %16204 = vst [vmem:[#allocation48_spill] sm:$0xff] %v14128_v46  ;;  %v3257_v52 = vpop.f32.mrf.mxu1  ;;  %6307 = vmatprep.subr.bf16.mxu1 %v11447_v42  ;;  %v3857_v37 = vld [vmem:[#allocation11 + $0x7e0] sm:$0xff]  ;;  %v11398_v58 = vcombine.low %v3725_v34, %v3729_v36  ;;  %v14415_v46 = vld [vmem:[#allocation8 + $0x90] ss:$24 sps:$4 sm:$0xff]  }
 0x279   : > { %v11527_v20 = vcombine.high %v3853_v56, %v3857_v37  ;;  %v3717_v42 = vld [vmem:[#allocation11 + $0x380] sm:$0xff]  ;;  %v11526_v33 = vcombine.low %v3853_v56, %v3857_v37 }
 0x27a   : > { %6195 = vmatpush1.bf16.msra.mxu0 %v11318_v48  ;;  %v3849_v1 = vld [vmem:[#allocation11 + $0x7a0] sm:$0xff]  ;;  %v11391_v47 = vcombine.high %v3717_v42, %v3721_v43 }
 0x27b   : > { %6308 = vmatpush1.bf16.msra.mxu1 %v11446_v50  ;;  %6196 = vmatprep.subr.bf16.mxu0 %v11311_v51  ;;  %v11519_v48 = vcombine.high %v3845_v45, %v3849_v1  ;;  %v3709_v49 = vld [vmem:[#allocation11 + $0x340] sm:$0xff]  ;;  %v11518_v61 = vcombine.low %v3845_v45, %v3849_v1 }
 0x27c   : > { %6309 = vmatprep.subr.bf16.mxu1 %v11439_v57  ;;  %v3713_v50 = vld [vmem:[#allocation11 + $0x360] sm:$0xff]  ;;  %v11390_v57 = vcombine.low %v3717_v42, %v3721_v43 }
 0x27d   : > { %v3837_v51 = vld [vmem:[#allocation11 + $0x740] sm:$0xff]  ;;  %v11383_v62 = vcombine.high %v3709_v49, %v3713_v50 }
 0x27e   : > { %6197 = vmatpush1.bf16.msra.mxu0 %v11310_v19  ;;  %v3841_v52 = vld [vmem:[#allocation11 + $0x760] sm:$0xff] }
 0x27f   : > { %6310 = vmatpush1.bf16.msra.mxu1 %v11438_v4  ;;  %6198 = vmatprep.subr.bf16.mxu0 %v11303_v16  ;;  %v11511_v63 = vcombine.high %v3837_v51, %v3841_v52  ;;  %v3705_v19 = vld [vmem:[#allocation11 + $0x320] sm:$0xff]  ;;  %v11510_v6 = vcombine.low %v3837_v51, %v3841_v52 }
 0x280   : > { %6311 = vmatprep.subr.bf16.mxu1 %v11431_v5  ;;  %v3829_v4 = vld [vmem:[#allocation11 + $0x700] sm:$0xff]  ;;  %v11382_v5 = vcombine.low %v3709_v49, %v3713_v50  ;;  %v11375_v7 = vcombine.high %v3701_v2, %v3705_v19  ;;  %v14131_v49 = vsub.s32 4, %v14073_v44 }
 0x281   : > { %v3833_v16 = vld [vmem:[#allocation11 + $0x720] sm:$0xff] }
 0x282   : > { %6199 = vmatpush1.bf16.msra.mxu0 %v11302_v10  ;;  %v11503_v30 = vcombine.high %v3829_v4, %v3833_v16  ;;  %v3693_v9 = vld [vmem:[#allocation11 + $0x2c0] sm:$0xff]  ;;  %v11502_v14 = vcombine.low %v3829_v4, %v3833_v16  ;;  %16205 = vst [vmem:[#allocation49_spill] sm:$0xff] %v14131_v49 }
 0x283   : > { %6312 = vmatpush1.bf16.msra.mxu1 %v11430_v11  ;;  %6200 = vmatprep.subr.bf16.mxu0 %v11295_v12  ;;  %v3697_v10 = vld [vmem:[#allocation11 + $0x2e0] sm:$0xff] }
 0x284   : > { %6313 = vmatprep.subr.bf16.mxu1 %v11423_v13  ;;  %v3821_v11 = vld [vmem:[#allocation11 + $0x6c0] sm:$0xff]  ;;  %v11374_v13 = vcombine.low %v3701_v2, %v3705_v19  ;;  %v11367_v59 = vcombine.high %v3693_v9, %v3697_v10  ;;  %v3654_v2 = vld [vmem:[#allocation11 + $0x188] sm:$0xff] }
 0x285   : > { %v3825_v12 = vld [vmem:[#allocation11 + $0x6e0] sm:$0xff]  ;;  %v3658_v19 = vld [vmem:[#allocation11 + $0x1a8] sm:$0xff] }
 0x286   : > { %6201 = vmatpush1.bf16.msra.mxu0 %v11294_v17  ;;  %v11495_v15 = vcombine.high %v3821_v11, %v3825_v12  ;;  %v3685_v28 = vld [vmem:[#allocation11 + $0x280] sm:$0xff]  ;;  %v11494_v23 = vcombine.low %v3821_v11, %v3825_v12  ;;  %v14144_v11 = vld [vmem:[#allocation8 + $0x34] ss:$24 sps:$4 sm:$0xff]  }
 0x287   : > { %6314 = vmatpush1.bf16.msra.mxu1 %v11422_v18  ;;  %6202 = vmatprep.subr.bf16.mxu0 %v11287_v21  ;;  %v3689_v17 = vld [vmem:[#allocation11 + $0x2a0] sm:$0xff] }
 0x288   : > { %6315 = vmatprep.subr.bf16.mxu1 %v11415_v22  ;;  %v3813_v18 = vld [vmem:[#allocation11 + $0x680] sm:$0xff]  ;;  %v11366_v22 = vcombine.low %v3693_v9, %v3697_v10  ;;  %v11359_v24 = vcombine.high %v3685_v28, %v3689_v17  ;;  %v11329_v10 = vcombine.high %v3654_v2, %v3658_v19 }
 0x289   : > { %v3817_v21 = vld [vmem:[#allocation11 + $0x6a0] sm:$0xff] }
 0x28a   : > { %6203 = vmatpush1.bf16.msra.mxu0 %v11286_v29  ;;  %v11487_v25 = vcombine.high %v3813_v18, %v3817_v21  ;;  %v3677_v27 = vld [vmem:[#allocation11 + $0x240] sm:$0xff]  ;;  %v11486_v34 = vcombine.low %v3813_v18, %v3817_v21 }
 0x28b   : > { %6316 = vmatpush1.bf16.msra.mxu1 %v11414_v31  ;;  %6204 = vmatprep.subr.bf16.mxu0 %v11279_v55  ;;  %v3681_v29 = vld [vmem:[#allocation11 + $0x260] sm:$0xff] }
 0x28c   : > { %6317 = vmatprep.subr.bf16.mxu1 %v11407_v32  ;;  %v3805_v31 = vld [vmem:[#allocation11 + $0x640] sm:$0xff]  ;;  %v11358_v32 = vcombine.low %v3685_v28, %v3689_v17  ;;  %v11351_v36 = vcombine.high %v3677_v27, %v3681_v29  ;;  %v3650_v28 = vld [vmem:[#allocation11 + $0x168] sm:$0xff] }
 0x28d   : > { %v3809_v55 = vld [vmem:[#allocation11 + $0x660] sm:$0xff] }
 0x28e   : > { %6205 = vmatpush1.bf16.msra.mxu0 %v11278_v38  ;;  %v11479_v56 = vcombine.high %v3805_v31, %v3809_v55  ;;  %v3669_v37 = vld [vmem:[#allocation11 + $0x200] sm:$0xff]  ;;  %v11478_v42 = vcombine.low %v3805_v31, %v3809_v55 }
 0x28f   : > { %6318 = vmatpush1.bf16.msra.mxu1 %v11406_v39  ;;  %6206 = vmatprep.subr.bf16.mxu0 %v11399_v41  ;;  %v3673_v38 = vld [vmem:[#allocation11 + $0x220] sm:$0xff] }
 0x290   : > { %6319 = vmatprep.subr.bf16.mxu1 %v11527_v20  ;;  %v3797_v39 = vld [vmem:[#allocation11 + $0x600] sm:$0xff]  ;;  %v11350_v20 = vcombine.low %v3677_v27, %v3681_v29  ;;  %v11343_v43 = vcombine.high %v3669_v37, %v3673_v38 }
 0x291   : > { %v3801_v41 = vld [vmem:[#allocation11 + $0x620] sm:$0xff] }
 0x292   : > { %6207 = vmatpush2.bf16.msra.mxu0 %v11398_v58  ;;  %v11471_v45 = vcombine.high %v3797_v39, %v3801_v41  ;;  %v3917_v1 = vld [vmem:[#allocation11 + $0x9c0] sm:$0xff]  ;;  %v11470_v50 = vcombine.low %v3797_v39, %v3801_v41  ;;  %v12263_v41 = vld [vmem:[#allocation8 + $0x38] ss:$24 sps:$4 sm:$0xff]  }
 0x293   : > { %6320 = vmatpush2.bf16.msra.mxu1 %v11526_v33  ;;  %6208 = vmatprep.subr.bf16.mxu0 %v11391_v47  ;;  %v3921_v58 = vld [vmem:[#allocation11 + $0x9e0] sm:$0xff]  ;;  %v3662_v33 = vld [vmem:[#allocation11 + $0x1c8] sm:$0xff] }
 0x294   : > { %6321 = vmatprep.subr.bf16.mxu1 %v11519_v48  ;;  %v3666_v47 = vld [vmem:[#allocation11 + $0x1e8] sm:$0xff]  ;;  %v11342_v48 = vcombine.low %v3669_v37, %v3673_v38  ;;  %v11591_v51 = vcombine.high %v3917_v1, %v3921_v58  ;;  %v14138_v4 = vld [vmem:[#allocation13] sm:$0xff] }
 0x295   : > { %v11337_v52 = vcombine.high %v3662_v33, %v3666_v47  ;;  %v1072_v16 = vrot.slane %v14138_v4, %v14131_v49  ;;  %v3901_v12 = vld [vmem:[#allocation11 + $0x940] sm:$0xff]  ;;  %v3642_v37 = vld [vmem:[#allocation11 + $0x128] sm:$0xff] }
 0x296   : > { %6209 = vmatpush2.bf16.msra.mxu0 %v11390_v57  ;;  %v14134_v57 = vsub.s32 5, %v14073_v44  ;;  %v3893_v55 = vld [vmem:[#allocation11 + $0x900] sm:$0xff] }
 0x297   : > { %6322 = vmatpush2.bf16.msra.mxu1 %v11518_v61  ;;  %6210 = vmatprep.subr.bf16.mxu0 %v11383_v62  ;;  %v3909_v61 = vld [vmem:[#allocation11 + $0x980] sm:$0xff] }
 0x298   : > { %6323 = vmatprep.subr.bf16.mxu1 %v11511_v63  ;;  %16206 = vst [vmem:[#allocation50_spill] sm:$0xff] %v14134_v57  ;;  %v3913_v62 = vld [vmem:[#allocation11 + $0x9a0] sm:$0xff]  ;;  %v1076_v9 = vrot.slane %v14138_v4, %v14134_v57 }
 0x299   : > { %v14136_v63 = vld [vmem:[#allocation8] ss:$24 sps:$4 sm:$0xff]   ;;  %v11582_v21 = vcombine.low %v3909_v61, %v3913_v62 }
 0x29a   : > { %6211 = vmatpush2.bf16.msra.mxu0 %v11382_v5  ;;  %v12257_v5 = vld [vmem:[#allocation8 + $0x8] ss:$24 sps:$4 sm:$0xff]  }
 0x29b   : > { %6324 = vmatpush2.bf16.msra.mxu1 %v11510_v6  ;;  %6212 = vmatprep.subr.bf16.mxu0 %v11375_v7  ;;  %v11590_v6 = vcombine.low %v3917_v1, %v3921_v58  ;;  %v11336_v7 = vcombine.low %v3662_v33, %v3666_v47  ;;  %v14154_v33 = vld [vmem:[#allocation8 + $0x64] ss:$24 sps:$4 sm:$0xff]  }
 0x29c   : > { %6325 = vmatprep.subr.bf16.mxu1 %v11503_v30  ;;  %v11583_v30 = vcombine.high %v3909_v61, %v3913_v62  ;;  %v3885_v47 = vld [vmem:[#allocation11 + $0x8c0] sm:$0xff] }
 0x29e   : > { %6213 = vmatpush2.bf16.msra.mxu0 %v11374_v13  ;;  %v3905_v13 = vld [vmem:[#allocation11 + $0x960] sm:$0xff] }
 0x29f   : > { %6326 = vmatpush2.bf16.msra.mxu1 %v11502_v14  ;;  %6214 = vmatprep.subr.bf16.mxu0 %v11367_v59  ;;  %v12260_v59 = vld [vmem:[#allocation8 + $0x3c] ss:$24 sps:$4 sm:$0xff]  }
 0x2a0   : > { %6327 = vmatprep.subr.bf16.mxu1 %v11495_v15  ;;  %v3646_v15 = vld [vmem:[#allocation11 + $0x148] sm:$0xff] }
 0x2a1   : > { %v11321_v31 = vcombine.high %v3646_v15, %v3650_v28 }
 0x2a2   : > { %6215 = vmatpush2.bf16.msra.mxu0 %v11366_v22 }
 0x2a3   : > { %6328 = vmatpush2.bf16.msra.mxu1 %v11494_v23  ;;  %6216 = vmatprep.subr.bf16.mxu0 %v11359_v24  ;;  %v11328_v23 = vcombine.low %v3654_v2, %v3658_v19  ;;  %v11575_v24 = vcombine.high %v3901_v12, %v3905_v13 }
 0x2a4   : > { %6329 = vmatprep.subr.bf16.mxu1 %v11487_v25 }
 0x2a6   : > { %6217 = vmatpush2.bf16.msra.mxu0 %v11358_v32  ;;  %v3897_v32 = vld [vmem:[#allocation11 + $0x920] sm:$0xff] }
 0x2a7   : > { %6330 = vmatpush2.bf16.msra.mxu1 %v11486_v34  ;;  %6218 = vmatprep.subr.bf16.mxu0 %v11351_v36  ;;  %v14150_v36 = vld [vmem:[#allocation8 + $0x30] ss:$24 sps:$4 sm:$0xff]   ;;  %v11566_v61 = vcombine.low %v3893_v55, %v3897_v32 }
 0x2a8   : > { %6331 = vmatprep.subr.bf16.mxu1 %v11479_v56  ;;  %v3638_v56 = vld [vmem:[#allocation11 + $0x108] sm:$0xff] }
 0x2a9   : > { %v11313_v58 = vcombine.high %v3638_v56, %v3642_v37  ;;  %v11312_v62 = vcombine.low %v3638_v56, %v3642_v37  ;;  %v12275_v56 = vld [vmem:[#allocation8 + $0x98] ss:$24 sps:$4 sm:$0xff]  }
 0x2aa   : > { %6219 = vmatpush2.bf16.msra.mxu0 %v11350_v20  ;;  %v11574_v20 = vcombine.low %v3901_v12, %v3905_v13 }
 0x2ab   : > { %6332 = vmatpush2.bf16.msra.mxu1 %v11478_v42  ;;  %6220 = vmatprep.subr.bf16.mxu0 %v11343_v43  ;;  %v11320_v43 = vcombine.low %v3646_v15, %v3650_v28  ;;  %v3869_v15 = vld [vmem:[#allocation11 + $0x840] sm:$0xff] }
 0x2ac   : > { %6333 = vmatprep.subr.bf16.mxu1 %v11471_v45  ;;  %v11567_v45 = vcombine.high %v3893_v55, %v3897_v32  ;;  %v3873_v28 = vld [vmem:[#allocation11 + $0x860] sm:$0xff]  ;;  %v14164_v55 = vld [vmem:[#allocation8 + $0x90] ss:$24 sps:$4 sm:$0xff]  }
 0x2ad   : > { %v3606_v32 = vld [vmem:[#allocation11 + $0x8] sm:$0xff]  ;;  %v11542_v37 = vcombine.low %v3869_v15, %v3873_v28 }
 0x2ae   : > { %6221 = vmatpush2.bf16.msra.mxu0 %v11342_v48  ;;  %v3889_v48 = vld [vmem:[#allocation11 + $0x8e0] sm:$0xff] }
 0x2af   : > { %6334 = vmatpush2.bf16.msra.mxu1 %v11470_v50  ;;  %6416 = vmatprep.subr.bf16.mxu0 %v11591_v51  ;;  %v12266_v50 = vld [vmem:[#allocation8 + $0x6c] ss:$24 sps:$4 sm:$0xff]   ;;  %v11559_v2 = vcombine.high %v3885_v47, %v3889_v48 }
 0x2b0   : > { %6529 = vmatprep.subr.bf16.mxu1 %v11337_v52  ;;  %v3630_v51 = vld [vmem:[#allocation11 + $0xc8] sm:$0xff] }
 0x2b1   : > { %v3293_v14 = vpop.f32.mrf.mxu0  ;;  %6223 = vmatmul.mubr.bf16.vlgmr.msra.gmra.mxu0 %v14136_v63  ;;  %v3634_v52 = vld [vmem:[#allocation11 + $0xe8] sm:$0xff] }
 0x2b2   : > { %v3294_v17 = vadd.f32 %v3293_v14, %v1072_v16  ;;  %v3334_v18 = vpop.f32.mrf.mxu1  ;;  %6336 = vmatmul.mubr.bf16.vlgmr.msra.gmra.mxu1 %v12257_v5  ;;  %6417 = vmatpush1.bf16.msra.mxu0 %v11590_v6  ;;  %v11305_v19 = vcombine.high %v3630_v51, %v3634_v52  ;;  %v3877_v16 = vld [vmem:[#allocation11 + $0x880] sm:$0xff]  ;;  %v11304_v12 = vcombine.low %v3630_v51, %v3634_v52 }
 0x2b3   : > { %6530 = vmatpush1.bf16.msra.mxu1 %v11336_v7  ;;  %v3295_v22 = vpop.f32.mrf.mxu0  ;;  %6418 = vmatprep.subr.bf16.mxu0 %v11583_v30  ;;  %v3881_v5 = vld [vmem:[#allocation11 + $0x8a0] sm:$0xff]  ;;  %v3622_v7 = vld [vmem:[#allocation11 + $0x88] sm:$0xff] }
 0x2b4   : > { %v14147_v25 = vadd.f32 %v3334_v18, %v3294_v17  ;;  %v3296_v27 = vadd.f32 %v3295_v22, %v1076_v9  ;;  %v3336_v29 = vpop.f32.mrf.mxu1  ;;  %6531 = vmatprep.subr.bf16.mxu1 %v11329_v10  ;;  %6232 = vmatprep.mubr.bf16.mxu0 %v14144_v11  ;;  %v14158_v6 = vld [vmem:[#allocation8 + $0x60] ss:$24 sps:$4 sm:$0xff]   ;;  %v3626_v30 = vld [vmem:[#allocation11 + $0xa8] sm:$0xff]  ;;  %v11558_v10 = vcombine.low %v3885_v47, %v3889_v48  ;;  %v12272_v17 = vld [vmem:[#allocation8 + $0x9c] ss:$24 sps:$4 sm:$0xff]  }
 0x2b5   : > { %v3297_v34 = vpop.f32.mrf.mxu0  ;;  %6345 = vmatprep.mubr.bf16.mxu1 %v12260_v59  ;;  %v12269_v9 = vld [vmem:[#allocation8 + $0x68] ss:$24 sps:$4 sm:$0xff]   ;;  %v11551_v13 = vcombine.high %v3877_v16, %v3881_v5  ;;  %v11297_v14 = vcombine.high %v3622_v7, %v3626_v30  ;;  %v14160_v59 = vld [vmem:[#allocation8 + $0x94] ss:$24 sps:$4 sm:$0xff]   ;;  %v11550_v22 = vcombine.low %v3877_v16, %v3881_v5 }
 0x2b6   : > { %v14152_v38 = vadd.f32 %v3336_v29, %v3296_v27  ;;  %v3338_v39 = vpop.f32.mrf.mxu1  ;;  %6419 = vmatpush1.bf16.msra.mxu0 %v11582_v21  ;;  %v3614_v18 = vld [vmem:[#allocation11 + $0x48] sm:$0xff]  ;;  %v3861_v29 = vld [vmem:[#allocation11 + $0x800] sm:$0xff] }
 0x2b7   : > { %6532 = vmatpush1.bf16.msra.mxu1 %v11328_v23  ;;  %v3298_v42 = vpop.f32.mrf.mxu0  ;;  %6420 = vmatprep.subr.bf16.mxu0 %v11575_v24  ;;  %v3618_v21 = vld [vmem:[#allocation11 + $0x68] sm:$0xff]  ;;  %v11296_v23 = vcombine.low %v3622_v7, %v3626_v30  ;;  %v11543_v24 = vcombine.high %v3869_v15, %v3873_v28  ;;  %v12284_v15 = vld [vmem:[#allocation8 + $0xfc] ss:$24 sps:$4 sm:$0xff]  }
 0x2b8   : > { %v3339_v1 = vpop.f32.mrf.mxu1  ;;  %6533 = vmatprep.subr.bf16.mxu1 %v11321_v31  ;;  %v11289_v27 = vcombine.high %v3614_v18, %v3618_v21  ;;  %v3865_v31 = vld [vmem:[#allocation11 + $0x820] sm:$0xff]  ;;  %v3610_v34 = vld [vmem:[#allocation11 + $0x28] sm:$0xff]  ;;  %v11288_v39 = vcombine.low %v3614_v18, %v3618_v21 }
 0x2b9   : > { %6233 = vmatmul.mubr.bf16.gmra.mxu0 %v14150_v36  ;;  %v14166_v42 = vld [vmem:[#allocation8 + $0xc4] ss:$24 sps:$4 sm:$0xff]   ;;  %v3730_v47 = vld [vmem:[#allocation11 + $0x3e8] sm:$0xff]  ;;  %v11534_v48 = vcombine.low %v3861_v29, %v3865_v31 }
 0x2ba   : > { %6346 = vmatmul.mubr.bf16.gmra.mxu1 %v12263_v41  ;;  %6421 = vmatpush1.bf16.msra.mxu0 %v11574_v20  ;;  %v11535_v41 = vcombine.high %v3861_v29, %v3865_v31  ;;  %v11281_v20 = vcombine.high %v3606_v32, %v3610_v34  ;;  %v12278_v1 = vld [vmem:[#allocation8 + $0xcc] ss:$24 sps:$4 sm:$0xff]   ;;  %v12281_v5 = vld [vmem:[#allocation8 + $0xc8] ss:$24 sps:$4 sm:$0xff]  }
 0x2bb   : > { %6534 = vmatpush1.bf16.msra.mxu1 %v11320_v43  ;;  %6422 = vmatprep.subr.bf16.mxu0 %v11567_v45  ;;  %v3981_v43 = vld [vmem:[#allocation11 + $0xbc0] sm:$0xff]  ;;  %v3722_v16 = vld [vmem:[#allocation11 + $0x3a8] sm:$0xff] }
 0x2bc   : > { %6535 = vmatprep.subr.bf16.mxu1 %v11313_v58  ;;  %6242 = vmatprep.mubr.bf16.mxu0 %v14154_v33  ;;  %v3985_v45 = vld [vmem:[#allocation11 + $0xbe0] sm:$0xff]  ;;  %v3726_v58 = vld [vmem:[#allocation11 + $0x3c8] sm:$0xff] }
 0x2bd   : > { %6355 = vmatprep.mubr.bf16.mxu1 %v12266_v50  ;;  %v11280_v50 = vcombine.low %v3606_v32, %v3610_v34  ;;  %v11655_v51 = vcombine.high %v3981_v43, %v3985_v45  ;;  %v11401_v52 = vcombine.high %v3726_v58, %v3730_v47  ;;  %v11654_v7 = vcombine.low %v3981_v43, %v3985_v45  ;;  %v3710_v28 = vld [vmem:[#allocation11 + $0x348] sm:$0xff]  ;;  %v14178_v34 = vld [vmem:[#allocation8 + $0xf8] ss:$24 sps:$4 sm:$0xff]   ;;  %v3949_v43 = vld [vmem:[#allocation11 + $0xac0] sm:$0xff] }
 0x2be   : > { %6423 = vmatpush1.bf16.msra.mxu0 %v11566_v61  ;;  %v3973_v61 = vld [vmem:[#allocation11 + $0xb80] sm:$0xff]  ;;  %v11400_v30 = vcombine.low %v3726_v58, %v3730_v47  ;;  %v14176_v29 = vld [vmem:[#allocation8 + $0xf0] ss:$24 sps:$4 sm:$0xff]  }
 0x2bf   : > { %6536 = vmatpush1.bf16.msra.mxu1 %v11312_v62  ;;  %6424 = vmatprep.subr.bf16.mxu0 %v11559_v2  ;;  %v3977_v62 = vld [vmem:[#allocation11 + $0xba0] sm:$0xff]  ;;  %v3702_v31 = vld [vmem:[#allocation11 + $0x308] sm:$0xff] }
 0x2c0   : > { %6537 = vmatprep.subr.bf16.mxu1 %v11305_v19  ;;  %v14170_v2 = vld [vmem:[#allocation8 + $0xc0] ss:$24 sps:$4 sm:$0xff]   ;;  %v3718_v19 = vld [vmem:[#allocation11 + $0x388] sm:$0xff]  ;;  %v11646_v18 = vcombine.low %v3973_v61, %v3977_v62 }
 0x2c1   : > { %6243 = vmatmul.mubr.bf16.gmra.mxu0 %v14158_v6  ;;  %v11392_v21 = vcombine.low %v3718_v19, %v3722_v16  ;;  %v3706_v32 = vld [vmem:[#allocation11 + $0x328] sm:$0xff]  ;;  %v3953_v45 = vld [vmem:[#allocation11 + $0xae0] sm:$0xff] }
 0x2c2   : > { %6356 = vmatmul.mubr.bf16.gmra.mxu1 %v12269_v9  ;;  %6425 = vmatpush1.bf16.msra.mxu0 %v11558_v10  ;;  %v11647_v9 = vcombine.high %v3973_v61, %v3977_v62  ;;  %v11393_v10 = vcombine.high %v3718_v19, %v3722_v16  ;;  %v3694_v58 = vld [vmem:[#allocation11 + $0x2c8] sm:$0xff]  ;;  %v3941_v61 = vld [vmem:[#allocation11 + $0xa80] sm:$0xff] }
 0x2c3   : > { %6538 = vmatpush1.bf16.msra.mxu1 %v11304_v12  ;;  %6426 = vmatprep.subr.bf16.mxu0 %v11551_v13  ;;  %v14172_v12 = vld [vmem:[#allocation8 + $0xf4] ss:$24 sps:$4 sm:$0xff]   ;;  %v3965_v13 = vld [vmem:[#allocation11 + $0xb40] sm:$0xff] }
 0x2c4   : > { %6539 = vmatprep.subr.bf16.mxu1 %v11297_v14  ;;  %6252 = vmatprep.mubr.bf16.mxu0 %v14160_v59  ;;  %v3969_v14 = vld [vmem:[#allocation11 + $0xb60] sm:$0xff]  ;;  %v3698_v47 = vld [vmem:[#allocation11 + $0x2e8] sm:$0xff] }
 0x2c5   : > { %6365 = vmatprep.mubr.bf16.mxu1 %v12272_v17  ;;  %v3714_v17 = vld [vmem:[#allocation11 + $0x368] sm:$0xff]  ;;  %v3945_v62 = vld [vmem:[#allocation11 + $0xaa0] sm:$0xff] }
 0x2c6   : > { %6427 = vmatpush1.bf16.msra.mxu0 %v11550_v22  ;;  %v11639_v22 = vcombine.high %v3965_v13, %v3969_v14  ;;  %v14188_v19 = vld [vmem:[#allocation8 + $0x120] ss:$24 sps:$4 sm:$0xff]   ;;  %v3686_v16 = vld [vmem:[#allocation11 + $0x288] sm:$0xff] }
 0x2c7   : > { %6540 = vmatpush1.bf16.msra.mxu1 %v11296_v23  ;;  %6428 = vmatprep.subr.bf16.mxu0 %v11543_v24  ;;  %v11385_v23 = vcombine.high %v3710_v28, %v3714_v17  ;;  %v3957_v24 = vld [vmem:[#allocation11 + $0xb00] sm:$0xff] }
 0x2c8   : > { %6541 = vmatprep.subr.bf16.mxu1 %v11289_v27  ;;  %v3961_v27 = vld [vmem:[#allocation11 + $0xb20] sm:$0xff] }
 0x2c9   : > { %6253 = vmatmul.mubr.bf16.gmra.mxu0 %v14164_v55 }
 0x2ca   : > { %6366 = vmatmul.mubr.bf16.gmra.mxu1 %v12275_v56  ;;  %6429 = vmatpush1.bf16.msra.mxu0 %v11542_v37  ;;  %v11638_v56 = vcombine.low %v3965_v13, %v3969_v14  ;;  %v11384_v37 = vcombine.low %v3710_v28, %v3714_v17  ;;  %v14192_v14 = vld [vmem:[#allocation8 + $0x154] ss:$24 sps:$4 sm:$0xff]   ;;  %v3937_v28 = vld [vmem:[#allocation11 + $0xa60] sm:$0xff] }
 0x2cb   : > { %6542 = vmatpush1.bf16.msra.mxu1 %v11288_v39  ;;  %6430 = vmatprep.subr.bf16.mxu0 %v11535_v41  ;;  %v11631_v39 = vcombine.high %v3957_v24, %v3961_v27  ;;  %v11377_v41 = vcombine.high %v3702_v31, %v3706_v32  ;;  %v14195_v17 = vld [vmem:[#allocation8 + $0x15c] ss:$24 sps:$4 sm:$0xff]  }
 0x2cc   : > { %6543 = vmatprep.subr.bf16.mxu1 %v11281_v20  ;;  %6262 = vmatprep.mubr.bf16.mxu0 %v14166_v42  ;;  %v14180_v20 = vld [vmem:[#allocation8 + $0x124] ss:$24 sps:$4 sm:$0xff]  }
 0x2cd   : > { %6375 = vmatprep.mubr.bf16.mxu1 %v12278_v1  ;;  %v14183_v1 = vld [vmem:[#allocation8 + $0x12c] ss:$24 sps:$4 sm:$0xff]  }
 0x2ce   : > { %6431 = vmatpush1.bf16.msra.mxu0 %v11534_v48  ;;  %v11630_v48 = vcombine.low %v3957_v24, %v3961_v27 }
 0x2cf   : > { %6544 = vmatpush1.bf16.msra.mxu1 %v11280_v50  ;;  %6432 = vmatprep.subr.bf16.mxu0 %v11655_v51  ;;  %v11376_v50 = vcombine.low %v3702_v31, %v3706_v32  ;;  %v11623_v51 = vcombine.high %v3949_v43, %v3953_v45  ;;  %v3925_v31 = vld [vmem:[#allocation11 + $0xa00] sm:$0xff] }
 0x2d0   : > { %6545 = vmatprep.subr.bf16.mxu1 %v11401_v52  ;;  %v11369_v52 = vcombine.high %v3694_v58, %v3698_v47  ;;  %v3929_v32 = vld [vmem:[#allocation11 + $0xa20] sm:$0xff] }
 0x2d1   : > { %6263 = vmatmul.mubr.bf16.gmra.mxu0 %v14170_v2 }
 0x2d2   : > { %6376 = vmatmul.mubr.bf16.gmra.mxu1 %v12281_v5  ;;  %6433 = vmatpush2.bf16.msra.mxu0 %v11654_v7  ;;  %v3690_v5 = vld [vmem:[#allocation11 + $0x2a8] sm:$0xff] }
 0x2d3   : > { %6546 = vmatpush2.bf16.msra.mxu1 %v11400_v30  ;;  %6434 = vmatprep.subr.bf16.mxu0 %v11647_v9  ;;  %v14190_v7 = vld [vmem:[#allocation8 + $0x128] ss:$24 sps:$4 sm:$0xff]   ;;  %v11622_v30 = vcombine.low %v3949_v43, %v3953_v45  ;;  %v11368_v9 = vcombine.low %v3694_v58, %v3698_v47  ;;  %v11361_v13 = vcombine.high %v3686_v16, %v3690_v5 }
 0x2d4   : > { %6547 = vmatprep.subr.bf16.mxu1 %v11393_v10  ;;  %6272 = vmatprep.mubr.bf16.mxu0 %v14172_v12  ;;  %v11615_v10 = vcombine.high %v3941_v61, %v3945_v62  ;;  %v11599_v58 = vcombine.high %v3925_v31, %v3929_v32 }
 0x2d5   : > { %6385 = vmatprep.mubr.bf16.mxu1 %v12284_v15  ;;  %v3933_v15 = vld [vmem:[#allocation11 + $0xa40] sm:$0xff] }
 0x2d6   : > { %6435 = vmatpush2.bf16.msra.mxu0 %v11646_v18  ;;  %v3678_v18 = vld [vmem:[#allocation11 + $0x248] sm:$0xff]  ;;  %v11607_v24 = vcombine.high %v3933_v15, %v3937_v28  ;;  %v11606_v43 = vcombine.low %v3933_v15, %v3937_v28 }
 0x2d7   : > { %6548 = vmatpush2.bf16.msra.mxu1 %v11392_v21  ;;  %6436 = vmatprep.subr.bf16.mxu0 %v11639_v22  ;;  %v3682_v21 = vld [vmem:[#allocation11 + $0x268] sm:$0xff]  ;;  %v11614_v22 = vcombine.low %v3941_v61, %v3945_v62  ;;  %v11598_v62 = vcombine.low %v3925_v31, %v3929_v32  ;;  %v14216_v31 = vld [vmem:[#allocation8 + $0x44] ss:$24 sps:$4 sm:$0xff]  }
 0x2d8   : > { %6549 = vmatprep.subr.bf16.mxu1 %v11385_v23  ;;  %v11360_v23 = vcombine.low %v3686_v16, %v3690_v5  ;;  %v11353_v27 = vcombine.high %v3678_v18, %v3682_v21  ;;  %v11352_v45 = vcombine.low %v3678_v18, %v3682_v21  ;;  %v3922_v61 = vld [vmem:[#allocation11 + $0x9e8] sm:$0xff]  ;;  %v16053_v5 = vsub.s32 6, %v14073_v44 }
 0x2d9   : > { %6273 = vmatmul.mubr.bf16.gmra.mxu0 %v14176_v29  ;;  %v14210_v15 = vld [vmem:[#allocation8 + $0x10] ss:$24 sps:$4 sm:$0xff]  }
 0x2da   : > { %6386 = vmatmul.mubr.bf16.gmra.mxu1 %v14178_v34  ;;  %6437 = vmatpush2.bf16.msra.mxu0 %v11638_v56  ;;  %v14200_v56 = vld [vmem:[#allocation8 + $0x150] ss:$24 sps:$4 sm:$0xff]  }
 0x2db   : > { %6550 = vmatpush2.bf16.msra.mxu1 %v11384_v37  ;;  %6438 = vmatprep.subr.bf16.mxu0 %v11631_v39  ;;  %v3670_v37 = vld [vmem:[#allocation11 + $0x208] sm:$0xff] }
 0x2dc   : > { %6551 = vmatprep.subr.bf16.mxu1 %v11377_v41  ;;  %6282 = vmatprep.mubr.bf16.mxu0 %v14180_v20  ;;  %v3674_v39 = vld [vmem:[#allocation11 + $0x228] sm:$0xff]  ;;  %v14202_v41 = vld [vmem:[#allocation8 + $0x158] ss:$24 sps:$4 sm:$0xff]  }
 0x2dd   : > { %6395 = vmatprep.mubr.bf16.mxu1 %v14183_v1  ;;  %v11345_v47 = vcombine.high %v3670_v37, %v3674_v39  ;;  %v11344_v16 = vcombine.low %v3670_v37, %v3674_v39  ;;  %v3910_v28 = vld [vmem:[#allocation11 + $0x988] sm:$0xff] }
 0x2de   : > { %6439 = vmatpush2.bf16.msra.mxu0 %v11630_v48  ;;  %v14204_v48 = vld [vmem:[#allocation8 + $0x14] ss:$24 sps:$4 sm:$0xff]  }
 0x2df   : > { %6552 = vmatpush2.bf16.msra.mxu1 %v11376_v50  ;;  %6440 = vmatprep.subr.bf16.mxu0 %v11623_v51  ;;  %v3790_v50 = vld [vmem:[#allocation11 + $0x5c8] sm:$0xff] }
 0x2e0   : > { %6553 = vmatprep.subr.bf16.mxu1 %v11369_v52  ;;  %v3794_v51 = vld [vmem:[#allocation11 + $0x5e8] sm:$0xff] }
 0x2e1   : > { %6283 = vmatmul.mubr.bf16.gmra.mxu0 %v14188_v19  ;;  %v3918_v52 = vld [vmem:[#allocation11 + $0x9c8] sm:$0xff]  ;;  %v11464_v21 = vcombine.low %v3790_v50, %v3794_v51 }
 0x2e2   : > { %6396 = vmatmul.mubr.bf16.gmra.mxu1 %v14190_v7  ;;  %6441 = vmatpush2.bf16.msra.mxu0 %v11622_v30  ;;  %v11465_v30 = vcombine.high %v3790_v50, %v3794_v51  ;;  %v3914_v18 = vld [vmem:[#allocation11 + $0x9a8] sm:$0xff] }
 0x2e3   : > { %6554 = vmatpush2.bf16.msra.mxu1 %v11368_v9  ;;  %6442 = vmatprep.subr.bf16.mxu0 %v11615_v10  ;;  %v11593_v9 = vcombine.high %v3918_v52, %v3922_v61  ;;  %v3782_v10 = vld [vmem:[#allocation11 + $0x588] sm:$0xff]  ;;  %v11584_v51 = vcombine.low %v3910_v28, %v3914_v18 }
 0x2e4   : > { %6555 = vmatprep.subr.bf16.mxu1 %v11361_v13  ;;  %6292 = vmatprep.mubr.bf16.mxu0 %v14192_v14  ;;  %v3786_v13 = vld [vmem:[#allocation11 + $0x5a8] sm:$0xff] }
 0x2e5   : > { %6405 = vmatprep.mubr.bf16.mxu1 %v14195_v17  ;;  %v3774_v32 = vld [vmem:[#allocation11 + $0x548] sm:$0xff] }
 0x2e6   : > { %6443 = vmatpush2.bf16.msra.mxu0 %v11614_v22  ;;  %v1080_v22 = vrot.slane %v14138_v4, %v16053_v5  ;;  %v3778_v37 = vld [vmem:[#allocation11 + $0x568] sm:$0xff]  ;;  %v11456_v4 = vcombine.low %v3782_v10, %v3786_v13 }
 0x2e7   : > { %6556 = vmatpush2.bf16.msra.mxu1 %v11360_v23  ;;  %6444 = vmatprep.subr.bf16.mxu0 %v11607_v24  ;;  %v11592_v23 = vcombine.low %v3918_v52, %v3922_v61  ;;  %v11457_v24 = vcombine.high %v3782_v10, %v3786_v13  ;;  %v11449_v52 = vcombine.high %v3774_v32, %v3778_v37  ;;  %v3894_v10 = vld [vmem:[#allocation11 + $0x908] sm:$0xff] }
 0x2e8   : > { %6557 = vmatprep.subr.bf16.mxu1 %v11353_v27  ;;  %v11585_v27 = vcombine.high %v3910_v28, %v3914_v18  ;;  %v3898_v13 = vld [vmem:[#allocation11 + $0x928] sm:$0xff]  ;;  %v11448_v18 = vcombine.low %v3774_v32, %v3778_v37 }
 0x2e9   : > { %6293 = vmatmul.mubr.bf16.gmra.mxu0 %v14200_v56  ;;  %v11568_v37 = vcombine.low %v3894_v10, %v3898_v13 }
 0x2ea   : > { %6406 = vmatmul.mubr.bf16.gmra.mxu1 %v14202_v41  ;;  %6445 = vmatpush2.bf16.msra.mxu0 %v11606_v43  ;;  %v3906_v43 = vld [vmem:[#allocation11 + $0x968] sm:$0xff] }
 0x2eb   : > { %6558 = vmatpush2.bf16.msra.mxu1 %v11352_v45  ;;  %6446 = vmatprep.subr.bf16.mxu0 %v11599_v58 }
 0x2ec   : > { %6559 = vmatprep.subr.bf16.mxu1 %v11345_v47  ;;  %6448 = vmatprep.mubr.bf16.mxu0 %v14204_v48 }
 0x2ed   : > { %6561 = vmatprep.mubr.bf16.mxu1 %v14120_v26  ;;  %v3902_v26 = vld [vmem:[#allocation11 + $0x948] sm:$0xff] }
 0x2ee   : > { %6447 = vmatpush2.bf16.msra.mxu0 %v11598_v62 }
 0x2ef   : > { %6560 = vmatpush2.bf16.msra.mxu1 %v11344_v16  ;;  %6642 = vmatprep.subr.bf16.mxu0 %v11465_v30  ;;  %v3766_v16 = vld [vmem:[#allocation11 + $0x508] sm:$0xff] }
 0x2f0   : > { %6755 = vmatprep.subr.bf16.mxu1 %v11593_v9  ;;  %v14232_v9 = vld [vmem:[#allocation8 + $0x40] ss:$24 sps:$4 sm:$0xff]  }
 0x2f1   : > { %v3375_v39 = vpop.f32.mrf.mxu0  ;;  %6449 = vmatmul.mubr.bf16.vlgmr.msra.gmra.mxu0 %v14210_v15 }
 0x2f2   : > { %v14220_v45 = vadd.f32 %v3375_v39, %v14147_v25  ;;  %v3416_v58 = vpop.f32.mrf.mxu1  ;;  %6562 = vmatmul.mubr.bf16.vlgmr.msra.gmra.mxu1 %v14136_v63  ;;  %6643 = vmatpush1.bf16.msra.mxu0 %v11464_v21  ;;  %v11577_v25 = vcombine.high %v3902_v26, %v3906_v43  ;;  %v3770_v63 = vld [vmem:[#allocation11 + $0x528] sm:$0xff]  ;;  %v11576_v21 = vcombine.low %v3902_v26, %v3906_v43 }
 0x2f3   : > { %v14223_v47 = vadd.f32 %v3416_v58, %v1080_v22  ;;  %6756 = vmatpush1.bf16.msra.mxu1 %v11592_v23  ;;  %v3377_v50 = vpop.f32.mrf.mxu0  ;;  %6644 = vmatprep.subr.bf16.mxu0 %v11457_v24  ;;  %v11441_v22 = vcombine.high %v3766_v16, %v3770_v63  ;;  %v11569_v24 = vcombine.high %v3894_v10, %v3898_v13  ;;  %v3758_v39 = vld [vmem:[#allocation11 + $0x4c8] sm:$0xff]  ;;  %v14242_v13 = vld [vmem:[#allocation8 + $0xa4] ss:$24 sps:$4 sm:$0xff]  }
 0x2f4   : > { %16207 = vst [vmem:[#allocation51_spill] sm:$0xff] %v14220_v45  ;;  %v14226_v61 = vadd.f32 %v3377_v50, %v14152_v38  ;;  %v14228_v62 = vpop.f32.mrf.mxu1  ;;  %6757 = vmatprep.subr.bf16.mxu1 %v11585_v27  ;;  %6458 = vmatprep.mubr.bf16.mxu0 %v14216_v31  ;;  %v14234_v27 = vld [vmem:[#allocation8 + $0x74] ss:$24 sps:$4 sm:$0xff]   ;;  %v11440_v32 = vcombine.low %v3766_v16, %v3770_v63 }
 0x2f5   : > { %v3379_v30 = vpop.f32.mrf.mxu0  ;;  %6571 = vmatprep.mubr.bf16.mxu1 %v14144_v11  ;;  %v3762_v58 = vld [vmem:[#allocation11 + $0x4e8] sm:$0xff]  ;;  %v3951_v45 = vld [vmem:[#allocation11 + $0xad0] sm:$0xff] }
 0x2f6   : > { %v3420_v28 = vpop.f32.mrf.mxu1  ;;  %6645 = vmatpush1.bf16.msra.mxu0 %v11456_v4  ;;  %v3886_v11 = vld [vmem:[#allocation11 + $0x8c8] sm:$0xff]  ;;  %v11433_v26 = vcombine.high %v3758_v39, %v3762_v58 }
 0x2f7   : > { %6758 = vmatpush1.bf16.msra.mxu1 %v11584_v51  ;;  %v3380_v38 = vpop.f32.mrf.mxu0  ;;  %6646 = vmatprep.subr.bf16.mxu0 %v11449_v52  ;;  %v3890_v50 = vld [vmem:[#allocation11 + $0x8e8] sm:$0xff] }
 0x2f8   : > { %v3421_v23 = vpop.f32.mrf.mxu1  ;;  %6759 = vmatprep.subr.bf16.mxu1 %v11577_v25  ;;  %v11561_v43 = vcombine.high %v3886_v11, %v3890_v50  ;;  %v3750_v4 = vld [vmem:[#allocation11 + $0x488] sm:$0xff]  ;;  %v11560_v16 = vcombine.low %v3886_v11, %v3890_v50  ;;  %v14248_v11 = vld [vmem:[#allocation8 + $0xa0] ss:$24 sps:$4 sm:$0xff]  }
 0x2f9   : > { %6459 = vmatmul.mubr.bf16.gmra.mxu0 %v14232_v9  ;;  %v3754_v51 = vld [vmem:[#allocation11 + $0x4a8] sm:$0xff] }
 0x2fa   : > { %6572 = vmatmul.mubr.bf16.gmra.mxu1 %v14150_v36  ;;  %6647 = vmatpush1.bf16.msra.mxu0 %v11448_v18  ;;  %v14240_v52 = vld [vmem:[#allocation8 + $0x70] ss:$24 sps:$4 sm:$0xff]   ;;  %v11432_v36 = vcombine.low %v3758_v39, %v3762_v58  ;;  %v11425_v63 = vcombine.high %v3750_v4, %v3754_v51 }
 0x2fb   : > { %6760 = vmatpush1.bf16.msra.mxu1 %v11576_v21  ;;  %6648 = vmatprep.subr.bf16.mxu0 %v11441_v22  ;;  %v3878_v25 = vld [vmem:[#allocation11 + $0x888] sm:$0xff]  ;;  %v11424_v21 = vcombine.low %v3750_v4, %v3754_v51 }
 0x2fc   : > { %6761 = vmatprep.subr.bf16.mxu1 %v11569_v24  ;;  %6468 = vmatprep.mubr.bf16.mxu0 %v14234_v27  ;;  %v3882_v30 = vld [vmem:[#allocation11 + $0x8a8] sm:$0xff] }
 0x2fd   : > { %6581 = vmatprep.mubr.bf16.mxu1 %v14154_v33  ;;  %v11553_v10 = vcombine.high %v3878_v25, %v3882_v30  ;;  %v3742_v28 = vld [vmem:[#allocation11 + $0x448] sm:$0xff]  ;;  %v11552_v22 = vcombine.low %v3878_v25, %v3882_v30 }
 0x2fe   : > { %6649 = vmatpush1.bf16.msra.mxu0 %v11440_v32  ;;  %v3746_v18 = vld [vmem:[#allocation11 + $0x468] sm:$0xff] }
 0x2ff   : > { %6762 = vmatpush1.bf16.msra.mxu1 %v11568_v37  ;;  %6650 = vmatprep.subr.bf16.mxu0 %v11433_v26  ;;  %v3870_v38 = vld [vmem:[#allocation11 + $0x848] sm:$0xff]  ;;  %v11417_v23 = vcombine.high %v3742_v28, %v3746_v18 }
 0x300   : > { %6763 = vmatprep.subr.bf16.mxu1 %v11561_v43  ;;  %v3874_v33 = vld [vmem:[#allocation11 + $0x868] sm:$0xff] }
 0x301   : > { %6469 = vmatmul.mubr.bf16.gmra.mxu0 %v14240_v52  ;;  %v11545_v24 = vcombine.high %v3870_v38, %v3874_v33  ;;  %v3734_v39 = vld [vmem:[#allocation11 + $0x408] sm:$0xff]  ;;  %v11544_v37 = vcombine.low %v3870_v38, %v3874_v33 }
 0x302   : > { %6582 = vmatmul.mubr.bf16.gmra.mxu1 %v14158_v6  ;;  %6651 = vmatpush1.bf16.msra.mxu0 %v11432_v36  ;;  %v3738_v58 = vld [vmem:[#allocation11 + $0x428] sm:$0xff]  ;;  %v11416_v6 = vcombine.low %v3742_v28, %v3746_v18 }
 0x303   : > { %6764 = vmatpush1.bf16.msra.mxu1 %v11560_v16  ;;  %6652 = vmatprep.subr.bf16.mxu0 %v11425_v63  ;;  %v3862_v50 = vld [vmem:[#allocation11 + $0x808] sm:$0xff]  ;;  %v11409_v26 = vcombine.high %v3734_v39, %v3738_v58  ;;  %v11408_v36 = vcombine.low %v3734_v39, %v3738_v58  ;;  %v14258_v39 = vld [vmem:[#allocation8 + $0x104] ss:$24 sps:$4 sm:$0xff]  }
 0x304   : > { %6765 = vmatprep.subr.bf16.mxu1 %v11553_v10  ;;  %6478 = vmatprep.mubr.bf16.mxu0 %v14242_v13  ;;  %v3866_v32 = vld [vmem:[#allocation11 + $0x828] sm:$0xff] }
 0x305   : > { %6591 = vmatprep.mubr.bf16.mxu1 %v14160_v59  ;;  %v11537_v43 = vcombine.high %v3862_v50, %v3866_v32  ;;  %v14250_v4 = vld [vmem:[#allocation8 + $0xd4] ss:$24 sps:$4 sm:$0xff]   ;;  %v11536_v16 = vcombine.low %v3862_v50, %v3866_v32  ;;  %v14256_v38 = vld [vmem:[#allocation8 + $0xd0] ss:$24 sps:$4 sm:$0xff]  }
 0x306   : > { %6653 = vmatpush1.bf16.msra.mxu0 %v11424_v21  ;;  %v3854_v51 = vld [vmem:[#allocation11 + $0x7c8] sm:$0xff] }
 0x307   : > { %6766 = vmatpush1.bf16.msra.mxu1 %v11552_v22  ;;  %6654 = vmatprep.subr.bf16.mxu0 %v11417_v23  ;;  %v3858_v25 = vld [vmem:[#allocation11 + $0x7e8] sm:$0xff] }
 0x308   : > { %6767 = vmatprep.subr.bf16.mxu1 %v11545_v24  ;;  %v3982_v30 = vld [vmem:[#allocation11 + $0xbc8] sm:$0xff]  ;;  %v11529_v63 = vcombine.high %v3854_v51, %v3858_v25 }
 0x309   : > { %6479 = vmatmul.mubr.bf16.gmra.mxu0 %v14248_v11  ;;  %v3986_v59 = vld [vmem:[#allocation11 + $0xbe8] sm:$0xff] }
 0x30a   : > { %6592 = vmatmul.mubr.bf16.gmra.mxu1 %v14164_v55  ;;  %6655 = vmatpush1.bf16.msra.mxu0 %v11416_v6  ;;  %v11657_v10 = vcombine.high %v3982_v30, %v3986_v59  ;;  %v3846_v28 = vld [vmem:[#allocation11 + $0x788] sm:$0xff]  ;;  %v11528_v55 = vcombine.low %v3854_v51, %v3858_v25  ;;  %v11656_v22 = vcombine.low %v3982_v30, %v3986_v59  ;;  %v14264_v30 = vld [vmem:[#allocation8 + $0x100] ss:$24 sps:$4 sm:$0xff]  }
 0x30b   : > { %6768 = vmatpush1.bf16.msra.mxu1 %v11544_v37  ;;  %6656 = vmatprep.subr.bf16.mxu0 %v11409_v26  ;;  %v3850_v18 = vld [vmem:[#allocation11 + $0x7a8] sm:$0xff] }
 0x30c   : > { %6769 = vmatprep.subr.bf16.mxu1 %v11537_v43  ;;  %6488 = vmatprep.mubr.bf16.mxu0 %v14250_v4  ;;  %v3974_v33 = vld [vmem:[#allocation11 + $0xb88] sm:$0xff]  ;;  %v11521_v23 = vcombine.high %v3846_v28, %v3850_v18  ;;  %v11520_v6 = vcombine.low %v3846_v28, %v3850_v18 }
 0x30d   : > { %6601 = vmatprep.mubr.bf16.mxu1 %v14166_v42  ;;  %v3978_v21 = vld [vmem:[#allocation11 + $0xba8] sm:$0xff] }
 0x30e   : > { %6657 = vmatpush1.bf16.msra.mxu0 %v11408_v36  ;;  %v11649_v24 = vcombine.high %v3974_v33, %v3978_v21  ;;  %v3838_v58 = vld [vmem:[#allocation11 + $0x748] sm:$0xff]  ;;  %v11648_v37 = vcombine.low %v3974_v33, %v3978_v21 }
 0x30f   : > { %6770 = vmatpush1.bf16.msra.mxu1 %v11536_v16  ;;  %6658 = vmatprep.subr.bf16.mxu0 %v11529_v63  ;;  %v3842_v50 = vld [vmem:[#allocation11 + $0x768] sm:$0xff] }
 0x310   : > { %6771 = vmatprep.subr.bf16.mxu1 %v11657_v10  ;;  %v3966_v32 = vld [vmem:[#allocation11 + $0xb48] sm:$0xff]  ;;  %v11513_v26 = vcombine.high %v3838_v58, %v3842_v50 }
 0x311   : > { %6489 = vmatmul.mubr.bf16.gmra.mxu0 %v14256_v38  ;;  %v3970_v42 = vld [vmem:[#allocation11 + $0xb68] sm:$0xff] }
 0x312   : > { %6602 = vmatmul.mubr.bf16.gmra.mxu1 %v14170_v2  ;;  %6659 = vmatpush2.bf16.msra.mxu0 %v11528_v55  ;;  %v11641_v43 = vcombine.high %v3966_v32, %v3970_v42  ;;  %v3830_v51 = vld [vmem:[#allocation11 + $0x708] sm:$0xff]  ;;  %v11512_v2 = vcombine.low %v3838_v58, %v3842_v50  ;;  %v11640_v16 = vcombine.low %v3966_v32, %v3970_v42 }
 0x313   : > { %6772 = vmatpush2.bf16.msra.mxu1 %v11656_v22  ;;  %6660 = vmatprep.subr.bf16.mxu0 %v11521_v23  ;;  %v3834_v25 = vld [vmem:[#allocation11 + $0x728] sm:$0xff] }
 0x314   : > { %6773 = vmatprep.subr.bf16.mxu1 %v11649_v24  ;;  %6498 = vmatprep.mubr.bf16.mxu0 %v14258_v39  ;;  %v3958_v59 = vld [vmem:[#allocation11 + $0xb08] sm:$0xff]  ;;  %v11505_v63 = vcombine.high %v3830_v51, %v3834_v25  ;;  %v11504_v55 = vcombine.low %v3830_v51, %v3834_v25  ;;  %v14274_v51 = vld [vmem:[#allocation8 + $0x164] ss:$24 sps:$4 sm:$0xff]  }
 0x315   : > { %6611 = vmatprep.mubr.bf16.mxu1 %v14172_v12  ;;  %v3962_v36 = vld [vmem:[#allocation11 + $0xb28] sm:$0xff] }
 0x316   : > { %6661 = vmatpush2.bf16.msra.mxu0 %v11520_v6  ;;  %v11633_v10 = vcombine.high %v3958_v59, %v3962_v36  ;;  %v14266_v28 = vld [vmem:[#allocation8 + $0x134] ss:$24 sps:$4 sm:$0xff]   ;;  %v11632_v22 = vcombine.low %v3958_v59, %v3962_v36  ;;  %v14272_v32 = vld [vmem:[#allocation8 + $0x130] ss:$24 sps:$4 sm:$0xff]  }
 0x317   : > { %6774 = vmatpush2.bf16.msra.mxu1 %v11648_v37  ;;  %6662 = vmatprep.subr.bf16.mxu0 %v11513_v26  ;;  %v3822_v18 = vld [vmem:[#allocation11 + $0x6c8] sm:$0xff] }
 0x318   : > { %6775 = vmatprep.subr.bf16.mxu1 %v11641_v43  ;;  %v3826_v33 = vld [vmem:[#allocation11 + $0x6e8] sm:$0xff] }
 0x319   : > { %6499 = vmatmul.mubr.bf16.gmra.mxu0 %v14264_v30  ;;  %v3950_v21 = vld [vmem:[#allocation11 + $0xac8] sm:$0xff]  ;;  %v11497_v23 = vcombine.high %v3822_v18, %v3826_v33 }
 0x31a   : > { %v3954_v12 = vld [vmem:[#allocation11 + $0xae8] sm:$0xff]  ;;  %6612 = vmatmul.mubr.bf16.gmra.mxu1 %v14176_v29  ;;  %6663 = vmatpush2.bf16.msra.mxu0 %v11512_v2  ;;  %v11496_v29 = vcombine.low %v3822_v18, %v3826_v33 }
 0x31b   : > { %6776 = vmatpush2.bf16.msra.mxu1 %v11640_v16  ;;  %6664 = vmatprep.subr.bf16.mxu0 %v11505_v63  ;;  %v11625_v24 = vcombine.high %v3950_v21, %v3954_v12  ;;  %v3814_v58 = vld [vmem:[#allocation11 + $0x688] sm:$0xff]  ;;  %v11624_v37 = vcombine.low %v3950_v21, %v3954_v12  ;;  %v14280_v21 = vld [vmem:[#allocation8 + $0x160] ss:$24 sps:$4 sm:$0xff]  }
 0x31c   : > { %6777 = vmatprep.subr.bf16.mxu1 %v11633_v10  ;;  %6508 = vmatprep.mubr.bf16.mxu0 %v14266_v28  ;;  %v3818_v50 = vld [vmem:[#allocation11 + $0x6a8] sm:$0xff] }
 0x31d   : > { %6621 = vmatprep.mubr.bf16.mxu1 %v14180_v20  ;;  %v3942_v42 = vld [vmem:[#allocation11 + $0xa88] sm:$0xff]  ;;  %v11489_v26 = vcombine.high %v3814_v58, %v3818_v50  ;;  %v11488_v2 = vcombine.low %v3814_v58, %v3818_v50  ;;  %v3663_v58 = vld [vmem:[#allocation11 + $0x1d0] sm:$0xff] }
 0x31e   : > { %v3946_v6 = vld [vmem:[#allocation11 + $0xaa8] sm:$0xff]  ;;  %6665 = vmatpush2.bf16.msra.mxu0 %v11504_v55  ;;  %v3667_v50 = vld [vmem:[#allocation11 + $0x1f0] sm:$0xff] }
 0x31f   : > { %6778 = vmatpush2.bf16.msra.mxu1 %v11632_v22  ;;  %6666 = vmatprep.subr.bf16.mxu0 %v11497_v23  ;;  %v11617_v43 = vcombine.high %v3942_v42, %v3946_v6  ;;  %v3806_v25 = vld [vmem:[#allocation11 + $0x648] sm:$0xff]  ;;  %v11616_v16 = vcombine.low %v3942_v42, %v3946_v6  ;;  %v3791_v42 = vld [vmem:[#allocation11 + $0x5d0] sm:$0xff] }
 0x320   : > { %6779 = vmatprep.subr.bf16.mxu1 %v11625_v24  ;;  %v3810_v59 = vld [vmem:[#allocation11 + $0x668] sm:$0xff]  ;;  %v3795_v6 = vld [vmem:[#allocation11 + $0x5f0] sm:$0xff] }
 0x321   : > { %6509 = vmatmul.mubr.bf16.gmra.mxu0 %v14272_v32  ;;  %v3934_v36 = vld [vmem:[#allocation11 + $0xa48] sm:$0xff]  ;;  %v11481_v63 = vcombine.high %v3806_v25, %v3810_v59 }
 0x322   : > { %v3938_v20 = vld [vmem:[#allocation11 + $0xa68] sm:$0xff]  ;;  %6622 = vmatmul.mubr.bf16.gmra.mxu1 %v14188_v19  ;;  %6667 = vmatpush2.bf16.msra.mxu0 %v11496_v29  ;;  %v11480_v19 = vcombine.low %v3806_v25, %v3810_v59  ;;  %v11467_v25 = vcombine.high %v3791_v42, %v3795_v6  ;;  %v3655_v59 = vld [vmem:[#allocation11 + $0x190] sm:$0xff] }
 0x323   : > { %6780 = vmatpush2.bf16.msra.mxu1 %v11624_v37  ;;  %6668 = vmatprep.subr.bf16.mxu0 %v11489_v26  ;;  %v11609_v10 = vcombine.high %v3934_v36, %v3938_v20  ;;  %v3798_v18 = vld [vmem:[#allocation11 + $0x608] sm:$0xff]  ;;  %v11608_v22 = vcombine.low %v3934_v36, %v3938_v20  ;;  %v11339_v26 = vcombine.high %v3663_v58, %v3667_v50  ;;  %v3659_v36 = vld [vmem:[#allocation11 + $0x1b0] sm:$0xff] }
 0x324   : > { %6781 = vmatprep.subr.bf16.mxu1 %v11617_v43  ;;  %6518 = vmatprep.mubr.bf16.mxu0 %v14274_v51  ;;  %v3802_v33 = vld [vmem:[#allocation11 + $0x628] sm:$0xff]  ;;  %v3783_v20 = vld [vmem:[#allocation11 + $0x590] sm:$0xff] }
 0x325   : > { %6631 = vmatprep.mubr.bf16.mxu1 %v14192_v14  ;;  %v3926_v12 = vld [vmem:[#allocation11 + $0xa08] sm:$0xff]  ;;  %v11473_v23 = vcombine.high %v3798_v18, %v3802_v33  ;;  %v16054_v14 = vsub.s32 7, %v14073_v44  ;;  %v11472_v29 = vcombine.low %v3798_v18, %v3802_v33  ;;  %v11331_v18 = vcombine.high %v3655_v59, %v3659_v36 }
 0x326   : > { %v3930_v55 = vld [vmem:[#allocation11 + $0xa28] sm:$0xff]  ;;  %6669 = vmatpush2.bf16.msra.mxu0 %v11488_v2  ;;  %v3787_v2 = vld [vmem:[#allocation11 + $0x5b0] sm:$0xff] }
 0x327   : > { %6782 = vmatpush2.bf16.msra.mxu1 %v11616_v16  ;;  %6670 = vmatprep.subr.bf16.mxu0 %v11481_v63  ;;  %v11601_v24 = vcombine.high %v3926_v12, %v3930_v55  ;;  %v11600_v37 = vcombine.low %v3926_v12, %v3930_v55  ;;  %v14285_v43 = vld [vmem:[#allocation8 + $0xc] ss:$24 sps:$4 sm:$0xff]   ;;  %v11338_v63 = vcombine.low %v3663_v58, %v3667_v50  ;;  %v3647_v12 = vld [vmem:[#allocation11 + $0x150] sm:$0xff] }
 0x328   : > { %6783 = vmatprep.subr.bf16.mxu1 %v11609_v10  ;;  %v13170_v16 = vld [vmem:[#allocation13] sm:$0xff]  ;;  %v11466_v10 = vcombine.low %v3791_v42, %v3795_v6  ;;  %v11459_v33 = vcombine.high %v3783_v20, %v3787_v2  ;;  %v3651_v55 = vld [vmem:[#allocation11 + $0x170] sm:$0xff]  ;;  %v11330_v50 = vcombine.low %v3655_v59, %v3659_v36  ;;  %v11458_v6 = vcombine.low %v3783_v20, %v3787_v2 }
 0x329   : > { %6519 = vmatmul.mubr.bf16.gmra.mxu0 %v14280_v21  ;;  %v3767_v59 = vld [vmem:[#allocation11 + $0x510] sm:$0xff]  ;;  %v11322_v2 = vcombine.low %v3647_v12, %v3651_v55 }
 0x32a   : > { %6632 = vmatmul.mubr.bf16.gmra.mxu1 %v14200_v56  ;;  %6671 = vmatpush2.bf16.msra.mxu0 %v11480_v19  ;;  %v1084_v56 = vrot.slane %v13170_v16, %v16054_v14  ;;  %v3771_v36 = vld [vmem:[#allocation11 + $0x530] sm:$0xff] }
 0x32b   : > { %6784 = vmatpush2.bf16.msra.mxu1 %v11608_v22  ;;  %6672 = vmatprep.subr.bf16.mxu0 %v11473_v23  ;;  %v14291_v22 = vld [vmem:[#allocation8 + $0x8] ss:$24 sps:$4 sm:$0xff]   ;;  %v3779_v23 = vld [vmem:[#allocation11 + $0x570] sm:$0xff] }
 0x32c   : > { %6785 = vmatprep.subr.bf16.mxu1 %v11601_v24  ;;  %6674 = vmatprep.mubr.bf16.mxu0 %v14285_v43  ;;  %v3419_v24 = vadd.f32 %v14228_v62, %v1084_v56  ;;  %v3639_v62 = vld [vmem:[#allocation11 + $0x110] sm:$0xff] }
 0x32d   : > { %6787 = vmatprep.mubr.bf16.mxu1 %v14204_v48  ;;  %v3775_v48 = vld [vmem:[#allocation11 + $0x550] sm:$0xff] }
 0x32e   : > { %6673 = vmatpush2.bf16.msra.mxu0 %v11472_v29  ;;  %v3643_v56 = vld [vmem:[#allocation11 + $0x130] sm:$0xff] }
 0x32f   : > { %6786 = vmatpush2.bf16.msra.mxu1 %v11600_v37  ;;  %6868 = vmatprep.subr.bf16.mxu0 %v11339_v26  ;;  %v11323_v37 = vcombine.high %v3647_v12, %v3651_v55  ;;  %v11314_v12 = vcombine.low %v3639_v62, %v3643_v56  ;;  %v11442_v55 = vcombine.low %v3767_v59, %v3771_v36  ;;  %v3983_v14 = vld [vmem:[#allocation11 + $0xbd0] sm:$0xff] }
 0x330   : > { %6981 = vmatprep.subr.bf16.mxu1 %v11467_v25  ;;  %v14455_v44 = vld [vmem:[#allocation8 + $0xf0] ss:$24 sps:$4 sm:$0xff]  }
 0x331   : > { %v3457_v19 = vpop.f32.mrf.mxu0  ;;  %6675 = vmatmul.mubr.bf16.vlgmr.msra.gmra.mxu0 %v14291_v22 }
 0x332   : > { %v3458_v29 = vadd.f32 %v3457_v19, %v14223_v47  ;;  %v3498_v58 = vpop.f32.mrf.mxu1  ;;  %6788 = vmatmul.mubr.bf16.vlgmr.msra.gmra.mxu1 %v14210_v15  ;;  %6869 = vmatpush1.bf16.msra.mxu0 %v11338_v63  ;;  %v11451_v47 = vcombine.high %v3775_v48, %v3779_v23 }
 0x333   : > { %6982 = vmatpush1.bf16.msra.mxu1 %v11466_v10  ;;  %v3459_v42 = vpop.f32.mrf.mxu0  ;;  %6870 = vmatprep.subr.bf16.mxu0 %v11331_v18  ;;  %v11450_v18 = vcombine.low %v3775_v48, %v3779_v23  ;;  %v14309_v23 = vld [vmem:[#allocation8 + $0x6c] ss:$24 sps:$4 sm:$0xff]  }
 0x334   : > { %v14297_v26 = vadd.f32 %v3498_v58, %v3458_v29  ;;  %v3460_v25 = vadd.f32 %v3459_v42, %v3419_v24  ;;  %v3500_v16 = vpop.f32.mrf.mxu1  ;;  %6983 = vmatprep.subr.bf16.mxu1 %v11459_v33  ;;  %6684 = vmatprep.mubr.bf16.mxu0 %v14299_v35  ;;  %v11315_v33 = vcombine.high %v3639_v62, %v3643_v56  ;;  %v3631_v29 = vld [vmem:[#allocation11 + $0xd0] sm:$0xff] }
 0x335   : > { %v3461_v15 = vpop.f32.mrf.mxu0  ;;  %6797 = vmatprep.mubr.bf16.mxu1 %v14216_v31  ;;  %v11443_v24 = vcombine.high %v3767_v59, %v3771_v36  ;;  %v3635_v58 = vld [vmem:[#allocation11 + $0xf0] sm:$0xff] }
 0x336   : > { %16208 = vst [vmem:[#allocation52_spill] sm:$0xff] %v14297_v26  ;;  %v14303_v63 = vadd.f32 %v3500_v16, %v3460_v25  ;;  %v3502_v20 = vpop.f32.mrf.mxu1  ;;  %6871 = vmatpush1.bf16.msra.mxu0 %v11330_v50  ;;  %v14305_v42 = vld [vmem:[#allocation8 + $0x38] ss:$24 sps:$4 sm:$0xff]   ;;  %v11307_v48 = vcombine.high %v3631_v29, %v3635_v58 }
 0x337   : > { %6984 = vmatpush1.bf16.msra.mxu1 %v11458_v6  ;;  %v3462_v10 = vpop.f32.mrf.mxu0  ;;  %6872 = vmatprep.subr.bf16.mxu0 %v11323_v37  ;;  %v3759_v31 = vld [vmem:[#allocation11 + $0x4d0] sm:$0xff]  ;;  %v14313_v20 = vld [vmem:[#allocation8 + $0x68] ss:$24 sps:$4 sm:$0xff]  }
 0x338   : > { %v3503_v19 = vpop.f32.mrf.mxu1  ;;  %6985 = vmatprep.subr.bf16.mxu1 %v11451_v47  ;;  %v3763_v25 = vld [vmem:[#allocation11 + $0x4f0] sm:$0xff]  ;;  %v14435_v26 = vld [vmem:[#allocation8 + $0xc0] ss:$24 sps:$4 sm:$0xff]  }
 0x339   : > { %6685 = vmatmul.mubr.bf16.gmra.mxu0 %v14305_v42  ;;  %v11435_v50 = vcombine.high %v3759_v31, %v3763_v25  ;;  %v3623_v6 = vld [vmem:[#allocation11 + $0x90] sm:$0xff]  ;;  %v11434_v62 = vcombine.low %v3759_v31, %v3763_v25 }
 0x33a   : > { %6798 = vmatmul.mubr.bf16.gmra.mxu1 %v14232_v9  ;;  %6873 = vmatpush1.bf16.msra.mxu0 %v11322_v2  ;;  %v3627_v37 = vld [vmem:[#allocation11 + $0xb0] sm:$0xff]  ;;  %v11306_v9 = vcombine.low %v3631_v29, %v3635_v58 }
 0x33b   : > { %6986 = vmatpush1.bf16.msra.mxu1 %v11450_v18  ;;  %6874 = vmatprep.subr.bf16.mxu0 %v11315_v33  ;;  %v3751_v16 = vld [vmem:[#allocation11 + $0x490] sm:$0xff]  ;;  %v11299_v56 = vcombine.high %v3623_v6, %v3627_v37 }
 0x33c   : > { %6987 = vmatprep.subr.bf16.mxu1 %v11443_v24  ;;  %6694 = vmatprep.mubr.bf16.mxu0 %v14309_v23  ;;  %v3755_v47 = vld [vmem:[#allocation11 + $0x4b0] sm:$0xff] }
 0x33d   : > { %6807 = vmatprep.mubr.bf16.mxu1 %v14234_v27  ;;  %v11427_v15 = vcombine.high %v3751_v16, %v3755_v47  ;;  %v3615_v59 = vld [vmem:[#allocation11 + $0x50] sm:$0xff]  ;;  %v11298_v27 = vcombine.low %v3623_v6, %v3627_v37  ;;  %v11426_v18 = vcombine.low %v3751_v16, %v3755_v47 }
 0x33e   : > { %6875 = vmatpush1.bf16.msra.mxu0 %v11314_v12  ;;  %v3619_v36 = vld [vmem:[#allocation11 + $0x70] sm:$0xff] }
 0x33f   : > { %6988 = vmatpush1.bf16.msra.mxu1 %v11442_v55  ;;  %6876 = vmatprep.subr.bf16.mxu0 %v11307_v48  ;;  %v3743_v2 = vld [vmem:[#allocation11 + $0x450] sm:$0xff]  ;;  %v11291_v33 = vcombine.high %v3615_v59, %v3619_v36 }
 0x340   : > { %6989 = vmatprep.subr.bf16.mxu1 %v11435_v50  ;;  %v3747_v10 = vld [vmem:[#allocation11 + $0x470] sm:$0xff] }
 0x341   : > { %6695 = vmatmul.mubr.bf16.gmra.mxu0 %v14313_v20  ;;  %v14317_v19 = vld [vmem:[#allocation8 + $0x9c] ss:$24 sps:$4 sm:$0xff]   ;;  %v11419_v24 = vcombine.high %v3743_v2, %v3747_v10  ;;  %v11418_v12 = vcombine.low %v3743_v2, %v3747_v10  ;;  %v14321_v37 = vld [vmem:[#allocation8 + $0x98] ss:$24 sps:$4 sm:$0xff]  }
 0x342   : > { %6808 = vmatmul.mubr.bf16.gmra.mxu1 %v14240_v52  ;;  %6877 = vmatpush1.bf16.msra.mxu0 %v11306_v9  ;;  %v3607_v29 = vld [vmem:[#allocation11 + $0x10] sm:$0xff]  ;;  %v11290_v52 = vcombine.low %v3615_v59, %v3619_v36 }
 0x343   : > { %6990 = vmatpush1.bf16.msra.mxu1 %v11434_v62  ;;  %6878 = vmatprep.subr.bf16.mxu0 %v11299_v56  ;;  %v3611_v58 = vld [vmem:[#allocation11 + $0x30] sm:$0xff]  ;;  %v14325_v56 = vld [vmem:[#allocation8 + $0xcc] ss:$24 sps:$4 sm:$0xff]  }
 0x344   : > { %6991 = vmatprep.subr.bf16.mxu1 %v11427_v15  ;;  %6704 = vmatprep.mubr.bf16.mxu0 %v14317_v19  ;;  %v3735_v31 = vld [vmem:[#allocation11 + $0x410] sm:$0xff]  ;;  %v11283_v55 = vcombine.high %v3607_v29, %v3611_v58 }
 0x345   : > { %6817 = vmatprep.mubr.bf16.mxu1 %v14242_v13  ;;  %v3739_v25 = vld [vmem:[#allocation11 + $0x430] sm:$0xff]  ;;  %v11282_v13 = vcombine.low %v3607_v29, %v3611_v58  ;;  %v14329_v58 = vld [vmem:[#allocation8 + $0xc8] ss:$24 sps:$4 sm:$0xff]  }
 0x346   : > { %6879 = vmatpush1.bf16.msra.mxu0 %v11298_v27  ;;  %v11411_v48 = vcombine.high %v3735_v31, %v3739_v25  ;;  %v3727_v50 = vld [vmem:[#allocation11 + $0x3d0] sm:$0xff]  ;;  %v11410_v9 = vcombine.low %v3735_v31, %v3739_v25 }
 0x347   : > { %6992 = vmatpush1.bf16.msra.mxu1 %v11426_v18  ;;  %6880 = vmatprep.subr.bf16.mxu0 %v11291_v33  ;;  %v3731_v6 = vld [vmem:[#allocation11 + $0x3f0] sm:$0xff] }
 0x348   : > { %6993 = vmatprep.subr.bf16.mxu1 %v11419_v24  ;;  %v3855_v16 = vld [vmem:[#allocation11 + $0x7d0] sm:$0xff]  ;;  %v11403_v62 = vcombine.high %v3727_v50, %v3731_v6 }
 0x349   : > { %6705 = vmatmul.mubr.bf16.gmra.mxu0 %v14321_v37  ;;  %v3859_v47 = vld [vmem:[#allocation11 + $0x7f0] sm:$0xff] }
 0x34a   : > { %6818 = vmatmul.mubr.bf16.gmra.mxu1 %v14248_v11  ;;  %6881 = vmatpush1.bf16.msra.mxu0 %v11290_v52  ;;  %v11531_v15 = vcombine.high %v3855_v16, %v3859_v47  ;;  %v3719_v59 = vld [vmem:[#allocation11 + $0x390] sm:$0xff]  ;;  %v11402_v11 = vcombine.low %v3727_v50, %v3731_v6  ;;  %v11530_v27 = vcombine.low %v3855_v16, %v3859_v47 }
 0x34b   : > { %6994 = vmatpush1.bf16.msra.mxu1 %v11418_v12  ;;  %6882 = vmatprep.subr.bf16.mxu0 %v11283_v55  ;;  %v3723_v36 = vld [vmem:[#allocation11 + $0x3b0] sm:$0xff] }
 0x34c   : > { %6995 = vmatprep.subr.bf16.mxu1 %v11411_v48  ;;  %6714 = vmatprep.mubr.bf16.mxu0 %v14325_v56  ;;  %v3847_v2 = vld [vmem:[#allocation11 + $0x790] sm:$0xff]  ;;  %v11395_v18 = vcombine.high %v3719_v59, %v3723_v36 }
 0x34d   : > { %6827 = vmatprep.mubr.bf16.mxu1 %v14250_v4  ;;  %v3851_v10 = vld [vmem:[#allocation11 + $0x7b0] sm:$0xff]  ;;  %v11394_v4 = vcombine.low %v3719_v59, %v3723_v36 }
 0x34e   : > { %6883 = vmatpush1.bf16.msra.mxu0 %v11282_v13  ;;  %v11523_v33 = vcombine.high %v3847_v2, %v3851_v10  ;;  %v3711_v24 = vld [vmem:[#allocation11 + $0x350] sm:$0xff]  ;;  %v11522_v52 = vcombine.low %v3847_v2, %v3851_v10 }
 0x34f   : > { %6996 = vmatpush1.bf16.msra.mxu1 %v11410_v9  ;;  %6884 = vmatprep.subr.bf16.mxu0 %v11403_v62  ;;  %v3715_v29 = vld [vmem:[#allocation11 + $0x370] sm:$0xff] }
 0x350   : > { %6997 = vmatprep.subr.bf16.mxu1 %v11531_v15  ;;  %v3839_v31 = vld [vmem:[#allocation11 + $0x750] sm:$0xff]  ;;  %v11387_v12 = vcombine.high %v3711_v24, %v3715_v29 }
 0x351   : > { %6715 = vmatmul.mubr.bf16.gmra.mxu0 %v14329_v58  ;;  %v3843_v25 = vld [vmem:[#allocation11 + $0x770] sm:$0xff] }
 0x352   : > { %6828 = vmatmul.mubr.bf16.gmra.mxu1 %v14256_v38  ;;  %6885 = vmatpush2.bf16.msra.mxu0 %v11402_v11  ;;  %v14333_v55 = vld [vmem:[#allocation8 + $0xfc] ss:$24 sps:$4 sm:$0xff]   ;;  %v11515_v48 = vcombine.high %v3839_v31, %v3843_v25  ;;  %v11386_v38 = vcombine.low %v3711_v24, %v3715_v29  ;;  %v11514_v13 = vcombine.low %v3839_v31, %v3843_v25 }
 0x353   : > { %6998 = vmatpush2.bf16.msra.mxu1 %v11530_v27  ;;  %6886 = vmatprep.subr.bf16.mxu0 %v11395_v18  ;;  %v3703_v50 = vld [vmem:[#allocation11 + $0x310] sm:$0xff] }
 0x354   : > { %6999 = vmatprep.subr.bf16.mxu1 %v11523_v33  ;;  %6724 = vmatprep.mubr.bf16.mxu0 %v14333_v55  ;;  %v3707_v6 = vld [vmem:[#allocation11 + $0x330] sm:$0xff] }
 0x355   : > { %6837 = vmatprep.mubr.bf16.mxu1 %v14258_v39  ;;  %v3831_v16 = vld [vmem:[#allocation11 + $0x710] sm:$0xff]  ;;  %v11379_v9 = vcombine.high %v3703_v50, %v3707_v6  ;;  %v11378_v39 = vcombine.low %v3703_v50, %v3707_v6 }
 0x356   : > { %v3835_v47 = vld [vmem:[#allocation11 + $0x730] sm:$0xff]  ;;  %6887 = vmatpush2.bf16.msra.mxu0 %v11394_v4 }
 0x357   : > { %7000 = vmatpush2.bf16.msra.mxu1 %v11522_v52  ;;  %6888 = vmatprep.subr.bf16.mxu0 %v11387_v12  ;;  %v11507_v62 = vcombine.high %v3831_v16, %v3835_v47  ;;  %v3695_v15 = vld [vmem:[#allocation11 + $0x2d0] sm:$0xff]  ;;  %v11506_v10 = vcombine.low %v3831_v16, %v3835_v47 }
 0x358   : > { %7001 = vmatprep.subr.bf16.mxu1 %v11515_v48  ;;  %v3699_v59 = vld [vmem:[#allocation11 + $0x2f0] sm:$0xff] }
 0x359   : > { %6725 = vmatmul.mubr.bf16.gmra.mxu0 %v14178_v34  ;;  %v3823_v36 = vld [vmem:[#allocation11 + $0x6d0] sm:$0xff]  ;;  %v11371_v11 = vcombine.high %v3695_v15, %v3699_v59  ;;  %v11370_v29 = vcombine.low %v3695_v15, %v3699_v59 }
 0x35a   : > { %v3827_v2 = vld [vmem:[#allocation11 + $0x6f0] sm:$0xff]  ;;  %6838 = vmatmul.mubr.bf16.gmra.mxu1 %v14264_v30  ;;  %6889 = vmatpush2.bf16.msra.mxu0 %v11386_v38 }
 0x35b   : > { %7002 = vmatpush2.bf16.msra.mxu1 %v11514_v13  ;;  %6890 = vmatprep.subr.bf16.mxu0 %v11379_v9  ;;  %v11499_v27 = vcombine.high %v3823_v36, %v3827_v2  ;;  %v3687_v18 = vld [vmem:[#allocation11 + $0x290] sm:$0xff]  ;;  %v11498_v30 = vcombine.low %v3823_v36, %v3827_v2  ;;  %v3668_v36 = vld [vmem:[#allocation11 + $0x1f8] sm:$0xff]  ;;  %v651_v2 = vld [vmem:[#allocation13 + $0x8] sm:$0xff] }
 0x35c   : > { %7003 = vmatprep.subr.bf16.mxu1 %v11507_v62  ;;  %6734 = vmatprep.mubr.bf16.mxu0 %v14183_v1  ;;  %v3691_v33 = vld [vmem:[#allocation11 + $0x2b0] sm:$0xff] }
 0x35d   : > { %6847 = vmatprep.mubr.bf16.mxu1 %v14266_v28  ;;  %v3815_v24 = vld [vmem:[#allocation11 + $0x690] sm:$0xff]  ;;  %v11363_v31 = vcombine.high %v3687_v18, %v3691_v33  ;;  %v11362_v28 = vcombine.low %v3687_v18, %v3691_v33 }
 0x35e   : > { %v3819_v34 = vld [vmem:[#allocation11 + $0x6b0] sm:$0xff]  ;;  %6891 = vmatpush2.bf16.msra.mxu0 %v11378_v39 }
 0x35f   : > { %7004 = vmatpush2.bf16.msra.mxu1 %v11506_v10  ;;  %6892 = vmatprep.subr.bf16.mxu0 %v11371_v11  ;;  %v11491_v25 = vcombine.high %v3815_v24, %v3819_v34  ;;  %v3679_v4 = vld [vmem:[#allocation11 + $0x250] sm:$0xff]  ;;  %v11490_v48 = vcombine.low %v3815_v24, %v3819_v34  ;;  %v14347_v11 = vld [vmem:[#allocation8 + $0x4] ss:$24 sps:$4 sm:$0xff]  }
 0x360   : > { %7005 = vmatprep.subr.bf16.mxu1 %v11499_v27  ;;  %v3683_v52 = vld [vmem:[#allocation11 + $0x270] sm:$0xff]  ;;  %v3660_v24 = vld [vmem:[#allocation11 + $0x1b8] sm:$0xff] }
 0x361   : > { %6735 = vmatmul.mubr.bf16.gmra.mxu0 %v14190_v7  ;;  %v3807_v1 = vld [vmem:[#allocation11 + $0x650] sm:$0xff]  ;;  %v11355_v50 = vcombine.high %v3679_v4, %v3683_v52  ;;  %v11354_v13 = vcombine.low %v3679_v4, %v3683_v52 }
 0x362   : > { %v3811_v12 = vld [vmem:[#allocation11 + $0x670] sm:$0xff]  ;;  %6848 = vmatmul.mubr.bf16.gmra.mxu1 %v14272_v32  ;;  %6893 = vmatpush2.bf16.msra.mxu0 %v11370_v29 }
 0x363   : > { %7006 = vmatpush2.bf16.msra.mxu1 %v11498_v30  ;;  %6894 = vmatprep.subr.bf16.mxu0 %v11363_v31  ;;  %v11483_v6 = vcombine.high %v3807_v1, %v3811_v12  ;;  %v3671_v16 = vld [vmem:[#allocation11 + $0x210] sm:$0xff]  ;;  %v11482_v32 = vcombine.low %v3807_v1, %v3811_v12  ;;  %v14355_v31 = vrot.slane %v651_v2, %v14081_v60  ;;  %v3648_v12 = vld [vmem:[#allocation11 + $0x158] sm:$0xff] }
 0x364   : > { %7007 = vmatprep.subr.bf16.mxu1 %v11491_v25  ;;  %6744 = vmatprep.mubr.bf16.mxu0 %v14195_v17  ;;  %v3675_v47 = vld [vmem:[#allocation11 + $0x230] sm:$0xff]  ;;  %v3664_v17 = vld [vmem:[#allocation11 + $0x1d8] sm:$0xff] }
 0x365   : > { %6857 = vmatprep.mubr.bf16.mxu1 %v14274_v51  ;;  %v3799_v38 = vld [vmem:[#allocation11 + $0x610] sm:$0xff]  ;;  %v11347_v9 = vcombine.high %v3671_v16, %v3675_v47  ;;  %v11346_v51 = vcombine.low %v3671_v16, %v3675_v47  ;;  %v11341_v27 = vcombine.high %v3664_v17, %v3668_v36  ;;  %v11340_v29 = vcombine.low %v3664_v17, %v3668_v36  ;;  %v3640_v17 = vld [vmem:[#allocation11 + $0x118] sm:$0xff] }
 0x366   : > { %v3803_v7 = vld [vmem:[#allocation11 + $0x630] sm:$0xff]  ;;  %6895 = vmatpush2.bf16.msra.mxu0 %v11362_v28  ;;  %v3652_v28 = vld [vmem:[#allocation11 + $0x178] sm:$0xff] }
 0x367   : > { %7008 = vmatpush2.bf16.msra.mxu1 %v11490_v48  ;;  %6896 = vmatprep.subr.bf16.mxu0 %v11355_v50  ;;  %v11475_v62 = vcombine.high %v3799_v38, %v3803_v7  ;;  %v3919_v15 = vld [vmem:[#allocation11 + $0x9d0] sm:$0xff]  ;;  %v11474_v39 = vcombine.low %v3799_v38, %v3803_v7  ;;  %v3644_v36 = vld [vmem:[#allocation11 + $0x138] sm:$0xff] }
 0x368   : > { %7009 = vmatprep.subr.bf16.mxu1 %v11483_v6  ;;  %v3923_v59 = vld [vmem:[#allocation11 + $0x9f0] sm:$0xff] }
 0x369   : > { %6745 = vmatmul.mubr.bf16.gmra.mxu0 %v14202_v41  ;;  %v11595_v10 = vcombine.high %v3919_v15, %v3923_v59  ;;  %v3911_v18 = vld [vmem:[#allocation11 + $0x990] sm:$0xff]  ;;  %v3656_v41 = vld [vmem:[#allocation11 + $0x198] sm:$0xff]  ;;  %v11594_v34 = vcombine.low %v3919_v15, %v3923_v59 }
 0x36a   : > { %6858 = vmatmul.mubr.bf16.gmra.mxu1 %v14280_v21  ;;  %6897 = vmatpush2.bf16.msra.mxu0 %v11354_v13  ;;  %v3915_v33 = vld [vmem:[#allocation11 + $0x9b0] sm:$0xff]  ;;  %v14352_v21 = vrot.slane %v651_v2, %v14076_v53  ;;  %v11333_v25 = vcombine.high %v3656_v41, %v3660_v24  ;;  %v11332_v47 = vcombine.low %v3656_v41, %v3660_v24 }
 0x36b   : > { %7010 = vmatpush2.bf16.msra.mxu1 %v11482_v32  ;;  %6898 = vmatprep.subr.bf16.mxu0 %v11347_v9  ;;  %v11587_v30 = vcombine.high %v3911_v18, %v3915_v33  ;;  %v3903_v4 = vld [vmem:[#allocation11 + $0x950] sm:$0xff]  ;;  %v11586_v6 = vcombine.low %v3911_v18, %v3915_v33  ;;  %v11324_v18 = vcombine.low %v3648_v12, %v3652_v28 }
 0x36c   : > { %7011 = vmatprep.subr.bf16.mxu1 %v11475_v62  ;;  %6900 = vmatprep.mubr.bf16.mxu0 %v14347_v11  ;;  %v3907_v52 = vld [vmem:[#allocation11 + $0x970] sm:$0xff]  ;;  %v11325_v62 = vcombine.high %v3648_v12, %v3652_v28 }
 0x36d   : > { %7013 = vmatprep.mubr.bf16.mxu1 %v14285_v43  ;;  %v14357_v43 = vld [vmem:[#allocation8] ss:$24 sps:$4 sm:$0xff]   ;;  %v11579_v38 = vcombine.high %v3903_v4, %v3907_v52  ;;  %v14365_v9 = vld [vmem:[#allocation8 + $0x34] ss:$24 sps:$4 sm:$0xff]  }
 0x36e   : > { %6899 = vmatpush2.bf16.msra.mxu0 %v11346_v51  ;;  %v3895_v15 = vld [vmem:[#allocation11 + $0x910] sm:$0xff] }
 0x36f   : > { %7012 = vmatpush2.bf16.msra.mxu1 %v11474_v39  ;;  %7094 = vmatprep.subr.bf16.mxu0 %v11595_v10  ;;  %v11578_v10 = vcombine.low %v3903_v4, %v3907_v52  ;;  %v3632_v4 = vld [vmem:[#allocation11 + $0xd8] sm:$0xff] }
 0x370   : > { %7207 = vmatprep.subr.bf16.mxu1 %v11341_v27  ;;  %v3636_v52 = vld [vmem:[#allocation11 + $0xf8] sm:$0xff] }
 0x371   : > { %v6224_v1 = vpop.f32.mrf.mxu0  ;;  %6901 = vmatmul.mubr.bf16.vlgmr.msra.gmra.mxu0 %v14357_v43 }
 0x372   : > { %v6225_v48 = vadd.f32 %v6224_v1, %v14352_v21  ;;  %v6337_v50 = vpop.f32.mrf.mxu1  ;;  %7014 = vmatmul.mubr.bf16.vlgmr.msra.gmra.mxu1 %v14291_v22  ;;  %7095 = vmatpush1.bf16.msra.mxu0 %v11594_v34  ;;  %v3899_v22 = vld [vmem:[#allocation11 + $0x930] sm:$0xff] }
 0x373   : > { %7208 = vmatpush1.bf16.msra.mxu1 %v11340_v29  ;;  %v6226_v16 = vpop.f32.mrf.mxu0  ;;  %7096 = vmatprep.subr.bf16.mxu0 %v11587_v30  ;;  %v11571_v33 = vcombine.high %v3895_v15, %v3899_v22  ;;  %v3887_v29 = vld [vmem:[#allocation11 + $0x8d0] sm:$0xff] }
 0x374   : > { %v14362_v7 = vadd.f32 %v6337_v50, %v6225_v48  ;;  %v6227_v13 = vadd.f32 %v6226_v16, %v14355_v31  ;;  %v6339_v32 = vpop.f32.mrf.mxu1  ;;  %7209 = vmatprep.subr.bf16.mxu1 %v11333_v25  ;;  %6910 = vmatprep.mubr.bf16.mxu0 %v14365_v9  ;;  %v3891_v30 = vld [vmem:[#allocation11 + $0x8f0] sm:$0xff]  ;;  %v11570_v50 = vcombine.low %v3895_v15, %v3899_v22  ;;  %v3624_v15 = vld [vmem:[#allocation11 + $0x98] sm:$0xff] }
 0x375   : > { %v6228_v59 = vpop.f32.mrf.mxu0  ;;  %7023 = vmatprep.mubr.bf16.mxu1 %v14299_v35  ;;  %v11317_v35 = vcombine.high %v3640_v17, %v3644_v36  ;;  %v14375_v1 = vld [vmem:[#allocation8 + $0x30] ss:$24 sps:$4 sm:$0xff]   ;;  %v11316_v16 = vcombine.low %v3640_v17, %v3644_v36  ;;  %v3628_v22 = vld [vmem:[#allocation11 + $0xb8] sm:$0xff] }
 0x376   : > { %v14369_v51 = vadd.f32 %v6339_v32, %v6227_v13  ;;  %v6229_v2 = vadd.f32 %v6228_v59, %v14352_v21  ;;  %v6341_v39 = vpop.f32.mrf.mxu1  ;;  %7097 = vmatpush1.bf16.msra.mxu0 %v11586_v6  ;;  %v11309_v59 = vcombine.high %v3632_v4, %v3636_v52 }
 0x377   : > { %7210 = vmatpush1.bf16.msra.mxu1 %v11332_v47  ;;  %v6230_v27 = vpop.f32.mrf.mxu0  ;;  %7098 = vmatprep.subr.bf16.mxu0 %v11579_v38  ;;  %v11563_v47 = vcombine.high %v3887_v29, %v3891_v30 }
 0x378   : > { %v14372_v41 = vadd.f32 %v6341_v39, %v6229_v2  ;;  %v6231_v24 = vadd.f32 %v6230_v27, %v14355_v31  ;;  %v6343_v34 = vpop.f32.mrf.mxu1  ;;  %7211 = vmatprep.subr.bf16.mxu1 %v11325_v62  ;;  %v14385_v62 = vld [vmem:[#allocation8 + $0x64] ss:$24 sps:$4 sm:$0xff]   ;;  %v3879_v2 = vld [vmem:[#allocation11 + $0x890] sm:$0xff]  ;;  %v11562_v27 = vcombine.low %v3887_v29, %v3891_v30 }
 0x379   : > { %v6234_v25 = vpop.f32.mrf.mxu0  ;;  %6911 = vmatmul.mubr.bf16.gmra.mxu0 %v14375_v1  ;;  %v3616_v29 = vld [vmem:[#allocation11 + $0x58] sm:$0xff] }
 0x37a   : > { %v14378_v48 = vadd.f32 %v6343_v34, %v6231_v24  ;;  %v6235_v12 = vadd.f32 %v6234_v25, %v14352_v21  ;;  %v6347_v28 = vpop.f32.mrf.mxu1  ;;  %7024 = vmatmul.mubr.bf16.gmra.mxu1 %v14305_v42  ;;  %7099 = vmatpush1.bf16.msra.mxu0 %v11578_v10  ;;  %v3883_v42 = vld [vmem:[#allocation11 + $0x8b0] sm:$0xff]  ;;  %v3620_v30 = vld [vmem:[#allocation11 + $0x78] sm:$0xff] }
 0x37b   : > { %7212 = vmatpush1.bf16.msra.mxu1 %v11324_v18  ;;  %v6236_v6 = vpop.f32.mrf.mxu0  ;;  %7100 = vmatprep.subr.bf16.mxu0 %v11571_v33  ;;  %v11308_v33 = vcombine.low %v3632_v4, %v3636_v52  ;;  %v11555_v24 = vcombine.high %v3879_v2, %v3883_v42 }
 0x37c   : > { %v14382_v38 = vadd.f32 %v6347_v28, %v6235_v12  ;;  %v6237_v13 = vadd.f32 %v6236_v6, %v14355_v31  ;;  %v6349_v32 = vpop.f32.mrf.mxu1  ;;  %7213 = vmatprep.subr.bf16.mxu1 %v11317_v35  ;;  %6920 = vmatprep.mubr.bf16.mxu0 %v14385_v62  ;;  %v3871_v12 = vld [vmem:[#allocation11 + $0x850] sm:$0xff] }
 0x37d   : > { %v6238_v39 = vpop.f32.mrf.mxu0  ;;  %7033 = vmatprep.mubr.bf16.mxu1 %v14309_v23  ;;  %v11301_v23 = vcombine.high %v3624_v15, %v3628_v22  ;;  %v3875_v28 = vld [vmem:[#allocation11 + $0x870] sm:$0xff] }
 0x37e   : > { %v14389_v17 = vadd.f32 %v6349_v32, %v6237_v13  ;;  %v6239_v36 = vadd.f32 %v6238_v39, %v14352_v21  ;;  %v6351_v10 = vpop.f32.mrf.mxu1  ;;  %7101 = vmatpush1.bf16.msra.mxu0 %v11570_v50  ;;  %v14395_v13 = vld [vmem:[#allocation8 + $0x60] ss:$24 sps:$4 sm:$0xff]   ;;  %v11300_v32 = vcombine.low %v3624_v15, %v3628_v22 }
 0x37f   : > { %7214 = vmatpush1.bf16.msra.mxu1 %v11316_v16  ;;  %v6240_v18 = vpop.f32.mrf.mxu0  ;;  %7102 = vmatprep.subr.bf16.mxu0 %v11563_v47  ;;  %v11554_v16 = vcombine.low %v3879_v2, %v3883_v42  ;;  %v3608_v2 = vld [vmem:[#allocation11 + $0x18] sm:$0xff] }
 0x380   : > { %v14392_v34 = vadd.f32 %v6351_v10, %v6239_v36  ;;  %v6241_v35 = vadd.f32 %v6240_v18, %v14355_v31  ;;  %v6353_v25 = vpop.f32.mrf.mxu1  ;;  %7215 = vmatprep.subr.bf16.mxu1 %v11309_v59  ;;  %v11547_v59 = vcombine.high %v3871_v12, %v3875_v28  ;;  %v14405_v18 = vld [vmem:[#allocation8 + $0x94] ss:$24 sps:$4 sm:$0xff]   ;;  %v3612_v42 = vld [vmem:[#allocation11 + $0x38] sm:$0xff] }
 0x381   : > { %v6244_v6 = vpop.f32.mrf.mxu0  ;;  %6921 = vmatmul.mubr.bf16.gmra.mxu0 %v14395_v13 }
 0x382   : > { %v14398_v50 = vadd.f32 %v6353_v25, %v6241_v35  ;;  %v6245_v4 = vadd.f32 %v6244_v6, %v14352_v21  ;;  %v6357_v52 = vpop.f32.mrf.mxu1  ;;  %7034 = vmatmul.mubr.bf16.gmra.mxu1 %v14313_v20  ;;  %7103 = vmatpush1.bf16.msra.mxu0 %v11562_v27  ;;  %v11293_v35 = vcombine.high %v3616_v29, %v3620_v30  ;;  %v3863_v25 = vld [vmem:[#allocation11 + $0x810] sm:$0xff] }
 0x383   : > { %7216 = vmatpush1.bf16.msra.mxu1 %v11308_v33  ;;  %v6246_v47 = vpop.f32.mrf.mxu0  ;;  %7104 = vmatprep.subr.bf16.mxu0 %v11555_v24  ;;  %v3867_v20 = vld [vmem:[#allocation11 + $0x830] sm:$0xff]  ;;  %v11546_v24 = vcombine.low %v3871_v12, %v3875_v28  ;;  %v11292_v6 = vcombine.low %v3616_v29, %v3620_v30  ;;  %v3728_v12 = vld [vmem:[#allocation11 + $0x3d8] sm:$0xff] }
 0x384   : > { %v14402_v39 = vadd.f32 %v6357_v52, %v6245_v4  ;;  %v6247_v36 = vadd.f32 %v6246_v47, %v14355_v31  ;;  %v6359_v10 = vpop.f32.mrf.mxu1  ;;  %7217 = vmatprep.subr.bf16.mxu1 %v11301_v23  ;;  %6930 = vmatprep.mubr.bf16.mxu0 %v14405_v18  ;;  %v11539_v4 = vcombine.high %v3863_v25, %v3867_v20  ;;  %v3732_v28 = vld [vmem:[#allocation11 + $0x3f8] sm:$0xff] }
 0x385   : > { %v6248_v27 = vpop.f32.mrf.mxu0  ;;  %7043 = vmatprep.mubr.bf16.mxu1 %v14317_v19  ;;  %v11285_v19 = vcombine.high %v3608_v2, %v3612_v42 }
 0x386   : > { %v14409_v15 = vadd.f32 %v6359_v10, %v6247_v36  ;;  %v6249_v22 = vadd.f32 %v6248_v27, %v14352_v21  ;;  %v6361_v33 = vpop.f32.mrf.mxu1  ;;  %7105 = vmatpush1.bf16.msra.mxu0 %v11554_v16  ;;  %v3987_v36 = vld [vmem:[#allocation11 + $0xbf0] sm:$0xff] }
 0x387   : > { %7218 = vmatpush1.bf16.msra.mxu1 %v11300_v32  ;;  %v6250_v23 = vpop.f32.mrf.mxu0  ;;  %7106 = vmatprep.subr.bf16.mxu0 %v11547_v59  ;;  %v11538_v32 = vcombine.low %v3863_v25, %v3867_v20  ;;  %v11659_v27 = vcombine.high %v3983_v14, %v3987_v36  ;;  %v3720_v25 = vld [vmem:[#allocation11 + $0x398] sm:$0xff] }
 0x388   : > { %v14412_v52 = vadd.f32 %v6361_v33, %v6249_v22  ;;  %v6251_v47 = vadd.f32 %v6250_v23, %v14355_v31  ;;  %v6363_v5 = vpop.f32.mrf.mxu1  ;;  %7219 = vmatprep.subr.bf16.mxu1 %v11293_v35  ;;  %v11284_v35 = vcombine.low %v3608_v2, %v3612_v42  ;;  %v3724_v20 = vld [vmem:[#allocation11 + $0x3b8] sm:$0xff] }
 0x389   : > { %v6254_v10 = vpop.f32.mrf.mxu0  ;;  %6931 = vmatmul.mubr.bf16.gmra.mxu0 %v14415_v46 }
 0x38a   : > { %v14418_v16 = vadd.f32 %v6363_v5, %v6251_v47  ;;  %v6255_v29 = vadd.f32 %v6254_v10, %v14352_v21  ;;  %v6367_v30 = vpop.f32.mrf.mxu1  ;;  %7044 = vmatmul.mubr.bf16.gmra.mxu1 %v14321_v37  ;;  %7107 = vmatpush1.bf16.msra.mxu0 %v11546_v24  ;;  %v14425_v5 = vld [vmem:[#allocation8 + $0xc4] ss:$24 sps:$4 sm:$0xff]   ;;  %v11405_v47 = vcombine.high %v3728_v12, %v3732_v28  ;;  %v3975_v10 = vld [vmem:[#allocation11 + $0xb90] sm:$0xff] }
 0x38b   : > { %7220 = vmatpush1.bf16.msra.mxu1 %v11292_v6  ;;  %v6256_v59 = vpop.f32.mrf.mxu0  ;;  %7108 = vmatprep.subr.bf16.mxu0 %v11539_v4  ;;  %v3979_v37 = vld [vmem:[#allocation11 + $0xbb0] sm:$0xff]  ;;  %v11658_v4 = vcombine.low %v3983_v14, %v3987_v36  ;;  %v3712_v14 = vld [vmem:[#allocation11 + $0x358] sm:$0xff] }
 0x38c   : > { %v14422_v22 = vadd.f32 %v6367_v30, %v6255_v29  ;;  %v6257_v33 = vadd.f32 %v6256_v59, %v14355_v31  ;;  %v6369_v23 = vpop.f32.mrf.mxu1  ;;  %7221 = vmatprep.subr.bf16.mxu1 %v11285_v19  ;;  %6940 = vmatprep.mubr.bf16.mxu0 %v14425_v5  ;;  %v11404_v29 = vcombine.low %v3728_v12, %v3732_v28  ;;  %v3716_v36 = vld [vmem:[#allocation11 + $0x378] sm:$0xff] }
 0x38d   : > { %v6258_v24 = vpop.f32.mrf.mxu0  ;;  %7053 = vmatprep.mubr.bf16.mxu1 %v14325_v56  ;;  %v11651_v30 = vcombine.high %v3975_v10, %v3979_v37  ;;  %v11397_v56 = vcombine.high %v3720_v25, %v3724_v20 }
 0x38e   : > { %v14429_v2 = vadd.f32 %v6369_v23, %v6257_v33  ;;  %v6259_v42 = vadd.f32 %v6258_v24, %v14352_v21  ;;  %v6371_v6 = vpop.f32.mrf.mxu1  ;;  %7109 = vmatpush1.bf16.msra.mxu0 %v11538_v32  ;;  %v3971_v33 = vld [vmem:[#allocation11 + $0xb70] sm:$0xff] }
 0x38f   : > { %7222 = vmatpush1.bf16.msra.mxu1 %v11284_v35  ;;  %v6260_v19 = vpop.f32.mrf.mxu0  ;;  %7110 = vmatprep.subr.bf16.mxu0 %v11659_v27  ;;  %v11650_v35 = vcombine.low %v3975_v10, %v3979_v37  ;;  %v11643_v24 = vcombine.high %v3967_v54, %v3971_v33  ;;  %v3704_v10 = vld [vmem:[#allocation11 + $0x318] sm:$0xff] }
 0x390   : > { %v14432_v59 = vadd.f32 %v6371_v6, %v6259_v42  ;;  %v6261_v0 = vadd.f32 %v6260_v19, %v14355_v31  ;;  %v6373_v40 = vpop.f32.mrf.mxu1  ;;  %7223 = vmatprep.subr.bf16.mxu1 %v11405_v47  ;;  %v11396_v47 = vcombine.low %v3720_v25, %v3724_v20  ;;  %v3708_v37 = vld [vmem:[#allocation11 + $0x338] sm:$0xff] }
 0x391   : > { %v6264_v23 = vpop.f32.mrf.mxu0  ;;  %6941 = vmatmul.mubr.bf16.gmra.mxu0 %v14435_v26 }
 0x392   : > { %v14438_v32 = vadd.f32 %v6373_v40, %v6261_v0  ;;  %v6265_v12 = vadd.f32 %v6264_v23, %v14352_v21  ;;  %v6377_v28 = vpop.f32.mrf.mxu1  ;;  %7054 = vmatmul.mubr.bf16.gmra.mxu1 %v14329_v58  ;;  %7111 = vmatpush2.bf16.msra.mxu0 %v11658_v4  ;;  %v14445_v0 = vld [vmem:[#allocation8 + $0xf4] ss:$24 sps:$4 sm:$0xff]   ;;  %v11389_v40 = vcombine.high %v3712_v14, %v3716_v36 }
 0x393   : > { %7224 = vmatpush2.bf16.msra.mxu1 %v11404_v29  ;;  %v6266_v27 = vpop.f32.mrf.mxu0  ;;  %7112 = vmatprep.subr.bf16.mxu0 %v11651_v30  ;;  %v3959_v23 = vld [vmem:[#allocation11 + $0xb10] sm:$0xff]  ;;  %v11642_v30 = vcombine.low %v3967_v54, %v3971_v33  ;;  %v3696_v54 = vld [vmem:[#allocation11 + $0x2d8] sm:$0xff] }
 0x394   : > { %v14442_v42 = vadd.f32 %v6377_v28, %v6265_v12  ;;  %v6267_v6 = vadd.f32 %v6266_v27, %v14355_v31  ;;  %v6379_v19 = vpop.f32.mrf.mxu1  ;;  %7225 = vmatprep.subr.bf16.mxu1 %v11397_v56  ;;  %6950 = vmatprep.mubr.bf16.mxu0 %v14445_v0  ;;  %v3963_v58 = vld [vmem:[#allocation11 + $0xb30] sm:$0xff]  ;;  %v11388_v12 = vcombine.low %v3712_v14, %v3716_v36  ;;  %v3700_v33 = vld [vmem:[#allocation11 + $0x2f8] sm:$0xff] }
 0x395   : > { %v6268_v4 = vpop.f32.mrf.mxu0  ;;  %7063 = vmatprep.mubr.bf16.mxu1 %v14333_v55  ;;  %v11635_v28 = vcombine.high %v3959_v23, %v3963_v58  ;;  %v11381_v55 = vcombine.high %v3704_v10, %v3708_v37 }
 0x396   : > { %v14449_v25 = vadd.f32 %v6379_v19, %v6267_v6  ;;  %v6269_v20 = vadd.f32 %v6268_v4, %v14352_v21  ;;  %v6381_v29 = vpop.f32.mrf.mxu1  ;;  %7113 = vmatpush2.bf16.msra.mxu0 %v11650_v35  ;;  %v3955_v6 = vld [vmem:[#allocation11 + $0xaf0] sm:$0xff]  ;;  %v11380_v4 = vcombine.low %v3704_v10, %v3708_v37 }
 0x397   : > { %7226 = vmatpush2.bf16.msra.mxu1 %v11396_v47  ;;  %v6270_v56 = vpop.f32.mrf.mxu0  ;;  %7114 = vmatprep.subr.bf16.mxu0 %v11643_v24  ;;  %v13193_v47 = vld [vmem:[#allocation8 + $0xf8] ss:$24 sps:$4 sm:$0xff]   ;;  %v11634_v24 = vcombine.low %v3959_v23, %v3963_v58  ;;  %v13195_v23 = vld [vmem:[#allocation8 + $0x12c] ss:$24 sps:$4 sm:$0xff]  }
 0x398   : > { %v14452_v27 = vadd.f32 %v6381_v29, %v6269_v20  ;;  %v6271_v60 = vadd.f32 %v6270_v56, %v14355_v31  ;;  %v6383_v53 = vpop.f32.mrf.mxu1  ;;  %7227 = vmatprep.subr.bf16.mxu1 %v11389_v40  ;;  %v11627_v20 = vcombine.high %v3951_v45, %v3955_v6  ;;  %v3688_v58 = vld [vmem:[#allocation11 + $0x298] sm:$0xff] }
 0x399   : > { %v6274_v19 = vpop.f32.mrf.mxu0  ;;  %6951 = vmatmul.mubr.bf16.gmra.mxu0 %v14455_v44 }
 0x39a   : > { %v14458_v35 = vadd.f32 %v6383_v53, %v6271_v60  ;;  %v6275_v14 = vadd.f32 %v6274_v19, %v14352_v21  ;;  %v6387_v36 = vpop.f32.mrf.mxu1  ;;  %7064 = vmatmul.mubr.bf16.gmra.mxu1 %v13193_v47  ;;  %7115 = vmatpush2.bf16.msra.mxu0 %v11642_v30  ;;  %v14464_v53 = vld [vmem:[#allocation8 + $0x124] ss:$24 sps:$4 sm:$0xff]   ;;  %v11373_v60 = vcombine.high %v3696_v54, %v3700_v33  ;;  %v3943_v19 = vld [vmem:[#allocation11 + $0xa90] sm:$0xff] }
 0x39b   : > { %7228 = vmatpush2.bf16.msra.mxu1 %v11388_v12  ;;  %v6276_v40 = vpop.f32.mrf.mxu0  ;;  %7116 = vmatprep.subr.bf16.mxu0 %v11635_v28  ;;  %16209 = vst [vmem:[#allocation53_spill] sm:$0xff] %v14464_v53  ;;  %v3947_v47 = vld [vmem:[#allocation11 + $0xab0] sm:$0xff]  ;;  %v3692_v12 = vld [vmem:[#allocation11 + $0x2b8] sm:$0xff] }
 0x39c   : > { %v14461_v29 = vadd.f32 %v6387_v36, %v6275_v14  ;;  %v6277_v56 = vadd.f32 %v6276_v40, %v14355_v31  ;;  %v6389_v57 = vpop.f32.mrf.mxu1  ;;  %7229 = vmatprep.subr.bf16.mxu1 %v11381_v55  ;;  %6960 = vmatprep.mubr.bf16.mxu0 %v14464_v53  ;;  %v11626_v14 = vcombine.low %v3951_v45, %v3955_v6  ;;  %v3935_v53 = vld [vmem:[#allocation11 + $0xa50] sm:$0xff]  ;;  %v3680_v45 = vld [vmem:[#allocation11 + $0x258] sm:$0xff] }
 0x39d   : > { %v6278_v30 = vpop.f32.mrf.mxu0  ;;  %7073 = vmatprep.mubr.bf16.mxu1 %v13195_v23  ;;  %v11372_v36 = vcombine.low %v3696_v54, %v3700_v33  ;;  %v11619_v40 = vcombine.high %v3943_v19, %v3947_v47  ;;  %v11365_v23 = vcombine.high %v3688_v58, %v3692_v12  ;;  %v3684_v6 = vld [vmem:[#allocation11 + $0x278] sm:$0xff] }
 0x39e   : > { %v14467_v10 = vadd.f32 %v6389_v57, %v6277_v56  ;;  %v6279_v37 = vadd.f32 %v6278_v30, %v14352_v21  ;;  %v6391_v28 = vpop.f32.mrf.mxu1  ;;  %7117 = vmatpush2.bf16.msra.mxu0 %v11634_v24  ;;  %v3939_v57 = vld [vmem:[#allocation11 + $0xa70] sm:$0xff]  ;;  %v11364_v30 = vcombine.low %v3688_v58, %v3692_v12 }
 0x39f   : > { %7230 = vmatpush2.bf16.msra.mxu1 %v11380_v4  ;;  %v6280_v55 = vpop.f32.mrf.mxu0  ;;  %7118 = vmatprep.subr.bf16.mxu0 %v11627_v20  ;;  %v13197_v4 = vld [vmem:[#allocation8 + $0x128] ss:$24 sps:$4 sm:$0xff]   ;;  %v11618_v20 = vcombine.low %v3943_v19, %v3947_v47  ;;  %v13199_v19 = vld [vmem:[#allocation8 + $0x15c] ss:$24 sps:$4 sm:$0xff]  }
 0x3a0   : > { %16210 = vst [vmem:[#allocation54_spill] sm:$0xff] %v14467_v10  ;;  %v14470_v49 = vadd.f32 %v6391_v28, %v6279_v37  ;;  %v6281_v8 = vadd.f32 %v6280_v55, %v14355_v31  ;;  %v6393_v3 = vpop.f32.mrf.mxu1  ;;  %7231 = vmatprep.subr.bf16.mxu1 %v11373_v60  ;;  %v14473_v10 = vld [vmem:[#allocation8 + $0x120] ss:$24 sps:$4 sm:$0xff]   ;;  %v11611_v37 = vcombine.high %v3935_v53, %v3939_v57 }
 0x3a1   : > { %v6284_v56 = vpop.f32.mrf.mxu0  ;;  %16212 = vst [vmem:[#allocation56_spill] sm:$0xff] %v14473_v10  ;;  %6961 = vmatmul.mubr.bf16.gmra.mxu0 %v14473_v10  ;;  %v3672_v47 = vld [vmem:[#allocation11 + $0x218] sm:$0xff] }
 0x3a2   : > { %16211 = vst [vmem:[#allocation55_spill] sm:$0xff] %v14470_v49  ;;  %v14476_v24 = vadd.f32 %v6393_v3, %v6281_v8  ;;  %v6285_v54 = vadd.f32 %v6284_v56, %v14352_v21  ;;  %v6397_v33 = vpop.f32.mrf.mxu1  ;;  %7074 = vmatmul.mubr.bf16.gmra.mxu1 %v13197_v4  ;;  %7119 = vmatpush2.bf16.msra.mxu0 %v11626_v14  ;;  %v14482_v3 = vld [vmem:[#allocation8 + $0x154] ss:$24 sps:$4 sm:$0xff]   ;;  %v3792_v49 = vld [vmem:[#allocation11 + $0x5d8] sm:$0xff] }
 0x3a3   : > { %7232 = vmatpush2.bf16.msra.mxu1 %v11372_v36  ;;  %v6286_v60 = vpop.f32.mrf.mxu0  ;;  %7120 = vmatprep.subr.bf16.mxu0 %v11619_v40  ;;  %16215 = vst [vmem:[#allocation59_spill] sm:$0xff] %v14482_v3  ;;  %v11357_v8 = vcombine.high %v3680_v45, %v3684_v6  ;;  %v3927_v56 = vld [vmem:[#allocation11 + $0xa10] sm:$0xff]  ;;  %v3676_v36 = vld [vmem:[#allocation11 + $0x238] sm:$0xff] }
 0x3a4   : > { %16213 = vst [vmem:[#allocation57_spill] sm:$0xff] %v14476_v24  ;;  %v14479_v28 = vadd.f32 %v6397_v33, %v6285_v54  ;;  %v6287_v55 = vadd.f32 %v6286_v60, %v14355_v31  ;;  %v6399_v10 = vpop.f32.mrf.mxu1  ;;  %7233 = vmatprep.subr.bf16.mxu1 %v11365_v23  ;;  %6970 = vmatprep.mubr.bf16.mxu0 %v14482_v3  ;;  %v3931_v4 = vld [vmem:[#allocation11 + $0xa30] sm:$0xff] }
 0x3a5   : > { %v6288_v14 = vpop.f32.mrf.mxu0  ;;  %7083 = vmatprep.mubr.bf16.mxu1 %v13199_v19  ;;  %v11610_v54 = vcombine.low %v3935_v53, %v3939_v57  ;;  %v11356_v33 = vcombine.low %v3680_v45, %v3684_v6  ;;  %v11603_v60 = vcombine.high %v3927_v56, %v3931_v4  ;;  %v11349_v19 = vcombine.high %v3672_v47, %v3676_v36  ;;  %v3920_v53 = vld [vmem:[#allocation11 + $0x9d8] sm:$0xff] }
 0x3a6   : > { %16214 = vst [vmem:[#allocation58_spill] sm:$0xff] %v14479_v28  ;;  %v14485_v58 = vadd.f32 %v6399_v10, %v6287_v55  ;;  %v6289_v12 = vadd.f32 %v6288_v14, %v14352_v21  ;;  %v6401_v40 = vpop.f32.mrf.mxu1  ;;  %7121 = vmatpush2.bf16.msra.mxu0 %v11618_v20  ;;  %v3796_v10 = vld [vmem:[#allocation11 + $0x5f8] sm:$0xff] }
 0x3a7   : > { %7234 = vmatpush2.bf16.msra.mxu1 %v11364_v30  ;;  %v6290_v23 = vpop.f32.mrf.mxu0  ;;  %7122 = vmatprep.subr.bf16.mxu0 %v11611_v37  ;;  %v3924_v57 = vld [vmem:[#allocation11 + $0x9f8] sm:$0xff]  ;;  %v11602_v37 = vcombine.low %v3927_v56, %v3931_v4 }
 0x3a8   : > { %16216 = vst [vmem:[#allocation60_spill] sm:$0xff] %v14485_v58  ;;  %v14488_v3 = vadd.f32 %v6401_v40, %v6289_v12  ;;  %v6291_v28 = vadd.f32 %v6290_v23, %v14355_v31  ;;  %v6403_v24 = vpop.f32.mrf.mxu1  ;;  %7235 = vmatprep.subr.bf16.mxu1 %v11357_v8  ;;  %v14491_v58 = vld [vmem:[#allocation8 + $0x150] ss:$24 sps:$4 sm:$0xff]   ;;  %v11227_v8 = vmul.f32 -1.442695, %v14226_v61  ;;  %v11348_v12 = vcombine.low %v3672_v47, %v3676_v36  ;;  %v3788_v56 = vld [vmem:[#allocation11 + $0x5b8] sm:$0xff] }
 0x3a9   : > { %v6294_v55 = vpop.f32.mrf.mxu0  ;;  %16217 = vst [vmem:[#allocation61_spill] sm:$0xff] %v14491_v58  ;;  %6971 = vmatmul.mubr.bf16.gmra.mxu0 %v14491_v58  ;;  %v13201_v30 = vld [vmem:[#allocation8 + $0x158] ss:$24 sps:$4 sm:$0xff]   ;;  %v11469_v40 = vcombine.high %v3792_v49, %v3796_v10 }
 0x3aa   : > { %v14494_v20 = vadd.f32 %v6403_v24, %v6291_v28  ;;  %v6295_v45 = vadd.f32 %v6294_v55, %v14352_v21  ;;  %v6407_v6 = vpop.f32.mrf.mxu1  ;;  %7084 = vmatmul.mubr.bf16.gmra.mxu1 %v13201_v30  ;;  %7123 = vmatpush2.bf16.msra.mxu0 %v11610_v54  ;;  %v14501_v28 = vld [vmem:[#allocation8 + $0x14] ss:$24 sps:$4 sm:$0xff]   ;;  %v11597_v55 = vcombine.high %v3920_v53, %v3924_v57  ;;  %v3784_v54 = vld [vmem:[#allocation11 + $0x598] sm:$0xff]  ;;  %12612 = vpow2.f32 %v11227_v8 }
 0x3ab   : > { %7236 = vmatpush2.bf16.msra.mxu1 %v11356_v33  ;;  %v6296_v14 = vpop.f32.mrf.mxu0  ;;  %7124 = vmatprep.subr.bf16.mxu0 %v11603_v60  ;;  %16219 = vst [vmem:[#allocation63_spill] sm:$0xff] %v14501_v28  ;;  %v3912_v61 = vld [vmem:[#allocation11 + $0x998] sm:$0xff]  ;;  %v11461_v30 = vcombine.high %v3784_v54, %v3788_v56 }
 0x3ac   : > { %v14498_v23 = vadd.f32 %v6407_v6, %v6295_v45  ;;  %v6297_v58 = vadd.f32 %v6296_v14, %v14355_v31  ;;  %v6409_v24 = vpop.f32.mrf.mxu1  ;;  %7237 = vmatprep.subr.bf16.mxu1 %v11349_v19  ;;  %7126 = vmatprep.mubr.bf16.mxu0 %v14501_v28  ;;  %v3916_v33 = vld [vmem:[#allocation11 + $0x9b8] sm:$0xff]  ;;  %v11468_v45 = vcombine.low %v3792_v49, %v3796_v10 }
 0x3ad   : > { %v6298_v4 = vpop.f32.mrf.mxu0  ;;  %7239 = vmatprep.mubr.bf16.mxu1 %v14347_v11  ;;  %v11596_v6 = vcombine.low %v3920_v53, %v3924_v57  ;;  %v3904_v49 = vld [vmem:[#allocation11 + $0x958] sm:$0xff] }
 0x3ae   : > { %16218 = vst [vmem:[#allocation62_spill] sm:$0xff] %v14498_v23  ;;  %v14505_v47 = vadd.f32 %v6409_v24, %v6297_v58  ;;  %v6299_v36 = vadd.f32 %v6298_v4, %v14352_v21  ;;  %v6411_v60 = vpop.f32.mrf.mxu1  ;;  %7125 = vmatpush2.bf16.msra.mxu0 %v11602_v37  ;;  %v11589_v23 = vcombine.high %v3912_v61, %v3916_v33  ;;  %v3776_v58 = vld [vmem:[#allocation11 + $0x558] sm:$0xff]  ;;  %v14511_v21 = vld [vmem:[#allocation8 + $0x10] ss:$24 sps:$4 sm:$0xff]  }
 0x3af   : > { %7238 = vmatpush2.bf16.msra.mxu1 %v11348_v12  ;;  %v6300_v19 = vpop.f32.mrf.mxu0  ;;  %7320 = vmatprep.subr.bf16.mxu0 %v11469_v40  ;;  %v3780_v24 = vld [vmem:[#allocation11 + $0x578] sm:$0xff]  ;;  %v11588_v12 = vcombine.low %v3912_v61, %v3916_v33 }
 0x3b0   : > { %16220 = vst [vmem:[#allocation64_spill] sm:$0xff] %v14505_v47  ;;  %v14508_v14 = vadd.f32 %v6411_v60, %v6299_v36  ;;  %v6301_v28 = vadd.f32 %v6300_v19, %v14355_v31  ;;  %v6413_v11 = vpop.f32.mrf.mxu1  ;;  %7433 = vmatprep.subr.bf16.mxu1 %v11597_v55  ;;  %v3908_v10 = vld [vmem:[#allocation11 + $0x978] sm:$0xff]  ;;  %v11460_v31 = vcombine.low %v3784_v54, %v3788_v56 }
 0x3b1   : > { %v6450_v47 = vpop.f32.mrf.mxu0  ;;  %7127 = vmatmul.mubr.bf16.vlgmr.msra.gmra.mxu0 %v14511_v21  ;;  %v11453_v40 = vcombine.high %v3776_v58, %v3780_v24  ;;  %v3896_v54 = vld [vmem:[#allocation11 + $0x918] sm:$0xff]  ;;  %v11580_v19 = vcombine.low %v3904_v49, %v3908_v10 }
 0x3b2   : > { %v14514_v37 = vadd.f32 %v6413_v11, %v6301_v28  ;;  %v6451_v53 = vadd.f32 %v6450_v47, %v14362_v7  ;;  %v14517_v57 = vpop.f32.mrf.mxu1  ;;  %7240 = vmatmul.mubr.bf16.vlgmr.msra.gmra.mxu1 %v14357_v43  ;;  %7321 = vmatpush1.bf16.msra.mxu0 %v11468_v45  ;;  %v14523_v28 = vld [vmem:[#allocation8 + $0x44] ss:$24 sps:$4 sm:$0xff]   ;;  %v11581_v7 = vcombine.high %v3904_v49, %v3908_v10 }
 0x3b3   : > { %7434 = vmatpush1.bf16.msra.mxu1 %v11596_v6  ;;  %v6452_v8 = vpop.f32.mrf.mxu0  ;;  %7322 = vmatprep.subr.bf16.mxu0 %v11461_v30  ;;  %v3768_v47 = vld [vmem:[#allocation11 + $0x518] sm:$0xff] }
 0x3b4   : > { %v11662_v55 = vmul.f32 -1.442695, %v6451_v53  ;;  %v6453_v4 = vadd.f32 %v6452_v8, %v14369_v51  ;;  %v14521_v36 = vpop.f32.mrf.mxu1  ;;  %7435 = vmatprep.subr.bf16.mxu1 %v11589_v23  ;;  %7136 = vmatprep.mubr.bf16.mxu0 %v14523_v28  ;;  %v3772_v43 = vld [vmem:[#allocation11 + $0x538] sm:$0xff]  ;;  %v11452_v23 = vcombine.low %v3776_v58, %v3780_v24 }
 0x3b5   : > { %v6454_v60 = vpop.f32.mrf.mxu0  ;;  %7249 = vmatprep.mubr.bf16.mxu1 %v14365_v9  ;;  %v3900_v56 = vld [vmem:[#allocation11 + $0x938] sm:$0xff]  ;;  %v11445_v6 = vcombine.high %v3768_v47, %v3772_v43 }
 0x3b6   : > { %12614 = vpow2.f32 %v11662_v55  ;;  %v11663_v61 = vmul.f32 -1.442695, %v6453_v4  ;;  %v6455_v33 = vadd.f32 %v6454_v60, %v14372_v41  ;;  %v14528_v51 = vpop.f32.mrf.mxu1  ;;  %7323 = vmatpush1.bf16.msra.mxu0 %v11460_v31  ;;  %v11573_v53 = vcombine.high %v3896_v54, %v3900_v56  ;;  %v14533_v8 = vld [vmem:[#allocation11 + $0x4d8] sm:$0xff] }
 0x3b7   : > { %7436 = vmatpush1.bf16.msra.mxu1 %v11588_v12  ;;  %v6456_v45 = vpop.f32.mrf.mxu0  ;;  %7324 = vmatprep.subr.bf16.mxu0 %v11453_v40  ;;  %v14535_v41 = vld [vmem:[#allocation11 + $0x4f8] sm:$0xff]  ;;  %v11444_v12 = vcombine.low %v3768_v47, %v3772_v43  ;;  %v11572_v4 = vcombine.low %v3896_v54, %v3900_v56  ;;  %v12613_v60 = vpop.eup %12612 }
 0x3b8   : > { %12616 = vpow2.f32 %v11663_v61  ;;  %v11666_v30 = vmul.f32 -1.442695, %v6455_v33  ;;  %v6457_v11 = vadd.f32 %v6456_v45, %v14378_v48  ;;  %v14531_v9 = vpop.f32.mrf.mxu1  ;;  %7437 = vmatprep.subr.bf16.mxu1 %v11581_v7  ;;  %v14537_v31 = vld [vmem:[#allocation8 + $0x40] ss:$24 sps:$4 sm:$0xff]   ;;  %v11437_v7 = vcombine.high %v14533_v8, %v14535_v41 }
 0x3b9   : > { %v6460_v55 = vpop.f32.mrf.mxu0  ;;  %7137 = vmatmul.mubr.bf16.gmra.mxu0 %v14537_v31  ;;  %v14540_v58 = vld [vmem:[#allocation11 + $0x8d8] sm:$0xff] }
 0x3ba   : > { %v14542_v24 = vld [vmem:[#allocation11 + $0x8f8] sm:$0xff]  ;;  %12618 = vpow2.f32 %v11666_v30  ;;  %v11667_v49 = vmul.f32 -1.442695, %v6457_v11  ;;  %v6461_v48 = vadd.f32 %v6460_v55, %v14382_v38  ;;  %v14545_v10 = vpop.f32.mrf.mxu1  ;;  %7250 = vmatmul.mubr.bf16.gmra.mxu1 %v14375_v1  ;;  %7325 = vmatpush1.bf16.msra.mxu0 %v11452_v23  ;;  %v14553_v38 = vld [vmem:[#allocation8 + $0x74] ss:$24 sps:$4 sm:$0xff]   ;;  %v11436_v30 = vcombine.low %v14533_v8, %v14535_v41 }
 0x3bb   : > { %7438 = vmatpush1.bf16.msra.mxu1 %v11580_v19  ;;  %v6462_v40 = vpop.f32.mrf.mxu0  ;;  %7326 = vmatprep.subr.bf16.mxu0 %v11445_v6  ;;  %v11565_v1 = vcombine.high %v14540_v58, %v14542_v24  ;;  %v14558_v47 = vld [vmem:[#allocation11 + $0x498] sm:$0xff]  ;;  %v3542_v11 = vadd.f32 1.0, %v12613_v60 }
 0x3bc   : > { %12620 = vpow2.f32 %v11667_v49  ;;  %v11670_v61 = vmul.f32 -1.442695, %v6461_v48  ;;  %v6463_v33 = vadd.f32 %v6462_v40, %v14389_v17  ;;  %v14551_v45 = vpop.f32.mrf.mxu1  ;;  %7439 = vmatprep.subr.bf16.mxu1 %v11573_v53  ;;  %7146 = vmatprep.mubr.bf16.mxu0 %v14553_v38  ;;  %v14560_v43 = vld [vmem:[#allocation11 + $0x4b8] sm:$0xff] }
 0x3bd   : > { %v6464_v54 = vpop.f32.mrf.mxu0  ;;  %7259 = vmatprep.mubr.bf16.mxu1 %v14385_v62  ;;  %v14563_v56 = vld [vmem:[#allocation11 + $0x898] sm:$0xff]  ;;  %v11564_v62 = vcombine.low %v14540_v58, %v14542_v24  ;;  %v11429_v55 = vcombine.high %v14558_v47, %v14560_v43  ;;  %v11229_v24 = vmul.f32 -1.442695, %v14303_v63 }
 0x3be   : > { %v14565_v17 = vld [vmem:[#allocation11 + $0x8b8] sm:$0xff]  ;;  %12622 = vpow2.f32 %v11670_v61  ;;  %v11671_v23 = vmul.f32 -1.442695, %v6463_v33  ;;  %v6465_v19 = vadd.f32 %v6464_v54, %v14392_v34  ;;  %v14568_v6 = vpop.f32.mrf.mxu1  ;;  %7327 = vmatpush1.bf16.msra.mxu0 %v11444_v12  ;;  %v11428_v33 = vcombine.low %v14558_v47, %v14560_v43 }
 0x3bf   : > { %7440 = vmatpush1.bf16.msra.mxu1 %v11572_v4  ;;  %v6466_v53 = vpop.f32.mrf.mxu0  ;;  %7328 = vmatprep.subr.bf16.mxu0 %v11437_v7  ;;  %v14576_v49 = vld [vmem:[#allocation11 + $0x458] sm:$0xff]  ;;  %v11557_v8 = vcombine.high %v14563_v56, %v14565_v17  ;;  %v14590_v7 = vld [vmem:[#allocation8 + $0x70] ss:$24 sps:$4 sm:$0xff]   ;;  %v11556_v54 = vcombine.low %v14563_v56, %v14565_v17 }
 0x3c0   : > { %12624 = vpow2.f32 %v11671_v23  ;;  %v11674_v34 = vmul.f32 -1.442695, %v6465_v19  ;;  %v6467_v48 = vadd.f32 %v6466_v53, %v14398_v50  ;;  %v14579_v12 = vpop.f32.mrf.mxu1  ;;  %7441 = vmatprep.subr.bf16.mxu1 %v11565_v1  ;;  %v14583_v41 = vld [vmem:[#allocation11 + $0x478] sm:$0xff] }
 0x3c1   : > { %v14585_v40 = vld [vmem:[#allocation11 + $0x858] sm:$0xff]  ;;  %v6470_v4 = vpop.f32.mrf.mxu0  ;;  %7147 = vmatmul.mubr.bf16.gmra.mxu0 %v14590_v7  ;;  %v11421_v23 = vcombine.high %v14576_v49, %v14583_v41 }
 0x3c2   : > { %v14587_v58 = vld [vmem:[#allocation11 + $0x878] sm:$0xff]  ;;  %12626 = vpow2.f32 %v11674_v34  ;;  %v11675_v50 = vmul.f32 -1.442695, %v6467_v48  ;;  %v6471_v60 = vadd.f32 %v6470_v4, %v14402_v39  ;;  %v14594_v61 = vpop.f32.mrf.mxu1  ;;  %7260 = vmatmul.mubr.bf16.gmra.mxu1 %v14395_v13  ;;  %7329 = vmatpush1.bf16.msra.mxu0 %v11436_v30 }
 0x3c3   : > { %v12615_v1 = vpop.eup %12614  ;;  %12628 = vrcp.f32 %v3542_v11  ;;  %7442 = vmatpush1.bf16.msra.mxu1 %v11564_v62  ;;  %v6472_v63 = vpop.f32.mrf.mxu0  ;;  %7330 = vmatprep.subr.bf16.mxu0 %v11429_v55  ;;  %v11549_v39 = vcombine.high %v14585_v40, %v14587_v58  ;;  %v14605_v19 = vld [vmem:[#allocation11 + $0x418] sm:$0xff] }
 0x3c4   : > { %v7738_v13 = vadd.f32 1.0, %v12615_v1  ;;  %12630 = vpow2.f32 %v11675_v50  ;;  %v11678_v30 = vmul.f32 -1.442695, %v6471_v60  ;;  %v6473_v47 = vadd.f32 %v6472_v63, %v14409_v15  ;;  %v14608_v43 = vpop.f32.mrf.mxu1  ;;  %7443 = vmatprep.subr.bf16.mxu1 %v11557_v8  ;;  %v14610_v11 = vld [vmem:[#allocation8 + $0xa4] ss:$24 sps:$4 sm:$0xff]   ;;  %7269 = vmatprep.mubr.bf16.mxu1 %v14405_v18 }
 0x3c5   : > { %7156 = vmatprep.mubr.bf16.mxu0 %v14610_v11  ;;  %v14613_v56 = vld [vmem:[#allocation11 + $0x438] sm:$0xff]  ;;  %v12617_v62 = vpop.eup %12616  ;;  %12632 = vpow2.f32 %v11229_v24  ;;  %v6474_v55 = vpop.f32.mrf.mxu0  ;;  %v11420_v15 = vcombine.low %v14576_v49, %v14583_v41  ;;  %v11548_v24 = vcombine.low %v14585_v40, %v14587_v58 }
 0x3c6   : > { %v14615_v17 = vld [vmem:[#allocation11 + $0x818] sm:$0xff]  ;;  %12634 = vrcp.f32 %v7738_v13  ;;  %v7739_v34 = vadd.f32 1.0, %v12617_v62  ;;  %v11679_v48 = vmul.f32 -1.442695, %v6473_v47  ;;  %v6475_v8 = vadd.f32 %v6474_v55, %v14412_v52  ;;  %v14623_v4 = vpop.f32.mrf.mxu1  ;;  %7331 = vmatpush1.bf16.msra.mxu0 %v11428_v33 }
 0x3c7   : > { %v14617_v53 = vld [vmem:[#allocation11 + $0x838] sm:$0xff]  ;;  %v12619_v50 = vpop.eup %12618  ;;  %12636 = vpow2.f32 %v11678_v30  ;;  %7444 = vmatpush1.bf16.msra.mxu1 %v11556_v54  ;;  %v6476_v60 = vpop.f32.mrf.mxu0  ;;  %7332 = vmatprep.subr.bf16.mxu0 %v11421_v23  ;;  %v11413_v18 = vcombine.high %v14605_v19, %v14613_v56  ;;  %v11412_v47 = vcombine.low %v14605_v19, %v14613_v56 }
 0x3c8   : > { %v11541_v49 = vcombine.high %v14615_v17, %v14617_v53  ;;  %v14631_v41 = vld [vmem:[#allocation11 + $0x7d8] sm:$0xff]  ;;  %12638 = vrcp.f32 %v7739_v34  ;;  %v7742_v52 = vadd.f32 1.0, %v12619_v50  ;;  %v11682_v1 = vmul.f32 -1.442695, %v6475_v8  ;;  %v14634_v63 = vpop.f32.mrf.mxu1  ;;  %7445 = vmatprep.subr.bf16.mxu1 %v11549_v39 }
 0x3c9   : > { %v6477_v33 = vadd.f32 %v6476_v60, %v14418_v16  ;;  %v14636_v54 = vld [vmem:[#allocation11 + $0x7f8] sm:$0xff]  ;;  %v12621_v58 = vpop.eup %12620  ;;  %12640 = vpow2.f32 %v11679_v48  ;;  %v6480_v13 = vpop.f32.mrf.mxu0  ;;  %v11540_v8 = vcombine.low %v14615_v17, %v14617_v53 }
 0x3ca   : > { %v14638_v23 = vld [vmem:[#allocation11 + $0xbd8] sm:$0xff]  ;;  %12642 = vrcp.f32 %v7742_v52  ;;  %v7743_v16 = vadd.f32 1.0, %v12621_v58  ;;  %v6481_v39 = vadd.f32 %v6480_v13, %v14422_v22  ;;  %v14648_v55 = vpop.f32.mrf.mxu1  ;;  %7270 = vmatmul.mubr.bf16.gmra.mxu1 %v14415_v46  ;;  %7333 = vmatpush1.bf16.msra.mxu0 %v11420_v15  ;;  %v11533_v19 = vcombine.high %v14631_v41, %v14636_v54 }
 0x3cb   : > { %v14640_v40 = vld [vmem:[#allocation11 + $0xbf8] sm:$0xff]  ;;  %v11683_v62 = vmul.f32 -1.442695, %v6477_v33  ;;  %v12623_v34 = vpop.eup %12622  ;;  %12644 = vpow2.f32 %v11682_v1  ;;  %7446 = vmatpush1.bf16.msra.mxu1 %v11548_v24  ;;  %v6482_v48 = vpop.f32.mrf.mxu0  ;;  %7334 = vmatprep.subr.bf16.mxu0 %v11413_v18  ;;  %v14662_v24 = vld [vmem:[#allocation8 + $0xd4] ss:$24 sps:$4 sm:$0xff]  }
 0x3cc   : > { %v14642_v30 = vld [vmem:[#allocation8 + $0xa0] ss:$24 sps:$4 sm:$0xff]   ;;  %v11661_v56 = vcombine.high %v14638_v23, %v14640_v40  ;;  %12646 = vrcp.f32 %v7743_v16  ;;  %v7746_v50 = vadd.f32 1.0, %v12623_v34  ;;  %v11686_v46 = vmul.f32 -1.442695, %v6481_v39  ;;  %v14660_v60 = vpop.f32.mrf.mxu1  ;;  %7447 = vmatprep.subr.bf16.mxu1 %v11541_v49  ;;  %7279 = vmatprep.mubr.bf16.mxu1 %v14425_v5 }
 0x3cd   : > { %7157 = vmatmul.mubr.bf16.gmra.mxu0 %v14642_v30  ;;  %v14657_v22 = vld [vmem:[#allocation11 + $0x798] sm:$0xff]  ;;  %v6483_v15 = vadd.f32 %v6482_v48, %v14429_v2  ;;  %v12625_v52 = vpop.eup %12624  ;;  %12648 = vpow2.f32 %v11683_v62  ;;  %v6484_v1 = vpop.f32.mrf.mxu0  ;;  %v11532_v2 = vcombine.low %v14631_v41, %v14636_v54  ;;  %v11660_v62 = vcombine.low %v14638_v23, %v14640_v40 }
 0x3ce   : > { %7166 = vmatprep.mubr.bf16.mxu0 %v14662_v24  ;;  %v14665_v17 = vld [vmem:[#allocation11 + $0x7b8] sm:$0xff]  ;;  %12650 = vrcp.f32 %v7746_v50  ;;  %v7747_v49 = vadd.f32 1.0, %v12625_v52  ;;  %v6485_v58 = vadd.f32 %v6484_v1, %v14432_v59  ;;  %v14675_v13 = vpop.f32.mrf.mxu1  ;;  %7335 = vmatpush1.bf16.msra.mxu0 %v11412_v47  ;;  %v14692_v50 = vld [vmem:[#allocation8 + $0xd0] ss:$24 sps:$4 sm:$0xff]  }
 0x3cf   : > { %v14667_v53 = vld [vmem:[#allocation11 + $0xb98] sm:$0xff]  ;;  %v11687_v33 = vmul.f32 -1.442695, %v6483_v15  ;;  %v12627_v16 = vpop.eup %12626  ;;  %12652 = vpow2.f32 %v11686_v46  ;;  %7448 = vmatpush1.bf16.msra.mxu1 %v11540_v8  ;;  %v6486_v39 = vpop.f32.mrf.mxu0  ;;  %7336 = vmatprep.subr.bf16.mxu0 %v11533_v19  ;;  %v11525_v5 = vcombine.high %v14657_v22, %v14665_v17  ;;  %v11524_v46 = vcombine.low %v14657_v22, %v14665_v17 }
 0x3d0   : > { %v14669_v18 = vld [vmem:[#allocation11 + $0xbb8] sm:$0xff]  ;;  %v14683_v54 = vpop.eup %12628  ;;  %12654 = vrcp.f32 %v7747_v49  ;;  %v7750_v59 = vadd.f32 1.0, %v12627_v16  ;;  %v11690_v34 = vmul.f32 -1.442695, %v6485_v58  ;;  %v6487_v47 = vadd.f32 %v6486_v39, %v14438_v32  ;;  %v14686_v48 = vpop.f32.mrf.mxu1  ;;  %7449 = vmatprep.subr.bf16.mxu1 %v11661_v56 }
 0x3d1   : > { %v11653_v41 = vcombine.high %v14667_v53, %v14669_v18  ;;  %16221 = vst [vmem:[#allocation65_spill] sm:$0xff] %v14683_v54  ;;  %v14688_v8 = vld [vmem:[#allocation11 + $0x758] sm:$0xff]  ;;  %v12631_v23 = vpop.eup %12630  ;;  %12656 = vpow2.f32 %v11687_v33  ;;  %v6490_v40 = vpop.f32.mrf.mxu0  ;;  %v11652_v17 = vcombine.low %v14667_v53, %v14669_v18 }
 0x3d2   : > { %v14690_v19 = vld [vmem:[#allocation11 + $0x778] sm:$0xff]  ;;  %v14701_v52 = vpop.eup %12632  ;;  %12658 = vrcp.f32 %v7750_v59  ;;  %v7751_v56 = vadd.f32 1.0, %v12631_v23  ;;  %v11691_v1 = vmul.f32 -1.442695, %v6487_v47  ;;  %v6491_v49 = vadd.f32 %v6490_v40, %v14442_v42  ;;  %v14704_v33 = vpop.f32.mrf.mxu1  ;;  %7280 = vmatmul.mubr.bf16.gmra.mxu1 %v14435_v26  ;;  %7337 = vmatpush2.bf16.msra.mxu0 %v11532_v2 }
 0x3d3   : > { %v14697_v15 = vld [vmem:[#allocation11 + $0xb58] sm:$0xff]  ;;  %v14707_v58 = vpop.eup %12634  ;;  %12660 = vpow2.f32 %v11690_v34  ;;  %7450 = vmatpush2.bf16.msra.mxu1 %v11660_v62  ;;  %v6492_v22 = vpop.f32.mrf.mxu0  ;;  %7338 = vmatprep.subr.bf16.mxu0 %v11525_v5  ;;  %v11517_v16 = vcombine.high %v14688_v8, %v14690_v19 }
 0x3d4   : > { %v14699_v32 = vld [vmem:[#allocation11 + $0xb78] sm:$0xff]  ;;  %16222 = vst [vmem:[#allocation66_spill] sm:$0xff] %v14707_v58  ;;  %v12637_v42 = vpop.eup %12636  ;;  %12662 = vrcp.f32 %v7751_v56  ;;  %v11694_v59 = vmul.f32 -1.442695, %v6491_v49  ;;  %v6493_v26 = vadd.f32 %v6492_v22, %v14449_v25  ;;  %v14716_v2 = vpop.f32.mrf.mxu1  ;;  %7451 = vmatprep.subr.bf16.mxu1 %v11653_v41  ;;  %7289 = vmatprep.mubr.bf16.mxu1 %v14445_v0  ;;  %v11516_v41 = vcombine.low %v14688_v8, %v14690_v19 }
 0x3d5   : > { %7167 = vmatmul.mubr.bf16.gmra.mxu0 %v14692_v50  ;;  %v14713_v39 = vld [vmem:[#allocation11 + $0x718] sm:$0xff]  ;;  %v11645_v53 = vcombine.high %v14697_v15, %v14699_v32  ;;  %v14729_v47 = vpop.eup %12638  ;;  %v7754_v23 = vadd.f32 1.0, %v12637_v42  ;;  %12664 = vpow2.f32 %v11691_v1  ;;  %v6494_v25 = vpop.f32.mrf.mxu0  ;;  %v11644_v54 = vcombine.low %v14697_v15, %v14699_v32 }
 0x3d6   : > { %v14718_v34 = vld [vmem:[#allocation8 + $0x104] ss:$24 sps:$4 sm:$0xff]   ;;  %16224 = vst [vmem:[#allocation68_spill] sm:$0xff] %v14729_v47  ;;  %v12641_v40 = vpop.eup %12640  ;;  %12666 = vpow2.f32 %v11694_v59  ;;  %v11695_v56 = vmul.f32 -1.442695, %v6493_v26  ;;  %v6495_v49 = vadd.f32 %v6494_v25, %v14452_v27  ;;  %v14735_v22 = vpop.f32.mrf.mxu1  ;;  %7339 = vmatpush2.bf16.msra.mxu0 %v11524_v46 }
 0x3d7   : > { %16223 = vst [vmem:[#allocation67_spill] sm:$0xff] %v14718_v34  ;;  %7176 = vmatprep.mubr.bf16.mxu0 %v14718_v34  ;;  %v14723_v18 = vld [vmem:[#allocation11 + $0x738] sm:$0xff]  ;;  %v14739_v34 = vpop.eup %12642  ;;  %12668 = vrcp.f32 %v7754_v23  ;;  %v7755_v1 = vadd.f32 1.0, %v12641_v40  ;;  %7452 = vmatpush2.bf16.msra.mxu1 %v11652_v17  ;;  %v6496_v0 = vpop.f32.mrf.mxu0  ;;  %v16234_v47 = vld [vmem:[#allocation55_spill] sm:$0xff] }
 0x3d8   : > { %v14725_v62 = vld [vmem:[#allocation11 + $0xb18] sm:$0xff]  ;;  %16225 = vst [vmem:[#allocation69_spill] sm:$0xff] %v14739_v34  ;;  %7340 = vmatprep.subr.bf16.mxu0 %v11517_v16  ;;  %v11509_v8 = vcombine.high %v14713_v39, %v14723_v18  ;;  %v12645_v27 = vpop.eup %12644  ;;  %12670 = vpow2.f32 %v11695_v56  ;;  %v11698_v42 = vmul.f32 -1.442695, %v6495_v49  ;;  %v6497_v46 = vadd.f32 %v6496_v0, %v14458_v35  ;;  %v14746_v59 = vpop.f32.mrf.mxu1  ;;  %7453 = vmatprep.subr.bf16.mxu1 %v11645_v53 }
 0x3d9   : > { %v14727_v5 = vld [vmem:[#allocation11 + $0xb38] sm:$0xff]  ;;  %v14754_v16 = vpop.eup %12646  ;;  %12672 = vrcp.f32 %v7755_v1  ;;  %v7758_v26 = vadd.f32 1.0, %v12645_v27  ;;  %v6500_v23 = vpop.f32.mrf.mxu0  ;;  %v11508_v35 = vcombine.low %v14713_v39, %v14723_v18 }
 0x3da   : > { %v11637_v19 = vcombine.high %v14725_v62, %v14727_v5  ;;  %v14748_v15 = vld [vmem:[#allocation11 + $0x6d8] sm:$0xff]  ;;  %16226 = vst [vmem:[#allocation70_spill] sm:$0xff] %v14754_v16  ;;  %v12649_v56 = vpop.eup %12648  ;;  %12674 = vpow2.f32 %v11698_v42  ;;  %v11699_v49 = vmul.f32 -1.442695, %v6497_v46  ;;  %v6501_v0 = vadd.f32 %v6500_v23, %v14461_v29  ;;  %v14766_v17 = vpop.f32.mrf.mxu1  ;;  %7290 = vmatmul.mubr.bf16.gmra.mxu1 %v14455_v44  ;;  %7341 = vmatpush2.bf16.msra.mxu0 %v11516_v41 }
 0x3db   : > { %v14750_v32 = vld [vmem:[#allocation11 + $0x6f8] sm:$0xff]  ;;  %v14771_v27 = vpop.eup %12650  ;;  %12676 = vrcp.f32 %v7758_v26  ;;  %v7759_v39 = vadd.f32 1.0, %v12649_v56  ;;  %7454 = vmatpush2.bf16.msra.mxu1 %v11644_v54  ;;  %v6502_v18 = vpop.f32.mrf.mxu0  ;;  %7342 = vmatprep.subr.bf16.mxu0 %v11509_v8  ;;  %v11636_v42 = vcombine.low %v14725_v62, %v14727_v5  ;;  %v14782_v26 = vld [vmem:[#allocation8 + $0x134] ss:$24 sps:$4 sm:$0xff]  }
 0x3dc   : > { %v14756_v25 = vld [vmem:[#allocation8 + $0x100] ss:$24 sps:$4 sm:$0xff]   ;;  %16228 = vst [vmem:[#allocation72_spill] sm:$0xff] %v14771_v27  ;;  %v11501_v29 = vcombine.high %v14748_v15, %v14750_v32  ;;  %v12653_v44 = vpop.eup %12652  ;;  %12678 = vpow2.f32 %v11699_v49  ;;  %v11702_v41 = vmul.f32 -1.442695, %v6501_v0  ;;  %v14780_v58 = vpop.f32.mrf.mxu1  ;;  %7455 = vmatprep.subr.bf16.mxu1 %v11637_v19  ;;  %16231 = vst [vmem:[#allocation73_spill] sm:$0xff] %v14782_v26  ;;  %v11500_v19 = vcombine.low %v14748_v15, %v14750_v32 }
 0x3dd   : > { %16227 = vst [vmem:[#allocation71_spill] sm:$0xff] %v14756_v25  ;;  %7177 = vmatmul.mubr.bf16.gmra.mxu0 %v14756_v25  ;;  %v14761_v53 = vld [vmem:[#allocation11 + $0xad8] sm:$0xff]  ;;  %v14793_v56 = vpop.eup %12654  ;;  %12680 = vrcp.f32 %v7759_v39  ;;  %v7762_v49 = vadd.f32 1.0, %v12653_v44  ;;  %v6504_v0 = vpop.f32.mrf.mxu0 }
 0x3de   : > { %v14763_v40 = vld [vmem:[#allocation11 + $0xaf8] sm:$0xff]  ;;  %7186 = vmatprep.mubr.bf16.mxu0 %v14782_v26  ;;  %16232 = vst [vmem:[#allocation74_spill] sm:$0xff] %v14793_v56  ;;  %12682 = vpow2.f32 %v11702_v41  ;;  %v6505_v16 = vadd.f32 %v6504_v0, %v16234_v47  ;;  %v14799_v26 = vpop.f32.mrf.mxu1  ;;  %7343 = vmatpush2.bf16.msra.mxu0 %v11508_v35 }
 0x3df   : > { %v14777_v46 = vld [vmem:[#allocation11 + $0x698] sm:$0xff]  ;;  %v11629_v54 = vcombine.high %v14761_v53, %v14763_v40  ;;  %v11628_v25 = vcombine.low %v14761_v53, %v14763_v40  ;;  %12684 = vrcp.f32 %v7762_v49  ;;  %7456 = vmatpush2.bf16.msra.mxu1 %v11636_v42  ;;  %v6506_v44 = vpop.f32.mrf.mxu0  ;;  %7344 = vmatprep.subr.bf16.mxu0 %v11501_v29 }
 0x3e0   : > { %v16229_v23 = vld [vmem:[#allocation54_spill] sm:$0xff]  ;;  %v11706_v35 = vmul.f32 -1.442695, %v6505_v16  ;;  %v16237_v41 = vld [vmem:[#allocation57_spill] sm:$0xff]  ;;  %v14812_v40 = vpop.f32.mrf.mxu1 }
 0x3e1   : > { %v6503_v1 = vadd.f32 %v6502_v18, %v16229_v23  ;;  %16230 = vst [vmem:[#allocation54_spill] sm:$0xff] %v14780_v58  ;;  %v14787_v62 = vld [vmem:[#allocation11 + $0x6b8] sm:$0xff]  ;;  %v12657_v23 = vpop.eup %12656  ;;  %v6507_v53 = vadd.f32 %v6506_v44, %v16237_v41  ;;  %16238 = vst [vmem:[#allocation57_spill] sm:$0xff] %v14812_v40  ;;  %7457 = vmatprep.subr.bf16.mxu1 %v11629_v54  ;;  %v14824_v16 = vld [vmem:[#allocation8 + $0x130] ss:$24 sps:$4 sm:$0xff]  }
 0x3e2   : > { %v14789_v5 = vld [vmem:[#allocation11 + $0xa98] sm:$0xff]  ;;  %v14803_v58 = vpop.eup %12658  ;;  %v7763_v39 = vadd.f32 1.0, %v12657_v23  ;;  %v11493_v15 = vcombine.high %v14777_v46, %v14787_v62  ;;  %16240 = vst [vmem:[#allocation76_spill] sm:$0xff] %v14824_v16  ;;  %v11492_v54 = vcombine.low %v14777_v46, %v14787_v62  ;;  %v14832_v27 = vpop.f32.mrf.mxu1  ;;  %7345 = vmatpush2.bf16.msra.mxu0 %v11500_v19 }
 0x3e3   : > { %v14791_v8 = vld [vmem:[#allocation11 + $0xab8] sm:$0xff]  ;;  %v11703_v34 = vmul.f32 -1.442695, %v6503_v1  ;;  %16236 = vst [vmem:[#allocation55_spill] sm:$0xff] %v14803_v58  ;;  %v12661_v1 = vpop.eup %12660  ;;  %v11707_v40 = vmul.f32 -1.442695, %v6507_v53  ;;  %7458 = vmatpush2.bf16.msra.mxu1 %v11628_v25 }
 0x3e4   : > { %v16233_v18 = vld [vmem:[#allocation53_spill] sm:$0xff]  ;;  %v11621_v32 = vcombine.high %v14789_v5, %v14791_v8  ;;  %v7766_v23 = vadd.f32 1.0, %v12661_v1  ;;  %v11620_v44 = vcombine.low %v14789_v5, %v14791_v8  ;;  %7346 = vmatprep.subr.bf16.mxu0 %v11493_v15  ;;  %v16244_v53 = vld [vmem:[#allocation60_spill] sm:$0xff]  ;;  %v14848_v25 = vld [vmem:[#allocation8 + $0x164] ss:$24 sps:$4 sm:$0xff]  }
 0x3e5   : > { %7299 = vmatprep.mubr.bf16.mxu1 %v16233_v18  ;;  %16235 = vst [vmem:[#allocation53_spill] sm:$0xff] %v14799_v26  ;;  %v14809_v47 = vld [vmem:[#allocation11 + $0x658] sm:$0xff]  ;;  %12686 = vpow2.f32 %v11703_v34  ;;  %v14822_v18 = vpop.eup %12662  ;;  %v6510_v34 = vpop.f32.mrf.mxu0  ;;  %7187 = vmatmul.mubr.bf16.gmra.mxu0 %v14824_v16 }
 0x3e6   : > { %v14814_v49 = vld [vmem:[#allocation11 + $0x678] sm:$0xff]  ;;  %16239 = vst [vmem:[#allocation75_spill] sm:$0xff] %v14822_v18  ;;  %12688 = vrcp.f32 %v7763_v39  ;;  %v12665_v41 = vpop.eup %12664  ;;  %v16242_v39 = vld [vmem:[#allocation56_spill] sm:$0xff]  ;;  %7459 = vmatprep.subr.bf16.mxu1 %v11621_v32  ;;  %7196 = vmatprep.mubr.bf16.mxu0 %v14848_v25 }
 0x3e7   : > { %v14816_v42 = vld [vmem:[#allocation11 + $0xa58] sm:$0xff]  ;;  %12690 = vpow2.f32 %v11706_v35  ;;  %7300 = vmatmul.mubr.bf16.gmra.mxu1 %v16242_v39  ;;  %v12667_v58 = vpop.eup %12666  ;;  %v7767_v16 = vadd.f32 1.0, %v12665_v41  ;;  %v6512_v46 = vpop.f32.mrf.mxu0  ;;  %v11485_v62 = vcombine.high %v14809_v47, %v14814_v49  ;;  %16245 = vst [vmem:[#allocation56_spill] sm:$0xff] %v14848_v25  ;;  %7347 = vmatpush2.bf16.msra.mxu0 %v11492_v54 }
 0x3e8   : > { %v14818_v29 = vld [vmem:[#allocation11 + $0xa78] sm:$0xff]  ;;  %12692 = vrcp.f32 %v7766_v23  ;;  %v14843_v8 = vpop.eup %12668  ;;  %v7770_v19 = vadd.f32 1.0, %v12667_v58  ;;  %v14846_v23 = vpop.f32.mrf.mxu1  ;;  %7460 = vmatpush2.bf16.msra.mxu1 %v11620_v44 }
 0x3e9   : > { %v16241_v26 = vld [vmem:[#allocation58_spill] sm:$0xff]  ;;  %12694 = vpow2.f32 %v11707_v40  ;;  %v12671_v1 = vpop.eup %12670  ;;  %v6514_v58 = vpop.f32.mrf.mxu0  ;;  %v16246_v40 = vld [vmem:[#allocation59_spill] sm:$0xff]  ;;  %7348 = vmatprep.subr.bf16.mxu0 %v11485_v62 }
 0x3ea   : > { %v6511_v0 = vadd.f32 %v6510_v34, %v16241_v26  ;;  %v11613_v26 = vcombine.high %v14816_v42, %v14818_v29  ;;  %v14841_v5 = vld [vmem:[#allocation11 + $0x618] sm:$0xff]  ;;  %16243 = vst [vmem:[#allocation58_spill] sm:$0xff] %v14843_v8  ;;  %v6513_v34 = vadd.f32 %v6512_v46, %v16244_v53  ;;  %12696 = vrcp.f32 %v7767_v16  ;;  %7309 = vmatprep.mubr.bf16.mxu1 %v16246_v40  ;;  %v14860_v46 = vpop.eup %12672  ;;  %v14863_v18 = vpop.f32.mrf.mxu1 }
 0x3eb   : > { %v14851_v15 = vld [vmem:[#allocation11 + $0x638] sm:$0xff]  ;;  %16247 = vst [vmem:[#allocation60_spill] sm:$0xff] %v14860_v46  ;;  %12698 = vrcp.f32 %v7770_v19  ;;  %v7771_v32 = vadd.f32 1.0, %v12671_v1  ;;  %v6515_v56 = vadd.f32 %v6514_v58, %v14488_v3  ;;  %v12675_v25 = vpop.eup %12674  ;;  %v6516_v16 = vpop.f32.mrf.mxu0  ;;  %v11612_v40 = vcombine.low %v14816_v42, %v14818_v29 }
 0x3ec   : > { %v11710_v35 = vmul.f32 -1.442695, %v6511_v0  ;;  %v14853_v41 = vld [vmem:[#allocation11 + $0xa18] sm:$0xff]  ;;  %v11484_v0 = vcombine.low %v14809_v47, %v14814_v49  ;;  %v11711_v53 = vmul.f32 -1.442695, %v6513_v34  ;;  %v11477_v47 = vcombine.high %v14841_v5, %v14851_v15  ;;  %v14871_v1 = vpop.eup %12676  ;;  %7461 = vmatprep.subr.bf16.mxu1 %v11613_v26 }
 0x3ed   : > { %v14855_v39 = vld [vmem:[#allocation11 + $0xa38] sm:$0xff]  ;;  %16248 = vst [vmem:[#allocation59_spill] sm:$0xff] %v14871_v1  ;;  %v7774_v3 = vadd.f32 1.0, %v12675_v25  ;;  %v11714_v19 = vmul.f32 -1.442695, %v6515_v56  ;;  %v6517_v54 = vadd.f32 %v6516_v16, %v14494_v20  ;;  %v12679_v44 = vpop.eup %12678  ;;  %v6520_v62 = vpop.f32.mrf.mxu0  ;;  %v11476_v29 = vcombine.low %v14841_v5, %v14851_v15  ;;  %7462 = vmatpush2.bf16.msra.mxu1 %v11612_v40 }
 0x3ee   : > { %12700 = vpow2.f32 %v11710_v35  ;;  %v11605_v49 = vcombine.high %v14853_v41, %v14855_v39  ;;  %v14874_v35 = vpop.f32.mrf.mxu1  ;;  %v14876_v42 = vld [vmem:[#allocation8 + $0x160] ss:$24 sps:$4 sm:$0xff]   ;;  %v14883_v25 = vpop.eup %12680  ;;  %v7775_v20 = vadd.f32 1.0, %v12679_v44  ;;  %7349 = vmatpush2.bf16.msra.mxu0 %v11484_v0 }
 0x3ef   : > { %12702 = vrcp.f32 %v7771_v32  ;;  %16249 = vst [vmem:[#allocation77_spill] sm:$0xff] %v14874_v35  ;;  %16250 = vst [vmem:[#allocation78_spill] sm:$0xff] %v14876_v42  ;;  %7197 = vmatmul.mubr.bf16.gmra.mxu0 %v14876_v42  ;;  %v11715_v56 = vmul.f32 -1.442695, %v6517_v54  ;;  %v16252_v58 = vld [vmem:[#allocation62_spill] sm:$0xff]  ;;  %v12683_v16 = vpop.eup %12682  ;;  %v14889_v42 = vld [vmem:[#allocation13 + $0x8] sm:$0xff]  ;;  %v6522_v15 = vpop.f32.mrf.mxu0  ;;  %7350 = vmatprep.subr.bf16.mxu0 %v11477_v47 }
 0x3f0   : > { %12704 = vpow2.f32 %v11711_v53  ;;  %16251 = vst [vmem:[#allocation79_spill] sm:$0xff] %v14883_v25  ;;  %v6521_v26 = vadd.f32 %v6520_v62, %v16252_v58  ;;  %v14886_v32 = vpop.f32.mrf.mxu1  ;;  %v16253_v53 = vld [vmem:[#allocation61_spill] sm:$0xff]  ;;  %v14899_v44 = vpop.eup %12684  ;;  %v7778_v0 = vadd.f32 1.0, %v12683_v16  ;;  %v16256_v58 = vld [vmem:[#allocation64_spill] sm:$0xff]  ;;  %7463 = vmatprep.subr.bf16.mxu1 %v11605_v49  ;;  %v16257_v47 = vld [vmem:[#allocation46_spill] sm:$0xff] }
 0x3f1   : > { %12706 = vrcp.f32 %v7774_v3  ;;  %7310 = vmatmul.mubr.bf16.gmra.mxu1 %v16253_v53  ;;  %v16254_v35 = vld [vmem:[#allocation45_spill] sm:$0xff]  ;;  %v11604_v3 = vcombine.low %v14853_v41, %v14855_v39  ;;  %16255 = vst [vmem:[#allocation62_spill] sm:$0xff] %v14899_v44  ;;  %v6523_v53 = vadd.f32 %v6522_v15, %v16256_v58  ;;  %v14906_v8 = vrot.slane %v14889_v42, %v16257_v47  ;;  %v6524_v41 = vpop.f32.mrf.mxu0  ;;  %v16258_v39 = vld [vmem:[#allocation63_spill] sm:$0xff] }
 0x3f2   : > { %v14893_v5 = vrot.slane %v14889_v42, %v16254_v35  ;;  %12708 = vpow2.f32 %v11714_v19  ;;  %v11718_v62 = vmul.f32 -1.442695, %v6521_v26  ;;  %v14902_v34 = vpop.f32.mrf.mxu1  ;;  %v13219_v19 = vld [vmem:[#allocation8 + $0xc] ss:$24 sps:$4 sm:$0xff]   ;;  %v12687_v40 = vpop.eup %12686  ;;  %7465 = vmatprep.mubr.bf16.mxu1 %v16258_v39  ;;  %v6525_v16 = vadd.f32 %v6524_v41, %v14508_v14  ;;  %7351 = vmatpush2.bf16.msra.mxu0 %v11476_v29  ;;  %v13220_v41 = vld [vmem:[#allocation8 + $0x8] ss:$24 sps:$4 sm:$0xff]  }
 0x3f3   : > { %12710 = vrcp.f32 %v7775_v20  ;;  %7352 = vmatprep.mubr.bf16.mxu0 %v13219_v19  ;;  %v14909_v54 = vpop.eup %12688  ;;  %v7779_v20 = vadd.f32 1.0, %v12687_v40  ;;  %v11719_v26 = vmul.f32 -1.442695, %v6523_v53  ;;  %7464 = vmatpush2.bf16.msra.mxu1 %v11604_v3  ;;  %v6566_v29 = vadd.f32 %v14521_v36, %v14906_v8 }
 0x3f4   : > { %12712 = vpow2.f32 %v11715_v56  ;;  %16259 = vst [vmem:[#allocation61_spill] sm:$0xff] %v14909_v54  ;;  %v14912_v15 = vpop.f32.mrf.mxu1  ;;  %v12691_v49 = vpop.eup %12690  ;;  %v6564_v58 = vadd.f32 %v14517_v57, %v14893_v5  ;;  %v11722_v1 = vmul.f32 -1.442695, %v6525_v16 }
 0x3f5   : > { %12714 = vrcp.f32 %v7778_v0  ;;  %v6526_v56 = vpop.f32.mrf.mxu0  ;;  %v14916_v19 = vpop.eup %12692  ;;  %v7782_v39 = vadd.f32 1.0, %v12691_v49  ;;  %v13221_v49 = vld [vmem:[#allocation8 + $0x3c] ss:$24 sps:$4 sm:$0xff]  }
 0x3f6   : > { %12716 = vpow2.f32 %v11718_v62  ;;  %16260 = vst [vmem:[#allocation45_spill] sm:$0xff] %v14916_v19  ;;  %v6527_v0 = vadd.f32 %v6526_v56, %v14514_v37  ;;  %v14919_v53 = vpop.f32.mrf.mxu1  ;;  %v12695_v14 = vpop.eup %12694 }
 0x3f7   : > { %12718 = vrcp.f32 %v7779_v20  ;;  %v6676_v40 = vpop.f32.mrf.mxu0  ;;  %7353 = vmatmul.mubr.bf16.vlgmr.msra.gmra.mxu0 %v13220_v41  ;;  %v14925_v3 = vpop.eup %12696  ;;  %v7783_v62 = vadd.f32 1.0, %v12695_v14 }
 0x3f8   : > { %12720 = vpow2.f32 %v11719_v26  ;;  %16261 = vst [vmem:[#allocation64_spill] sm:$0xff] %v14925_v3  ;;  %v11723_v20 = vmul.f32 -1.442695, %v6527_v0  ;;  %v6677_v16 = vadd.f32 %v6676_v40, %v6564_v58  ;;  %v6789_v37 = vpop.f32.mrf.mxu1  ;;  %7362 = vmatprep.mubr.bf16.mxu0 %v13221_v49  ;;  %v14928_v56 = vpop.eup %12698 }
 0x3f9   : > { %12722 = vrcp.f32 %v7782_v39  ;;  %7466 = vmatmul.mubr.bf16.vlgmr.msra.gmra.mxu1 %v14511_v21  ;;  %16262 = vst [vmem:[#allocation46_spill] sm:$0xff] %v14928_v56  ;;  %v6678_v36 = vpop.f32.mrf.mxu0  ;;  %v6568_v39 = vadd.f32 %v14528_v51, %v14893_v5  ;;  %v6574_v51 = vadd.f32 %v14545_v10, %v14893_v5 }
 0x3fa   : > { %12724 = vpow2.f32 %v11722_v1  ;;  %7475 = vmatprep.mubr.bf16.mxu1 %v14523_v28  ;;  %v6790_v58 = vadd.f32 %v6789_v37, %v6677_v16  ;;  %v6679_v0 = vadd.f32 %v6678_v36, %v6566_v29  ;;  %v6791_v14 = vpop.f32.mrf.mxu1  ;;  %v6570_v28 = vadd.f32 %v14531_v9, %v14906_v8 }
 0x3fb   : > { %v12701_v41 = vpop.eup %12700  ;;  %12726 = vrcp.f32 %v7783_v62  ;;  %v6680_v49 = vpop.f32.mrf.mxu0  ;;  %v6576_v9 = vadd.f32 %v14551_v45, %v14906_v8  ;;  %v6578_v45 = vadd.f32 %v14568_v6, %v14893_v5 }
 0x3fc   : > { %v14935_v21 = vpop.eup %12702  ;;  %v7786_v40 = vadd.f32 1.0, %v12701_v41  ;;  %12728 = vpow2.f32 %v11723_v20  ;;  %v11664_v57 = vmul.f32 -1.442695, %v6790_v58  ;;  %v6792_v46 = vadd.f32 %v6791_v14, %v6679_v0  ;;  %v6793_v25 = vpop.f32.mrf.mxu1  ;;  %v13222_v0 = vld [vmem:[#allocation8 + $0x38] ss:$24 sps:$4 sm:$0xff]  }
 0x3fd   : > { %16263 = vst [vmem:[#allocation63_spill] sm:$0xff] %v14935_v21  ;;  %v12705_v1 = vpop.eup %12704  ;;  %v6681_v26 = vadd.f32 %v6680_v49, %v6568_v39  ;;  %v6682_v62 = vpop.f32.mrf.mxu0 }
 0x3fe   : > { %v14939_v44 = vpop.eup %12706  ;;  %12730 = vrcp.f32 %v7786_v40  ;;  %v7787_v29 = vadd.f32 1.0, %v12705_v1  ;;  %v11665_v20 = vmul.f32 -1.442695, %v6792_v46  ;;  %v6683_v36 = vadd.f32 %v6682_v62, %v6570_v28  ;;  %v6795_v41 = vpop.f32.mrf.mxu1  ;;  %v13223_v40 = vld [vmem:[#allocation8 + $0x6c] ss:$24 sps:$4 sm:$0xff]  }
 0x3ff   : > { %16264 = vst [vmem:[#allocation80_spill] sm:$0xff] %v14939_v44  ;;  %v12709_v16 = vpop.eup %12708  ;;  %12732 = vpow2.f32 %v11664_v57  ;;  %v6794_v37 = vadd.f32 %v6793_v25, %v6681_v26  ;;  %v6686_v58 = vpop.f32.mrf.mxu0  ;;  %7363 = vmatmul.mubr.bf16.gmra.mxu0 %v13222_v0 }
 0x400   : > { %v14943_v19 = vpop.eup %12710  ;;  %12734 = vrcp.f32 %v7787_v29  ;;  %v7790_v39 = vadd.f32 1.0, %v12709_v16  ;;  %v6796_v46 = vadd.f32 %v6795_v41, %v6683_v36  ;;  %v6687_v25 = vadd.f32 %v6686_v58, %v6574_v51  ;;  %v6799_v26 = vpop.f32.mrf.mxu1  ;;  %7372 = vmatprep.mubr.bf16.mxu0 %v13223_v40 }
 0x401   : > { %16265 = vst [vmem:[#allocation81_spill] sm:$0xff] %v14943_v19  ;;  %v12713_v14 = vpop.eup %12712  ;;  %12736 = vpow2.f32 %v11665_v20  ;;  %v11668_v57 = vmul.f32 -1.442695, %v6794_v37  ;;  %7476 = vmatmul.mubr.bf16.gmra.mxu1 %v14537_v31  ;;  %v6688_v28 = vpop.f32.mrf.mxu0  ;;  %v6580_v36 = vadd.f32 %v14579_v12, %v14906_v8 }
 0x402   : > { %v14950_v49 = vpop.eup %12714  ;;  %12738 = vrcp.f32 %v7790_v39  ;;  %v7791_v1 = vadd.f32 1.0, %v12713_v14  ;;  %7485 = vmatprep.mubr.bf16.mxu1 %v14553_v38  ;;  %v11669_v51 = vmul.f32 -1.442695, %v6796_v46  ;;  %v6800_v16 = vadd.f32 %v6799_v26, %v6687_v25  ;;  %v6801_v20 = vpop.f32.mrf.mxu1 }
 0x403   : > { %16266 = vst [vmem:[#allocation82_spill] sm:$0xff] %v14950_v49  ;;  %v12717_v62 = vpop.eup %12716  ;;  %12740 = vpow2.f32 %v11668_v57  ;;  %v6689_v31 = vadd.f32 %v6688_v28, %v6576_v9  ;;  %v6690_v41 = vpop.f32.mrf.mxu0  ;;  %v6584_v9 = vadd.f32 %v14594_v61, %v14893_v5 }
 0x404   : > { %v14957_v37 = vpop.eup %12718  ;;  %12742 = vrcp.f32 %v7791_v1  ;;  %v7794_v6 = vadd.f32 1.0, %v12717_v62  ;;  %v11672_v38 = vmul.f32 -1.442695, %v6800_v16  ;;  %v6691_v0 = vadd.f32 %v6690_v41, %v6578_v45  ;;  %v6803_v14 = vpop.f32.mrf.mxu1 }
 0x405   : > { %16267 = vst [vmem:[#allocation83_spill] sm:$0xff] %v14957_v37  ;;  %v12721_v39 = vpop.eup %12720  ;;  %12744 = vpow2.f32 %v11669_v51  ;;  %v6802_v58 = vadd.f32 %v6801_v20, %v6689_v31  ;;  %v6692_v46 = vpop.f32.mrf.mxu0  ;;  %v6586_v45 = vadd.f32 %v14608_v43, %v14906_v8  ;;  %v13224_v31 = vld [vmem:[#allocation8 + $0x68] ss:$24 sps:$4 sm:$0xff]   ;;  %v3544_v43 = vadd.f32 1.0, %v14701_v52 }
 0x406   : > { %v14961_v40 = vpop.eup %12722  ;;  %12746 = vrcp.f32 %v7794_v6  ;;  %v7795_v57 = vadd.f32 1.0, %v12721_v39  ;;  %v6804_v26 = vadd.f32 %v6803_v14, %v6691_v0  ;;  %v6693_v1 = vadd.f32 %v6692_v46, %v6580_v36  ;;  %v6805_v28 = vpop.f32.mrf.mxu1 }
 0x407   : > { %16268 = vst [vmem:[#allocation84_spill] sm:$0xff] %v14961_v40  ;;  %v12725_v25 = vpop.eup %12724  ;;  %12748 = vpow2.f32 %v11672_v38  ;;  %v11673_v12 = vmul.f32 -1.442695, %v6802_v58  ;;  %v6696_v16 = vpop.f32.mrf.mxu0  ;;  %7373 = vmatmul.mubr.bf16.gmra.mxu0 %v13224_v31  ;;  %v13225_v38 = vld [vmem:[#allocation8 + $0x9c] ss:$24 sps:$4 sm:$0xff]   ;;  %v6590_v52 = vadd.f32 %v14634_v63, %v14906_v8 }
 0x408   : > { %v14965_v62 = vpop.eup %12726  ;;  %12750 = vrcp.f32 %v7795_v57  ;;  %v7798_v51 = vadd.f32 1.0, %v12725_v25  ;;  %v11676_v6 = vmul.f32 -1.442695, %v6804_v26  ;;  %v6806_v41 = vadd.f32 %v6805_v28, %v6693_v1  ;;  %v6809_v36 = vpop.f32.mrf.mxu1  ;;  %7382 = vmatprep.mubr.bf16.mxu0 %v13225_v38 }
 0x409   : > { %16269 = vst [vmem:[#allocation85_spill] sm:$0xff] %v14965_v62  ;;  %v12729_v20 = vpop.eup %12728  ;;  %12752 = vpow2.f32 %v11673_v12  ;;  %v6697_v39 = vadd.f32 %v6696_v16, %v6584_v9  ;;  %7486 = vmatmul.mubr.bf16.gmra.mxu1 %v14590_v7  ;;  %v6698_v0 = vpop.f32.mrf.mxu0  ;;  %v6588_v26 = vadd.f32 %v14623_v4, %v14893_v5 }
 0x40a   : > { %12754 = vrcp.f32 %v7798_v51  ;;  %v7799_v58 = vadd.f32 1.0, %v12729_v20  ;;  %7495 = vmatprep.mubr.bf16.mxu1 %v14610_v11  ;;  %v11677_v46 = vmul.f32 -1.442695, %v6806_v41  ;;  %v6699_v25 = vadd.f32 %v6698_v0, %v6586_v45  ;;  %v6811_v12 = vpop.f32.mrf.mxu1 }
 0x40b   : > { %v14976_v57 = vpop.eup %12730  ;;  %12756 = vpow2.f32 %v11676_v6  ;;  %v6810_v9 = vadd.f32 %v6809_v36, %v6697_v39  ;;  %v6700_v1 = vpop.f32.mrf.mxu0  ;;  %v6594_v45 = vadd.f32 %v14648_v55, %v14893_v5  ;;  %v6596_v0 = vadd.f32 %v14660_v60, %v14906_v8 }
 0x40c   : > { %16270 = vst [vmem:[#allocation86_spill] sm:$0xff] %v14976_v57  ;;  %v12733_v7 = vpop.eup %12732  ;;  %12758 = vrcp.f32 %v7799_v58  ;;  %v6812_v16 = vadd.f32 %v6811_v12, %v6699_v25  ;;  %v6813_v31 = vpop.f32.mrf.mxu1  ;;  %v6701_v6 = vadd.f32 %v6700_v1, %v6588_v26  ;;  %v13227_v1 = vld [vmem:[#allocation8 + $0xcc] ss:$24 sps:$4 sm:$0xff]  }
 0x40d   : > { %v14982_v11 = vpop.eup %12734  ;;  %v7740_v28 = vadd.f32 1.0, %v12733_v7  ;;  %12760 = vpow2.f32 %v11677_v46  ;;  %v11680_v51 = vmul.f32 -1.442695, %v6810_v9  ;;  %v6702_v41 = vpop.f32.mrf.mxu0 }
 0x40e   : > { %16271 = vst [vmem:[#allocation87_spill] sm:$0xff] %v14982_v11  ;;  %v12737_v20 = vpop.eup %12736  ;;  %12762 = vrcp.f32 %v3544_v43  ;;  %v11681_v39 = vmul.f32 -1.442695, %v6812_v16  ;;  %v6703_v36 = vadd.f32 %v6702_v41, %v6590_v52  ;;  %v6815_v38 = vpop.f32.mrf.mxu1  ;;  %v6814_v46 = vadd.f32 %v6813_v31, %v6701_v6  ;;  %v13226_v43 = vld [vmem:[#allocation8 + $0x98] ss:$24 sps:$4 sm:$0xff]  }
 0x40f   : > { %v14986_v4 = vpop.eup %12738  ;;  %12764 = vrcp.f32 %v7740_v28  ;;  %v7741_v63 = vadd.f32 1.0, %v12737_v20  ;;  %v6706_v9 = vpop.f32.mrf.mxu0  ;;  %7383 = vmatmul.mubr.bf16.gmra.mxu0 %v13226_v43  ;;  %v6598_v28 = vadd.f32 %v14675_v13, %v14893_v5 }
 0x410   : > { %16272 = vst [vmem:[#allocation88_spill] sm:$0xff] %v14986_v4  ;;  %v12741_v58 = vpop.eup %12740  ;;  %12766 = vpow2.f32 %v11680_v51  ;;  %v6816_v7 = vadd.f32 %v6815_v38, %v6703_v36  ;;  %v6707_v26 = vadd.f32 %v6706_v9, %v6594_v45  ;;  %v6819_v52 = vpop.f32.mrf.mxu1  ;;  %7392 = vmatprep.mubr.bf16.mxu0 %v13227_v1  ;;  %v11684_v51 = vmul.f32 -1.442695, %v6814_v46 }
 0x411   : > { %v14992_v25 = vpop.eup %12742  ;;  %12768 = vrcp.f32 %v7741_v63  ;;  %v7744_v12 = vadd.f32 1.0, %v12741_v58  ;;  %7496 = vmatmul.mubr.bf16.gmra.mxu1 %v14642_v30  ;;  %v6708_v16 = vpop.f32.mrf.mxu0  ;;  %v6600_v36 = vadd.f32 %v14686_v48, %v14906_v8 }
 0x412   : > { %16273 = vst [vmem:[#allocation89_spill] sm:$0xff] %v14992_v25  ;;  %v12745_v60 = vpop.eup %12744  ;;  %12770 = vpow2.f32 %v11681_v39  ;;  %7505 = vmatprep.mubr.bf16.mxu1 %v14662_v24  ;;  %v11685_v6 = vmul.f32 -1.442695, %v6816_v7  ;;  %v6820_v30 = vadd.f32 %v6819_v52, %v6707_v26  ;;  %v6821_v41 = vpop.f32.mrf.mxu1  ;;  %v6709_v13 = vadd.f32 %v6708_v16, %v6596_v0  ;;  %v16327_v25 = vld [vmem:[#allocation41_spill] sm:$0xff] }
 0x413   : > { %v15000_v20 = vpop.eup %12746  ;;  %12772 = vrcp.f32 %v7744_v12  ;;  %v7745_v45 = vadd.f32 1.0, %v12745_v60  ;;  %v6710_v39 = vpop.f32.mrf.mxu0  ;;  %v6604_v12 = vadd.f32 %v14704_v33, %v14893_v5  ;;  %v6606_v16 = vadd.f32 %v14716_v2, %v14906_v8 }
 0x414   : > { %16274 = vst [vmem:[#allocation90_spill] sm:$0xff] %v15000_v20  ;;  %v12749_v63 = vpop.eup %12748  ;;  %12774 = vpow2.f32 %v11684_v51  ;;  %v11688_v58 = vmul.f32 -1.442695, %v6820_v30  ;;  %v6711_v46 = vadd.f32 %v6710_v39, %v6598_v28  ;;  %v6823_v9 = vpop.f32.mrf.mxu1  ;;  %v6822_v7 = vadd.f32 %v6821_v41, %v6709_v13  ;;  %v13228_v30 = vld [vmem:[#allocation8 + $0xc8] ss:$24 sps:$4 sm:$0xff]  }
 0x415   : > { %v15004_v38 = vpop.eup %12750  ;;  %12776 = vrcp.f32 %v7745_v45  ;;  %v7748_v24 = vadd.f32 1.0, %v12749_v63  ;;  %v6712_v26 = vpop.f32.mrf.mxu0  ;;  %v13229_v39 = vld [vmem:[#allocation8 + $0xfc] ss:$24 sps:$4 sm:$0xff]  }
 0x416   : > { %16275 = vst [vmem:[#allocation91_spill] sm:$0xff] %v15004_v38  ;;  %v12753_v43 = vpop.eup %12752  ;;  %12778 = vpow2.f32 %v11685_v6  ;;  %v6824_v0 = vadd.f32 %v6823_v9, %v6711_v46  ;;  %v6713_v1 = vadd.f32 %v6712_v26, %v6600_v36  ;;  %v6825_v60 = vpop.f32.mrf.mxu1  ;;  %v11689_v28 = vmul.f32 -1.442695, %v6822_v7  ;;  %v16278_v9 = vld [vmem:[#allocation67_spill] sm:$0xff] }
 0x417   : > { %v15008_v52 = vpop.eup %12754  ;;  %12780 = vrcp.f32 %v7748_v24  ;;  %v7749_v48 = vadd.f32 1.0, %v12753_v43  ;;  %v6716_v45 = vpop.f32.mrf.mxu0  ;;  %7393 = vmatmul.mubr.bf16.gmra.mxu0 %v13228_v30  ;;  %v6608_v24 = vadd.f32 %v14735_v22, %v14893_v5 }
 0x418   : > { %16276 = vst [vmem:[#allocation92_spill] sm:$0xff] %v15008_v52  ;;  %v12757_v51 = vpop.eup %12756  ;;  %12782 = vpow2.f32 %v11688_v58  ;;  %v11692_v63 = vmul.f32 -1.442695, %v6824_v0  ;;  %v6826_v13 = vadd.f32 %v6825_v60, %v6713_v1  ;;  %v6829_v36 = vpop.f32.mrf.mxu1  ;;  %7402 = vmatprep.mubr.bf16.mxu0 %v13229_v39  ;;  %v6717_v58 = vadd.f32 %v6716_v45, %v6604_v12 }
 0x419   : > { %v15014_v6 = vpop.eup %12758  ;;  %12784 = vrcp.f32 %v7749_v48  ;;  %v7752_v41 = vadd.f32 1.0, %v12757_v51  ;;  %7506 = vmatmul.mubr.bf16.gmra.mxu1 %v14692_v50  ;;  %v6718_v46 = vpop.f32.mrf.mxu0  ;;  %v6610_v12 = vadd.f32 %v14746_v59, %v14906_v8  ;;  %v16282_v59 = vld [vmem:[#allocation54_spill] sm:$0xff] }
 0x41a   : > { %16277 = vst [vmem:[#allocation93_spill] sm:$0xff] %v15014_v6  ;;  %v12761_v2 = vpop.eup %12760  ;;  %12786 = vpow2.f32 %v11689_v28  ;;  %7515 = vmatprep.mubr.bf16.mxu1 %v16278_v9  ;;  %v11693_v48 = vmul.f32 -1.442695, %v6826_v13  ;;  %v6719_v50 = vadd.f32 %v6718_v46, %v6606_v16  ;;  %v6831_v0 = vpop.f32.mrf.mxu1  ;;  %v6830_v60 = vadd.f32 %v6829_v36, %v6717_v58 }
 0x41b   : > { %v15022_v7 = vpop.eup %12762  ;;  %12788 = vrcp.f32 %v7752_v41  ;;  %v7753_v26 = vadd.f32 1.0, %v12761_v2  ;;  %v6720_v22 = vpop.f32.mrf.mxu0 }
 0x41c   : > { %v15024_v1 = vpop.eup %12764  ;;  %12790 = vpow2.f32 %v11692_v63  ;;  %v6832_v28 = vadd.f32 %v6831_v0, %v6719_v50  ;;  %v6721_v45 = vadd.f32 %v6720_v22, %v6608_v24  ;;  %v6833_v30 = vpop.f32.mrf.mxu1  ;;  %v11696_v13 = vmul.f32 -1.442695, %v6830_v60  ;;  %v13230_v0 = vld [vmem:[#allocation8 + $0xf8] ss:$24 sps:$4 sm:$0xff]  }
 0x41d   : > { %16279 = vst [vmem:[#allocation67_spill] sm:$0xff] %v15024_v1  ;;  %v12767_v51 = vpop.eup %12766  ;;  %12792 = vrcp.f32 %v7753_v26  ;;  %v6722_v16 = vpop.f32.mrf.mxu0  ;;  %v6614_v63 = vadd.f32 %v14766_v17, %v14893_v5  ;;  %v6616_v24 = vadd.f32 %v16282_v59, %v14906_v8  ;;  %v16286_v59 = vld [vmem:[#allocation73_spill] sm:$0xff] }
 0x41e   : > { %v15028_v39 = vpop.eup %12768  ;;  %v7756_v41 = vadd.f32 1.0, %v12767_v51  ;;  %12794 = vpow2.f32 %v11693_v48  ;;  %v11697_v36 = vmul.f32 -1.442695, %v6832_v28  ;;  %v6834_v58 = vadd.f32 %v6833_v30, %v6721_v45  ;;  %v6835_v9 = vpop.f32.mrf.mxu1  ;;  %v16283_v28 = vld [vmem:[#allocation71_spill] sm:$0xff]  ;;  %v16285_v30 = vld [vmem:[#allocation53_spill] sm:$0xff] }
 0x41f   : > { %16280 = vst [vmem:[#allocation94_spill] sm:$0xff] %v15028_v39  ;;  %v12771_v2 = vpop.eup %12770  ;;  %v6723_v46 = vadd.f32 %v6722_v16, %v6610_v12  ;;  %v6726_v50 = vpop.f32.mrf.mxu0  ;;  %7403 = vmatmul.mubr.bf16.gmra.mxu0 %v13230_v0  ;;  %v13231_v12 = vld [vmem:[#allocation8 + $0x12c] ss:$24 sps:$4 sm:$0xff]   ;;  %v6618_v16 = vadd.f32 %v16285_v30, %v14893_v5 }
 0x420   : > { %v15032_v10 = vpop.eup %12772  ;;  %12796 = vrcp.f32 %v7756_v41  ;;  %v7757_v26 = vadd.f32 1.0, %v12771_v2  ;;  %v11700_v60 = vmul.f32 -1.442695, %v6834_v58  ;;  %v6727_v51 = vadd.f32 %v6726_v50, %v6614_v63  ;;  %v6839_v17 = vpop.f32.mrf.mxu1  ;;  %7412 = vmatprep.mubr.bf16.mxu0 %v13231_v12 }
 0x421   : > { %16281 = vst [vmem:[#allocation95_spill] sm:$0xff] %v15032_v10  ;;  %v12775_v48 = vpop.eup %12774  ;;  %12798 = vpow2.f32 %v11696_v13  ;;  %v6836_v22 = vadd.f32 %v6835_v9, %v6723_v46  ;;  %7516 = vmatmul.mubr.bf16.gmra.mxu1 %v16283_v28  ;;  %v6728_v2 = vpop.f32.mrf.mxu0  ;;  %v16288_v28 = vld [vmem:[#allocation57_spill] sm:$0xff] }
 0x422   : > { %v15037_v45 = vpop.eup %12776  ;;  %12800 = vrcp.f32 %v7757_v26  ;;  %v7760_v41 = vadd.f32 1.0, %v12775_v48  ;;  %7525 = vmatprep.mubr.bf16.mxu1 %v16286_v59  ;;  %v6840_v46 = vadd.f32 %v6839_v17, %v6727_v51  ;;  %v6729_v9 = vadd.f32 %v6728_v2, %v6616_v24  ;;  %v6841_v50 = vpop.f32.mrf.mxu1 }
 0x423   : > { %16284 = vst [vmem:[#allocation54_spill] sm:$0xff] %v15037_v45  ;;  %v12779_v58 = vpop.eup %12778  ;;  %12802 = vpow2.f32 %v11697_v36  ;;  %v11701_v63 = vmul.f32 -1.442695, %v6836_v22  ;;  %v6620_v12 = vadd.f32 %v16288_v28, %v14906_v8  ;;  %v6730_v48 = vpop.f32.mrf.mxu0  ;;  %v6624_v24 = vadd.f32 %v14832_v27, %v14893_v5 }
 0x424   : > { %v15044_v0 = vpop.eup %12780  ;;  %12804 = vrcp.f32 %v7760_v41  ;;  %v7761_v26 = vadd.f32 1.0, %v12779_v58  ;;  %v11704_v13 = vmul.f32 -1.442695, %v6840_v46  ;;  %v6842_v29 = vadd.f32 %v6841_v50, %v6729_v9  ;;  %v6843_v22 = vpop.f32.mrf.mxu1  ;;  %v13232_v9 = vld [vmem:[#allocation8 + $0x128] ss:$24 sps:$4 sm:$0xff]  }
 0x425   : > { %16287 = vst [vmem:[#allocation71_spill] sm:$0xff] %v15044_v0  ;;  %v12783_v59 = vpop.eup %12782  ;;  %12806 = vpow2.f32 %v11700_v60  ;;  %v6731_v36 = vadd.f32 %v6730_v48, %v6618_v16  ;;  %v6732_v2 = vpop.f32.mrf.mxu0  ;;  %v6626_v60 = vadd.f32 %v14846_v23, %v14906_v8  ;;  %v6628_v23 = vadd.f32 %v14863_v18, %v14893_v5 }
 0x426   : > { %v15050_v51 = vpop.eup %12784  ;;  %12808 = vrcp.f32 %v7761_v26  ;;  %v7764_v17 = vadd.f32 1.0, %v12783_v59  ;;  %v11705_v58 = vmul.f32 -1.442695, %v6842_v29  ;;  %v6733_v61 = vadd.f32 %v6732_v2, %v6620_v12  ;;  %v6845_v30 = vpop.f32.mrf.mxu1  ;;  %v16291_v29 = vld [vmem:[#allocation76_spill] sm:$0xff]  ;;  %v13233_v12 = vld [vmem:[#allocation8 + $0x15c] ss:$24 sps:$4 sm:$0xff]  }
 0x427   : > { %16289 = vst [vmem:[#allocation53_spill] sm:$0xff] %v15050_v51  ;;  %v12787_v41 = vpop.eup %12786  ;;  %12810 = vpow2.f32 %v11701_v63  ;;  %v6844_v28 = vadd.f32 %v6843_v22, %v6731_v36  ;;  %v6736_v46 = vpop.f32.mrf.mxu0  ;;  %7413 = vmatmul.mubr.bf16.gmra.mxu0 %v13232_v9 }
 0x428   : > { %v15054_v14 = vpop.eup %12788  ;;  %12812 = vrcp.f32 %v7764_v17  ;;  %v7765_v16 = vadd.f32 1.0, %v12787_v41  ;;  %v6846_v26 = vadd.f32 %v6845_v30, %v6733_v61  ;;  %v6737_v48 = vadd.f32 %v6736_v46, %v6624_v24  ;;  %v6849_v63 = vpop.f32.mrf.mxu1  ;;  %7422 = vmatprep.mubr.bf16.mxu0 %v13233_v12  ;;  %v16293_v17 = vld [vmem:[#allocation56_spill] sm:$0xff] }
 0x429   : > { %16290 = vst [vmem:[#allocation73_spill] sm:$0xff] %v15054_v14  ;;  %v12791_v27 = vpop.eup %12790  ;;  %12814 = vpow2.f32 %v11704_v13  ;;  %v11708_v50 = vmul.f32 -1.442695, %v6844_v28  ;;  %7526 = vmatmul.mubr.bf16.gmra.mxu1 %v16291_v29  ;;  %v6738_v22 = vpop.f32.mrf.mxu0  ;;  %v16294_v28 = vld [vmem:[#allocation49_spill] sm:$0xff] }
 0x42a   : > { %v15059_v59 = vpop.eup %12792  ;;  %12816 = vrcp.f32 %v7765_v16  ;;  %v7768_v36 = vadd.f32 1.0, %v12791_v27  ;;  %7535 = vmatprep.mubr.bf16.mxu1 %v16293_v17  ;;  %v11709_v30 = vmul.f32 -1.442695, %v6846_v26  ;;  %v6850_v24 = vadd.f32 %v6849_v63, %v6737_v48  ;;  %v6851_v41 = vpop.f32.mrf.mxu1  ;;  %v16297_v17 = vld [vmem:[#allocation65_spill] sm:$0xff] }
 0x42b   : > { %16292 = vst [vmem:[#allocation57_spill] sm:$0xff] %v15059_v59  ;;  %v12795_v61 = vpop.eup %12794  ;;  %12818 = vpow2.f32 %v11705_v58  ;;  %v6739_v2 = vadd.f32 %v6738_v22, %v6626_v60  ;;  %v15068_v46 = vrot.slane %v14889_v42, %v16294_v28  ;;  %v6740_v16 = vpop.f32.mrf.mxu0  ;;  %v16296_v60 = vld [vmem:[#allocation77_spill] sm:$0xff]  ;;  %v6634_v22 = vadd.f32 %v14886_v32, %v14893_v5 }
 0x42c   : > { %12820 = vrcp.f32 %v7768_v36  ;;  %v7769_v18 = vadd.f32 1.0, %v12795_v61  ;;  %v11712_v29 = vmul.f32 -1.442695, %v6850_v24  ;;  %v6741_v58 = vadd.f32 %v6740_v16, %v6628_v23  ;;  %v6853_v26 = vpop.f32.mrf.mxu1  ;;  %v13234_v32 = vld [vmem:[#allocation8 + $0x158] ss:$24 sps:$4 sm:$0xff]  }
 0x42d   : > { %v15072_v27 = vpop.eup %12796  ;;  %12822 = vpow2.f32 %v11708_v50  ;;  %v6852_v12 = vadd.f32 %v6851_v41, %v6739_v2  ;;  %v6630_v63 = vadd.f32 %v16296_v60, %v14906_v8  ;;  %v6742_v36 = vpop.f32.mrf.mxu0  ;;  %v3554_v61 = vpack.c.bf16 %v16297_v17, %v16297_v17 }
 0x42e   : > { %16295 = vst [vmem:[#allocation76_spill] sm:$0xff] %v15072_v27  ;;  %v12799_v48 = vpop.eup %12798  ;;  %12824 = vrcp.f32 %v7769_v18  ;;  %v6854_v24 = vadd.f32 %v6853_v26, %v6741_v58  ;;  %v6855_v23 = vpop.f32.mrf.mxu1  ;;  %v6636_v41 = vadd.f32 %v14902_v34, %v14906_v8  ;;  %v3556_v18 = vpack.c.bf16 %v15022_v7, %v15022_v7  ;;  %v16300_v26 = vld [vmem:[#allocation78_spill] sm:$0xff] }
 0x42f   : > { %v15080_v13 = vpop.eup %12800  ;;  %v7772_v9 = vadd.f32 1.0, %v12799_v48  ;;  %12826 = vpow2.f32 %v11709_v30  ;;  %v11713_v50 = vmul.f32 -1.442695, %v6852_v12  ;;  %v6743_v16 = vadd.f32 %v6742_v36, %v6630_v63  ;;  %v6746_v60 = vpop.f32.mrf.mxu0  ;;  %7423 = vmatmul.mubr.bf16.gmra.mxu0 %v13234_v32 }
 0x430   : > { %16298 = vst [vmem:[#allocation56_spill] sm:$0xff] %v15080_v13  ;;  %v12803_v2 = vpop.eup %12802  ;;  %12828 = vpow2.f32 %v11712_v29  ;;  %v11716_v30 = vmul.f32 -1.442695, %v6854_v24  ;;  %v6747_v12 = vadd.f32 %v6746_v60, %v6634_v22  ;;  %v6859_v58 = vpop.f32.mrf.mxu1  ;;  %8499 = vmatprep.mubr.bf16.mxu0 %v3554_v61  ;;  %v6638_v34 = vadd.f32 %v14912_v15, %v14893_v5 }
 0x431   : > { %v15086_v17 = vpop.eup %12804  ;;  %12830 = vrcp.f32 %v7772_v9  ;;  %v7773_v48 = vadd.f32 1.0, %v12803_v2  ;;  %7536 = vmatmul.mubr.bf16.gmra.mxu1 %v16300_v26  ;;  %v6856_v29 = vadd.f32 %v6855_v23, %v6743_v16  ;;  %v6748_v63 = vpop.f32.mrf.mxu0  ;;  %v6640_v61 = vadd.f32 %v14919_v53, %v14906_v8 }
 0x432   : > { %16299 = vst [vmem:[#allocation77_spill] sm:$0xff] %v15086_v17  ;;  %v12807_v55 = vpop.eup %12806  ;;  %12832 = vpow2.f32 %v11713_v50  ;;  %8539 = vmatprep.mubr.bf16.mxu1 %v3556_v18  ;;  %v6860_v22 = vadd.f32 %v6859_v58, %v6747_v12  ;;  %v6749_v24 = vadd.f32 %v6748_v63, %v6636_v41  ;;  %v6861_v2 = vpop.f32.mrf.mxu1  ;;  %v16304_v63 = vld [vmem:[#allocation50_spill] sm:$0xff] }
 0x433   : > { %v15093_v36 = vpop.eup %12808  ;;  %12834 = vrcp.f32 %v7773_v48  ;;  %v7776_v9 = vadd.f32 1.0, %v12807_v55  ;;  %v11717_v5 = vmul.f32 -1.442695, %v6856_v29  ;;  %v6750_v15 = vpop.f32.mrf.mxu0  ;;  %v15105_v7 = vrot.slane %v14889_v42, %v16304_v63 }
 0x434   : > { %16301 = vst [vmem:[#allocation65_spill] sm:$0xff] %v15093_v36  ;;  %v12811_v60 = vpop.eup %12810  ;;  %12836 = vpow2.f32 %v11716_v30  ;;  %v11720_v32 = vmul.f32 -1.442695, %v6860_v22  ;;  %v6862_v18 = vadd.f32 %v6861_v2, %v6749_v24  ;;  %v6863_v55 = vpop.f32.mrf.mxu1  ;;  %v6751_v41 = vadd.f32 %v6750_v15, %v6638_v34 }
 0x435   : > { %v15099_v23 = vpop.eup %12812  ;;  %12838 = vrcp.f32 %v7776_v9  ;;  %v7777_v16 = vadd.f32 1.0, %v12811_v60  ;;  %v6752_v12 = vpop.f32.mrf.mxu0 }
 0x436   : > { %16302 = vst [vmem:[#allocation78_spill] sm:$0xff] %v15099_v23  ;;  %v12815_v48 = vpop.eup %12814  ;;  %12840 = vpow2.f32 %v11717_v5  ;;  %v11721_v53 = vmul.f32 -1.442695, %v6862_v18  ;;  %v6753_v30 = vadd.f32 %v6752_v12, %v6640_v61  ;;  %v6865_v26 = vpop.f32.mrf.mxu1  ;;  %v6864_v9 = vadd.f32 %v6863_v55, %v6751_v41 }
 0x437   : > { %v15101_v58 = vpop.eup %12816  ;;  %12842 = vrcp.f32 %v7777_v16  ;;  %v7780_v8 = vadd.f32 1.0, %v12815_v48  ;;  %v6902_v22 = vpop.f32.mrf.mxu0 }
 0x438   : > { %16303 = vst [vmem:[#allocation96_spill] sm:$0xff] %v15101_v58  ;;  %v12819_v29 = vpop.eup %12818  ;;  %12844 = vpow2.f32 %v11720_v32  ;;  %v6866_v2 = vadd.f32 %v6865_v26, %v6753_v30  ;;  %v6903_v60 = vadd.f32 %v6902_v22, %v15068_v46  ;;  %v7015_v5 = vpop.f32.mrf.mxu1  ;;  %v11724_v61 = vmul.f32 -1.442695, %v6864_v9 }
 0x439   : > { %v15107_v24 = vpop.eup %12820  ;;  %12846 = vrcp.f32 %v7780_v8  ;;  %v7781_v34 = vadd.f32 1.0, %v12819_v29  ;;  %v6904_v16 = vpop.f32.mrf.mxu0 }
 0x43a   : > { %16305 = vst [vmem:[#allocation97_spill] sm:$0xff] %v15107_v24  ;;  %v12823_v15 = vpop.eup %12822  ;;  %12848 = vpow2.f32 %v11721_v53  ;;  %v11725_v55 = vmul.f32 -1.442695, %v6866_v2  ;;  %v15114_v48 = vadd.f32 %v7015_v5, %v6903_v60  ;;  %v7017_v41 = vpop.f32.mrf.mxu1  ;;  %v6905_v8 = vadd.f32 %v6904_v16, %v15105_v7 }
 0x43b   : > { %v15112_v42 = vpop.eup %12824  ;;  %12850 = vrcp.f32 %v7781_v34  ;;  %v7784_v32 = vadd.f32 1.0, %v12823_v15  ;;  %v6906_v30 = vpop.f32.mrf.mxu0 }
 0x43c   : > { %16306 = vst [vmem:[#allocation98_spill] sm:$0xff] %v15112_v42  ;;  %v12827_v12 = vpop.eup %12826  ;;  %12852 = vpow2.f32 %v11724_v61  ;;  %v6907_v9 = vadd.f32 %v6906_v30, %v15068_v46  ;;  %v7019_v22 = vpop.f32.mrf.mxu1  ;;  %v15122_v2 = vadd.f32 %v7017_v41, %v6905_v8 }
 0x43d   : > { %v12829_v26 = vpop.eup %12828  ;;  %12854 = vrcp.f32 %v7784_v32  ;;  %v7785_v29 = vadd.f32 1.0, %v12827_v12  ;;  %v15124_v60 = vpop.f32.mrf.mxu0 }
 0x43e   : > { %v15120_v34 = vpop.eup %12830  ;;  %12856 = vpow2.f32 %v11725_v55  ;;  %v7788_v15 = vadd.f32 1.0, %v12829_v26  ;;  %v15126_v61 = vadd.f32 %v7019_v22, %v6907_v9  ;;  %v15128_v16 = vpop.f32.mrf.mxu1 }
 0x43f   : > { %16307 = vst [vmem:[#allocation99_spill] sm:$0xff] %v15120_v34  ;;  %v12833_v5 = vpop.eup %12832  ;;  %12858 = vrcp.f32 %v7785_v29  ;;  %v6912_v32 = vpop.f32.mrf.mxu0 }
 0x440   : > { %v15130_v50 = vpop.eup %12834  ;;  %v7789_v30 = vadd.f32 1.0, %v12833_v5  ;;  %v6913_v18 = vadd.f32 %v6912_v32, %v15068_v46  ;;  %v7025_v53 = vpop.f32.mrf.mxu1  ;;  %12860 = vrcp.f32 %v7788_v15 }
 0x441   : > { %16308 = vst [vmem:[#allocation100_spill] sm:$0xff] %v15130_v50  ;;  %v12837_v12 = vpop.eup %12836  ;;  %v15135_v8 = vpop.f32.mrf.mxu0 }
 0x442   : > { %v15133_v55 = vpop.eup %12838  ;;  %v7792_v41 = vadd.f32 1.0, %v12837_v12  ;;  %v15137_v26 = vadd.f32 %v7025_v53, %v6913_v18  ;;  %v15139_v29 = vpop.f32.mrf.mxu1  ;;  %v6915_v40 = vadd.f32 %v15135_v8, %v15105_v7 }
 0x443   : > { %16309 = vst [vmem:[#allocation101_spill] sm:$0xff] %v15133_v55  ;;  %v12841_v31 = vpop.eup %12840  ;;  %v6916_v32 = vpop.f32.mrf.mxu0 }
 0x444   : > { %v15143_v22 = vpop.eup %12842  ;;  %12862 = vrcp.f32 %v7792_v41  ;;  %v7793_v5 = vadd.f32 1.0, %v12841_v31  ;;  %v6917_v12 = vadd.f32 %v6916_v32, %v15068_v46  ;;  %v7029_v43 = vpop.f32.mrf.mxu1  ;;  %v7028_v4 = vadd.f32 %v15139_v29, %v6915_v40 }
 0x445   : > { %16310 = vst [vmem:[#allocation102_spill] sm:$0xff] %v15143_v22  ;;  %v12845_v33 = vpop.eup %12844  ;;  %12864 = vrcp.f32 %v7789_v30  ;;  %v15150_v53 = vpop.f32.mrf.mxu0 }
 0x446   : > { %v15148_v18 = vpop.eup %12846  ;;  %12866 = vrcp.f32 %v7793_v5  ;;  %v7796_v9 = vadd.f32 1.0, %v12845_v33  ;;  %v15152_v63 = vadd.f32 %v7029_v43, %v6917_v12  ;;  %v15154_v41 = vpop.f32.mrf.mxu1 }
 0x447   : > { %16311 = vst [vmem:[#allocation103_spill] sm:$0xff] %v15148_v18  ;;  %v12849_v28 = vpop.eup %12848  ;;  %v6922_v30 = vpop.f32.mrf.mxu0 }
 0x448   : > { %v15156_v31 = vpop.eup %12850  ;;  %v7797_v32 = vadd.f32 1.0, %v12849_v28  ;;  %v6923_v10 = vadd.f32 %v6922_v30, %v15068_v46  ;;  %v7035_v39 = vpop.f32.mrf.mxu1  ;;  %12868 = vrcp.f32 %v7796_v9 }
 0x449   : > { %16312 = vst [vmem:[#allocation104_spill] sm:$0xff] %v15156_v31  ;;  %v12853_v1 = vpop.eup %12852  ;;  %v6924_v5 = vpop.f32.mrf.mxu0 }
 0x44a   : > { %v15159_v15 = vpop.eup %12854  ;;  %v7800_v45 = vadd.f32 1.0, %v12853_v1  ;;  %v15161_v14 = vadd.f32 %v7035_v39, %v6923_v10  ;;  %v6925_v33 = vadd.f32 %v6924_v5, %v15105_v7  ;;  %v7037_v43 = vpop.f32.mrf.mxu1 }
 0x44b   : > { %16313 = vst [vmem:[#allocation105_spill] sm:$0xff] %v15159_v15  ;;  %v12857_v0 = vpop.eup %12856  ;;  %v6926_v30 = vpop.f32.mrf.mxu0 }
 0x44c   : > { %v15166_v51 = vpop.eup %12858  ;;  %12870 = vrcp.f32 %v7800_v45  ;;  %v7801_v28 = vadd.f32 1.0, %v12857_v0  ;;  %v15168_v59 = vadd.f32 %v7037_v43, %v6925_v33  ;;  %v6927_v1 = vadd.f32 %v6926_v30, %v15068_v46  ;;  %v7039_v27 = vpop.f32.mrf.mxu1 }
 0x44d   : > { %16314 = vst [vmem:[#allocation106_spill] sm:$0xff] %v15166_v51  ;;  %12872 = vrcp.f32 %v7797_v32  ;;  %v6928_v39 = vpop.f32.mrf.mxu0  ;;  %v15176_v17 = vpop.eup %12860 }
 0x44e   : > { %12874 = vrcp.f32 %v7801_v28  ;;  %v15173_v9 = vadd.f32 %v7039_v27, %v6927_v1  ;;  %v6929_v5 = vadd.f32 %v6928_v39, %v15105_v7  ;;  %v7041_v12 = vpop.f32.mrf.mxu1  ;;  %16315 = vst [vmem:[#allocation107_spill] sm:$0xff] %v15176_v17 }
 0x44f   : > { %v6932_v45 = vpop.f32.mrf.mxu0 }
 0x450   : > { %v15180_v32 = vadd.f32 %v7041_v12, %v6929_v5  ;;  %v6933_v33 = vadd.f32 %v6932_v45, %v15068_v46  ;;  %v7045_v43 = vpop.f32.mrf.mxu1 }
 0x451   : > { %v15178_v0 = vpop.eup %12862  ;;  %v6934_v10 = vpop.f32.mrf.mxu0 }
 0x452   : > { %16316 = vst [vmem:[#allocation108_spill] sm:$0xff] %v15178_v0  ;;  %v15183_v30 = vpop.eup %12864  ;;  %v15189_v1 = vadd.f32 %v7045_v43, %v6933_v33  ;;  %v6935_v39 = vadd.f32 %v6934_v10, %v15105_v7  ;;  %v7047_v13 = vpop.f32.mrf.mxu1 }
 0x453   : > { %16317 = vst [vmem:[#allocation109_spill] sm:$0xff] %v15183_v30  ;;  %v15187_v28 = vpop.eup %12866  ;;  %v6936_v36 = vpop.f32.mrf.mxu0 }
 0x454   : > { %16318 = vst [vmem:[#allocation110_spill] sm:$0xff] %v15187_v28  ;;  %v15194_v5 = vadd.f32 %v7047_v13, %v6935_v39  ;;  %v6937_v45 = vadd.f32 %v6936_v36, %v15068_v46  ;;  %v7049_v23 = vpop.f32.mrf.mxu1 }
 0x455   : > { %v6938_v24 = vpop.f32.mrf.mxu0  ;;  %v15200_v33 = vpop.eup %12868 }
 0x456   : > { %v15197_v58 = vadd.f32 %v7049_v23, %v6937_v45  ;;  %v6939_v27 = vadd.f32 %v6938_v24, %v15105_v7  ;;  %v7051_v42 = vpop.f32.mrf.mxu1  ;;  %16319 = vst [vmem:[#allocation111_spill] sm:$0xff] %v15200_v33 }
 0x457   : > { %v6942_v43 = vpop.f32.mrf.mxu0 }
 0x458   : > { %v15204_v34 = vadd.f32 %v7051_v42, %v6939_v27  ;;  %v6943_v12 = vadd.f32 %v6942_v43, %v15068_v46  ;;  %v7055_v13 = vpop.f32.mrf.mxu1 }
 0x459   : > { %v15202_v10 = vpop.eup %12870  ;;  %v6944_v36 = vpop.f32.mrf.mxu0 }
 0x45a   : > { %16320 = vst [vmem:[#allocation112_spill] sm:$0xff] %v15202_v10  ;;  %v15207_v39 = vpop.eup %12872  ;;  %v15213_v24 = vadd.f32 %v7055_v13, %v6943_v12  ;;  %v6945_v55 = vadd.f32 %v6944_v36, %v15105_v7  ;;  %v7057_v50 = vpop.f32.mrf.mxu1 }
 0x45b   : > { %16321 = vst [vmem:[#allocation113_spill] sm:$0xff] %v15207_v39  ;;  %v15211_v45 = vpop.eup %12874  ;;  %v6946_v22 = vpop.f32.mrf.mxu0 }
 0x45c   : > { %16322 = vst [vmem:[#allocation114_spill] sm:$0xff] %v15211_v45  ;;  %v15218_v27 = vadd.f32 %v7057_v50, %v6945_v55  ;;  %v6947_v43 = vadd.f32 %v6946_v22, %v15068_v46  ;;  %v7059_v18 = vpop.f32.mrf.mxu1 }
 0x45d   : > { %v6948_v15 = vpop.f32.mrf.mxu0 }
 0x45e   : > { %v15221_v31 = vadd.f32 %v7059_v18, %v6947_v43  ;;  %v6949_v23 = vadd.f32 %v6948_v15, %v15105_v7  ;;  %v7061_v51 = vpop.f32.mrf.mxu1 }
 0x45f   : > { %v6952_v12 = vpop.f32.mrf.mxu0 }
 0x460   : > { %v15224_v13 = vadd.f32 %v7061_v51, %v6949_v23  ;;  %v6953_v36 = vadd.f32 %v6952_v12, %v15068_v46  ;;  %v7065_v17 = vpop.f32.mrf.mxu1 }
 0x461   : > { %v6954_v0 = vpop.f32.mrf.mxu0 }
 0x462   : > { %v15227_v30 = vadd.f32 %v7065_v17, %v6953_v36  ;;  %v6955_v50 = vadd.f32 %v6954_v0, %v15105_v7  ;;  %v7067_v55 = vpop.f32.mrf.mxu1 }
 0x463   : > { %v6956_v22 = vpop.f32.mrf.mxu0 }
 0x464   : > { %v15230_v42 = vadd.f32 %v7067_v55, %v6955_v50  ;;  %v6957_v18 = vadd.f32 %v6956_v22, %v15068_v46  ;;  %v7069_v43 = vpop.f32.mrf.mxu1 }
 0x465   : > { %v6958_v15 = vpop.f32.mrf.mxu0 }
 0x466   : > { %v15233_v28 = vadd.f32 %v7069_v43, %v6957_v18  ;;  %v6959_v51 = vadd.f32 %v6958_v15, %v15105_v7  ;;  %v7071_v23 = vpop.f32.mrf.mxu1 }
 0x467   : > { %v6962_v12 = vpop.f32.mrf.mxu0 }
 0x468   : > { %v15236_v33 = vadd.f32 %v7071_v23, %v6959_v51  ;;  %v6963_v17 = vadd.f32 %v6962_v12, %v15068_v46  ;;  %v7075_v36 = vpop.f32.mrf.mxu1 }
 0x469   : > { %v6964_v0 = vpop.f32.mrf.mxu0 }
 0x46a   : > { %v15239_v10 = vadd.f32 %v7075_v36, %v6963_v17  ;;  %v6965_v50 = vadd.f32 %v6964_v0, %v15105_v7  ;;  %v7077_v55 = vpop.f32.mrf.mxu1 }
 0x46b   : > { %v6966_v22 = vpop.f32.mrf.mxu0 }
 0x46c   : > { %v15242_v39 = vadd.f32 %v7077_v55, %v6965_v50  ;;  %v6967_v18 = vadd.f32 %v6966_v22, %v15068_v46  ;;  %v7079_v43 = vpop.f32.mrf.mxu1 }
 0x46d   : > { %v6968_v15 = vpop.f32.mrf.mxu0 }
 0x46e   : > { %v15245_v45 = vadd.f32 %v7079_v43, %v6967_v18  ;;  %v6969_v51 = vadd.f32 %v6968_v15, %v15105_v7  ;;  %v7081_v23 = vpop.f32.mrf.mxu1 }
 0x46f   : > { %v6972_v12 = vpop.f32.mrf.mxu0 }
 0x470   : > { %v15248_v54 = vadd.f32 %v7081_v23, %v6969_v51  ;;  %v6973_v17 = vadd.f32 %v6972_v12, %v15068_v46  ;;  %v7085_v36 = vpop.f32.mrf.mxu1  ;;  %v15264_v51 = vld [vmem:[#allocation13 + $0x8] sm:$0xff] }
 0x471   : > { %v6974_v0 = vpop.f32.mrf.mxu0  ;;  %v16323_v23 = vld [vmem:[#allocation40_spill] sm:$0xff] }
 0x472   : > { %v15251_v3 = vadd.f32 %v7085_v36, %v6973_v17  ;;  %v6975_v50 = vadd.f32 %v6974_v0, %v15105_v7  ;;  %v7087_v55 = vpop.f32.mrf.mxu1  ;;  %v16324_v12 = vsub.s32 7, %v16323_v23  ;;  %v6909_v0 = vadd.f32 %v15124_v60, %v15105_v7 }
 0x473   : > { %v15254_v22 = vpop.f32.mrf.mxu0 }
 0x474   : > { %v15256_v56 = vadd.f32 %v7087_v55, %v6975_v50  ;;  %v15258_v18 = vpop.f32.mrf.mxu1  ;;  %v15269_v17 = vrot.slane %v15264_v51, %v16324_v12  ;;  %v7022_v62 = vadd.f32 %v15128_v16, %v6909_v0  ;;  %v6919_v16 = vadd.f32 %v15150_v53, %v15105_v7 }
 0x475   : > { %v15260_v43 = vpop.f32.mrf.mxu0 }
 0x476   : > { %v15262_v15 = vpop.f32.mrf.mxu1 }
 0x477   : > { %v7128_v36 = vpop.f32.mrf.mxu0 }
 0x478   : > { %v7129_v50 = vadd.f32 %v7128_v36, %v15114_v48  ;;  %v15274_v55 = vpop.f32.mrf.mxu1 }
 0x479   : > { %v7130_v44 = vpop.f32.mrf.mxu0 }
 0x47a   : > { %v11726_v21 = vmul.f32 -1.442695, %v7129_v50  ;;  %v7131_v19 = vadd.f32 %v7130_v44, %v15122_v2  ;;  %v7243_v49 = vpop.f32.mrf.mxu1 }
 0x47b   : > { %v15280_v37 = vadd.f32 %v7243_v49, %v15269_v17  ;;  %v7132_v12 = vpop.f32.mrf.mxu0 }
 0x47c   : > { %12876 = vpow2.f32 %v11726_v21  ;;  %v11727_v60 = vmul.f32 -1.442695, %v7131_v19  ;;  %v7133_v48 = vadd.f32 %v7132_v12, %v15126_v61  ;;  %v15284_v36 = vpop.f32.mrf.mxu1 }
 0x47d   : > { %v7134_v57 = vpop.f32.mrf.mxu0 }
 0x47e   : > { %12878 = vpow2.f32 %v11727_v60  ;;  %v11730_v50 = vmul.f32 -1.442695, %v7133_v48  ;;  %v7135_v44 = vadd.f32 %v7134_v57, %v7022_v62  ;;  %v7247_v2 = vpop.f32.mrf.mxu1  ;;  %v7032_v60 = vadd.f32 %v15154_v41, %v6919_v16 }
 0x47f   : > { %v15288_v8 = vadd.f32 %v7247_v2, %v15269_v17  ;;  %v7138_v49 = vpop.f32.mrf.mxu0 }
 0x480   : > { %12880 = vpow2.f32 %v11730_v50  ;;  %v11731_v19 = vmul.f32 -1.442695, %v7135_v44  ;;  %v7139_v21 = vadd.f32 %v7138_v49, %v15137_v26  ;;  %v15293_v61 = vpop.f32.mrf.mxu1 }
 0x481   : > { %v7140_v0 = vpop.f32.mrf.mxu0 }
 0x482   : > { %12882 = vpow2.f32 %v11731_v19  ;;  %v11734_v12 = vmul.f32 -1.442695, %v7139_v21  ;;  %v7141_v62 = vadd.f32 %v7140_v0, %v7028_v4  ;;  %v7253_v57 = vpop.f32.mrf.mxu1  ;;  %v16325_v19 = vld [vmem:[#allocation51_spill] sm:$0xff] }
 0x483   : > { %v15296_v40 = vadd.f32 %v7253_v57, %v15269_v17  ;;  %v7142_v29 = vpop.f32.mrf.mxu0  ;;  %v11226_v4 = vmul.f32 -1.442695, %v16325_v19 }
 0x484   : > { %12884 = vpow2.f32 %v11734_v12  ;;  %v11735_v48 = vmul.f32 -1.442695, %v7141_v62  ;;  %v7143_v53 = vadd.f32 %v7142_v29, %v15152_v63  ;;  %v15300_v50 = vpop.f32.mrf.mxu1 }
 0x485   : > { %v7144_v26 = vpop.f32.mrf.mxu0 }
 0x486   : > { %12886 = vpow2.f32 %v11735_v48  ;;  %v11738_v44 = vmul.f32 -1.442695, %v7143_v53  ;;  %v7145_v2 = vadd.f32 %v7144_v26, %v7032_v60  ;;  %v7257_v49 = vpop.f32.mrf.mxu1 }
 0x487   : > { %v15304_v21 = vadd.f32 %v7257_v49, %v15269_v17  ;;  %v7148_v0 = vpop.f32.mrf.mxu0 }
 0x488   : > { %12888 = vpow2.f32 %v11738_v44  ;;  %v11739_v57 = vmul.f32 -1.442695, %v7145_v2  ;;  %v7149_v41 = vadd.f32 %v7148_v0, %v15161_v14  ;;  %v15307_v16 = vpop.f32.mrf.mxu1 }
 0x489   : > { %v12877_v63 = vpop.eup %12876  ;;  %v7150_v12 = vpop.f32.mrf.mxu0 }
 0x48a   : > { %v8154_v62 = vadd.f32 1.0, %v12877_v63  ;;  %12890 = vpow2.f32 %v11739_v57  ;;  %v11742_v29 = vmul.f32 -1.442695, %v7149_v41  ;;  %v7151_v60 = vadd.f32 %v7150_v12, %v15168_v59  ;;  %v7263_v48 = vpop.f32.mrf.mxu1 }
 0x48b   : > { %v12879_v53 = vpop.eup %12878  ;;  %12892 = vpow2.f32 %v11226_v4  ;;  %v15311_v26 = vadd.f32 %v7263_v48, %v15269_v17  ;;  %v7152_v49 = vpop.f32.mrf.mxu0 }
 0x48c   : > { %12894 = vrcp.f32 %v8154_v62  ;;  %v8155_v44 = vadd.f32 1.0, %v12879_v53  ;;  %v11743_v2 = vmul.f32 -1.442695, %v7151_v60  ;;  %v7153_v14 = vadd.f32 %v7152_v49, %v15173_v9  ;;  %v15314_v19 = vpop.f32.mrf.mxu1 }
 0x48d   : > { %v12881_v0 = vpop.eup %12880  ;;  %12896 = vpow2.f32 %v11742_v29  ;;  %v7154_v57 = vpop.f32.mrf.mxu0 }
 0x48e   : > { %12898 = vrcp.f32 %v8155_v44  ;;  %v8158_v41 = vadd.f32 1.0, %v12881_v0  ;;  %v11746_v59 = vmul.f32 -1.442695, %v7153_v14  ;;  %v7155_v63 = vadd.f32 %v7154_v57, %v15180_v32  ;;  %v7267_v4 = vpop.f32.mrf.mxu1 }
 0x48f   : > { %v12883_v12 = vpop.eup %12882  ;;  %12900 = vpow2.f32 %v11743_v2  ;;  %v15318_v48 = vadd.f32 %v7267_v4, %v15269_v17  ;;  %v7158_v62 = vpop.f32.mrf.mxu0 }
 0x490   : > { %12902 = vrcp.f32 %v8158_v41  ;;  %v8159_v60 = vadd.f32 1.0, %v12883_v12  ;;  %v11747_v9 = vmul.f32 -1.442695, %v7155_v63  ;;  %v7159_v53 = vadd.f32 %v7158_v62, %v15189_v1  ;;  %v15321_v49 = vpop.f32.mrf.mxu1 }
 0x491   : > { %v12885_v29 = vpop.eup %12884  ;;  %12904 = vpow2.f32 %v11746_v59  ;;  %v7160_v44 = vpop.f32.mrf.mxu0 }
 0x492   : > { %12906 = vrcp.f32 %v8159_v60  ;;  %v8162_v14 = vadd.f32 1.0, %v12885_v29  ;;  %v11750_v32 = vmul.f32 -1.442695, %v7159_v53  ;;  %v7161_v0 = vadd.f32 %v7160_v44, %v15194_v5  ;;  %v7273_v2 = vpop.f32.mrf.mxu1 }
 0x493   : > { %v12887_v57 = vpop.eup %12886  ;;  %12908 = vpow2.f32 %v11747_v9  ;;  %v15325_v4 = vadd.f32 %v7273_v2, %v15269_v17  ;;  %v7162_v41 = vpop.f32.mrf.mxu0 }
 0x494   : > { %12910 = vrcp.f32 %v8162_v14  ;;  %v8163_v63 = vadd.f32 1.0, %v12887_v57  ;;  %v11751_v1 = vmul.f32 -1.442695, %v7161_v0  ;;  %v7163_v12 = vadd.f32 %v7162_v41, %v15197_v58  ;;  %v15328_v62 = vpop.f32.mrf.mxu1  ;;  %v15336_v58 = vld [vmem:[#allocation13 + $0x10] sm:$0xf] }
 0x495   : > { %v12889_v59 = vpop.eup %12888  ;;  %12912 = vpow2.f32 %v11750_v32  ;;  %v7164_v60 = vpop.f32.mrf.mxu0  ;;  %v15344_v20 = vrot.slane %v15336_v58, %v16327_v25 }
 0x496   : > { %12914 = vrcp.f32 %v8163_v63  ;;  %v8166_v53 = vadd.f32 1.0, %v12889_v59  ;;  %v11754_v5 = vmul.f32 -1.442695, %v7163_v12  ;;  %v7165_v29 = vadd.f32 %v7164_v60, %v15204_v34  ;;  %v7277_v9 = vpop.f32.mrf.mxu1 }
 0x497   : > { %v12891_v44 = vpop.eup %12890  ;;  %12916 = vpow2.f32 %v11751_v1  ;;  %v15332_v2 = vadd.f32 %v7277_v9, %v15269_v17  ;;  %v7168_v14 = vpop.f32.mrf.mxu0 }
 0x498   : > { %v15334_v0 = vpop.eup %12892  ;;  %12918 = vrcp.f32 %v8166_v53  ;;  %v8167_v57 = vadd.f32 1.0, %v12891_v44  ;;  %v11755_v32 = vmul.f32 -1.442695, %v7165_v29  ;;  %v7169_v41 = vadd.f32 %v7168_v14, %v15213_v24  ;;  %v15339_v63 = vpop.f32.mrf.mxu1 }
 0x499   : > { %16326 = vst [vmem:[#allocation51_spill] sm:$0xff] %v15334_v0  ;;  %v12895_v12 = vpop.eup %12894  ;;  %12920 = vpow2.f32 %v11754_v5  ;;  %v7170_v34 = vpop.f32.mrf.mxu0 }
 0x49a   : > { %v12897_v59 = vpop.eup %12896  ;;  %12922 = vrcp.f32 %v8167_v57  ;;  %v11758_v1 = vmul.f32 -1.442695, %v7169_v41  ;;  %v7171_v60 = vadd.f32 %v7170_v34, %v15218_v27  ;;  %v7283_v9 = vpop.f32.mrf.mxu1  ;;  %v16328_v41 = vld [vmem:[#allocation42_spill] sm:$0xff] }
 0x49b   : > { %v12899_v11 = vpop.eup %12898  ;;  %v8170_v53 = vadd.f32 1.0, %v12897_v59  ;;  %12924 = vpow2.f32 %v11755_v32  ;;  %v15347_v24 = vadd.f32 %v7283_v9, %v15269_v17  ;;  %v7172_v29 = vpop.f32.mrf.mxu0  ;;  %v15354_v34 = vrot.slane %v15336_v58, %v16328_v41 }
 0x49c   : > { %v12901_v44 = vpop.eup %12900  ;;  %12926 = vpow2.f32 %v11758_v1  ;;  %v11759_v5 = vmul.f32 -1.442695, %v7171_v60  ;;  %v7173_v14 = vadd.f32 %v7172_v29, %v15221_v31  ;;  %v15350_v57 = vpop.f32.mrf.mxu1 }
 0x49d   : > { %v12903_v27 = vpop.eup %12902  ;;  %12928 = vrcp.f32 %v8170_v53  ;;  %v8171_v25 = vadd.f32 1.0, %v12901_v44  ;;  %v7174_v59 = vpop.f32.mrf.mxu0  ;;  %v15364_v53 = vmul.f32 %v12895_v12, %v15344_v20 }
 0x49e   : > { %v12905_v32 = vpop.eup %12904  ;;  %12930 = vpow2.f32 %v11759_v5  ;;  %v11762_v9 = vmul.f32 -1.442695, %v7173_v14  ;;  %v7175_v52 = vadd.f32 %v7174_v59, %v15224_v13  ;;  %v7287_v38 = vpop.f32.mrf.mxu1  ;;  %v15358_v1 = vmul.f32 %v12903_v27, %v15344_v20 }
 0x49f   : > { %v12907_v31 = vpop.eup %12906  ;;  %12932 = vrcp.f32 %v8171_v25  ;;  %v8174_v60 = vadd.f32 1.0, %v12905_v32  ;;  %v15361_v29 = vadd.f32 %v7287_v38, %v15269_v17  ;;  %v7178_v41 = vpop.f32.mrf.mxu0  ;;  %16331 = vst [vmem:[#allocation117_spill] sm:$0xff] %v15364_v53  ;;  %v15373_v38 = vmul.f32 %v12899_v11, %v15354_v34 }
 0x4a0   : > { %16329 = vst [vmem:[#allocation115_spill] sm:$0xff] %v15358_v1  ;;  %v12909_v44 = vpop.eup %12908  ;;  %12934 = vpow2.f32 %v11762_v9  ;;  %v11763_v5 = vmul.f32 -1.442695, %v7175_v52  ;;  %v7179_v14 = vadd.f32 %v7178_v41, %v15227_v30  ;;  %v15367_v13 = vpop.f32.mrf.mxu1  ;;  %v15370_v27 = vmul.f32 %v12907_v31, %v15354_v34 }
 0x4a1   : > { %16330 = vst [vmem:[#allocation116_spill] sm:$0xff] %v15361_v29  ;;  %v12911_v59 = vpop.eup %12910  ;;  %12936 = vrcp.f32 %v8174_v60  ;;  %v8175_v25 = vadd.f32 1.0, %v12909_v44  ;;  %v7180_v32 = vpop.f32.mrf.mxu0  ;;  %16333 = vst [vmem:[#allocation119_spill] sm:$0xff] %v15373_v38 }
 0x4a2   : > { %16332 = vst [vmem:[#allocation118_spill] sm:$0xff] %v15370_v27  ;;  %v12913_v6 = vpop.eup %12912  ;;  %12938 = vpow2.f32 %v11763_v5  ;;  %v11766_v52 = vmul.f32 -1.442695, %v7179_v14  ;;  %v7181_v30 = vadd.f32 %v7180_v32, %v15230_v42  ;;  %v7293_v41 = vpop.f32.mrf.mxu1  ;;  %v6977_v42 = vadd.f32 %v15254_v22, %v15068_v46 }
 0x4a3   : > { %v12915_v9 = vpop.eup %12914  ;;  %12940 = vrcp.f32 %v8175_v25  ;;  %v8178_v31 = vadd.f32 1.0, %v12913_v6  ;;  %v15379_v0 = vadd.f32 %v7293_v41, %v15269_v17  ;;  %v7182_v60 = vpop.f32.mrf.mxu0  ;;  %v15396_v46 = vmul.f32 %v12911_v59, %v15344_v20 }
 0x4a4   : > { %v12917_v44 = vpop.eup %12916  ;;  %12942 = vpow2.f32 %v11766_v52  ;;  %v11767_v29 = vmul.f32 -1.442695, %v7181_v30  ;;  %v7183_v12 = vadd.f32 %v7182_v60, %v15233_v28  ;;  %v15384_v5 = vpop.f32.mrf.mxu1 }
 0x4a5   : > { %v12919_v14 = vpop.eup %12918  ;;  %12944 = vrcp.f32 %v8178_v31  ;;  %v8179_v6 = vadd.f32 1.0, %v12917_v44  ;;  %v7184_v25 = vpop.f32.mrf.mxu0  ;;  %16335 = vst [vmem:[#allocation121_spill] sm:$0xff] %v15396_v46 }
 0x4a6   : > { %v12921_v32 = vpop.eup %12920  ;;  %12946 = vpow2.f32 %v11767_v29  ;;  %v11770_v41 = vmul.f32 -1.442695, %v7183_v12  ;;  %v7185_v53 = vadd.f32 %v7184_v25, %v15236_v33  ;;  %v7297_v11 = vpop.f32.mrf.mxu1  ;;  %v15390_v52 = vmul.f32 %v12919_v14, %v15344_v20 }
 0x4a7   : > { %v12923_v30 = vpop.eup %12922  ;;  %12948 = vrcp.f32 %v8179_v6  ;;  %v8182_v28 = vadd.f32 1.0, %v12921_v32  ;;  %v15393_v60 = vadd.f32 %v7297_v11, %v15269_v17  ;;  %v7188_v1 = vpop.f32.mrf.mxu0  ;;  %v15405_v11 = vmul.f32 %v12915_v9, %v15354_v34 }
 0x4a8   : > { %16334 = vst [vmem:[#allocation120_spill] sm:$0xff] %v15390_v52  ;;  %v12925_v22 = vpop.eup %12924  ;;  %12950 = vpow2.f32 %v11770_v41  ;;  %v11771_v29 = vmul.f32 -1.442695, %v7185_v53  ;;  %v7189_v12 = vadd.f32 %v7188_v1, %v15239_v10  ;;  %v15399_v33 = vpop.f32.mrf.mxu1  ;;  %v15402_v31 = vmul.f32 %v12923_v30, %v15354_v34 }
 0x4a9   : > { %v12927_v44 = vpop.eup %12926  ;;  %12952 = vrcp.f32 %v8182_v28  ;;  %v8183_v14 = vadd.f32 1.0, %v12925_v22  ;;  %v7190_v6 = vpop.f32.mrf.mxu0  ;;  %16337 = vst [vmem:[#allocation123_spill] sm:$0xff] %v15405_v11 }
 0x4aa   : > { %16336 = vst [vmem:[#allocation122_spill] sm:$0xff] %v15402_v31  ;;  %v12929_v25 = vpop.eup %12928  ;;  %v8186_v32 = vadd.f32 1.0, %v12927_v44  ;;  %12954 = vpow2.f32 %v11771_v29  ;;  %v11774_v53 = vmul.f32 -1.442695, %v7189_v12  ;;  %v7191_v10 = vadd.f32 %v7190_v6, %v15242_v39  ;;  %v7303_v1 = vpop.f32.mrf.mxu1 }
 0x4ab   : > { %v12931_v41 = vpop.eup %12930  ;;  %12956 = vrcp.f32 %v8183_v14  ;;  %v15411_v30 = vadd.f32 %v7303_v1, %v15269_v17  ;;  %v7192_v28 = vpop.f32.mrf.mxu0  ;;  %v16338_v39 = vsub.s32 6, %v16323_v23  ;;  %v7090_v6 = vadd.f32 %v15258_v18, %v6977_v42 }
 0x4ac   : > { %v12933_v22 = vpop.eup %12932  ;;  %12958 = vrcp.f32 %v8186_v32  ;;  %v8187_v38 = vadd.f32 1.0, %v12931_v41  ;;  %v11775_v59 = vmul.f32 -1.442695, %v7191_v10  ;;  %v7193_v44 = vadd.f32 %v7192_v28, %v15245_v45  ;;  %v15416_v29 = vpop.f32.mrf.mxu1 }
 0x4ad   : > { %v12935_v12 = vpop.eup %12934  ;;  %v15421_v14 = vrot.slane %v15264_v51, %v16338_v39  ;;  %v6979_v1 = vadd.f32 %v15260_v43, %v15105_v7  ;;  %12960 = vpow2.f32 %v11774_v53  ;;  %v7194_v9 = vpop.f32.mrf.mxu0  ;;  %v15431_v18 = vmul.f32 %v12929_v25, %v15344_v20 }
 0x4ae   : > { %v12937_v32 = vpop.eup %12936  ;;  %12962 = vrcp.f32 %v8187_v38  ;;  %v8190_v10 = vadd.f32 1.0, %v12935_v12  ;;  %v11778_v41 = vmul.f32 -1.442695, %v7193_v44  ;;  %v7195_v45 = vadd.f32 %v7194_v9, %v15248_v54  ;;  %v7307_v28 = vpop.f32.mrf.mxu1 }
 0x4af   : > { %v12939_v27 = vpop.eup %12938  ;;  %12964 = vpow2.f32 %v11775_v59  ;;  %v15428_v23 = vadd.f32 %v7307_v28, %v15269_v17  ;;  %v7198_v51 = vpop.f32.mrf.mxu0  ;;  %16339 = vst [vmem:[#allocation124_spill] sm:$0xff] %v15431_v18  ;;  %v15434_v7 = vmul.f32 %v12937_v32, %v15344_v20  ;;  %v15440_v44 = vmul.f32 %v12933_v22, %v15354_v34 }
 0x4b0   : > { %v12941_v43 = vpop.eup %12940  ;;  %12966 = vrcp.f32 %v8190_v10  ;;  %v8191_v38 = vadd.f32 1.0, %v12939_v27  ;;  %v11779_v42 = vmul.f32 -1.442695, %v7195_v45  ;;  %v7199_v53 = vadd.f32 %v7198_v51, %v15251_v3 }
 0x4b1   : > { %16340 = vst [vmem:[#allocation125_spill] sm:$0xff] %v15434_v7  ;;  %v15437_v54 = vpop.f32.mrf.mxu1  ;;  %v12943_v9 = vpop.eup %12942  ;;  %12968 = vpow2.f32 %v11778_v41  ;;  %16341 = vst [vmem:[#allocation126_spill] sm:$0xff] %v15440_v44  ;;  %v15443_v25 = vmul.f32 %v12941_v43, %v15354_v34  ;;  %v7092_v41 = vadd.f32 %v15262_v15, %v6979_v1 }
 0x4b2   : > { %v7200_v59 = vpop.f32.mrf.mxu0  ;;  %v12945_v39 = vpop.eup %12944  ;;  %12970 = vrcp.f32 %v8191_v38  ;;  %v8194_v27 = vadd.f32 1.0, %v12943_v9  ;;  %v11782_v32 = vmul.f32 -1.442695, %v7199_v53 }
 0x4b3   : > { %v7201_v3 = vadd.f32 %v7200_v59, %v15256_v56  ;;  %v7313_v10 = vpop.f32.mrf.mxu1  ;;  %v12947_v45 = vpop.eup %12946  ;;  %12972 = vpow2.f32 %v11779_v42  ;;  %v7242_v59 = vadd.f32 %v15274_v55, %v15421_v14 }
 0x4b4   : > { %v15450_v22 = vadd.f32 %v7313_v10, %v15269_v17  ;;  %v7202_v28 = vpop.f32.mrf.mxu0  ;;  %v12949_v43 = vpop.eup %12948  ;;  %12974 = vrcp.f32 %v8194_v27  ;;  %v8195_v12 = vadd.f32 1.0, %v12947_v45 }
 0x4b5   : > { %v11783_v38 = vmul.f32 -1.442695, %v7201_v3  ;;  %v7203_v9 = vadd.f32 %v7202_v28, %v7090_v6  ;;  %v15454_v53 = vpop.f32.mrf.mxu1  ;;  %v12951_v56 = vpop.eup %12950  ;;  %12976 = vpow2.f32 %v11782_v32  ;;  %v15461_v6 = vmul.f32 %v12945_v39, %v15344_v20 }
 0x4b6   : > { %v7204_v15 = vpop.f32.mrf.mxu0  ;;  %v12953_v1 = vpop.eup %12952  ;;  %12978 = vrcp.f32 %v8195_v12  ;;  %v8198_v42 = vadd.f32 1.0, %v12951_v56  ;;  %v7252_v39 = vadd.f32 %v15293_v61, %v15421_v14 }
 0x4b7   : > { %v11786_v10 = vmul.f32 -1.442695, %v7203_v9  ;;  %v7205_v46 = vadd.f32 %v7204_v15, %v7092_v41  ;;  %v15458_v52 = vpop.f32.mrf.mxu1  ;;  %v12955_v51 = vpop.eup %12954  ;;  %12980 = vpow2.f32 %v11783_v38  ;;  %v15464_v3 = vmul.f32 %v12953_v1, %v15344_v20 }
 0x4b8   : > { %v7354_v27 = vpop.f32.mrf.mxu0  ;;  %v12957_v45 = vpop.eup %12956  ;;  %12982 = vrcp.f32 %v8198_v42  ;;  %v8199_v55 = vadd.f32 1.0, %v12955_v51  ;;  %v15467_v9 = vmul.f32 %v12949_v43, %v15354_v34  ;;  %v7246_v1 = vadd.f32 %v15284_v36, %v15421_v14 }
 0x4b9   : > { %v11787_v32 = vmul.f32 -1.442695, %v7205_v46  ;;  %v7355_v28 = vadd.f32 %v7354_v27, %v7242_v59  ;;  %v7467_v12 = vpop.f32.mrf.mxu1  ;;  %v12959_v56 = vpop.eup %12958  ;;  %12984 = vpow2.f32 %v11786_v10  ;;  %v15470_v38 = vmul.f32 %v12957_v45, %v15354_v34 }
 0x4ba   : > { %v7356_v41 = vpop.f32.mrf.mxu0  ;;  %v12961_v15 = vpop.eup %12960  ;;  %12986 = vrcp.f32 %v8199_v55 }
 0x4bb   : > { %v7468_v46 = vadd.f32 %v7467_v12, %v7355_v28  ;;  %v7357_v51 = vadd.f32 %v7356_v41, %v15280_v37  ;;  %v7469_v59 = vpop.f32.mrf.mxu1  ;;  %v12963_v42 = vpop.eup %12962  ;;  %v8202_v10 = vadd.f32 1.0, %v12961_v15  ;;  %12988 = vpow2.f32 %v11787_v32 }
 0x4bc   : > { %v7358_v43 = vpop.f32.mrf.mxu0  ;;  %v12965_v45 = vpop.eup %12964  ;;  %v7256_v37 = vadd.f32 %v15300_v50, %v15421_v14  ;;  %v15484_v32 = vmul.f32 %v12959_v56, %v15344_v20 }
 0x4bd   : > { %v11728_v11 = vmul.f32 -1.442695, %v7468_v46  ;;  %v7470_v31 = vadd.f32 %v7469_v59, %v7357_v51  ;;  %v7359_v18 = vadd.f32 %v7358_v43, %v7246_v1  ;;  %v7471_v36 = vpop.f32.mrf.mxu1  ;;  %v12967_v55 = vpop.eup %12966  ;;  %12990 = vrcp.f32 %v8202_v10 }
 0x4be   : > { %v8203_v28 = vadd.f32 1.0, %v12965_v45  ;;  %v7360_v12 = vpop.f32.mrf.mxu0  ;;  %v12969_v41 = vpop.eup %12968  ;;  %v15488_v43 = vmul.f32 %v12963_v42, %v15354_v34  ;;  %v15491_v50 = vmul.f32 %v12967_v55, %v15344_v20 }
 0x4bf   : > { %12992 = vpow2.f32 %v11728_v11  ;;  %v11729_v15 = vmul.f32 -1.442695, %v7470_v31  ;;  %v7472_v27 = vadd.f32 %v7471_v36, %v7359_v18  ;;  %v7361_v61 = vadd.f32 %v7360_v12, %v15288_v8  ;;  %v7473_v46 = vpop.f32.mrf.mxu1  ;;  %v12971_v51 = vpop.eup %12970 }
 0x4c0   : > { %12994 = vrcp.f32 %v8203_v28  ;;  %v8206_v1 = vadd.f32 1.0, %v12969_v41  ;;  %v7364_v59 = vpop.f32.mrf.mxu0  ;;  %v12973_v10 = vpop.eup %12972  ;;  %v15494_v28 = vmul.f32 %v12971_v51, %v15354_v34 }
 0x4c1   : > { %12996 = vpow2.f32 %v11729_v15  ;;  %v11732_v56 = vmul.f32 -1.442695, %v7472_v27  ;;  %v7474_v45 = vadd.f32 %v7473_v46, %v7361_v61  ;;  %v7365_v11 = vadd.f32 %v7364_v59, %v7252_v39  ;;  %v7477_v31 = vpop.f32.mrf.mxu1  ;;  %v12975_v18 = vpop.eup %12974 }
 0x4c2   : > { %12998 = vrcp.f32 %v8206_v1  ;;  %v8207_v8 = vadd.f32 1.0, %v12973_v10  ;;  %v7366_v36 = vpop.f32.mrf.mxu0  ;;  %v12977_v12 = vpop.eup %12976 }
 0x4c3   : > { %13000 = vpow2.f32 %v11732_v56  ;;  %v11733_v55 = vmul.f32 -1.442695, %v7474_v45  ;;  %v7478_v41 = vadd.f32 %v7477_v31, %v7365_v11  ;;  %v7367_v15 = vadd.f32 %v7366_v36, %v15296_v40  ;;  %v7479_v27 = vpop.f32.mrf.mxu1  ;;  %v12979_v61 = vpop.eup %12978 }
 0x4c4   : > { %13002 = vrcp.f32 %v8207_v8  ;;  %v8210_v39 = vadd.f32 1.0, %v12977_v12  ;;  %v7368_v46 = vpop.f32.mrf.mxu0  ;;  %v12981_v59 = vpop.eup %12980  ;;  %v7262_v56 = vadd.f32 %v15307_v16, %v15421_v14  ;;  %v15504_v11 = vmul.f32 %v12975_v18, %v15344_v20 }
 0x4c5   : > { %13004 = vpow2.f32 %v11733_v55  ;;  %v11736_v51 = vmul.f32 -1.442695, %v7478_v41  ;;  %v7480_v10 = vadd.f32 %v7479_v27, %v7367_v15  ;;  %v7369_v7 = vadd.f32 %v7368_v46, %v7256_v37  ;;  %v7481_v42 = vpop.f32.mrf.mxu1  ;;  %v12983_v44 = vpop.eup %12982 }
 0x4c6   : > { %13006 = vrcp.f32 %v8210_v39  ;;  %v8211_v40 = vadd.f32 1.0, %v12981_v59  ;;  %v7370_v45 = vpop.f32.mrf.mxu0  ;;  %v12985_v31 = vpop.eup %12984  ;;  %v15508_v27 = vmul.f32 %v12979_v61, %v15354_v34  ;;  %v15511_v16 = vmul.f32 %v12983_v44, %v15344_v20 }
 0x4c7   : > { %13008 = vpow2.f32 %v11736_v51  ;;  %v11737_v8 = vmul.f32 -1.442695, %v7480_v10  ;;  %v7482_v36 = vadd.f32 %v7481_v42, %v7369_v7  ;;  %v7371_v12 = vadd.f32 %v7370_v45, %v15304_v21  ;;  %v7483_v55 = vpop.f32.mrf.mxu1  ;;  %v12987_v41 = vpop.eup %12986 }
 0x4c8   : > { %13010 = vrcp.f32 %v8211_v40  ;;  %v8214_v37 = vadd.f32 1.0, %v12985_v31  ;;  %v7374_v15 = vpop.f32.mrf.mxu0  ;;  %v12989_v39 = vpop.eup %12988  ;;  %v15514_v42 = vmul.f32 %v12987_v41, %v15354_v34 }
 0x4c9   : > { %13012 = vpow2.f32 %v11737_v8  ;;  %v11740_v18 = vmul.f32 -1.442695, %v7482_v36  ;;  %v7484_v46 = vadd.f32 %v7483_v55, %v7371_v12  ;;  %v7375_v59 = vadd.f32 %v7374_v15, %v7262_v56  ;;  %v7487_v51 = vpop.f32.mrf.mxu1 }
 0x4ca   : > { %13014 = vrcp.f32 %v8214_v37  ;;  %v8215_v7 = vadd.f32 1.0, %v12989_v39  ;;  %v7376_v21 = vpop.f32.mrf.mxu0  ;;  %v12991_v61 = vpop.eup %12990  ;;  %v7266_v56 = vadd.f32 %v15314_v19, %v15421_v14 }
 0x4cb   : > { %13016 = vpow2.f32 %v11740_v18  ;;  %v11741_v40 = vmul.f32 -1.442695, %v7484_v46  ;;  %v7488_v44 = vadd.f32 %v7487_v51, %v7375_v59  ;;  %v7377_v45 = vadd.f32 %v7376_v21, %v15311_v26  ;;  %v7489_v31 = vpop.f32.mrf.mxu1 }
 0x4cc   : > { %v12993_v8 = vpop.eup %12992  ;;  %13018 = vrcp.f32 %v8215_v7  ;;  %v7378_v36 = vpop.f32.mrf.mxu0  ;;  %v7272_v26 = vadd.f32 %v15321_v49, %v15421_v14  ;;  %v7276_v46 = vadd.f32 %v15328_v62, %v15421_v14  ;;  %v15528_v51 = vmul.f32 %v12991_v61, %v15344_v20 }
 0x4cd   : > { %v12995_v55 = vpop.eup %12994  ;;  %v8156_v41 = vadd.f32 1.0, %v12993_v8  ;;  %13020 = vpow2.f32 %v11741_v40  ;;  %v11744_v37 = vmul.f32 -1.442695, %v7488_v44  ;;  %v7490_v15 = vadd.f32 %v7489_v31, %v7377_v45  ;;  %v7491_v39 = vpop.f32.mrf.mxu1 }
 0x4ce   : > { %v12997_v18 = vpop.eup %12996  ;;  %v7379_v59 = vadd.f32 %v7378_v36, %v7266_v56  ;;  %v7380_v19 = vpop.f32.mrf.mxu0  ;;  %v15532_v49 = vmul.f32 %v12995_v55, %v15354_v34 }
 0x4cf   : > { %v12999_v7 = vpop.eup %12998  ;;  %13022 = vrcp.f32 %v8156_v41  ;;  %v8157_v21 = vadd.f32 1.0, %v12997_v18  ;;  %v11745_v8 = vmul.f32 -1.442695, %v7490_v15  ;;  %v7381_v40 = vadd.f32 %v7380_v19, %v15318_v48  ;;  %v7493_v44 = vpop.f32.mrf.mxu1 }
 0x4d0   : > { %v13001_v45 = vpop.eup %13000  ;;  %13024 = vpow2.f32 %v11744_v37  ;;  %v7492_v31 = vadd.f32 %v7491_v39, %v7379_v59  ;;  %v7384_v1 = vpop.f32.mrf.mxu0  ;;  %v15535_v62 = vmul.f32 %v12999_v7, %v15344_v20 }
 0x4d1   : > { %v13003_v56 = vpop.eup %13002  ;;  %13026 = vrcp.f32 %v8157_v21  ;;  %v8160_v61 = vadd.f32 1.0, %v13001_v45  ;;  %v7494_v36 = vadd.f32 %v7493_v44, %v7381_v40  ;;  %v7385_v41 = vadd.f32 %v7384_v1, %v7272_v26  ;;  %v7497_v18 = vpop.f32.mrf.mxu1 }
 0x4d2   : > { %v13005_v15 = vpop.eup %13004  ;;  %13028 = vpow2.f32 %v11745_v8  ;;  %v11748_v48 = vmul.f32 -1.442695, %v7492_v31  ;;  %v7386_v19 = vpop.f32.mrf.mxu0  ;;  %v15538_v37 = vmul.f32 %v13003_v56, %v15354_v34 }
 0x4d3   : > { %v13007_v39 = vpop.eup %13006  ;;  %13030 = vrcp.f32 %v8160_v61  ;;  %v8161_v59 = vadd.f32 1.0, %v13005_v15  ;;  %v11749_v7 = vmul.f32 -1.442695, %v7494_v36  ;;  %v7498_v10 = vadd.f32 %v7497_v18, %v7385_v41  ;;  %v7499_v21 = vpop.f32.mrf.mxu1 }
 0x4d4   : > { %v13009_v45 = vpop.eup %13008  ;;  %13032 = vpow2.f32 %v11748_v48  ;;  %v7387_v1 = vadd.f32 %v7386_v19, %v15325_v4  ;;  %v7388_v26 = vpop.f32.mrf.mxu0  ;;  %v7282_v61 = vadd.f32 %v15339_v63, %v15421_v14  ;;  %v7286_v36 = vadd.f32 %v15350_v57, %v15421_v14 }
 0x4d5   : > { %v13011_v40 = vpop.eup %13010  ;;  %13034 = vrcp.f32 %v8161_v59  ;;  %v8164_v44 = vadd.f32 1.0, %v13009_v45  ;;  %v11752_v31 = vmul.f32 -1.442695, %v7498_v10  ;;  %v7389_v56 = vadd.f32 %v7388_v26, %v7276_v46  ;;  %v7501_v12 = vpop.f32.mrf.mxu1 }
 0x4d6   : > { %v13013_v55 = vpop.eup %13012  ;;  %13036 = vpow2.f32 %v11749_v7  ;;  %v7500_v41 = vadd.f32 %v7499_v21, %v7387_v1  ;;  %v7390_v4 = vpop.f32.mrf.mxu0  ;;  %v8423_v26 = vmul.f32 %v13007_v39, %v15344_v20 }
 0x4d7   : > { %v13015_v18 = vpop.eup %13014  ;;  %13038 = vrcp.f32 %v8164_v44  ;;  %v8165_v15 = vadd.f32 1.0, %v13013_v55  ;;  %v7502_v48 = vadd.f32 %v7501_v12, %v7389_v56  ;;  %v7391_v19 = vadd.f32 %v7390_v4, %v15332_v2  ;;  %v7503_v59 = vpop.f32.mrf.mxu1 }
 0x4d8   : > { %v13017_v10 = vpop.eup %13016  ;;  %13040 = vpow2.f32 %v11752_v31  ;;  %v11753_v46 = vmul.f32 -1.442695, %v7500_v41  ;;  %v7394_v45 = vpop.f32.mrf.mxu0  ;;  %v8427_v63 = vmul.f32 %v13015_v18, %v15344_v20  ;;  %v8424_v2 = vmul.f32 %v13011_v40, %v15354_v34 }
 0x4d9   : > { %v13019_v8 = vpop.eup %13018  ;;  %13042 = vrcp.f32 %v8165_v15  ;;  %v8168_v57 = vadd.f32 1.0, %v13017_v10  ;;  %v11756_v7 = vmul.f32 -1.442695, %v7502_v48  ;;  %v7504_v21 = vadd.f32 %v7503_v59, %v7391_v19  ;;  %v7507_v1 = vpop.f32.mrf.mxu1 }
 0x4da   : > { %v13021_v44 = vpop.eup %13020  ;;  %13044 = vpow2.f32 %v11753_v46  ;;  %v7395_v12 = vadd.f32 %v7394_v45, %v7282_v61  ;;  %v7396_v55 = vpop.f32.mrf.mxu0  ;;  %v8428_v31 = vmul.f32 %v13019_v8, %v15354_v34  ;;  %v15557_v18 = vrot.slane %v15336_v58, %v16254_v35 }
 0x4db   : > { %13046 = vrcp.f32 %v8168_v57  ;;  %v8169_v56 = vadd.f32 1.0, %v13021_v44  ;;  %v11757_v41 = vmul.f32 -1.442695, %v7504_v21  ;;  %v7397_v39 = vadd.f32 %v7396_v55, %v15347_v24  ;;  %v7509_v20 = vpop.f32.mrf.mxu1 }
 0x4dc   : > { %v13023_v4 = vpop.eup %13022  ;;  %13048 = vpow2.f32 %v11756_v7  ;;  %v7508_v15 = vadd.f32 %v7507_v1, %v7395_v12  ;;  %v7398_v48 = vpop.f32.mrf.mxu0  ;;  %v8460_v61 = vpack.c.bf16 %v8428_v31, %v8424_v2  ;;  %v8459_v8 = vpack.c.bf16 %v8427_v63, %v8423_v26  ;;  %v16342_v12 = vld [vmem:[#allocation116_spill] sm:$0xff] }
 0x4dd   : > { %v13025_v19 = vpop.eup %13024  ;;  %13050 = vrcp.f32 %v8169_v56  ;;  %v7510_v40 = vadd.f32 %v7509_v20, %v7397_v39  ;;  %v7399_v59 = vadd.f32 %v7398_v48, %v7286_v36  ;;  %v7511_v34 = vpop.f32.mrf.mxu1  ;;  %v15561_v24 = vrot.slane %v15336_v58, %v16257_v47 }
 0x4de   : > { %v13027_v10 = vpop.eup %13026  ;;  %v8172_v46 = vadd.f32 1.0, %v13025_v19  ;;  %13052 = vpow2.f32 %v11757_v41  ;;  %v11760_v45 = vmul.f32 -1.442695, %v7508_v15  ;;  %8467 = vmatprep.subr.bf16.mxu0 %v8460_v61  ;;  %v7400_v57 = vpop.f32.mrf.mxu0  ;;  %v7292_v21 = vadd.f32 %v15367_v13, %v15421_v14 }
 0x4df   : > { %v13029_v7 = vpop.eup %13028  ;;  %v11761_v1 = vmul.f32 -1.442695, %v7510_v40  ;;  %v7512_v44 = vadd.f32 %v7511_v34, %v7399_v59  ;;  %v7401_v36 = vadd.f32 %v7400_v57, %v16342_v12  ;;  %v7513_v55 = vpop.f32.mrf.mxu1  ;;  %8468 = vmatpush1.bf16.xpose.msra.mxu0 %v8459_v8  ;;  %v7296_v58 = vadd.f32 %v15384_v5, %v15421_v14 }
 0x4e0   : > { %v13031_v26 = vpop.eup %13030  ;;  %13054 = vrcp.f32 %v8172_v46  ;;  %v8173_v63 = vadd.f32 1.0, %v13029_v7  ;;  %v16343_v2 = vpack.c.bf16 %v15538_v37, %v15532_v49  ;;  %v7404_v31 = vpop.f32.mrf.mxu0  ;;  %v15572_v56 = vmul.f32 %v13023_v4, %v15557_v18 }
 0x4e1   : > { %v13033_v13 = vpop.eup %13032  ;;  %13056 = vpow2.f32 %v11760_v45  ;;  %v11764_v41 = vmul.f32 -1.442695, %v7512_v44  ;;  %v7514_v39 = vadd.f32 %v7513_v55, %v7401_v36  ;;  %v7405_v20 = vadd.f32 %v7404_v31, %v7292_v21  ;;  %v7517_v15 = vpop.f32.mrf.mxu1 }
 0x4e2   : > { %8469 = vmatprep.subr.bf16.mxu0 %v16343_v2  ;;  %v13035_v48 = vpop.eup %13034  ;;  %13058 = vrcp.f32 %v8173_v63  ;;  %v8176_v61 = vadd.f32 1.0, %v13033_v13  ;;  %v7406_v5 = vpop.f32.mrf.mxu0  ;;  %v15575_v19 = vmul.f32 %v13027_v10, %v15561_v24  ;;  %v15578_v49 = vmul.f32 %v13031_v26, %v15557_v18 }
 0x4e3   : > { %v13037_v37 = vpop.eup %13036  ;;  %13060 = vpow2.f32 %v11761_v1  ;;  %v11765_v4 = vmul.f32 -1.442695, %v7514_v39  ;;  %v7518_v40 = vadd.f32 %v7517_v15, %v7405_v20  ;;  %v7407_v59 = vadd.f32 %v7406_v5, %v15379_v0  ;;  %v7519_v34 = vpop.f32.mrf.mxu1 }
 0x4e4   : > { %v13039_v8 = vpop.eup %13038  ;;  %13062 = vrcp.f32 %v8176_v61  ;;  %v8177_v46 = vadd.f32 1.0, %v13037_v37  ;;  %v7408_v45 = vpop.f32.mrf.mxu0  ;;  %v15582_v57 = vmul.f32 %v13035_v48, %v15561_v24  ;;  %v8433_v10 = vpack.c.bf16 %v15578_v49, %v15572_v56  ;;  %v16430_v56 = vld [vmem:[#allocation106_spill] sm:$0xff]  ;;  %v16431_v49 = vld [vmem:[#allocation104_spill] sm:$0xff] }
 0x4e5   : > { %v13041_v7 = vpop.eup %13040  ;;  %13064 = vpow2.f32 %v11764_v41  ;;  %v11768_v21 = vmul.f32 -1.442695, %v7518_v40  ;;  %v7520_v44 = vadd.f32 %v7519_v34, %v7407_v59  ;;  %v7409_v1 = vadd.f32 %v7408_v45, %v7296_v58  ;;  %v7521_v12 = vpop.f32.mrf.mxu1 }
 0x4e6   : > { %v13043_v36 = vpop.eup %13042  ;;  %v7302_v0 = vadd.f32 %v15399_v33, %v15421_v14  ;;  %13066 = vrcp.f32 %v8177_v46  ;;  %v8180_v55 = vadd.f32 1.0, %v13041_v7  ;;  %v7410_v26 = vpop.f32.mrf.mxu0  ;;  %v8434_v63 = vpack.c.bf16 %v15582_v57, %v15575_v19  ;;  %v16427_v19 = vld [vmem:[#allocation108_spill] sm:$0xff]  ;;  %v16428_v57 = vld [vmem:[#allocation107_spill] sm:$0xff] }
 0x4e7   : > { %v13045_v2 = vpop.eup %13044  ;;  %13068 = vpow2.f32 %v11765_v4  ;;  %v11769_v31 = vmul.f32 -1.442695, %v7520_v44  ;;  %v7522_v13 = vadd.f32 %v7521_v12, %v7409_v1  ;;  %v7411_v41 = vadd.f32 %v7410_v26, %v15393_v60  ;;  %v7523_v39 = vpop.f32.mrf.mxu1 }
 0x4e8   : > { %v16344_v58 = vpack.c.bf16 %v15535_v62, %v15528_v51  ;;  %v13047_v20 = vpop.eup %13046  ;;  %v7306_v33 = vadd.f32 %v15416_v29, %v15421_v14  ;;  %13070 = vrcp.f32 %v8180_v55  ;;  %v8181_v15 = vadd.f32 1.0, %v13045_v2  ;;  %v7414_v61 = vpop.f32.mrf.mxu0 }
 0x4e9   : > { %v16345_v48 = vpack.c.bf16 %v15514_v42, %v15508_v27  ;;  %v15600_v5 = vmul.f32 %v13039_v8, %v15557_v18  ;;  %v13049_v60 = vpop.eup %13048  ;;  %13072 = vpow2.f32 %v11768_v21  ;;  %v11772_v37 = vmul.f32 -1.442695, %v7522_v13  ;;  %v7527_v62 = vpop.f32.mrf.mxu1 }
 0x4ea   : > { %8470 = vmatpush1.bf16.xpose.msra.mxu0 %v16344_v58  ;;  %v7524_v4 = vadd.f32 %v7523_v39, %v7411_v41  ;;  %v7415_v51 = vadd.f32 %v7414_v61, %v7302_v0  ;;  %v13051_v40 = vpop.eup %13050  ;;  %13074 = vrcp.f32 %v8181_v15  ;;  %v8184_v59 = vadd.f32 1.0, %v13049_v60  ;;  %v7416_v29 = vpop.f32.mrf.mxu0 }
 0x4eb   : > { %8471 = vmatprep.subr.bf16.mxu0 %v16345_v48  ;;  %v15603_v34 = vmul.f32 %v13043_v36, %v15561_v24  ;;  %v15606_v27 = vmul.f32 %v13047_v20, %v15557_v18  ;;  %v13053_v42 = vpop.eup %13052  ;;  %13076 = vpow2.f32 %v11769_v31  ;;  %v7417_v45 = vadd.f32 %v7416_v29, %v15411_v30  ;;  %v7529_v7 = vpop.f32.mrf.mxu1 }
 0x4ec   : > { %v11773_v8 = vmul.f32 -1.442695, %v7524_v4  ;;  %v7528_v46 = vadd.f32 %v7527_v62, %v7415_v51  ;;  %13078 = vrcp.f32 %v8184_v59  ;;  %v8185_v21 = vadd.f32 1.0, %v13053_v42  ;;  %v7418_v44 = vpop.f32.mrf.mxu0 }
 0x4ed   : > { %v15610_v1 = vmul.f32 %v13051_v40, %v15561_v24  ;;  %v8437_v12 = vpack.c.bf16 %v15606_v27, %v15600_v5  ;;  %v13055_v36 = vpop.eup %13054  ;;  %13080 = vpow2.f32 %v11772_v37  ;;  %v7530_v55 = vadd.f32 %v7529_v7, %v7417_v45  ;;  %v7531_v2 = vpop.f32.mrf.mxu1  ;;  %v16424_v5 = vld [vmem:[#allocation110_spill] sm:$0xff]  ;;  %v16425_v27 = vld [vmem:[#allocation109_spill] sm:$0xff] }
 0x4ee   : > { %v11776_v0 = vmul.f32 -1.442695, %v7528_v46  ;;  %v7419_v26 = vadd.f32 %v7418_v44, %v7306_v33  ;;  %v13057_v31 = vpop.eup %13056  ;;  %v7312_v30 = vadd.f32 %v15437_v54, %v15421_v14  ;;  %v7316_v13 = vadd.f32 %v15454_v53, %v15421_v14  ;;  %v7420_v41 = vpop.f32.mrf.mxu0 }
 0x4ef   : > { %13082 = vrcp.f32 %v8185_v21  ;;  %v8438_v39 = vpack.c.bf16 %v15610_v1, %v15603_v34  ;;  %v13059_v58 = vpop.eup %13058  ;;  %v8188_v20 = vadd.f32 1.0, %v13057_v31  ;;  %v11777_v15 = vmul.f32 -1.442695, %v7530_v55  ;;  %v7533_v61 = vpop.f32.mrf.mxu1  ;;  %v16421_v1 = vld [vmem:[#allocation112_spill] sm:$0xff] }
 0x4f0   : > { %13084 = vpow2.f32 %v11773_v8  ;;  %v7532_v48 = vadd.f32 %v7531_v2, %v7419_v26  ;;  %v16346_v33 = vpack.c.bf16 %v15511_v16, %v15504_v11  ;;  %v13061_v60 = vpop.eup %13060  ;;  %v7318_v54 = vadd.f32 %v15458_v52, %v15269_v17  ;;  %v7424_v37 = vpop.f32.mrf.mxu0 }
 0x4f1   : > { %13086 = vpow2.f32 %v11776_v0  ;;  %v7421_v14 = vadd.f32 %v7420_v41, %v15428_v23  ;;  %v16347_v53 = vpack.c.bf16 %v15494_v28, %v15488_v43  ;;  %v15630_v4 = vmul.f32 %v13055_v36, %v15557_v18  ;;  %v13063_v51 = vpop.eup %13062  ;;  %v7537_v40 = vpop.f32.mrf.mxu1 }
 0x4f2   : > { %8472 = vmatpush1.bf16.xpose.msra.mxu0 %v16346_v33  ;;  %13088 = vrcp.f32 %v8188_v20  ;;  %v8189_v62 = vadd.f32 1.0, %v13061_v60  ;;  %v11780_v11 = vmul.f32 -1.442695, %v7532_v48  ;;  %v7425_v16 = vadd.f32 %v7424_v37, %v7312_v30  ;;  %v13065_v59 = vpop.eup %13064  ;;  %v7426_v52 = vpop.f32.mrf.mxu0 }
 0x4f3   : > { %8473 = vmatprep.subr.bf16.mxu0 %v16347_v53  ;;  %13090 = vpow2.f32 %v11777_v15  ;;  %v7534_v17 = vadd.f32 %v7533_v61, %v7421_v14  ;;  %v15633_v23 = vmul.f32 %v13059_v58, %v15561_v24  ;;  %v15636_v43 = vmul.f32 %v13063_v51, %v15557_v18  ;;  %v13067_v28 = vpop.eup %13066  ;;  %v7539_v46 = vpop.f32.mrf.mxu1 }
 0x4f4   : > { %13092 = vrcp.f32 %v8189_v62  ;;  %v8192_v29 = vadd.f32 1.0, %v13065_v59  ;;  %v7538_v42 = vadd.f32 %v7537_v40, %v7425_v16  ;;  %v7427_v8 = vadd.f32 %v7426_v52, %v15450_v22  ;;  %v13069_v45 = vpop.eup %13068  ;;  %v7428_v21 = vpop.f32.mrf.mxu0 }
 0x4f5   : > { %13094 = vpow2.f32 %v11780_v11  ;;  %v11781_v7 = vmul.f32 -1.442695, %v7534_v17  ;;  %v15640_v44 = vmul.f32 %v13067_v28, %v15561_v24  ;;  %v8441_v36 = vpack.c.bf16 %v15636_v43, %v15630_v4  ;;  %v13071_v0 = vpop.eup %13070  ;;  %v7541_v31 = vpop.f32.mrf.mxu1  ;;  %v16418_v4 = vld [vmem:[#allocation114_spill] sm:$0xff] }
 0x4f6   : > { %13096 = vrcp.f32 %v8192_v29  ;;  %v8193_v55 = vadd.f32 1.0, %v13069_v45  ;;  %v11784_v26 = vmul.f32 -1.442695, %v7538_v42  ;;  %v7540_v2 = vadd.f32 %v7539_v46, %v7427_v8  ;;  %v13073_v30 = vpop.eup %13072  ;;  %v7430_v41 = vpop.f32.mrf.mxu0 }
 0x4f7   : > { %13098 = vpow2.f32 %v11781_v7  ;;  %v7429_v22 = vadd.f32 %v7428_v21, %v7316_v13  ;;  %v8442_v58 = vpack.c.bf16 %v15640_v44, %v15633_v23  ;;  %v13075_v20 = vpop.eup %13074  ;;  %v8196_v15 = vadd.f32 1.0, %v13073_v30  ;;  %v7543_v53 = vpop.f32.mrf.mxu1  ;;  %v16419_v23 = vld [vmem:[#allocation113_spill] sm:$0xff] }
 0x4f8   : > { %13100 = vrcp.f32 %v8193_v55  ;;  %v11785_v48 = vmul.f32 -1.442695, %v7540_v2  ;;  %v7431_v61 = vadd.f32 %v7430_v41, %v7318_v54  ;;  %v16348_v33 = vpack.c.bf16 %v15491_v50, %v15484_v32  ;;  %v13077_v60 = vpop.eup %13076  ;;  %v16351_v55 = vld [vmem:[#allocation126_spill] sm:$0xff] }
 0x4f9   : > { %13102 = vpow2.f32 %v11784_v26  ;;  %v7542_v14 = vadd.f32 %v7541_v31, %v7429_v22  ;;  %v16349_v13 = vpack.c.bf16 %v15470_v38, %v15467_v9  ;;  %v13079_v37 = vpop.eup %13078  ;;  %v8197_v51 = vadd.f32 1.0, %v13077_v60  ;;  %v16353_v60 = vld [vmem:[#allocation51_spill] sm:$0xff] }
 0x4fa   : > { %8474 = vmatpush1.bf16.xpose.msra.mxu0 %v16348_v33  ;;  %13104 = vrcp.f32 %v8196_v15  ;;  %v7544_v62 = vadd.f32 %v7543_v53, %v7431_v61  ;;  %v13081_v11 = vpop.eup %13080  ;;  %v15653_v54 = vmul.f32 %v13071_v0, %v15557_v18  ;;  %v15656_v32 = vmul.f32 %v13079_v37, %v15557_v18  ;;  %v16355_v37 = vld [vmem:[#allocation124_spill] sm:$0xff] }
 0x4fb   : > { %8475 = vmatprep.subr.bf16.mxu0 %v16349_v13  ;;  %13106 = vpow2.f32 %v11785_v48  ;;  %v11788_v16 = vmul.f32 -1.442695, %v7542_v14  ;;  %v8200_v40 = vadd.f32 1.0, %v13081_v11  ;;  %v15659_v9 = vmul.f32 %v13075_v20, %v15561_v24  ;;  %v16354_v13 = vld [vmem:[#allocation125_spill] sm:$0xff] }
 0x4fc   : > { %v13083_v50 = vpop.eup %13082  ;;  %13108 = vrcp.f32 %v8197_v51  ;;  %v11789_v59 = vmul.f32 -1.442695, %v7544_v62  ;;  %v8445_v52 = vpack.c.bf16 %v15656_v32, %v15653_v54  ;;  %v16350_v7 = vpack.c.bf16 %v15464_v3, %v15461_v6  ;;  %v16434_v54 = vld [vmem:[#allocation103_spill] sm:$0xff] }
 0x4fd   : > { %v13085_v17 = vpop.eup %13084  ;;  %13110 = vpow2.f32 %v11788_v16  ;;  %v15662_v38 = vmul.f32 %v13083_v50, %v15561_v24  ;;  %v16352_v26 = vpack.c.bf16 %v15443_v25, %v16351_v55  ;;  %v3541_v14 = vadd.f32 1.0, %v16353_v60  ;;  %v16357_v50 = vld [vmem:[#allocation122_spill] sm:$0xff]  ;;  %v16364_v60 = vld [vmem:[#allocation119_spill] sm:$0xff] }
 0x4fe   : > { %v13087_v28 = vpop.eup %13086  ;;  %13112 = vrcp.f32 %v8200_v40  ;;  %v8201_v29 = vadd.f32 1.0, %v13085_v17  ;;  %v16356_v51 = vpack.c.bf16 %v16354_v13, %v16355_v37  ;;  %v16358_v40 = vld [vmem:[#allocation123_spill] sm:$0xff]  ;;  %v16420_v43 = vpack.c.bf16 %v16418_v4, %v16419_v23 }
 0x4ff   : > { %v13089_v42 = vpop.eup %13088  ;;  %v8204_v8 = vadd.f32 1.0, %v13087_v28  ;;  %13114 = vpow2.f32 %v11789_v59  ;;  %v8446_v46 = vpack.c.bf16 %v15662_v38, %v15659_v9  ;;  %v16359_v59 = vpack.c.bf16 %v16357_v50, %v16358_v40  ;;  %v16436_v9 = vld [vmem:[#allocation102_spill] sm:$0xff]  ;;  %v16437_v38 = vld [vmem:[#allocation100_spill] sm:$0xff] }
 0x500   : > { %v13091_v45 = vpop.eup %13090  ;;  %13116 = vrcp.f32 %v8201_v29  ;;  %v15675_v41 = vmul.f32 %v13089_v42, %v15557_v18 }
 0x501   : > { %v13093_v21 = vpop.eup %13092  ;;  %v8205_v0 = vadd.f32 1.0, %v13091_v45  ;;  %13118 = vrcp.f32 %v8204_v8 }
 0x502   : > { %8476 = vmatpush1.bf16.xpose.msra.mxu0 %v16350_v7  ;;  %v13095_v2 = vpop.eup %13094  ;;  %v15681_v48 = vmul.f32 %v13093_v21, %v15561_v24 }
 0x503   : > { %8477 = vmatprep.subr.bf16.mxu0 %v16352_v26  ;;  %v13097_v31 = vpop.eup %13096  ;;  %v8208_v30 = vadd.f32 1.0, %v13095_v2  ;;  %13120 = vrcp.f32 %v8205_v0 }
 0x504   : > { %v13099_v22 = vpop.eup %13098  ;;  %v15678_v20 = vmul.f32 %v13097_v31, %v15557_v18 }
 0x505   : > { %v13101_v6 = vpop.eup %13100  ;;  %13122 = vrcp.f32 %v8208_v30  ;;  %v8209_v3 = vadd.f32 1.0, %v13099_v22  ;;  %v16360_v30 = vld [vmem:[#allocation120_spill] sm:$0xff]  ;;  %v16361_v22 = vld [vmem:[#allocation121_spill] sm:$0xff] }
 0x506   : > { %v13103_v15 = vpop.eup %13102  ;;  %v15684_v25 = vmul.f32 %v13101_v6, %v15561_v24  ;;  %v8449_v61 = vpack.c.bf16 %v15678_v20, %v15675_v41  ;;  %v16362_v6 = vpack.c.bf16 %v16360_v30, %v16361_v22  ;;  %v16440_v20 = vld [vmem:[#allocation99_spill] sm:$0xff] }
 0x507   : > { %v13105_v33 = vpop.eup %13104  ;;  %13124 = vrcp.f32 %v8209_v3  ;;  %v8212_v28 = vadd.f32 1.0, %v13103_v15 }
 0x508   : > { %v13107_v53 = vpop.eup %13106  ;;  %v8450_v62 = vpack.c.bf16 %v15684_v25, %v15681_v48  ;;  %13126 = vrcp.f32 %v3541_v14  ;;  %v8409_v45 = vmul.f32 %v13105_v33, %v15557_v18  ;;  %v16363_v33 = vld [vmem:[#allocation118_spill] sm:$0xff]  ;;  %v16415_v48 = vld [vmem:[#allocation69_spill] sm:$0xff] }
 0x509   : > { %v13109_v11 = vpop.eup %13108  ;;  %v8213_v16 = vadd.f32 1.0, %v13107_v53  ;;  %v16365_v14 = vpack.c.bf16 %v16363_v33, %v16364_v60  ;;  %v16372_v33 = vld [vmem:[#allocation92_spill] sm:$0xff]  ;;  %v16373_v60 = vld [vmem:[#allocation90_spill] sm:$0xff] }
 0x50a   : > { %8478 = vmatpush1.bf16.xpose.msra.mxu0 %v16356_v51  ;;  %v13111_v17 = vpop.eup %13110  ;;  %v8410_v55 = vmul.f32 %v13109_v11, %v15561_v24  ;;  %v16416_v25 = vld [vmem:[#allocation66_spill] sm:$0xff] }
 0x50b   : > { %8479 = vmatprep.subr.bf16.mxu0 %v16359_v59  ;;  %v13113_v29 = vpop.eup %13112  ;;  %v8216_v42 = vadd.f32 1.0, %v13111_v17  ;;  %13128 = vrcp.f32 %v8213_v16  ;;  %v16366_v17 = vld [vmem:[#allocation115_spill] sm:$0xff] }
 0x50c   : > { %v13115_v8 = vpop.eup %13114  ;;  %v8413_v7 = vmul.f32 %v13113_v29, %v15557_v18 }
 0x50d   : > { %v13117_v21 = vpop.eup %13116  ;;  %13130 = vrcp.f32 %v8216_v42  ;;  %v8217_v0 = vadd.f32 1.0, %v13115_v8  ;;  %v16369_v8 = vld [vmem:[#allocation93_spill] sm:$0xff] }
 0x50e   : > { %13132 = vrcp.f32 %v8212_v28  ;;  %v8414_v26 = vmul.f32 %v13117_v21, %v15561_v24  ;;  %v8453_v2 = vpack.c.bf16 %v8413_v7, %v8409_v45  ;;  %v13119_v31 = vpop.eup %13118  ;;  %v16367_v28 = vld [vmem:[#allocation117_spill] sm:$0xff]  ;;  %v16370_v45 = vld [vmem:[#allocation91_spill] sm:$0xff] }
 0x50f   : > { %13134 = vrcp.f32 %v8217_v0  ;;  %v8417_v13 = vmul.f32 %v13119_v31, %v15557_v18  ;;  %v16368_v29 = vpack.c.bf16 %v16366_v17, %v16367_v28  ;;  %v16371_v7 = vpack.c.bf16 %v16369_v8, %v16370_v45  ;;  %v16384_v28 = vld [vmem:[#allocation84_spill] sm:$0xff]  ;;  %v16387_v8 = vld [vmem:[#allocation81_spill] sm:$0xff]  ;;  %v16388_v45 = vld [vmem:[#allocation63_spill] sm:$0xff] }
 0x510   : > { %v8454_v3 = vpack.c.bf16 %v8414_v26, %v8410_v55  ;;  %v13121_v15 = vpop.eup %13120 }
 0x511   : > { %v8418_v11 = vmul.f32 %v13121_v15, %v15561_v24 }
 0x512   : > { %8480 = vmatpush1.bf16.xpose.msra.mxu0 %v16362_v6  ;;  %v13123_v53 = vpop.eup %13122 }
 0x513   : > { %8481 = vmatprep.subr.bf16.mxu0 %v16365_v14  ;;  %v8421_v37 = vmul.f32 %v13123_v53, %v15557_v18  ;;  %v16374_v14 = vpack.c.bf16 %v16372_v33, %v16373_v60  ;;  %v16400_v33 = vld [vmem:[#allocation60_spill] sm:$0xff] }
 0x514   : > { %v13125_v51 = vpop.eup %13124 }
 0x515   : > { %v8422_v16 = vmul.f32 %v13125_v51, %v15561_v24  ;;  %v8457_v50 = vpack.c.bf16 %v8421_v37, %v8417_v13  ;;  %v13127_v59 = vpop.eup %13126  ;;  %v16375_v13 = vld [vmem:[#allocation89_spill] sm:$0xff]  ;;  %v16376_v37 = vld [vmem:[#allocation87_spill] sm:$0xff] }
 0x516   : > { %v3553_v31 = vpack.c.bf16 %v13127_v59, %v13127_v59  ;;  %v16377_v51 = vpack.c.bf16 %v16375_v13, %v16376_v37  ;;  %v16406_v13 = vld [vmem:[#allocation74_spill] sm:$0xff] }
 0x517   : > { %v8458_v40 = vpack.c.bf16 %v8422_v16, %v8418_v11  ;;  %v16378_v11 = vld [vmem:[#allocation88_spill] sm:$0xff]  ;;  %v16379_v16 = vld [vmem:[#allocation86_spill] sm:$0xff] }
 0x518   : > { %v13129_v42 = vpop.eup %13128  ;;  %v16380_v59 = vpack.c.bf16 %v16378_v11, %v16379_v16  ;;  %v16409_v16 = vld [vmem:[#allocation55_spill] sm:$0xff] }
 0x519   : > { %v8426_v30 = vmul.f32 %v13129_v42, %v15561_v24 }
 0x51a   : > { %8482 = vmatpush1.bf16.xpose.msra.mxu0 %v16368_v29  ;;  %v13131_v21 = vpop.eup %13130  ;;  %v16385_v29 = vld [vmem:[#allocation82_spill] sm:$0xff] }
 0x51b   : > { %8557 = vmatprep.subr.bf16.mxu0 %v16371_v7  ;;  %v13133_v0 = vpop.eup %13132  ;;  %v8429_v26 = vmul.f32 %v13131_v21, %v15557_v18  ;;  %v16386_v42 = vpack.c.bf16 %v16384_v28, %v16385_v29  ;;  %v16389_v7 = vpack.c.bf16 %v16387_v8, %v16388_v45  ;;  %v16390_v21 = vld [vmem:[#allocation80_spill] sm:$0xff]  ;;  %v16442_v29 = vld [vmem:[#allocation98_spill] sm:$0xff]  ;;  %v16445_v45 = vld [vmem:[#allocation97_spill] sm:$0xff] }
 0x51c   : > { %v13135_v55 = vpop.eup %13134  ;;  %v8425_v6 = vmul.f32 %v13133_v0, %v15557_v18  ;;  %v16382_v18 = vld [vmem:[#allocation83_spill] sm:$0xff] }
 0x51d   : > { %v8430_v22 = vmul.f32 %v13135_v55, %v15561_v24  ;;  %v16381_v24 = vld [vmem:[#allocation85_spill] sm:$0xff]  ;;  %v16393_v55 = vld [vmem:[#allocation64_spill] sm:$0xff] }
 0x51e   : > { %v8461_v53 = vpack.c.bf16 %v8429_v26, %v8425_v6  ;;  %v16383_v17 = vpack.c.bf16 %v16381_v24, %v16382_v18  ;;  %v16394_v26 = vld [vmem:[#allocation61_spill] sm:$0xff]  ;;  %v16412_v18 = vld [vmem:[#allocation70_spill] sm:$0xff] }
 0x51f   : > { %v8462_v15 = vpack.c.bf16 %v8430_v22, %v8426_v30  ;;  %v16396_v30 = vld [vmem:[#allocation45_spill] sm:$0xff]  ;;  %v16397_v22 = vld [vmem:[#allocation62_spill] sm:$0xff] }
 0x520   : > { %v16398_v6 = vpack.c.bf16 %v16396_v30, %v16397_v22  ;;  %v16454_v22 = vld [vmem:[#allocation57_spill] sm:$0xff] }
 0x521   : > { %8500 = vmatmul.mubr.bf16.vlgmr.msra.gmra.mxu0 %v3553_v31  ;;  %8507 = vmatprep.subr.bf16.mxu1 %v8462_v15  ;;  %v16395_v31 = vpack.c.bf16 %v16393_v55, %v16394_v26  ;;  %v16399_v15 = vld [vmem:[#allocation79_spill] sm:$0xff]  ;;  %v16451_v26 = vld [vmem:[#allocation77_spill] sm:$0xff] }
 0x522   : > { %8558 = vmatpush1.bf16.msra.mxu0 %v16374_v14  ;;  %8508 = vmatpush1.bf16.xpose.msra.mxu1 %v8461_v53  ;;  %v16401_v60 = vpack.c.bf16 %v16399_v15, %v16400_v33  ;;  %v16405_v53 = vld [vmem:[#allocation75_spill] sm:$0xff]  ;;  %v16457_v33 = vld [vmem:[#allocation73_spill] sm:$0xff] }
 0x523   : > { %8559 = vmatprep.subr.bf16.mxu0 %v16377_v51  ;;  %8509 = vmatprep.subr.bf16.mxu1 %v8458_v40  ;;  %v16391_v40 = vld [vmem:[#allocation46_spill] sm:$0xff]  ;;  %v16407_v37 = vpack.c.bf16 %v16405_v53, %v16406_v13  ;;  %v16408_v51 = vld [vmem:[#allocation52_spill] sm:$0xff]  ;;  %v16463_v13 = vld [vmem:[#allocation95_spill] sm:$0xff] }
 0x524   : > { %v16392_v0 = vpack.c.bf16 %v16390_v21, %v16391_v40  ;;  %v11228_v11 = vmul.f32 -1.442695, %v16408_v51  ;;  %v16448_v40 = vld [vmem:[#allocation65_spill] sm:$0xff] }
 0x526   : > { %8560 = vmatpush1.bf16.msra.mxu0 %v16380_v59  ;;  %v16410_v59 = vld [vmem:[#allocation72_spill] sm:$0xff]  ;;  %13136 = vpow2.f32 %v11228_v11 }
 0x527   : > { %8561 = vmatprep.subr.bf16.mxu0 %v16383_v17  ;;  %v16411_v24 = vpack.c.bf16 %v16409_v16, %v16410_v59 }
 0x52a   : > { %8562 = vmatpush1.bf16.msra.mxu0 %v16386_v42  ;;  %8510 = vmatpush1.bf16.xpose.msra.mxu1 %v8457_v50  ;;  %v16403_v50 = vld [vmem:[#allocation58_spill] sm:$0xff]  ;;  %v16443_v42 = vld [vmem:[#allocation96_spill] sm:$0xff] }
 0x52b   : > { %8563 = vmatprep.subr.bf16.mxu0 %v16389_v7  ;;  %8511 = vmatprep.subr.bf16.mxu1 %v8454_v3  ;;  %v16402_v3 = vld [vmem:[#allocation59_spill] sm:$0xff]  ;;  %v16444_v8 = vpack.c.bf16 %v16442_v29, %v16443_v42  ;;  %v16446_v7 = vld [vmem:[#allocation78_spill] sm:$0xff] }
 0x52c   : > { %v16404_v14 = vpack.c.bf16 %v16402_v3, %v16403_v50  ;;  %v16447_v21 = vpack.c.bf16 %v16445_v45, %v16446_v7  ;;  %v16460_v50 = vld [vmem:[#allocation54_spill] sm:$0xff]  ;;  %v12354_v7 = vld [vmem:[#allocation14 + $0x60] ss:$24 sps:$4 sm:$0xff]  }
 0x52d   : > { %v12348_v29 = vld [vmem:[#allocation14 + $0x90] ss:$24 sps:$4 sm:$0xff]   ;;  %v12359_v45 = vld [vmem:[#allocation14 + $0x364] ss:$24 sps:$4 sm:$0xff]  }
 0x52e   : > { %8564 = vmatpush1.bf16.msra.mxu0 %v16392_v0  ;;  %v16449_v0 = vld [vmem:[#allocation56_spill] sm:$0xff]  ;;  %v12351_v42 = vld [vmem:[#allocation14 + $0x390] ss:$24 sps:$4 sm:$0xff]  }
 0x52f   : > { %8565 = vmatprep.subr.bf16.mxu0 %v16395_v31  ;;  %v16450_v55 = vpack.c.bf16 %v16448_v40, %v16449_v0  ;;  %v16452_v31 = vld [vmem:[#allocation76_spill] sm:$0xff] }
 0x530   : > { %v16453_v30 = vpack.c.bf16 %v16451_v26, %v16452_v31  ;;  %v12362_v40 = vld [vmem:[#allocation14 + $0x34] ss:$24 sps:$4 sm:$0xff]   ;;  %v12363_v26 = vld [vmem:[#allocation14 + $0x330] ss:$24 sps:$4 sm:$0xff]   ;;  %v12368_v31 = vld [vmem:[#allocation14 + $0x4] ss:$24 sps:$4 sm:$0xff]  }
 0x531   : > { %v12365_v0 = vld [vmem:[#allocation14 + $0x334] ss:$24 sps:$4 sm:$0xff]  }
 0x532   : > { %8566 = vmatpush1.bf16.msra.mxu0 %v16398_v6  ;;  %8512 = vmatpush1.bf16.xpose.msra.mxu1 %v8453_v2  ;;  %v16413_v2 = vld [vmem:[#allocation68_spill] sm:$0xff]  ;;  %v16455_v6 = vld [vmem:[#allocation53_spill] sm:$0xff] }
 0x533   : > { %8567 = vmatprep.subr.bf16.mxu0 %v16401_v60  ;;  %8513 = vmatprep.subr.bf16.mxu1 %v8450_v62  ;;  %v16414_v17 = vpack.c.bf16 %v16412_v18, %v16413_v2  ;;  %v16417_v62 = vpack.c.bf16 %v16415_v48, %v16416_v25  ;;  %v13137_v28 = vpop.eup %13136  ;;  %v16456_v15 = vpack.c.bf16 %v16454_v22, %v16455_v6  ;;  %v16458_v60 = vld [vmem:[#allocation71_spill] sm:$0xff]  ;;  %v11790_v18 = vld [vmem:[#allocation17 + $0x2] ss:$0 sm:$0xff] }
 0x534   : > { %v3543_v41 = vadd.f32 1.0, %v13137_v28  ;;  %v16459_v3 = vpack.c.bf16 %v16457_v33, %v16458_v60  ;;  %v12366_v22 = vld [vmem:[#allocation14] ss:$24 sps:$4 sm:$0xff]   ;;  %v12377_v33 = vld [vmem:[#allocation14 + $0x5d4] ss:$24 sps:$4 sm:$0xff]  }
 0x535   : > { %v12369_v6 = vld [vmem:[#allocation14 + $0x300] ss:$24 sps:$4 sm:$0xff]   ;;  %v12372_v60 = vld [vmem:[#allocation14 + $0x2d0] ss:$24 sps:$4 sm:$0xff]  }
 0x536   : > { %8568 = vmatpush1.bf16.msra.mxu0 %v16404_v14  ;;  %13138 = vrcp.f32 %v3543_v41  ;;  %v16461_v14 = vld [vmem:[#allocation94_spill] sm:$0xff] }
 0x537   : > { %8569 = vmatprep.subr.bf16.mxu0 %v16407_v37  ;;  %v16462_v53 = vpack.c.bf16 %v16460_v50, %v16461_v14  ;;  %v16464_v37 = vld [vmem:[#allocation67_spill] sm:$0xff]  ;;  %v12380_v50 = vld [vmem:[#allocation14 + $0x2a4] ss:$24 sps:$4 sm:$0xff]  }
 0x538   : > { %v16465_v51 = vpack.c.bf16 %v16463_v13, %v16464_v37  ;;  %v12383_v14 = vld [vmem:[#allocation14 + $0x5a4] ss:$24 sps:$4 sm:$0xff]   ;;  %v12381_v13 = vld [vmem:[#allocation14 + $0x5a0] ss:$24 sps:$4 sm:$0xff]   ;;  %v12386_v37 = vld [vmem:[#allocation14 + $0x274] ss:$24 sps:$4 sm:$0xff]  }
 0x53a   : > { %8570 = vmatpush1.bf16.msra.mxu0 %v16411_v24  ;;  %8514 = vmatpush1.bf16.xpose.msra.mxu1 %v8449_v61 }
 0x53b   : > { %8571 = vmatprep.subr.bf16.mxu0 %v16414_v17  ;;  %8515 = vmatprep.subr.bf16.mxu1 %v8446_v46  ;;  %v16439_v46 = vld [vmem:[#allocation101_spill] sm:$0xff] }
 0x53c   : > { %v16441_v61 = vpack.c.bf16 %v16439_v46, %v16440_v20  ;;  %v12345_v46 = vld [vmem:[#allocation14 + $0x3c0] ss:$24 sps:$4 sm:$0xff]   ;;  %v12350_v20 = vld [vmem:[#allocation14 + $0x94] ss:$24 sps:$4 sm:$0xff]  }
 0x53e   : > { %8572 = vmatpush1.bf16.msra.mxu0 %v16417_v62 }
 0x542   : > { %8516 = vmatpush1.bf16.xpose.msra.mxu1 %v8445_v52  ;;  %v16438_v52 = vpack.c.bf16 %v16436_v9, %v16437_v38  ;;  %v12344_v9 = vld [vmem:[#allocation14 + $0xc4] ss:$24 sps:$4 sm:$0xff]  }
 0x543   : > { %8517 = vmatprep.subr.bf16.mxu1 %v8442_v58  ;;  %v13139_v44 = vpop.eup %13138  ;;  %v16433_v58 = vld [vmem:[#allocation105_spill] sm:$0xff] }
 0x544   : > { %v3555_v34 = vpack.c.bf16 %v13139_v44, %v13139_v44  ;;  %v16435_v32 = vpack.c.bf16 %v16433_v58, %v16434_v54  ;;  %v13690_v44 = vmov 0   ;;  %v12341_v58 = vld [vmem:[#allocation14 + $0x3f4] ss:$24 sps:$4 sm:$0xff]   ;;  %v12336_v54 = vld [vmem:[#allocation14 + $0xf0] ss:$24 sps:$4 sm:$0xff]  }
 0x545   : > { %8589 = vmatprep.mubr.bf16.mxu0 %v13690_v44  ;;  %v12347_v38 = vld [vmem:[#allocation14 + $0x3c4] ss:$24 sps:$4 sm:$0xff]  }
 0x54a   : > { %8518 = vmatpush1.bf16.xpose.msra.mxu1 %v8441_v36 }
 0x54b   : > { %8519 = vmatprep.subr.bf16.mxu1 %v8438_v39  ;;  %v16422_v39 = vld [vmem:[#allocation111_spill] sm:$0xff] }
 0x54c   : > { %v16423_v36 = vpack.c.bf16 %v16421_v1, %v16422_v39  ;;  %v12329_v1 = vld [vmem:[#allocation14 + $0x454] ss:$24 sps:$4 sm:$0xff]  }
 0x552   : > { %8520 = vmatpush1.bf16.xpose.msra.mxu1 %v8437_v12  ;;  %v16426_v12 = vpack.c.bf16 %v16424_v5, %v16425_v27  ;;  %v12324_v27 = vld [vmem:[#allocation14 + $0x150] ss:$24 sps:$4 sm:$0xff]  }
 0x553   : > { %8521 = vmatprep.subr.bf16.mxu1 %v8434_v63  ;;  %v16429_v63 = vpack.c.bf16 %v16427_v19, %v16428_v57  ;;  %v12332_v57 = vld [vmem:[#allocation14 + $0x124] ss:$24 sps:$4 sm:$0xff]  }
 0x55a   : > { %8522 = vmatpush1.bf16.xpose.msra.mxu1 %v8433_v10  ;;  %v16432_v10 = vpack.c.bf16 %v16430_v56, %v16431_v49  ;;  %v12330_v56 = vld [vmem:[#allocation14 + $0x120] ss:$24 sps:$4 sm:$0xff]  }
 0x55b   : > { %8598 = vmatprep.subr.bf16.mxu1 %v16420_v43  ;;  %v12333_v49 = vld [vmem:[#allocation14 + $0x420] ss:$24 sps:$4 sm:$0xff]  }
 0x561   : > { %8540 = vmatmul.mubr.bf16.vlgmr.msra.gmra.mxu1 %v3555_v34  ;;  %v12326_v34 = vld [vmem:[#allocation14 + $0x154] ss:$24 sps:$4 sm:$0xff]  }
 0x562   : > { %8599 = vmatpush1.bf16.msra.mxu1 %v16423_v36  ;;  %8630 = vmatprep.mubr.bf16.mxu1 %v13690_v44  ;;  %v12413_v44 = vld [vmem:[#allocation14 + $0x4b4] ss:$24 sps:$4 sm:$0xff]  }
 0x563   : > { %8600 = vmatprep.subr.bf16.mxu1 %v16426_v12  ;;  %9823 = vmatprep.subr.bf16.mxu0 %v12326_v34  ;;  %v12327_v12 = vld [vmem:[#allocation14 + $0x450] ss:$24 sps:$4 sm:$0xff]  }
 0x564   : > { %v12408_v34 = vld [vmem:[#allocation14 + $0x1b0] ss:$24 sps:$4 sm:$0xff]  }
 0x566   : > { %8601 = vmatpush1.bf16.msra.mxu1 %v16429_v63  ;;  %v12335_v63 = vld [vmem:[#allocation14 + $0x424] ss:$24 sps:$4 sm:$0xff]  }
 0x567   : > { %8602 = vmatprep.subr.bf16.mxu1 %v16432_v10  ;;  %v12338_v10 = vld [vmem:[#allocation14 + $0xf4] ss:$24 sps:$4 sm:$0xff]  }
 0x56a   : > { %8603 = vmatpush1.bf16.msra.mxu1 %v16435_v32  ;;  %v12339_v32 = vld [vmem:[#allocation14 + $0x3f0] ss:$24 sps:$4 sm:$0xff]  }
 0x56b   : > { %8604 = vmatprep.subr.bf16.mxu1 %v16438_v52  ;;  %v12342_v52 = vld [vmem:[#allocation14 + $0xc0] ss:$24 sps:$4 sm:$0xff]  }
 0x56e   : > { %8605 = vmatpush1.bf16.msra.mxu1 %v16441_v61  ;;  %v12353_v61 = vld [vmem:[#allocation14 + $0x394] ss:$24 sps:$4 sm:$0xff]  }
 0x56f   : > { %8606 = vmatprep.subr.bf16.mxu1 %v16444_v8  ;;  %v12356_v8 = vld [vmem:[#allocation14 + $0x64] ss:$24 sps:$4 sm:$0xff]  }
 0x572   : > { %8607 = vmatpush1.bf16.msra.mxu1 %v16447_v21  ;;  %v12357_v21 = vld [vmem:[#allocation14 + $0x360] ss:$24 sps:$4 sm:$0xff]  }
 0x573   : > { %8608 = vmatprep.subr.bf16.mxu1 %v16450_v55  ;;  %v12360_v55 = vld [vmem:[#allocation14 + $0x30] ss:$24 sps:$4 sm:$0xff]  }
 0x576   : > { %8609 = vmatpush1.bf16.msra.mxu1 %v16453_v30  ;;  %v12371_v30 = vld [vmem:[#allocation14 + $0x304] ss:$24 sps:$4 sm:$0xff]  }
 0x577   : > { %8610 = vmatprep.subr.bf16.mxu1 %v16456_v15  ;;  %v12374_v15 = vld [vmem:[#allocation14 + $0x2d4] ss:$24 sps:$4 sm:$0xff]  }
 0x57a   : > { %8611 = vmatpush1.bf16.msra.mxu1 %v16459_v3  ;;  %v12375_v3 = vld [vmem:[#allocation14 + $0x5d0] ss:$24 sps:$4 sm:$0xff]  }
 0x57b   : > { %8612 = vmatprep.subr.bf16.mxu1 %v16462_v53  ;;  %v12378_v53 = vld [vmem:[#allocation14 + $0x2a0] ss:$24 sps:$4 sm:$0xff]  }
 0x57e   : > { %8613 = vmatpush1.bf16.msra.mxu1 %v16465_v51  ;;  %v12389_v51 = vld [vmem:[#allocation14 + $0x574] ss:$24 sps:$4 sm:$0xff]  }
 0x57f   : > { %9864 = vmatprep.subr.bf16.mxu1 %v12329_v1  ;;  %v12411_v1 = vld [vmem:[#allocation14 + $0x4b0] ss:$24 sps:$4 sm:$0xff]  }
 0x5e1   : > { %v8501_v11 = vpop.f32.mrf.mxu0 }
 0x5e2   : > { %v8502_v2 = vadd.f32 %v11790_v18, %v8501_v11  ;;  %v12384_v11 = vld [vmem:[#allocation14 + $0x270] ss:$24 sps:$4 sm:$0xff]   ;;  %v12390_v18 = vld [vmem:[#allocation14 + $0x240] ss:$24 sps:$4 sm:$0xff]  }
 0x5e3   : > { %v8503_v16 = vpop.f32.mrf.mxu0 }
 0x5e4   : > { %v12387_v16 = vld [vmem:[#allocation14 + $0x570] ss:$24 sps:$4 sm:$0xff]  }
 0x5e5   : > { %v8504_v59 = vpop.f32.mrf.mxu0 }
 0x5e6   : > { %v12392_v59 = vld [vmem:[#allocation14 + $0x244] ss:$24 sps:$4 sm:$0xff]  }
 0x5e7   : > { %v8505_v24 = vpop.f32.mrf.mxu0 }
 0x5e8   : > { %v12395_v24 = vld [vmem:[#allocation14 + $0x544] ss:$24 sps:$4 sm:$0xff]  }
 0x621   : > { %v8541_v17 = vpop.f32.mrf.mxu1 }
 0x622   : > { %v8542_v48 = vadd.f32 %v8541_v17, %v8502_v2  ;;  %v12393_v2 = vld [vmem:[#allocation14 + $0x540] ss:$24 sps:$4 sm:$0xff]   ;;  %v12398_v17 = vld [vmem:[#allocation14 + $0x214] ss:$24 sps:$4 sm:$0xff]  }
 0x623   : > { %v8543_v25 = vpop.f32.mrf.mxu1 }
 0x624   : > { %8547 = vmax.xlane.f32.xlu0 %v8542_v48  ;;  %v12396_v25 = vld [vmem:[#allocation14 + $0x210] ss:$24 sps:$4 sm:$0xff]  }
 0x625   : > { %v8544_v62 = vpop.f32.mrf.mxu1 }
 0x626   : > { %v12399_v62 = vld [vmem:[#allocation14 + $0x510] ss:$24 sps:$4 sm:$0xff]  }
 0x627   : > { %v8545_v28 = vpop.f32.mrf.mxu1 }
 0x628   : > { %v12404_v28 = vld [vmem:[#allocation14 + $0x1e4] ss:$24 sps:$4 sm:$0xff]  }
 0x6ad   : > { %v8548_v41 = vpop.xlane.xlu0 %8547 }
 0x6ae   : > { %v8549_v4 = vsub.f32 %v8542_v48, %v8548_v41  ;;  %v12401_v48 = vld [vmem:[#allocation14 + $0x514] ss:$24 sps:$4 sm:$0xff]   ;;  %v12407_v41 = vld [vmem:[#allocation14 + $0x4e4] ss:$24 sps:$4 sm:$0xff]  }
 0x6b0   : > { %v8550_v23 = vmul.f32 1.442695, %v8549_v4  ;;  %v12402_v4 = vld [vmem:[#allocation14 + $0x1e0] ss:$24 sps:$4 sm:$0xff]  }
 0x6b2   : > { %13140 = vpow2.f32 %v8550_v23  ;;  %v12405_v23 = vld [vmem:[#allocation14 + $0x4e0] ss:$24 sps:$4 sm:$0xff]  }
 0x6bf   : > { %v13141_v43 = vpop.eup %13140 }
 0x6c0   : > { %8552 = vadd.xlane.f32.xlu0 %v13141_v43 }
 0x749   : > { %v8553_v39 = vpop.xlane.xlu0 %8552 }
 0x74a   : > { %13142 = vrcp.f32 %v8553_v39  ;;  %v12416_v39 = vld [vmem:[#allocation14 + $0x184] ss:$24 sps:$4 sm:$0xff]  }
 0x757   : > { %v13143_v36 = vpop.eup %13142 }
 0x758   : > { %v8555_v5 = vmul.f32 %v13143_v36, %v13141_v43  ;;  %v12410_v43 = vld [vmem:[#allocation14 + $0x1b4] ss:$24 sps:$4 sm:$0xff]   ;;  %v12419_v36 = vld [vmem:[#allocation14 + $0x484] ss:$24 sps:$4 sm:$0xff]  }
 0x75a   : > { %v8556_v19 = vpack.c.bf16 %v8555_v5, %v8555_v5  ;;  %v12414_v5 = vld [vmem:[#allocation14 + $0x180] ss:$24 sps:$4 sm:$0xff]  }
 0x75c   : > { %8590 = vmatmul.mubr.bf16.vlgmr.msra.gmra.mxu0 %v8556_v19  ;;  %8631 = vmatmul.mubr.bf16.vlgmr.msra.gmra.mxu1 %v8556_v19  ;;  %v12425_v19 = vld [vmem:[#allocation14 + $0x45c] ss:$24 sps:$4 sm:$0xff]  }
 0x75d   : > { %9824 = vmatpush1.bf16.msra.mxu0 %v12324_v27  ;;  %9865 = vmatpush1.bf16.msra.mxu1 %v12327_v12  ;;  %v12417_v27 = vld [vmem:[#allocation14 + $0x480] ss:$24 sps:$4 sm:$0xff]   ;;  %v12422_v12 = vld [vmem:[#allocation14 + $0x15c] ss:$24 sps:$4 sm:$0xff]  }
 0x75e   : > { %9825 = vmatprep.subr.bf16.mxu0 %v12332_v57  ;;  %9866 = vmatprep.subr.bf16.mxu1 %v12335_v63  ;;  %v16466_v57 = vld [vmem:[#allocation43_spill] sm:$0xff] }
 0x75f   : > { %v11222_v63 = vmul.f32 -1.442695, %v16466_v57  ;;  %v12428_v57 = vld [vmem:[#allocation14 + $0x12c] ss:$24 sps:$4 sm:$0xff]  }
 0x761   : > { %9826 = vmatpush1.bf16.msra.mxu0 %v12330_v56  ;;  %9867 = vmatpush1.bf16.msra.mxu1 %v12333_v49  ;;  %v16467_v56 = vld [vmem:[#allocation47_spill] sm:$0xff]  ;;  %13144 = vpow2.f32 %v11222_v63 }
 0x762   : > { %9827 = vmatprep.subr.bf16.mxu0 %v12338_v10  ;;  %9868 = vmatprep.subr.bf16.mxu1 %v12341_v58  ;;  %v11224_v49 = vmul.f32 -1.442695, %v16467_v56  ;;  %v16468_v10 = vld [vmem:[#allocation44_spill] sm:$0xff]  ;;  %v12431_v63 = vld [vmem:[#allocation14 + $0x42c] ss:$24 sps:$4 sm:$0xff]  }
 0x763   : > { %v11223_v58 = vmul.f32 -1.442695, %v16468_v10  ;;  %v12426_v56 = vld [vmem:[#allocation14 + $0x128] ss:$24 sps:$4 sm:$0xff]   ;;  %v12434_v10 = vld [vmem:[#allocation14 + $0xfc] ss:$24 sps:$4 sm:$0xff]  }
 0x764   : > { %13146 = vpow2.f32 %v11224_v49  ;;  %v12429_v49 = vld [vmem:[#allocation14 + $0x428] ss:$24 sps:$4 sm:$0xff]  }
 0x765   : > { %9828 = vmatpush1.bf16.msra.mxu0 %v12336_v54  ;;  %9869 = vmatpush1.bf16.msra.mxu1 %v12339_v32  ;;  %v16469_v54 = vld [vmem:[#allocation48_spill] sm:$0xff]  ;;  %13148 = vpow2.f32 %v11223_v58 }
 0x766   : > { %9829 = vmatprep.subr.bf16.mxu0 %v12344_v9  ;;  %9870 = vmatprep.subr.bf16.mxu1 %v12347_v38  ;;  %v11225_v32 = vmul.f32 -1.442695, %v16469_v54  ;;  %v12437_v58 = vld [vmem:[#allocation14 + $0x3fc] ss:$24 sps:$4 sm:$0xff]   ;;  %v12432_v54 = vld [vmem:[#allocation14 + $0xf8] ss:$24 sps:$4 sm:$0xff]  }
 0x768   : > { %13150 = vpow2.f32 %v11225_v32  ;;  %v12435_v32 = vld [vmem:[#allocation14 + $0x3f8] ss:$24 sps:$4 sm:$0xff]  }
 0x769   : > { %9830 = vmatpush1.bf16.msra.mxu0 %v12342_v52  ;;  %9871 = vmatpush1.bf16.msra.mxu1 %v12345_v46 }
 0x76a   : > { %9831 = vmatprep.subr.bf16.mxu0 %v12350_v20  ;;  %9872 = vmatprep.subr.bf16.mxu1 %v12353_v61 }
 0x76d   : > { %9832 = vmatpush1.bf16.msra.mxu0 %v12348_v29  ;;  %9873 = vmatpush1.bf16.msra.mxu1 %v12351_v42 }
 0x76e   : > { %9833 = vmatprep.subr.bf16.mxu0 %v12356_v8  ;;  %9874 = vmatprep.subr.bf16.mxu1 %v12359_v45  ;;  %v13145_v9 = vpop.eup %13144 }
 0x76f   : > { %v3517_v20 = vadd.f32 1.0, %v13145_v9  ;;  %v12440_v9 = vld [vmem:[#allocation14 + $0xcc] ss:$24 sps:$4 sm:$0xff]  }
 0x771   : > { %9834 = vmatpush1.bf16.msra.mxu0 %v12354_v7  ;;  %9875 = vmatpush1.bf16.msra.mxu1 %v12357_v21  ;;  %v13147_v38 = vpop.eup %13146  ;;  %13152 = vrcp.f32 %v3517_v20  ;;  %v12446_v20 = vld [vmem:[#allocation14 + $0x9c] ss:$24 sps:$4 sm:$0xff]  }
 0x772   : > { %9835 = vmatprep.subr.bf16.mxu0 %v12362_v40  ;;  %9876 = vmatprep.subr.bf16.mxu1 %v12365_v0  ;;  %v13149_v52 = vpop.eup %13148  ;;  %v3519_v61 = vadd.f32 1.0, %v13147_v38  ;;  %v12443_v38 = vld [vmem:[#allocation14 + $0x3cc] ss:$24 sps:$4 sm:$0xff]  }
 0x773   : > { %v3518_v29 = vadd.f32 1.0, %v13149_v52  ;;  %v12438_v52 = vld [vmem:[#allocation14 + $0xc8] ss:$24 sps:$4 sm:$0xff]  }
 0x774   : > { %13154 = vrcp.f32 %v3519_v61  ;;  %v12449_v61 = vld [vmem:[#allocation14 + $0x39c] ss:$24 sps:$4 sm:$0xff]  }
 0x775   : > { %9836 = vmatpush1.bf16.msra.mxu0 %v12360_v55  ;;  %9877 = vmatpush1.bf16.msra.mxu1 %v12363_v26  ;;  %v13151_v46 = vpop.eup %13150  ;;  %13156 = vrcp.f32 %v3518_v29  ;;  %v12444_v29 = vld [vmem:[#allocation14 + $0x98] ss:$24 sps:$4 sm:$0xff]  }
 0x776   : > { %9837 = vmatprep.subr.bf16.mxu0 %v12368_v31  ;;  %9878 = vmatprep.subr.bf16.mxu1 %v12371_v30  ;;  %v3520_v42 = vadd.f32 1.0, %v13151_v46  ;;  %v12441_v46 = vld [vmem:[#allocation14 + $0x3c8] ss:$24 sps:$4 sm:$0xff]  }
 0x778   : > { %13158 = vrcp.f32 %v3520_v42  ;;  %v12447_v42 = vld [vmem:[#allocation14 + $0x398] ss:$24 sps:$4 sm:$0xff]  }
 0x779   : > { %9838 = vmatpush1.bf16.msra.mxu0 %v12366_v22  ;;  %9879 = vmatpush1.bf16.msra.mxu1 %v12369_v6 }
 0x77a   : > { %9839 = vmatprep.subr.bf16.mxu0 %v12374_v15  ;;  %9880 = vmatprep.subr.bf16.mxu1 %v12377_v33 }
 0x77d   : > { %9840 = vmatpush2.bf16.msra.mxu0 %v12372_v60  ;;  %9881 = vmatpush2.bf16.msra.mxu1 %v12375_v3 }
 0x77e   : > { %9841 = vmatprep.subr.bf16.mxu0 %v12380_v50  ;;  %9882 = vmatprep.subr.bf16.mxu1 %v12383_v14  ;;  %v13153_v8 = vpop.eup %13152 }
 0x781   : > { %9842 = vmatpush2.bf16.msra.mxu0 %v12378_v53  ;;  %9883 = vmatpush2.bf16.msra.mxu1 %v12381_v13  ;;  %v13155_v45 = vpop.eup %13154 }
 0x782   : > { %9843 = vmatprep.subr.bf16.mxu0 %v12386_v37  ;;  %9884 = vmatprep.subr.bf16.mxu1 %v12389_v51  ;;  %v13157_v40 = vpop.eup %13156 }
 0x785   : > { %9844 = vmatpush2.bf16.msra.mxu0 %v12384_v11  ;;  %9885 = vmatpush2.bf16.msra.mxu1 %v12387_v16  ;;  %v13159_v26 = vpop.eup %13158 }
 0x786   : > { %9845 = vmatprep.subr.bf16.mxu0 %v12392_v59  ;;  %9886 = vmatprep.subr.bf16.mxu1 %v12395_v24 }
 0x789   : > { %9846 = vmatpush2.bf16.msra.mxu0 %v12390_v18  ;;  %9887 = vmatpush2.bf16.msra.mxu1 %v12393_v2 }
 0x78a   : > { %9847 = vmatprep.subr.bf16.mxu0 %v12398_v17  ;;  %9888 = vmatprep.subr.bf16.mxu1 %v12401_v48 }
 0x78d   : > { %9848 = vmatpush2.bf16.msra.mxu0 %v12396_v25  ;;  %9889 = vmatpush2.bf16.msra.mxu1 %v12399_v62 }
 0x78e   : > { %9849 = vmatprep.subr.bf16.mxu0 %v12404_v28  ;;  %9890 = vmatprep.subr.bf16.mxu1 %v12407_v41 }
 0x791   : > { %9850 = vmatpush2.bf16.msra.mxu0 %v12402_v4  ;;  %9891 = vmatpush2.bf16.msra.mxu1 %v12405_v23 }
 0x792   : > { %9851 = vmatprep.subr.bf16.mxu0 %v12410_v43  ;;  %9892 = vmatprep.subr.bf16.mxu1 %v12413_v44 }
 0x795   : > { %9852 = vmatpush2.bf16.msra.mxu0 %v12408_v34  ;;  %9893 = vmatpush2.bf16.msra.mxu1 %v12411_v1 }
 0x796   : > { %9853 = vmatprep.subr.bf16.mxu0 %v12416_v39  ;;  %9894 = vmatprep.subr.bf16.mxu1 %v12419_v36 }
 0x799   : > { %9854 = vmatpush2.bf16.msra.mxu0 %v12414_v5  ;;  %9895 = vmatpush2.bf16.msra.mxu1 %v12417_v27  ;;  %v12420_v5 = vld [vmem:[#allocation14 + $0x158] ss:$24 sps:$4 sm:$0xff]  }
 0x79a   : > { %9905 = vmatprep.subr.bf16.mxu0 %v12422_v12  ;;  %9946 = vmatprep.subr.bf16.mxu1 %v12425_v19  ;;  %v12423_v27 = vld [vmem:[#allocation14 + $0x458] ss:$24 sps:$4 sm:$0xff]  }
 0x81c   : > { %v8591_v7 = vpop.f32.mrf.mxu0  ;;  %v8632_v21 = vpop.f32.mrf.mxu1 }
 0x81d   : > { %v8639_v0 = vmul.f32 %v13153_v8, %v8591_v7  ;;  %v8641_v55 = vmul.f32 %v13155_v45, %v8632_v21  ;;  %v12452_v8 = vld [vmem:[#allocation14 + $0x6c] ss:$24 sps:$4 sm:$0xff]   ;;  %v12450_v7 = vld [vmem:[#allocation14 + $0x68] ss:$24 sps:$4 sm:$0xff]  }
 0x81e   : > { %v8593_v31 = vpop.f32.mrf.mxu0  ;;  %v8634_v30 = vpop.f32.mrf.mxu1  ;;  %v12455_v45 = vld [vmem:[#allocation14 + $0x36c] ss:$24 sps:$4 sm:$0xff]   ;;  %v12453_v21 = vld [vmem:[#allocation14 + $0x368] ss:$24 sps:$4 sm:$0xff]  }
 0x81f   : > { %v8643_v22 = vrot.slane %v8639_v0, 4  ;;  %v8655_v6 = vrot.slane %v8641_v55, 4  ;;  %v8640_v15 = vmul.f32 %v13157_v40, %v8593_v31  ;;  %v8642_v33 = vmul.f32 %v13159_v26, %v8634_v30  ;;  %v12458_v40 = vld [vmem:[#allocation14 + $0x3c] ss:$24 sps:$4 sm:$0xff]   ;;  %v12459_v26 = vld [vmem:[#allocation14 + $0x338] ss:$24 sps:$4 sm:$0xff]  }
 0x820   : > { %v8595_v60 = vpop.f32.mrf.mxu0  ;;  %v8636_v3 = vpop.f32.mrf.mxu1  ;;  %v12464_v31 = vld [vmem:[#allocation14 + $0xc] ss:$24 sps:$4 sm:$0xff]  }
 0x821   : > { %v8644_v50 = vadd.f32 %v8643_v22, %v8639_v0  ;;  %v8656_v14 = vadd.f32 %v8655_v6, %v8641_v55  ;;  %v8649_v53 = vrot.slane %v8640_v15, 4  ;;  %v8661_v13 = vrot.slane %v8642_v33, 4  ;;  %v12461_v0 = vld [vmem:[#allocation14 + $0x33c] ss:$24 sps:$4 sm:$0xff]   ;;  %v12456_v55 = vld [vmem:[#allocation14 + $0x38] ss:$24 sps:$4 sm:$0xff]  }
 0x822   : > { %v8596_v37 = vpop.f32.mrf.mxu0  ;;  %v8637_v51 = vpop.f32.mrf.mxu1  ;;  %v12467_v30 = vld [vmem:[#allocation14 + $0x30c] ss:$24 sps:$4 sm:$0xff]   ;;  %v12462_v22 = vld [vmem:[#allocation14 + $0x8] ss:$24 sps:$4 sm:$0xff]   ;;  %v12468_v60 = vld [vmem:[#allocation14 + $0x2d8] ss:$24 sps:$4 sm:$0xff]  }
 0x823   : > { %v8645_v11 = vrot.slane %v8644_v50, 2  ;;  %v8657_v16 = vrot.slane %v8656_v14, 2  ;;  %v8650_v59 = vadd.f32 %v8649_v53, %v8640_v15  ;;  %v8662_v24 = vadd.f32 %v8661_v13, %v8642_v33  ;;  %v12465_v6 = vld [vmem:[#allocation14 + $0x308] ss:$24 sps:$4 sm:$0xff]   ;;  %v12470_v15 = vld [vmem:[#allocation14 + $0x2dc] ss:$24 sps:$4 sm:$0xff]  }
 0x824   : > { %v12473_v33 = vld [vmem:[#allocation14 + $0x5dc] ss:$24 sps:$4 sm:$0xff]   ;;  %v12471_v3 = vld [vmem:[#allocation14 + $0x5d8] ss:$24 sps:$4 sm:$0xff]   ;;  %v12474_v53 = vld [vmem:[#allocation14 + $0x2a8] ss:$24 sps:$4 sm:$0xff]  }
 0x825   : > { %v8646_v18 = vadd.f32 %v8645_v11, %v8644_v50  ;;  %v8658_v2 = vadd.f32 %v8657_v16, %v8656_v14  ;;  %v8651_v17 = vrot.slane %v8650_v59, 2  ;;  %v8663_v48 = vrot.slane %v8662_v24, 2  ;;  %v12476_v50 = vld [vmem:[#allocation14 + $0x2ac] ss:$24 sps:$4 sm:$0xff]   ;;  %v12477_v13 = vld [vmem:[#allocation14 + $0x5a8] ss:$24 sps:$4 sm:$0xff]  }
 0x826   : > { %v12479_v14 = vld [vmem:[#allocation14 + $0x5ac] ss:$24 sps:$4 sm:$0xff]   ;;  %v12482_v37 = vld [vmem:[#allocation14 + $0x27c] ss:$24 sps:$4 sm:$0xff]   ;;  %v12480_v11 = vld [vmem:[#allocation14 + $0x278] ss:$24 sps:$4 sm:$0xff]  }
 0x827   : > { %v8647_v25 = vrot.slane %v8646_v18, 1  ;;  %v8659_v62 = vrot.slane %v8658_v2, 1  ;;  %v8652_v28 = vadd.f32 %v8651_v17, %v8650_v59  ;;  %v8664_v41 = vadd.f32 %v8663_v48, %v8662_v24  ;;  %v12485_v51 = vld [vmem:[#allocation14 + $0x57c] ss:$24 sps:$4 sm:$0xff]   ;;  %v12483_v16 = vld [vmem:[#allocation14 + $0x578] ss:$24 sps:$4 sm:$0xff]  }
 0x828   : > { %v12488_v59 = vld [vmem:[#allocation14 + $0x24c] ss:$24 sps:$4 sm:$0xff]   ;;  %v12494_v17 = vld [vmem:[#allocation14 + $0x21c] ss:$24 sps:$4 sm:$0xff]  }
 0x829   : > { %v8653_v4 = vrot.slane %v8652_v28, 1  ;;  %v8665_v23 = vrot.slane %v8664_v41, 1  ;;  %v8648_v43 = vadd.f32 %v8647_v25, %v8646_v18  ;;  %v8660_v44 = vadd.f32 %v8659_v62, %v8658_v2  ;;  %v12491_v24 = vld [vmem:[#allocation14 + $0x54c] ss:$24 sps:$4 sm:$0xff]   ;;  %v12486_v18 = vld [vmem:[#allocation14 + $0x248] ss:$24 sps:$4 sm:$0xff]  }
 0x82a   : > { %v12489_v2 = vld [vmem:[#allocation14 + $0x548] ss:$24 sps:$4 sm:$0xff]   ;;  %v12497_v48 = vld [vmem:[#allocation14 + $0x51c] ss:$24 sps:$4 sm:$0xff]   ;;  %v12492_v25 = vld [vmem:[#allocation14 + $0x218] ss:$24 sps:$4 sm:$0xff]  }
 0x82b   : > { %v8654_v34 = vadd.f32 %v8653_v4, %v8652_v28  ;;  %v8666_v1 = vadd.f32 %v8665_v23, %v8664_v41  ;;  %v15853_v12 = vpack.c.bf16 %v8648_v43, %v8648_v43  ;;  %v15855_v19 = vpack.c.bf16 %v8660_v44, %v8660_v44  ;;  %v12495_v62 = vld [vmem:[#allocation14 + $0x518] ss:$24 sps:$4 sm:$0xff]   ;;  %v12500_v28 = vld [vmem:[#allocation14 + $0x1ec] ss:$24 sps:$4 sm:$0xff]   ;;  %v12498_v4 = vld [vmem:[#allocation14 + $0x1e8] ss:$24 sps:$4 sm:$0xff]  }
 0x82c   : > { %v12503_v41 = vld [vmem:[#allocation14 + $0x4ec] ss:$24 sps:$4 sm:$0xff]   ;;  %v12501_v23 = vld [vmem:[#allocation14 + $0x4e8] ss:$24 sps:$4 sm:$0xff]   ;;  %v12506_v43 = vld [vmem:[#allocation14 + $0x1bc] ss:$24 sps:$4 sm:$0xff]  }
 0x82d   : > { %v15849_v39 = vpack.c.bf16 %v8654_v34, %v8654_v34  ;;  %v15851_v36 = vpack.c.bf16 %v8666_v1, %v8666_v1  ;;  %v12509_v44 = vld [vmem:[#allocation14 + $0x4bc] ss:$24 sps:$4 sm:$0xff]   ;;  %v12504_v34 = vld [vmem:[#allocation14 + $0x1b8] ss:$24 sps:$4 sm:$0xff]  }
 0x82e   : > { %v12507_v1 = vld [vmem:[#allocation14 + $0x4b8] ss:$24 sps:$4 sm:$0xff]  }
 0x82f   : > { %9855 = vmatprep.mubr.bf16.mxu0 %v15849_v39  ;;  %9896 = vmatprep.mubr.bf16.mxu1 %v15851_v36 }
 0x830   : > { %9856 = vmatmul.mubr.bf16.vlgmr.msra.gmra.mxu0 %v15853_v12  ;;  %9897 = vmatmul.mubr.bf16.vlgmr.msra.gmra.mxu1 %v15855_v19 }
 0x831   : > { %9906 = vmatpush1.bf16.msra.mxu0 %v12420_v5  ;;  %9947 = vmatpush1.bf16.msra.mxu1 %v12423_v27  ;;  %v12512_v5 = vld [vmem:[#allocation14 + $0x18c] ss:$24 sps:$4 sm:$0xff]  }
 0x832   : > { %9937 = vmatprep.mubr.bf16.mxu0 %v15849_v39  ;;  %9978 = vmatprep.mubr.bf16.mxu1 %v15851_v36  ;;  %v12515_v27 = vld [vmem:[#allocation14 + $0x48c] ss:$24 sps:$4 sm:$0xff]  }
 0x833   : > { %9907 = vmatprep.subr.bf16.mxu0 %v12428_v57  ;;  %9948 = vmatprep.subr.bf16.mxu1 %v12431_v63  ;;  %v12510_v57 = vld [vmem:[#allocation14 + $0x188] ss:$24 sps:$4 sm:$0xff]  }
 0x834   : > { %v12513_v63 = vld [vmem:[#allocation14 + $0x488] ss:$24 sps:$4 sm:$0xff]  }
 0x835   : > { %9908 = vmatpush1.bf16.msra.mxu0 %v12426_v56  ;;  %9949 = vmatpush1.bf16.msra.mxu1 %v12429_v49  ;;  %v12518_v56 = vld [vmem:[#allocation14 + $0x164] ss:$24 sps:$4 sm:$0xff]  }
 0x836   : > { %9909 = vmatprep.subr.bf16.mxu0 %v12434_v10  ;;  %9950 = vmatprep.subr.bf16.mxu1 %v12437_v58  ;;  %v12521_v49 = vld [vmem:[#allocation14 + $0x464] ss:$24 sps:$4 sm:$0xff]   ;;  %v12516_v10 = vld [vmem:[#allocation14 + $0x160] ss:$24 sps:$4 sm:$0xff]  }
 0x837   : > { %v12519_v58 = vld [vmem:[#allocation14 + $0x460] ss:$24 sps:$4 sm:$0xff]  }
 0x839   : > { %9910 = vmatpush1.bf16.msra.mxu0 %v12432_v54  ;;  %9951 = vmatpush1.bf16.msra.mxu1 %v12435_v32  ;;  %v12524_v54 = vld [vmem:[#allocation14 + $0x134] ss:$24 sps:$4 sm:$0xff]  }
 0x83a   : > { %9911 = vmatprep.subr.bf16.mxu0 %v12440_v9  ;;  %9952 = vmatprep.subr.bf16.mxu1 %v12443_v38  ;;  %v12527_v32 = vld [vmem:[#allocation14 + $0x434] ss:$24 sps:$4 sm:$0xff]   ;;  %v12522_v9 = vld [vmem:[#allocation14 + $0x130] ss:$24 sps:$4 sm:$0xff]  }
 0x83b   : > { %v12525_v38 = vld [vmem:[#allocation14 + $0x430] ss:$24 sps:$4 sm:$0xff]  }
 0x83d   : > { %9912 = vmatpush1.bf16.msra.mxu0 %v12438_v52  ;;  %9953 = vmatpush1.bf16.msra.mxu1 %v12441_v46  ;;  %v12530_v52 = vld [vmem:[#allocation14 + $0x104] ss:$24 sps:$4 sm:$0xff]  }
 0x83e   : > { %9913 = vmatprep.subr.bf16.mxu0 %v12446_v20  ;;  %9954 = vmatprep.subr.bf16.mxu1 %v12449_v61  ;;  %v12533_v46 = vld [vmem:[#allocation14 + $0x404] ss:$24 sps:$4 sm:$0xff]   ;;  %v12528_v20 = vld [vmem:[#allocation14 + $0x100] ss:$24 sps:$4 sm:$0xff]  }
 0x83f   : > { %v12531_v61 = vld [vmem:[#allocation14 + $0x400] ss:$24 sps:$4 sm:$0xff]  }
 0x841   : > { %9914 = vmatpush1.bf16.msra.mxu0 %v12444_v29  ;;  %9955 = vmatpush1.bf16.msra.mxu1 %v12447_v42  ;;  %v12536_v29 = vld [vmem:[#allocation14 + $0xd4] ss:$24 sps:$4 sm:$0xff]  }
 0x842   : > { %9915 = vmatprep.subr.bf16.mxu0 %v12452_v8  ;;  %9956 = vmatprep.subr.bf16.mxu1 %v12455_v45  ;;  %v12539_v42 = vld [vmem:[#allocation14 + $0x3d4] ss:$24 sps:$4 sm:$0xff]   ;;  %v12534_v8 = vld [vmem:[#allocation14 + $0xd0] ss:$24 sps:$4 sm:$0xff]   ;;  %v12542_v45 = vld [vmem:[#allocation14 + $0xa4] ss:$24 sps:$4 sm:$0xff]  }
 0x845   : > { %9916 = vmatpush1.bf16.msra.mxu0 %v12450_v7  ;;  %9957 = vmatpush1.bf16.msra.mxu1 %v12453_v21  ;;  %v12540_v7 = vld [vmem:[#allocation14 + $0xa0] ss:$24 sps:$4 sm:$0xff]  }
 0x846   : > { %9917 = vmatprep.subr.bf16.mxu0 %v12458_v40  ;;  %9958 = vmatprep.subr.bf16.mxu1 %v12461_v0  ;;  %v12543_v21 = vld [vmem:[#allocation14 + $0x3a0] ss:$24 sps:$4 sm:$0xff]   ;;  %v12548_v40 = vld [vmem:[#allocation14 + $0x74] ss:$24 sps:$4 sm:$0xff]  }
 0x847   : > { %v12551_v0 = vld [vmem:[#allocation14 + $0x374] ss:$24 sps:$4 sm:$0xff]  }
 0x849   : > { %9918 = vmatpush1.bf16.msra.mxu0 %v12456_v55  ;;  %9959 = vmatpush1.bf16.msra.mxu1 %v12459_v26  ;;  %v12546_v55 = vld [vmem:[#allocation14 + $0x70] ss:$24 sps:$4 sm:$0xff]  }
 0x84a   : > { %9919 = vmatprep.subr.bf16.mxu0 %v12464_v31  ;;  %9960 = vmatprep.subr.bf16.mxu1 %v12467_v30  ;;  %v12549_v26 = vld [vmem:[#allocation14 + $0x370] ss:$24 sps:$4 sm:$0xff]   ;;  %v12554_v31 = vld [vmem:[#allocation14 + $0x44] ss:$24 sps:$4 sm:$0xff]  }
 0x84b   : > { %v12557_v30 = vld [vmem:[#allocation14 + $0x344] ss:$24 sps:$4 sm:$0xff]  }
 0x84d   : > { %9920 = vmatpush1.bf16.msra.mxu0 %v12462_v22  ;;  %9961 = vmatpush1.bf16.msra.mxu1 %v12465_v6  ;;  %v12552_v22 = vld [vmem:[#allocation14 + $0x40] ss:$24 sps:$4 sm:$0xff]  }
 0x84e   : > { %9921 = vmatprep.subr.bf16.mxu0 %v12470_v15  ;;  %9962 = vmatprep.subr.bf16.mxu1 %v12473_v33  ;;  %v12555_v6 = vld [vmem:[#allocation14 + $0x340] ss:$24 sps:$4 sm:$0xff]   ;;  %v12560_v15 = vld [vmem:[#allocation14 + $0x14] ss:$24 sps:$4 sm:$0xff]  }
 0x84f   : > { %v12563_v33 = vld [vmem:[#allocation14 + $0x314] ss:$24 sps:$4 sm:$0xff]  }
 0x851   : > { %9922 = vmatpush2.bf16.msra.mxu0 %v12468_v60  ;;  %9963 = vmatpush2.bf16.msra.mxu1 %v12471_v3  ;;  %v12558_v60 = vld [vmem:[#allocation14 + $0x10] ss:$24 sps:$4 sm:$0xff]  }
 0x852   : > { %9923 = vmatprep.subr.bf16.mxu0 %v12476_v50  ;;  %9964 = vmatprep.subr.bf16.mxu1 %v12479_v14  ;;  %v12561_v3 = vld [vmem:[#allocation14 + $0x310] ss:$24 sps:$4 sm:$0xff]   ;;  %v12566_v50 = vld [vmem:[#allocation14 + $0x2e4] ss:$24 sps:$4 sm:$0xff]  }
 0x853   : > { %v12569_v14 = vld [vmem:[#allocation14 + $0x5e4] ss:$24 sps:$4 sm:$0xff]  }
 0x855   : > { %9924 = vmatpush2.bf16.msra.mxu0 %v12474_v53  ;;  %9965 = vmatpush2.bf16.msra.mxu1 %v12477_v13  ;;  %v12564_v53 = vld [vmem:[#allocation14 + $0x2e0] ss:$24 sps:$4 sm:$0xff]  }
 0x856   : > { %9925 = vmatprep.subr.bf16.mxu0 %v12482_v37  ;;  %9966 = vmatprep.subr.bf16.mxu1 %v12485_v51  ;;  %v12567_v13 = vld [vmem:[#allocation14 + $0x5e0] ss:$24 sps:$4 sm:$0xff]   ;;  %v12572_v37 = vld [vmem:[#allocation14 + $0x2b4] ss:$24 sps:$4 sm:$0xff]  }
 0x857   : > { %v12575_v51 = vld [vmem:[#allocation14 + $0x5b4] ss:$24 sps:$4 sm:$0xff]  }
 0x859   : > { %9926 = vmatpush2.bf16.msra.mxu0 %v12480_v11  ;;  %9967 = vmatpush2.bf16.msra.mxu1 %v12483_v16  ;;  %v12570_v11 = vld [vmem:[#allocation14 + $0x2b0] ss:$24 sps:$4 sm:$0xff]  }
 0x85a   : > { %9927 = vmatprep.subr.bf16.mxu0 %v12488_v59  ;;  %9968 = vmatprep.subr.bf16.mxu1 %v12491_v24  ;;  %v12573_v16 = vld [vmem:[#allocation14 + $0x5b0] ss:$24 sps:$4 sm:$0xff]   ;;  %v12578_v59 = vld [vmem:[#allocation14 + $0x284] ss:$24 sps:$4 sm:$0xff]  }
 0x85b   : > { %v12581_v24 = vld [vmem:[#allocation14 + $0x584] ss:$24 sps:$4 sm:$0xff]  }
 0x85d   : > { %9928 = vmatpush2.bf16.msra.mxu0 %v12486_v18  ;;  %9969 = vmatpush2.bf16.msra.mxu1 %v12489_v2  ;;  %v12576_v18 = vld [vmem:[#allocation14 + $0x280] ss:$24 sps:$4 sm:$0xff]  }
 0x85e   : > { %9929 = vmatprep.subr.bf16.mxu0 %v12494_v17  ;;  %9970 = vmatprep.subr.bf16.mxu1 %v12497_v48  ;;  %v12579_v2 = vld [vmem:[#allocation14 + $0x580] ss:$24 sps:$4 sm:$0xff]   ;;  %v12584_v17 = vld [vmem:[#allocation14 + $0x254] ss:$24 sps:$4 sm:$0xff]  }
 0x85f   : > { %v12587_v48 = vld [vmem:[#allocation14 + $0x554] ss:$24 sps:$4 sm:$0xff]  }
 0x861   : > { %9930 = vmatpush2.bf16.msra.mxu0 %v12492_v25  ;;  %9971 = vmatpush2.bf16.msra.mxu1 %v12495_v62  ;;  %v12582_v25 = vld [vmem:[#allocation14 + $0x250] ss:$24 sps:$4 sm:$0xff]  }
 0x862   : > { %9931 = vmatprep.subr.bf16.mxu0 %v12500_v28  ;;  %9972 = vmatprep.subr.bf16.mxu1 %v12503_v41  ;;  %v12585_v62 = vld [vmem:[#allocation14 + $0x550] ss:$24 sps:$4 sm:$0xff]   ;;  %v12590_v28 = vld [vmem:[#allocation14 + $0x224] ss:$24 sps:$4 sm:$0xff]  }
 0x863   : > { %v12593_v41 = vld [vmem:[#allocation14 + $0x524] ss:$24 sps:$4 sm:$0xff]  }
 0x865   : > { %9932 = vmatpush2.bf16.msra.mxu0 %v12498_v4  ;;  %9973 = vmatpush2.bf16.msra.mxu1 %v12501_v23  ;;  %v12588_v4 = vld [vmem:[#allocation14 + $0x220] ss:$24 sps:$4 sm:$0xff]  }
 0x866   : > { %9933 = vmatprep.subr.bf16.mxu0 %v12506_v43  ;;  %9974 = vmatprep.subr.bf16.mxu1 %v12509_v44  ;;  %v12591_v23 = vld [vmem:[#allocation14 + $0x520] ss:$24 sps:$4 sm:$0xff]   ;;  %v12596_v43 = vld [vmem:[#allocation14 + $0x1f4] ss:$24 sps:$4 sm:$0xff]  }
 0x867   : > { %v12599_v44 = vld [vmem:[#allocation14 + $0x4f4] ss:$24 sps:$4 sm:$0xff]  }
 0x869   : > { %9934 = vmatpush2.bf16.msra.mxu0 %v12504_v34  ;;  %9975 = vmatpush2.bf16.msra.mxu1 %v12507_v1  ;;  %v12594_v34 = vld [vmem:[#allocation14 + $0x1f0] ss:$24 sps:$4 sm:$0xff]  }
 0x86a   : > { %9935 = vmatprep.subr.bf16.mxu0 %v12512_v5  ;;  %9976 = vmatprep.subr.bf16.mxu1 %v12515_v27  ;;  %v12597_v1 = vld [vmem:[#allocation14 + $0x4f0] ss:$24 sps:$4 sm:$0xff]   ;;  %v12602_v5 = vld [vmem:[#allocation14 + $0x1c4] ss:$24 sps:$4 sm:$0xff]  }
 0x86b   : > { %v12605_v27 = vld [vmem:[#allocation14 + $0x4c4] ss:$24 sps:$4 sm:$0xff]  }
 0x86d   : > { %9936 = vmatpush2.bf16.msra.mxu0 %v12510_v57  ;;  %9977 = vmatpush2.bf16.msra.mxu1 %v12513_v63  ;;  %v12600_v57 = vld [vmem:[#allocation14 + $0x1c0] ss:$24 sps:$4 sm:$0xff]  }
 0x86e   : > { %9987 = vmatprep.subr.bf16.mxu0 %v12518_v56  ;;  %10028 = vmatprep.subr.bf16.mxu1 %v12521_v49  ;;  %v12603_v63 = vld [vmem:[#allocation14 + $0x4c0] ss:$24 sps:$4 sm:$0xff]   ;;  %v12608_v56 = vld [vmem:[#allocation14 + $0x194] ss:$24 sps:$4 sm:$0xff]  }
 0x86f   : > { %v12611_v49 = vld [vmem:[#allocation14 + $0x494] ss:$24 sps:$4 sm:$0xff]  }
 0x870   : > { %9938 = vmatmul.mubr.bf16.vlgmr.msra.gmra.mxu0 %v15853_v12  ;;  %9979 = vmatmul.mubr.bf16.vlgmr.msra.gmra.mxu1 %v15855_v19 }
 0x871   : > { %9988 = vmatpush1.bf16.msra.mxu0 %v12516_v10  ;;  %10019 = vmatprep.mubr.bf16.mxu0 %v15849_v39  ;;  %v12537_v39 = vld [vmem:[#allocation14 + $0x3d0] ss:$24 sps:$4 sm:$0xff]  }
 0x872   : > { %10029 = vmatpush1.bf16.msra.mxu1 %v12519_v58  ;;  %10060 = vmatprep.mubr.bf16.mxu1 %v15851_v36  ;;  %v12545_v36 = vld [vmem:[#allocation14 + $0x3a4] ss:$24 sps:$4 sm:$0xff]   ;;  %v12606_v10 = vld [vmem:[#allocation14 + $0x190] ss:$24 sps:$4 sm:$0xff]  }
 0x873   : > { %9989 = vmatprep.subr.bf16.mxu0 %v12524_v54  ;;  %10030 = vmatprep.subr.bf16.mxu1 %v12527_v32  ;;  %v12609_v58 = vld [vmem:[#allocation14 + $0x490] ss:$24 sps:$4 sm:$0xff]   ;;  %v10153_v54 = vld [vmem:[#allocation16 + $0xf8] sm:$0xff] }
 0x874   : > { %v10185_v32 = vld [vmem:[#allocation16 + $0x1f8] sm:$0xff] }
 0x875   : > { %9990 = vmatpush1.bf16.msra.mxu0 %v12522_v9  ;;  %v10137_v9 = vld [vmem:[#allocation16 + $0x78] sm:$0xff] }
 0x876   : > { %10031 = vmatpush1.bf16.msra.mxu1 %v12525_v38  ;;  %9991 = vmatprep.subr.bf16.mxu0 %v12530_v52  ;;  %v10152_v38 = vld [vmem:[#allocation16 + $0xf0] sm:$0xff]  ;;  %v10169_v52 = vld [vmem:[#allocation16 + $0x178] sm:$0xff] }
 0x877   : > { %10032 = vmatprep.subr.bf16.mxu1 %v12533_v46  ;;  %v10136_v46 = vld [vmem:[#allocation16 + $0x70] sm:$0xff] }
 0x879   : > { %9992 = vmatpush1.bf16.msra.mxu0 %v12528_v20  ;;  %v10184_v20 = vld [vmem:[#allocation16 + $0x1f0] sm:$0xff] }
 0x87a   : > { %10033 = vmatpush1.bf16.msra.mxu1 %v12531_v61  ;;  %9993 = vmatprep.subr.bf16.mxu0 %v12536_v29  ;;  %v10151_v61 = vld [vmem:[#allocation16 + $0xe8] sm:$0xff]  ;;  %v10168_v29 = vld [vmem:[#allocation16 + $0x170] sm:$0xff] }
 0x87b   : > { %10034 = vmatprep.subr.bf16.mxu1 %v12539_v42  ;;  %v10135_v42 = vld [vmem:[#allocation16 + $0x68] sm:$0xff] }
 0x87d   : > { %9994 = vmatpush1.bf16.msra.mxu0 %v12534_v8  ;;  %v10183_v8 = vld [vmem:[#allocation16 + $0x1e8] sm:$0xff] }
 0x87e   : > { %10035 = vmatpush1.bf16.msra.mxu1 %v12537_v39  ;;  %9995 = vmatprep.subr.bf16.mxu0 %v12542_v45  ;;  %v10150_v39 = vld [vmem:[#allocation16 + $0xe0] sm:$0xff]  ;;  %v10167_v45 = vld [vmem:[#allocation16 + $0x168] sm:$0xff] }
 0x87f   : > { %10036 = vmatprep.subr.bf16.mxu1 %v12545_v36  ;;  %v10134_v36 = vld [vmem:[#allocation16 + $0x60] sm:$0xff] }
 0x881   : > { %9996 = vmatpush1.bf16.msra.mxu0 %v12540_v7  ;;  %v10182_v7 = vld [vmem:[#allocation16 + $0x1e0] sm:$0xff] }
 0x882   : > { %10037 = vmatpush1.bf16.msra.mxu1 %v12543_v21  ;;  %9997 = vmatprep.subr.bf16.mxu0 %v12548_v40  ;;  %v10166_v21 = vld [vmem:[#allocation16 + $0x160] sm:$0xff]  ;;  %v10181_v40 = vld [vmem:[#allocation16 + $0x1d8] sm:$0xff] }
 0x883   : > { %10038 = vmatprep.subr.bf16.mxu1 %v12551_v0  ;;  %v10148_v0 = vld [vmem:[#allocation16 + $0xd0] sm:$0xff] }
 0x885   : > { %9998 = vmatpush1.bf16.msra.mxu0 %v12546_v55  ;;  %v10165_v55 = vld [vmem:[#allocation16 + $0x158] sm:$0xff] }
 0x886   : > { %10039 = vmatpush1.bf16.msra.mxu1 %v12549_v26  ;;  %9999 = vmatprep.subr.bf16.mxu0 %v12554_v31  ;;  %v10132_v26 = vld [vmem:[#allocation16 + $0x50] sm:$0xff] }
 0x887   : > { %10040 = vmatprep.subr.bf16.mxu1 %v12557_v30  ;;  %v10180_v31 = vld [vmem:[#allocation16 + $0x1d0] sm:$0xff]  ;;  %v10147_v30 = vld [vmem:[#allocation16 + $0xc8] sm:$0xff] }
 0x889   : > { %10000 = vmatpush1.bf16.msra.mxu0 %v12552_v22  ;;  %v10164_v22 = vld [vmem:[#allocation16 + $0x150] sm:$0xff] }
 0x88a   : > { %10041 = vmatpush1.bf16.msra.mxu1 %v12555_v6  ;;  %10001 = vmatprep.subr.bf16.mxu0 %v12560_v15  ;;  %v10131_v6 = vld [vmem:[#allocation16 + $0x48] sm:$0xff] }
 0x88b   : > { %10042 = vmatprep.subr.bf16.mxu1 %v12563_v33  ;;  %v10179_v15 = vld [vmem:[#allocation16 + $0x1c8] sm:$0xff]  ;;  %v10146_v33 = vld [vmem:[#allocation16 + $0xc0] sm:$0xff] }
 0x88d   : > { %10002 = vmatpush1.bf16.msra.mxu0 %v12558_v60  ;;  %v10163_v60 = vld [vmem:[#allocation16 + $0x148] sm:$0xff] }
 0x88e   : > { %10043 = vmatpush1.bf16.msra.mxu1 %v12561_v3  ;;  %10003 = vmatprep.subr.bf16.mxu0 %v12566_v50  ;;  %v10130_v3 = vld [vmem:[#allocation16 + $0x40] sm:$0xff] }
 0x88f   : > { %10044 = vmatprep.subr.bf16.mxu1 %v12569_v14  ;;  %v10178_v50 = vld [vmem:[#allocation16 + $0x1c0] sm:$0xff]  ;;  %v10145_v14 = vld [vmem:[#allocation16 + $0xb8] sm:$0xff] }
 0x891   : > { %10004 = vmatpush2.bf16.msra.mxu0 %v12564_v53  ;;  %v10162_v53 = vld [vmem:[#allocation16 + $0x140] sm:$0xff] }
 0x892   : > { %10045 = vmatpush2.bf16.msra.mxu1 %v12567_v13  ;;  %10005 = vmatprep.subr.bf16.mxu0 %v12572_v37  ;;  %v10129_v13 = vld [vmem:[#allocation16 + $0x38] sm:$0xff] }
 0x893   : > { %10046 = vmatprep.subr.bf16.mxu1 %v12575_v51  ;;  %v10177_v37 = vld [vmem:[#allocation16 + $0x1b8] sm:$0xff]  ;;  %v10144_v51 = vld [vmem:[#allocation16 + $0xb0] sm:$0xff] }
 0x895   : > { %10006 = vmatpush2.bf16.msra.mxu0 %v12570_v11  ;;  %v10161_v11 = vld [vmem:[#allocation16 + $0x138] sm:$0xff] }
 0x896   : > { %10047 = vmatpush2.bf16.msra.mxu1 %v12573_v16  ;;  %10007 = vmatprep.subr.bf16.mxu0 %v12578_v59  ;;  %v10128_v16 = vld [vmem:[#allocation16 + $0x30] sm:$0xff] }
 0x897   : > { %10048 = vmatprep.subr.bf16.mxu1 %v12581_v24  ;;  %v10176_v59 = vld [vmem:[#allocation16 + $0x1b0] sm:$0xff]  ;;  %v10143_v24 = vld [vmem:[#allocation16 + $0xa8] sm:$0xff] }
 0x899   : > { %10008 = vmatpush2.bf16.msra.mxu0 %v12576_v18  ;;  %v10160_v18 = vld [vmem:[#allocation16 + $0x130] sm:$0xff] }
 0x89a   : > { %10049 = vmatpush2.bf16.msra.mxu1 %v12579_v2  ;;  %10009 = vmatprep.subr.bf16.mxu0 %v12584_v17  ;;  %v10127_v2 = vld [vmem:[#allocation16 + $0x28] sm:$0xff] }
 0x89b   : > { %10050 = vmatprep.subr.bf16.mxu1 %v12587_v48  ;;  %v10175_v17 = vld [vmem:[#allocation16 + $0x1a8] sm:$0xff]  ;;  %v10142_v48 = vld [vmem:[#allocation16 + $0xa0] sm:$0xff] }
 0x89d   : > { %10010 = vmatpush2.bf16.msra.mxu0 %v12582_v25  ;;  %v10159_v25 = vld [vmem:[#allocation16 + $0x128] sm:$0xff] }
 0x89e   : > { %10051 = vmatpush2.bf16.msra.mxu1 %v12585_v62  ;;  %10011 = vmatprep.subr.bf16.mxu0 %v12590_v28  ;;  %v10126_v62 = vld [vmem:[#allocation16 + $0x20] sm:$0xff] }
 0x89f   : > { %10052 = vmatprep.subr.bf16.mxu1 %v12593_v41  ;;  %v10174_v28 = vld [vmem:[#allocation16 + $0x1a0] sm:$0xff]  ;;  %v10141_v41 = vld [vmem:[#allocation16 + $0x98] sm:$0xff] }
 0x8a1   : > { %10012 = vmatpush2.bf16.msra.mxu0 %v12588_v4  ;;  %v10158_v4 = vld [vmem:[#allocation16 + $0x120] sm:$0xff] }
 0x8a2   : > { %10053 = vmatpush2.bf16.msra.mxu1 %v12591_v23  ;;  %10013 = vmatprep.subr.bf16.mxu0 %v12596_v43  ;;  %v10125_v23 = vld [vmem:[#allocation16 + $0x18] sm:$0xff] }
 0x8a3   : > { %10054 = vmatprep.subr.bf16.mxu1 %v12599_v44  ;;  %v10173_v43 = vld [vmem:[#allocation16 + $0x198] sm:$0xff] }
 0x8a4   : > { %v15870_v44 = vld [vmem:[%s14017_s13] sm:$0x3f] }
 0x8a5   : > { %10014 = vmatpush2.bf16.msra.mxu0 %v12594_v34  ;;  %v10140_v34 = vld [vmem:[#allocation16 + $0x90] sm:$0xff] }
 0x8a6   : > { %10055 = vmatpush2.bf16.msra.mxu1 %v12597_v1  ;;  %10015 = vmatprep.subr.bf16.mxu0 %v12602_v5  ;;  %v10157_v1 = vld [vmem:[#allocation16 + $0x118] sm:$0xff]  ;;  %v10124_v5 = vld [vmem:[#allocation16 + $0x10] sm:$0xff] }
 0x8a7   : > { %10056 = vmatprep.subr.bf16.mxu1 %v12605_v27  ;;  %v10172_v27 = vld [vmem:[#allocation16 + $0x190] sm:$0xff] }
 0x8a9   : > { %10016 = vmatpush2.bf16.msra.mxu0 %v12600_v57  ;;  %v10139_v57 = vld [vmem:[#allocation16 + $0x88] sm:$0xff] }
 0x8aa   : > { %10057 = vmatpush2.bf16.msra.mxu1 %v12603_v63  ;;  %10017 = vmatprep.subr.bf16.mxu0 %v12608_v56  ;;  %v10156_v63 = vld [vmem:[#allocation16 + $0x110] sm:$0xff]  ;;  %v10123_v56 = vld [vmem:[#allocation16 + $0x8] sm:$0xff] }
 0x8ab   : > { %10058 = vmatprep.subr.bf16.mxu1 %v12611_v49  ;;  %v10171_v49 = vld [vmem:[#allocation16 + $0x188] sm:$0xff] }
 0x8ad   : > { %10018 = vmatpush2.bf16.msra.mxu0 %v12606_v10  ;;  %v16470_v10 = vld [vmem:[#allocation42_spill] sm:$0xff] }
 0x8ae   : > { %10059 = vmatpush2.bf16.msra.mxu1 %v12609_v58  ;;  %11990 = vmatprep.subr.mxu0 %v10153_v54  ;;  %v10226_v58 = vrot.slane %v15870_v44, %v16470_v10  ;;  %v10138_v54 = vld [vmem:[#allocation16 + $0x80] sm:$0xff] }
 0x8af   : > { %12025 = vmatprep.subr.mxu1 %v10185_v32  ;;  %v10122_v32 = vld [vmem:[#allocation16] sm:$0xff] }
 0x8b0   : > { %10020 = vmatmul.mubr.bf16.vlgmr.msra.gmra.mxu0 %v15853_v12  ;;  %v10149_v12 = vld [vmem:[#allocation16 + $0xd8] sm:$0xff] }
 0x8b1   : > { %10061 = vmatmul.mubr.bf16.vlgmr.msra.gmra.mxu1 %v15855_v19  ;;  %11991 = vmatpush3.msra.mxu0 %v10137_v9  ;;  %v10133_v19 = vld [vmem:[#allocation16 + $0x58] sm:$0xff]  ;;  %v10155_v9 = vld [vmem:[#allocation16 + $0x108] sm:$0xff] }
 0x8b2   : > { %11992 = vmatprep.subr.mxu0 %v10152_v38  ;;  %12026 = vmatpush3.msra.mxu1 %v10169_v52  ;;  %v16471_v38 = vld [vmem:[#allocation41_spill] sm:$0xff] }
 0x8b3   : > { %11993 = vmatpush3.msra.mxu0 %v10136_v46  ;;  %12027 = vmatprep.subr.mxu1 %v10184_v20  ;;  %v10222_v52 = vrot.slane %v15870_v44, %v16471_v38  ;;  %v10170_v46 = vld [vmem:[#allocation16 + $0x180] sm:$0xff]  ;;  %v10217_v20 = vld [vmem:[#allocation16 + $0x2f8] sm:$0xff] }
 0x8b4   : > { %11994 = vmatprep.subr.mxu0 %v10151_v61  ;;  %12028 = vmatpush3.msra.mxu1 %v10168_v29  ;;  %v10154_v61 = vld [vmem:[#allocation16 + $0x100] sm:$0xff]  ;;  %v10234_v29 = vrot.slane %v15870_v44, %v16257_v47  ;;  %v10199_v47 = vld [vmem:[#allocation16 + $0x268] sm:$0xff] }
 0x8b5   : > { %11995 = vmatpush3.msra.mxu0 %v10135_v42  ;;  %12029 = vmatprep.subr.mxu1 %v10183_v8  ;;  %v10201_v42 = vld [vmem:[#allocation16 + $0x278] sm:$0xff]  ;;  %v10230_v8 = vrot.slane %v15870_v44, %v16254_v35  ;;  %v10198_v35 = vld [vmem:[#allocation16 + $0x260] sm:$0xff] }
 0x8b6   : > { %11996 = vmatprep.subr.mxu0 %v10150_v39  ;;  %12030 = vmatpush3.msra.mxu1 %v10167_v45  ;;  %v10216_v39 = vld [vmem:[#allocation16 + $0x2f0] sm:$0xff]  ;;  %v16472_v45 = vld [vmem:[#allocation50_spill] sm:$0xff] }
 0x8b7   : > { %11997 = vmatpush3.msra.mxu0 %v10134_v36  ;;  %12031 = vmatprep.subr.mxu1 %v10182_v7  ;;  %v10242_v36 = vrot.slane %v15870_v44, %v16472_v45  ;;  %v10200_v7 = vld [vmem:[#allocation16 + $0x270] sm:$0xff] }
 0x8b8   : > { %11998 = vmatprep.subr.mxu0 %v10149_v12  ;;  %12032 = vmatpush3.msra.mxu1 %v10166_v21  ;;  %v10215_v12 = vld [vmem:[#allocation16 + $0x2e8] sm:$0xff]  ;;  %v10214_v21 = vld [vmem:[#allocation16 + $0x2e0] sm:$0xff] }
 0x8b9   : > { %11999 = vmatpush3.msra.mxu0 %v10133_v19  ;;  %12033 = vmatprep.subr.mxu1 %v10181_v40  ;;  %v10213_v19 = vld [vmem:[#allocation16 + $0x2d8] sm:$0xff] }
 0x8ba   : > { %12000 = vmatprep.subr.mxu0 %v10148_v0  ;;  %12034 = vmatpush3.msra.mxu1 %v10165_v55  ;;  %v10197_v40 = vld [vmem:[#allocation16 + $0x258] sm:$0xff]  ;;  %v10212_v0 = vld [vmem:[#allocation16 + $0x2d0] sm:$0xff] }
 0x8bb   : > { %12001 = vmatpush3.msra.mxu0 %v10132_v26  ;;  %12035 = vmatprep.subr.mxu1 %v10180_v31  ;;  %v10196_v55 = vld [vmem:[#allocation16 + $0x250] sm:$0xff]  ;;  %v10211_v26 = vld [vmem:[#allocation16 + $0x2c8] sm:$0xff] }
 0x8bc   : > { %12002 = vmatprep.subr.mxu0 %v10147_v30  ;;  %12036 = vmatpush3.msra.mxu1 %v10164_v22  ;;  %v10195_v31 = vld [vmem:[#allocation16 + $0x248] sm:$0xff]  ;;  %v10210_v30 = vld [vmem:[#allocation16 + $0x2c0] sm:$0xff] }
 0x8bd   : > { %12003 = vmatpush3.msra.mxu0 %v10131_v6  ;;  %12037 = vmatprep.subr.mxu1 %v10179_v15  ;;  %v10194_v22 = vld [vmem:[#allocation16 + $0x240] sm:$0xff]  ;;  %v10209_v6 = vld [vmem:[#allocation16 + $0x2b8] sm:$0xff] }
 0x8be   : > { %12004 = vmatprep.subr.mxu0 %v10146_v33  ;;  %12038 = vmatpush3.msra.mxu1 %v10163_v60  ;;  %v10193_v15 = vld [vmem:[#allocation16 + $0x238] sm:$0xff]  ;;  %v10208_v33 = vld [vmem:[#allocation16 + $0x2b0] sm:$0xff] }
 0x8bf   : > { %12005 = vmatpush3.msra.mxu0 %v10130_v3  ;;  %12039 = vmatprep.subr.mxu1 %v10178_v50  ;;  %v10192_v60 = vld [vmem:[#allocation16 + $0x230] sm:$0xff]  ;;  %v10207_v3 = vld [vmem:[#allocation16 + $0x2a8] sm:$0xff] }
 0x8c0   : > { %12006 = vmatprep.subr.mxu0 %v10145_v14  ;;  %12040 = vmatpush3.msra.mxu1 %v10162_v53  ;;  %v10191_v50 = vld [vmem:[#allocation16 + $0x228] sm:$0xff]  ;;  %v10206_v14 = vld [vmem:[#allocation16 + $0x2a0] sm:$0xff] }
 0x8c1   : > { %12007 = vmatpush3.msra.mxu0 %v10129_v13  ;;  %12041 = vmatprep.subr.mxu1 %v10177_v37  ;;  %v10190_v53 = vld [vmem:[#allocation16 + $0x220] sm:$0xff]  ;;  %v10205_v13 = vld [vmem:[#allocation16 + $0x298] sm:$0xff] }
 0x8c2   : > { %12008 = vmatprep.subr.mxu0 %v10144_v51  ;;  %12042 = vmatpush3.msra.mxu1 %v10161_v11  ;;  %v10189_v37 = vld [vmem:[#allocation16 + $0x218] sm:$0xff]  ;;  %v10204_v51 = vld [vmem:[#allocation16 + $0x290] sm:$0xff] }
 0x8c3   : > { %12009 = vmatpush3.msra.mxu0 %v10128_v16  ;;  %12043 = vmatprep.subr.mxu1 %v10176_v59  ;;  %v10188_v11 = vld [vmem:[#allocation16 + $0x210] sm:$0xff]  ;;  %v10203_v16 = vld [vmem:[#allocation16 + $0x288] sm:$0xff] }
 0x8c4   : > { %12010 = vmatprep.subr.mxu0 %v10143_v24  ;;  %12044 = vmatpush3.msra.mxu1 %v10160_v18  ;;  %v10187_v59 = vld [vmem:[#allocation16 + $0x208] sm:$0xff]  ;;  %v10202_v24 = vld [vmem:[#allocation16 + $0x280] sm:$0xff] }
 0x8c5   : > { %12011 = vmatpush3.msra.mxu0 %v10127_v2  ;;  %12045 = vmatprep.subr.mxu1 %v10175_v17  ;;  %v16473_v18 = vld [vmem:[#allocation49_spill] sm:$0xff] }
 0x8c6   : > { %12012 = vmatprep.subr.mxu0 %v10142_v48  ;;  %12046 = vmatpush3.msra.mxu1 %v10159_v25  ;;  %v10238_v2 = vrot.slane %v15870_v44, %v16473_v18  ;;  %v10186_v17 = vld [vmem:[#allocation16 + $0x200] sm:$0xff] }
 0x8c7   : > { %12013 = vmatpush3.msra.mxu0 %v10126_v62  ;;  %12047 = vmatprep.subr.mxu1 %v10174_v28 }
 0x8c8   : > { %12014 = vmatprep.subr.mxu0 %v10141_v41  ;;  %12048 = vmatpush3.msra.mxu1 %v10158_v4 }
 0x8c9   : > { %12015 = vmatpush3.msra.mxu0 %v10125_v23  ;;  %12049 = vmatprep.subr.mxu1 %v10173_v43 }
 0x8ca   : > { %12016 = vmatprep.subr.mxu0 %v10140_v34  ;;  %12050 = vmatpush3.msra.mxu1 %v10157_v1 }
 0x8cb   : > { %12017 = vmatpush3.msra.mxu0 %v10124_v5  ;;  %12051 = vmatprep.subr.mxu1 %v10172_v27  ;;  %v13691_v27 = vmov 1966171168  }
 0x8cc   : > { %12018 = vmatprep.subr.mxu0 %v10139_v57  ;;  %12052 = vmatpush3.msra.mxu1 %v10156_v63  ;;  %v10079_v57 = vunpack.c.l.s4 %v13691_v27 }
 0x8cd   : > { %12019 = vmatpush3.msra.mxu0 %v10123_v56  ;;  %12053 = vmatprep.subr.mxu1 %v10171_v49 }
 0x8ce   : > { %12020 = vmatprep.subr.mxu0 %v10138_v54  ;;  %10313 = vmatprep.mubr.f32.mxu0 %v10226_v58  ;;  %v10080_v44 = vunpack.c.0.s8 %v10079_v57  ;;  %v16474_v54 = vld [vmem:[#allocation40_spill] sm:$0xff] }
 0x8cf   : > { %12021 = vmatpush3.msra.mxu0 %v10122_v32  ;;  %12054 = vmatpush3.msra.mxu1 %v10155_v9 }
 0x8d0   : > { %10314 = vmatmul.mubr.f32.vlgmr.msra.gmra.mxu0 %v10222_v52  ;;  %12055 = vmatprep.subr.mxu1 %v10170_v46  ;;  %v10083_v32 = vsub.s32 %v10080_v44, %v16474_v54 }
 0x8d1   : > { %12060 = vmatprep.subr.mxu0 %v10217_v20  ;;  %12056 = vmatpush3.msra.mxu1 %v10154_v61 }
 0x8d2   : > { %10383 = vmatprep.mubr.f32.mxu1 %v10234_v29  ;;  %12061 = vmatpush3.msra.mxu0 %v10201_v42 }
 0x8d3   : > { %10384 = vmatmul.mubr.f32.vlgmr.msra.gmra.mxu1 %v10230_v8  ;;  %12062 = vmatprep.subr.mxu0 %v10216_v39 }
 0x8d4   : > { %12063 = vmatpush3.msra.mxu0 %v10200_v7  ;;  %10453 = vmatprep.mubr.f32.mxu0 %v10242_v36 }
 0x8d5   : > { %12064 = vmatprep.subr.mxu0 %v10215_v12 }
 0x8d6   : > { %12065 = vmatpush3.msra.mxu0 %v10199_v47 }
 0x8d7   : > { %12066 = vmatprep.subr.mxu0 %v10214_v21 }
 0x8d8   : > { %12067 = vmatpush3.msra.mxu0 %v10198_v35 }
 0x8d9   : > { %12068 = vmatprep.subr.mxu0 %v10213_v19 }
 0x8da   : > { %12069 = vmatpush3.msra.mxu0 %v10197_v40 }
 0x8db   : > { %12070 = vmatprep.subr.mxu0 %v10212_v0 }
 0x8dc   : > { %12071 = vmatpush3.msra.mxu0 %v10196_v55 }
 0x8dd   : > { %12072 = vmatprep.subr.mxu0 %v10211_v26 }
 0x8de   : > { %12073 = vmatpush3.msra.mxu0 %v10195_v31 }
 0x8df   : > { %12074 = vmatprep.subr.mxu0 %v10210_v30  ;;  %v16475_v30 = vlaneseq }
 0x8e0   : > { %12075 = vmatpush3.msra.mxu0 %v10194_v22 }
 0x8e1   : > { %12076 = vmatprep.subr.mxu0 %v10209_v6  ;;  %vm10118_vm0 = vcmp.lt.s32.totalorder %v16475_v30, 768 }
 0x8e2   : > { %12077 = vmatpush3.msra.mxu0 %v10193_v15 }
 0x8e3   : > { %12078 = vmatprep.subr.mxu0 %v10208_v33 }
 0x8e4   : > { %12079 = vmatpush3.msra.mxu0 %v10192_v60 }
 0x8e5   : > { %12080 = vmatprep.subr.mxu0 %v10207_v3  ;;  %v653_v3 = vld [vmem:[#allocation17] sm:$0x1] }
 0x8e6   : > { %12081 = vmatpush3.msra.mxu0 %v10191_v50 }
 0x8e7   : > { %12082 = vmatprep.subr.mxu0 %v10206_v14 }
 0x8e8   : > { %12083 = vmatpush3.msra.mxu0 %v10190_v53 }
 0x8e9   : > { %12084 = vmatprep.subr.mxu0 %v10205_v13 }
 0x8ea   : > { %12085 = vmatpush3.msra.mxu0 %v10189_v37 }
 0x8eb   : > { %12086 = vmatprep.subr.mxu0 %v10204_v51 }
 0x8ec   : > { %12087 = vmatpush3.msra.mxu0 %v10188_v11 }
 0x8ed   : > { %12088 = vmatprep.subr.mxu0 %v10203_v16 }
 0x8ee   : > { %12089 = vmatpush3.msra.mxu0 %v10187_v59 }
 0x8ef   : > { %12090 = vmatprep.subr.mxu0 %v10202_v24 }
 0x8f0   : > { %12091 = vmatpush3.msra.mxu0 %v10186_v17  ;;  %v9857_v48 = vpop.f32.mrf.mxu0  ;;  %v9898_v25 = vpop.f32.mrf.mxu1 }
 0x8f1   : > { %10454 = vmatmul.mubr.f32.vlgmr.msra.gmra.mxu0 %v10238_v2  ;;  %v9899_v62 = vadd.f32 %v9898_v25, %v9857_v48 }
 0x8f2   : > { %v9859_v28 = vpop.f32.mrf.mxu0  ;;  %v9900_v41 = vpop.f32.mrf.mxu1 }
 0x8f3   : > { %v9901_v4 = vadd.f32 %v9900_v41, %v9859_v28  ;;  %v10465_v41 = vld [vmem:[%s557_s27] sm:$0x1] }
 0x8f4   : > { %v9861_v23 = vpop.f32.mrf.mxu0  ;;  %v9902_v43 = vpop.f32.mrf.mxu1 }
 0x8f5   : > { %v10075_v34 = vcombine.low %v9899_v62, %v9901_v4 }
 0x8f6   : > { %v9862_v1 = vpop.f32.mrf.mxu0  ;;  %v9903_v5 = vpop.f32.mrf.mxu1 }
 0x8f7   : > { %v10084_v29 = vrot.slane %v10075_v34, %v10083_v32 }
 0x930   : > { %v9939_v63 = vpop.f32.mrf.mxu0  ;;  %v9980_v56 = vpop.f32.mrf.mxu1 }
 0x931   : > { %v9981_v49 = vadd.f32 %v9980_v56, %v9939_v63  ;;  %v654_v63 = vld [vmem:[#allocation17 + $0x1] sm:$0x1] }
 0x932   : > { %v9941_v10 = vpop.f32.mrf.mxu0  ;;  %v9982_v58 = vpop.f32.mrf.mxu1 }
 0x933   : > { %v9983_v9 = vadd.f32 %v9982_v58, %v9941_v10 }
 0x934   : > { %v9943_v38 = vpop.f32.mrf.mxu0  ;;  %v9984_v52 = vpop.f32.mrf.mxu1 }
 0x935   : > { %v10076_v46 = vcombine.low %v9981_v49, %v9983_v9 }
 0x936   : > { %v9944_v20 = vpop.f32.mrf.mxu0  ;;  %v9985_v61 = vpop.f32.mrf.mxu1 }
 0x937   : > { %v10091_v42 = vrot.slane %v10076_v46, %v10083_v32 }
 0x939   : > { %v10099_v8 = vcombine.low %v10084_v29, %v10091_v42 }
 0x93b   : > { %v10106_v26 = vrot.slane %v10099_v8, %v10083_v32 }
 0x970   : > { %v10021_v39 = vpop.f32.mrf.mxu0 }
 0x971   : > { %v10062_v45 = vpop.f32.mrf.mxu1 }
 0x972   : > { %v10023_v36 = vpop.f32.mrf.mxu0  ;;  %v10063_v12 = vadd.f32 %v10062_v45, %v10021_v39 }
 0x973   : > { %v10064_v7 = vpop.f32.mrf.mxu1 }
 0x974   : > { %v10065_v47 = vadd.f32 %v10064_v7, %v10023_v36  ;;  %v10025_v21 = vpop.f32.mrf.mxu0 }
 0x975   : > { %v10066_v35 = vpop.f32.mrf.mxu1 }
 0x976   : > { %v10077_v19 = vcombine.low %v10063_v12, %v10065_v47  ;;  %v10026_v40 = vpop.f32.mrf.mxu0 }
 0x977   : > { %v10067_v0 = vpop.f32.mrf.mxu1 }
 0x978   : > { %v10098_v55 = vrot.slane %v10077_v19, %v10083_v32 }
 0x97a   : > { %v10113_v31 = vrot.slane %v10098_v55, %v10083_v32 }
 0x97c   : > { %v10114_v22 = vcombine.low %v10106_v26, %v10113_v31 }
 0x97e   : > { %10120 = vst.msk [vmem:[%s15888_s20] sm:$0x3f] %vm10118_vm0, %v10114_v22 }
 0x990   : > { %v12022_v6 = vpop.f32.mrf.mxu0 }
 0x992   : > { %v12023_v15 = vpop.f32.mrf.mxu0 }
 0x993   : > { %v12057_v33 = vpop.f32.mrf.mxu1  ;;  %v12024_v60 = vadd.f32 %v12023_v15, %v12022_v6 }
 0x995   : > { %v12058_v50 = vpop.f32.mrf.mxu1  ;;  %v10316_v14 = vadd.f32 %v12024_v60, %v653_v3 }
 0x996   : > { %v12059_v53 = vadd.f32 %v12058_v50, %v12057_v33 }
 0x998   : > { %v10386_v51 = vadd.f32 %v12059_v53, %v10316_v14 }
 0x9b1   : > { %v12092_v13 = vpop.f32.mrf.mxu0 }
 0x9b3   : > { %v12093_v37 = vpop.f32.mrf.mxu0 }
 0x9b4   : > { %v12094_v11 = vadd.f32 %v12093_v37, %v12092_v13 }
 0x9b6   : > { %v10456_v16 = vadd.f32 %v12094_v11, %v10386_v51 }
 0x9b8   : > { %v11983_v59 = vmul.f32 -1.442695, %v10456_v16  ;;  %v10469_v24 = vand.u32 2147483647, %v10456_v16  ;;  %10489 = vst [vmem:[%s636_s30] sm:$0x1] %v10456_v16  ;;  %v10466_v43 = vmax.f32 %v10456_v16, 0.0  ;;  %v10467_v34 = vmul.f32 %v10465_v41, %v10456_v16 }
 0x9ba   : > { %13160 = vpow2.f32 %v11983_v59  ;;  %v10470_v18 = vsub.f32 0.0, %v10469_v24  ;;  %v10468_v44 = vsub.f32 %v10466_v43, %v10467_v34 }
 0x9bc   : > { %v10471_v2 = vmul.f32 1.442695, %v10470_v18 }
 0x9be   : > { %13162 = vpow2.f32 %v10471_v2 }
 0x9c7   : > { %v13161_v17 = vpop.eup %13160 }
 0x9c8   : > { %v10462_v48 = vadd.f32 1.0, %v13161_v17 }
 0x9ca   : > { %13164 = vrcp.f32 %v10462_v48 }
 0x9cb   : > { %v13163_v25 = vpop.eup %13162 }
 0x9cc   : > { %v10473_v62 = vadd.f32 1.0, %v13163_v25  ;;  %v10476_v28 = vmul.f32 -0.5, %v13163_v25  ;;  %v10479_v1 = vand.u32 2147483647, %v13163_v25 }
 0x9ce   : > { %13166 = vlog2.f32 %v10473_v62  ;;  %v10477_v23 = vadd.f32 1.0, %v10476_v28  ;;  %vm10480_vm1 = vcmp.lt.f32.partialorder %v10479_v1, 0.0004427343 }
 0x9d0   : > { %v10478_v57 = vmul.f32 %v13163_v25, %v10477_v23 }
 0x9d7   : > { %v13165_v4 = vpop.eup %13164 }
 0x9d8   : > { %10490 = vst [vmem:[%s642_s17] sm:$0x1] %v13165_v4 }
 0x9db   : > { %v13167_v5 = vpop.eup %13166 }
 0x9dc   : > { %v10475_v27 = vmul.f32 0.6931472, %v13167_v5 }
 0x9de   : > { %v10481_v56 = vsel %vm10480_vm1, %v10478_v57, %v10475_v27 }
 0x9df   : > { %v10482_v49 = vadd.f32 %v10481_v56, %v10468_v44 }
 0x9e1   : > { %v10483_v10 = vmul.f32 %v10482_v49, %v654_v63 }
 0x9e3   : > { %v10485_v58 = vsel %vm10484_vm2, %v10483_v10, 0.0 }
 0x9e4   : > { %10486 = vadd.xlane.f32.xlu1 %v10485_v58 }
 0x9e5   : > { %13515 = shalt.err (!%p13512_p4)
}
 0x9e6   : > { %s13516_s15 = scalar_lea.hbm %s10531_s21, 16  ;;  %s13520_s13 = scalar_lea.hbm %s16477_s24, 32 }
 0x9e7   : > { %p13517_p12 = scmp.ne.s32.totalorder %s10531_s21, %s13516_s15  ;;  %p13521_p1 = scmp.lt.s32.totalorder %s10531_s21, %s16477_s24 }
 0x9e8   : > { %p13522_p9 = scmp.lt.s32.totalorder %s13520_s13, %s13516_s15 }
 0x9e9   : > { %p13518_p11 = pnand %p13517_p12, %p16478_p3 }
 0x9ea   : > { %p13523_p0 = por %p13522_p9, %p13521_p1 }
 0x9eb   : > { %p13519_p13 = pneg %p13518_p11 }
 0x9ed   : > { %p13524_p2 = pnand %p13523_p0, %p13519_p13 }
 0x9ef   : > { %13527 = shalt.err (!%p13524_p2)
}
 0x9f0   : > { %12137 = dma.vmem_to_hbm [thread:$0]  (%p16478_p3), %s10534_s7, 16, %s10531_s21, %s15910_s11  }
 0x9f1   : > { %s12101_s22 = smul.u32 96, %s13787_s14  ;;  %s10520_s3 = sshll.u32 %s15888_s20, 4  ;;  %s15927_s3 = int_to_ptr.vmem [resolvable:$true] %s10520_s3 }
 0x9f2   : > { %s16479_s10 = sld [smem:[#allocation132_spill]]  ;;  %s10546_s27 = sshll.u32 %s642_s17, 4  ;;  %s10547_s27 = int_to_ptr.vmem [resolvable:$true] %s10546_s27 }
 0x9f3   : > { %s16480_s29 = sld [smem:[#allocation130_spill]]  ;;  %s10494_s30 = scalar_lea.sflag [#allocation4], %s14001_s5 }
 0x9f4   : > { %s13528_s7 = scalar_lea.vmem %s15927_s3, 96  ;;  %s13693_s14 = smov [#allocation19]  }
 0x9f5   : > { %p13529_p6 = scmp.ne.s32.totalorder %s15927_s3, %s13528_s7  ;;  %s13532_s20 = sshll.u32 %s13693_s14, 4  ;;  %s13533_s20 = int_to_ptr.vmem [resolvable:$false] %s13532_s20 }
 0x9f6   : > { %s13534_s21 = scalar_lea.vmem %s13533_s20, 192  ;;  %p13535_p5 = scmp.lt.s32.totalorder %s15927_s3, %s13533_s20 }
 0x9f7   : > { %p13530_p7 = pnand %p13529_p6, %p16478_p3  ;;  %p13536_p10 = scmp.lt.s32.totalorder %s13534_s21, %s13528_s7 }
 0x9f8   : > { %s15933_s23 = scalar_lea.hbm %s16479_s10, %s15900_s19 }
 0x9f9   : > { %s10518_s13 = scalar_lea.hbm %s16480_s29, %s12101_s22  ;;  %p13531_p8 = pneg %p13530_p7 }
 0x9fa   : > { %p13537_p4 = por %p13536_p10, %p13535_p5 }
 0x9fc   : > { %p13538_p12 = pnand %p13537_p4, %p13531_p8 }
 0x9fe   : > { %13541 = shalt.err (!%p13538_p12)
}
 0x9ff   : > { %s13542_s12 = scalar_lea.hbm %s10518_s13, 96  ;;  %s13546_s16 = scalar_lea.hbm %s16480_s29, 192 }
 0xa00   : > { %p13543_p11 = scmp.ne.s32.totalorder %s10518_s13, %s13542_s12  ;;  %p13547_p9 = scmp.lt.s32.totalorder %s10518_s13, %s16480_s29 }
 0xa01   : > { %p13548_p0 = scmp.lt.s32.totalorder %s13546_s16, %s13542_s12 }
 0xa02   : > { %p13544_p13 = pnand %p13543_p11, %p16478_p3 }
 0xa03   : > { %p13549_p2 = por %p13548_p0, %p13547_p9 }
 0xa04   : > { %p13545_p1 = pneg %p13544_p13 }
 0xa06   : > { %p13550_p6 = pnand %p13549_p2, %p13545_p1 }
 0xa08   : > { %13553 = shalt.err (!%p13550_p6)
}
 0xa09   : > { %12136 = dma.vmem_to_hbm [thread:$0]  (%p16478_p3), %s15927_s3, 96, %s10518_s13, %s10494_s30  }
 0xa0a   : > { %s13554_s7 = scalar_lea.vmem %s10547_s27, 16  ;;  %s13694_s14 = smov [#allocation22]  }
 0xa0b   : > { %p13555_p7 = scmp.ne.s32.totalorder %s10547_s27, %s13554_s7  ;;  %s13558_s20 = sshll.u32 %s13694_s14, 4  ;;  %s13559_s20 = int_to_ptr.vmem [resolvable:$false] %s13558_s20 }
 0xa0c   : > { %s13560_s21 = scalar_lea.vmem %s13559_s20, 32  ;;  %p13561_p10 = scmp.lt.s32.totalorder %s10547_s27, %s13559_s20 }
 0xa0d   : > { %p13556_p8 = pnand %p13555_p7, %p16478_p3  ;;  %p13562_p4 = scmp.lt.s32.totalorder %s13560_s21, %s13554_s7 }
 0xa0f   : > { %p13557_p5 = pneg %p13556_p8  ;;  %p13563_p12 = por %p13562_p4, %p13561_p10 }
 0xa11   : > { %p13564_p11 = pnand %p13563_p12, %p13557_p5 }
 0xa13   : > { %13567 = shalt.err (!%p13564_p11)
}
 0xa14   : > { %s13568_s3 = scalar_lea.hbm %s15933_s23, 16  ;;  %s13572_s12 = scalar_lea.hbm %s16479_s10, 32 }
 0xa15   : > { %p13569_p13 = scmp.ne.s32.totalorder %s15933_s23, %s13568_s3  ;;  %p13573_p0 = scmp.lt.s32.totalorder %s15933_s23, %s16479_s10 }
 0xa16   : > { %p13574_p2 = scmp.lt.s32.totalorder %s13572_s12, %s13568_s3 }
 0xa17   : > { %p13570_p1 = pnand %p13569_p13, %p16478_p3 }
 0xa18   : > { %p13575_p6 = por %p13574_p2, %p13573_p0 }
 0xa19   : > { %p13571_p9 = pneg %p13570_p1 }
 0xa1b   : > { %p13576_p7 = pnand %p13575_p6, %p13571_p9 }
 0xa1d   : > { %13579 = shalt.err (!%p13576_p7)
}
 0xa1e   : > { %12138 = dma.vmem_to_hbm [thread:$0]  (%p16478_p3), %s10547_s27, 16, %s15933_s23, %s15910_s11  }
 0xa1f   : > { %s648_s16 = scalar_lea.vmem [#allocation23], %s14001_s5  ;;  %s16481_s14 = sld [smem:[#allocation133_spill]] }
 0xa20   : > { %s10559_s15 = sshll.u32 %s648_s16, 4  ;;  %s10507_s21 = scalar_lea.sflag [#allocation24], %s14001_s5  ;;  %s10560_s15 = int_to_ptr.vmem [resolvable:$true] %s10559_s15 }
 0xa21   : > { %s13580_s3 = scalar_lea.vmem %s10560_s15, 16  ;;  %s13695_s13 = smov [#allocation23]  }
 0xa22   : > { %p13581_p8 = scmp.ne.s32.totalorder %s10560_s15, %s13580_s3  ;;  %s13584_s30 = sshll.u32 %s13695_s13, 4  ;;  %s13585_s30 = int_to_ptr.vmem [resolvable:$false] %s13584_s30 }
 0xa23   : > { %s13586_s11 = scalar_lea.vmem %s13585_s30, 32  ;;  %p13587_p4 = scmp.lt.s32.totalorder %s10560_s15, %s13585_s30 }
 0xa24   : > { %p13582_p5 = pnand %p13581_p8, %p16478_p3  ;;  %p13588_p12 = scmp.lt.s32.totalorder %s13586_s11, %s13580_s3 }
 0xa25   : > { %s10557_s20 = scalar_lea.hbm %s16481_s14, %s15900_s19 }
 0xa26   : > { %p13583_p10 = pneg %p13582_p5  ;;  %p13589_p11 = por %p13588_p12, %p13587_p4 }
 0xa28   : > { %p13590_p13 = pnand %p13589_p11, %p13583_p10 }
 0xa6d   : > { %v10487_v54 = vpop.xlane.xlu1 %10486 }
 0xa6e   : > { %v10491_v32 = vmul.f32 0.0625, %v10487_v54 }
 0xa70   : > { %10492 = vst [vmem:[%s648_s16] sm:$0x1] %v10491_v32 }
 0xa71   : > { %13593 = shalt.err (!%p13590_p13)
}
 0xa72   : > { %s13594_s23 = scalar_lea.hbm %s10557_s20, 16  ;;  %s13598_s27 = scalar_lea.hbm %s16481_s14, 32 }
 0xa73   : > { %p13595_p1 = scmp.ne.s32.totalorder %s10557_s20, %s13594_s23  ;;  %p13599_p2 = scmp.lt.s32.totalorder %s10557_s20, %s16481_s14 }
 0xa74   : > { %p13600_p6 = scmp.lt.s32.totalorder %s13598_s27, %s13594_s23 }
 0xa75   : > { %p13596_p9 = pnand %p13595_p1, %p16478_p3 }
 0xa76   : > { %p13601_p7 = por %p13600_p6, %p13599_p2 }
 0xa77   : > { %p13597_p0 = pneg %p13596_p9 }
 0xa79   : > { %p13602_p8 = pnand %p13601_p7, %p13597_p0 }
 0xa7b   : > { %13605 = shalt.err (!%p13602_p8)
}
 0xa7c   : > { %12139 = dma.vmem_to_hbm [thread:$0]  (%p16478_p3), %s10560_s15, 16, %s10557_s20, %s10507_s21  }
 0xa7d PF: > { %s16482_s22 = sld [smem:[#allocation34_spill]]  ;;  %p16485_p10 = scmp.ge.s32.totalorder %s13672_s28, 2 }
 0xa7e   : > { %s16483_s16 = sld [smem:[#allocation39_spill]] }
 0xa83   : > { %s10571_s25 = sand.u32 1, %s16482_s22  }
 0xa84   : > { %p16484_p5 = scmp.ne.s32.totalorder %s16483_s16, 0  ;;  %s10572_s7 = scalar_lea.sflag [#allocation4], %s10571_s25 }
 0xa86   : > { %p12177_p4 = pnand %p16485_p10, %p16484_p5 }
 0xa88   : > { %p12178_p12 = pneg %p12177_p4 }
 0xa8a   : > { %13647 = dma.done.wait (%p12178_p12), %s10572_s7, 96  }
 0xa8b   : > { %13649 = vsyncadd (%p12178_p12), %s10572_s7, 4294967200  ;;  %s16486_s3 = sadd.s32 4294967294, %s13672_s28  }
 0xa8c   : > { %s10580_s13 = sand.u32 1, %s16486_s3  }
 0xa8d   : > { %s10581_s30 = scalar_lea.sflag [#allocation21], %s10580_s13 }
 0xa8e   : > { %13651 = dma.done.wait (%p12178_p12), %s10581_s30, 32  }
 0xa8f   : > { %13653 = vsyncadd (%p12178_p12), %s10581_s30, 4294967264  ;;  %s10597_s18 = scalar_lea.sflag [#allocation24], %s10571_s25 }
 0xa90   : > { %13655 = dma.done.wait (%p12178_p12), %s10597_s18, 16  }
 0xa91   : > { %13657 = vsyncadd (%p12178_p12), %s10597_s18, 4294967280  ;;  %s16487_s28 = sld [smem:[#allocation36_spill]]  ;;  %s16490_s25 = smov %s13664_s26 }
 0xa92   : > { %s16488_s15 = sld [smem:[#allocation35_spill]] }
 0xa93   : > { %s16489_s27 = sld [smem:[#allocation37_spill]] }
 0xa97   : > { %p40_p3 = scmp.ge.s32.totalorder %s16487_s28, 4  }
 0xa98   : > { %s16491_s26 = smov %s16488_s15 }
 0xa99   :  { %42 = sbr.rel (!%p40_p3) target bundleno = 23 (0x17), region = 206 }
 0xa9e   :  { %10601 = vsyncpa [#allocation3], 1 }
 0xa9f   :  { %10603 = vsyncpa [#allocation3 + $0x1], 1 }
 0xaa0   :  { %10604 = vsyncpa [#allocation6], 1 }
 0xaa1   :  { %10606 = vsyncpa [#allocation6 + $0x1], 1 }
 0xaa2   :  { %10607 = vsyncpa [#allocation9], 1 }
 0xaa3   :  { %10608 = vsyncpa [#allocation12], 1 }
 0xaa4   :  { %10609 = vsyncpa [#allocation15], 1 }
 0xaa5   :  { %10610 = vsyncpa [#allocation18], 1 }
 0xaa6   :  { %10611 = vsyncpa [#allocation4], 1 }
 0xaa7   :  { %10613 = vsyncpa [#allocation4 + $0x1], 1 }
 0xaa8   :  { %10614 = vsyncpa [#allocation21], 1 }
 0xaa9   :  { %10616 = vsyncpa [#allocation21 + $0x1], 1 }
 0xaaa   :  { %10617 = vsyncpa [#allocation24], 1 }
 0xaab   :  { %10619 = vsyncpa [#allocation24 + $0x1], 1 }

</bundles_post_ra>
